<compile_context>
chip_gen: v5e
topology: v5e:2x2
jax: 0.10.0
libtpu: 0.0.40
codegen_flags: <defaults>
</compile_context>

<pallas_src>
import functools

import jax
import jax.numpy as jnp
from jax.experimental import pallas as pl
from jax.experimental.pallas import tpu as pltpu

SELU_ALPHA = 1.6732632423543772
SELU_SCALE = 1.0507009873554805

_VMEM = pltpu.MemorySpace.VMEM


# ----------------------------------------------------------------------------
# In-kernel math helpers (operate on loaded values)
# ----------------------------------------------------------------------------
def _selu(y):
    return SELU_SCALE * jnp.where(y > 0, y, SELU_ALPHA * (jnp.exp(y) - 1.0))


def _gru_gates(gi, gh, h, H):
    # PyTorch GRU gate order (r, z, n); gi already includes b_ih, gh includes b_hh.
    r = jax.nn.sigmoid(gi[:, :H] + gh[:, :H])
    z = jax.nn.sigmoid(gi[:, H:2 * H] + gh[:, H:2 * H])
    n = jnp.tanh(gi[:, 2 * H:3 * H] + r * gh[:, 2 * H:3 * H])
    return (1.0 - z) * n + z * h


def _gru_rec(gi, h, u, bhh, H):
    # Recurrent half only: the input-side gates `gi` were hoisted/batched.
    gh = jnp.dot(h, u, preferred_element_type=jnp.float32) + bhh
    return _gru_gates(gi, gh, h, H)


def _gru_full(x, h, w, u, bih, bhh, H):
    gi = jnp.dot(x, w, preferred_element_type=jnp.float32) + bih
    return _gru_rec(gi, h, u, bhh, H)


# ----------------------------------------------------------------------------
# The single fused kernel: encoder + latent + beat GRU + tick decoder
# ----------------------------------------------------------------------------
def _polyvae_kernel(x_ref, noise_ref, slab_ref,          # inputs
                    muvar_ref, recon_ref,                # outputs
                    l0_ref, beat_ref,                    # VMEM scratch
                    *, layout, T, H, Z, V, beat_num, tick_num):
    B = noise_ref.shape[0]
    H2, H3 = 2 * H, 3 * H

    def par(name):
        off, r, c = layout[name]
        return slab_ref[off:off + r, 0:c]

    def gru_b(name):
        b = par(name)                       # (2, 3H) = [b_ih; b_hh]
        return b[0:1, :], b[1:2, :]

    # ------------------------------------------------------------------ encoder
    # Token one-hot built in-kernel; the embedding gather is fused with the
    # (hoisted) layer-0 input projection: onehot @ (E @ W_ih) for all T steps.
    ids = x_ref[...]                                                 # (B*T, 1) int32
    onehot = (jax.lax.broadcasted_iota(jnp.int32, (B * T, V), 1)
              == ids).astype(jnp.float32)                            # (B*T, V)
    emb_tbl = par("embedding")                                       # (V, D)

    bih0f, bhh0f = gru_b("e0f_b")
    bih0b, bhh0b = gru_b("e0b_b")
    gi0f = (jnp.dot(onehot, jnp.dot(emb_tbl, par("e0f_w"),
                                    preferred_element_type=jnp.float32),
                    preferred_element_type=jnp.float32) + bih0f).reshape(B, T, H3)
    gi0b = (jnp.dot(onehot, jnp.dot(emb_tbl, par("e0b_w"),
                                    preferred_element_type=jnp.float32),
                    preferred_element_type=jnp.float32) + bih0b).reshape(B, T, H3)
    u0f = par("e0f_u")
    u0b = par("e0b_u")

    zeros_h = jnp.zeros((B, H), jnp.float32)
    hf0 = zeros_h
    hb0 = zeros_h
    # layer 0, fwd + bwd (independent chains) fused in one unrolled loop;
    # outputs go to a packed (B, T, 2H) scratch so layer 1 never concats.
    for t in range(T):
        tb = T - 1 - t
        hf0 = _gru_rec(gi0f[:, t, :], hf0, u0f, bhh0f, H)
        hb0 = _gru_rec(gi0b[:, tb, :], hb0, u0b, bhh0b, H)
        l0_ref[:, t, 0:H] = hf0
        l0_ref[:, tb, H:H2] = hb0

    # layer 1 (eval mode: no inter-layer dropout); input matmuls hoisted.
    bih1f, bhh1f = gru_b("e1f_b")
    bih1b, bhh1b = gru_b("e1b_b")
    l0_all = l0_ref[...].reshape(B * T, H2)
    gi1f = (jnp.dot(l0_all, par("e1f_w"),
                    preferred_element_type=jnp.float32) + bih1f).reshape(B, T, H3)
    gi1b = (jnp.dot(l0_all, par("e1b_w"),
                    preferred_element_type=jnp.float32) + bih1b).reshape(B, T, H3)
    u1f = par("e1f_u")
    u1b = par("e1b_u")
    hf1 = zeros_h
    hb1 = zeros_h
    for t in range(T):
        tb = T - 1 - t
        hf1 = _gru_rec(gi1f[:, t, :], hf1, u1f, bhh1f, H)
        hb1 = _gru_rec(gi1b[:, tb, :], hb1, u1b, bhh1b, H)

    # ---------------------------------------------------- latent heads + reparam
    # h_n order = [l0_fwd, l0_bwd, l1_fwd, l1_bwd]; mu|var packed lane-dense.
    rx = jnp.concatenate([hf0, hb0, hf1, hb1], axis=-1)              # (B, 4H)
    muvar = jnp.dot(rx, par("muvar_w"),
                    preferred_element_type=jnp.float32) + par("muvar_b")
    muvar_ref[...] = muvar
    # Normal(mu, var).rsample() == mu + scale * eps (scale passed through
    # unchanged, faithful to the reference usage).
    z = muvar[:, :Z] + muvar[:, Z:] * noise_ref[...]

    # ------------------------------------------------------------------ beat GRU
    hbeat = _selu(jnp.dot(z, par("zh_w"),
                          preferred_element_type=jnp.float32) + par("zh_b"))
    hbt0 = hbeat[:, :H]
    hbt1 = hbeat[:, H:]
    bih_b0, bhh_b0 = gru_b("beat_l0_b")
    bih_b1, bhh_b1 = gru_b("beat_l1_b")
    # constant scalar beat input -> constant (1, 3H) input gates, no matmul
    gi_beat = par("beat_0") * par("beat_l0_w") + bih_b0
    u_b0 = par("beat_l0_u")
    w_b1 = par("beat_l1_w")
    u_b1 = par("beat_l1_u")
    for i in range(beat_num):
        hbt0 = _gru_rec(gi_beat, hbt0, u_b0, bhh_b0, H)
        hbt1 = _gru_full(hbt0, hbt1, w_b1, u_b1, bih_b1, bhh_b1, H)
        beat_ref[:, i, :] = hbt1                                     # stays in VMEM

    # ------------------------------------------------------------- tick decoder
    bih_t0, bhh_t0 = gru_b("t0_b")
    bih_t1, bhh_t1 = gru_b("t1_b")
    beat_all = beat_ref[...].reshape(B * beat_num, H)
    # per-beat projections batched across all beats (hoisted out of the loops)
    htick_all = _selu(jnp.dot(beat_all, par("bth_w"),
                              preferred_element_type=jnp.float32)
                      + par("bth_b")).reshape(B, beat_num, H2)
    ctick = _selu(jnp.dot(beat_all, par("bti_w"),
                          preferred_element_type=jnp.float32) + par("bti_b"))
    gic_all = (jnp.dot(ctick, par("t0_wc"),
                       preferred_element_type=jnp.float32)
               + bih_t0).reshape(B, beat_num, H3)

    w_y = par("t0_wy")                                               # (D, 3H)
    # previous-token embedding folded into the input gates: (V, 3H) table
    m_yw = jnp.dot(par("d_embedding"), w_y, preferred_element_type=jnp.float32)
    gi_y = jnp.dot(par("tick_0"), w_y, preferred_element_type=jnp.float32)  # (1,3H)
    u_t0 = par("t0_u")
    w_t1 = par("t1_w")
    u_t1 = par("t1_u")
    note_w = par("note_w")
    note_b = par("note_b")
    col = jax.lax.broadcasted_iota(jnp.int32, (B, V), 1)

    for i in range(beat_num):
        ht0 = htick_all[:, i, 0:H]
        ht1 = htick_all[:, i, H:H2]
        gic = gic_all[:, i, :]
        for j in range(tick_num):
            ht0 = _gru_rec(gi_y + gic, ht0, u_t0, bhh_t0, H)
            ht1 = _gru_full(ht0, ht1, w_t1, u_t1, bih_t1, bhh_t1, H)
            logits = jnp.maximum(
                jnp.dot(ht1, note_w, preferred_element_type=jnp.float32)
                + note_b, 0.0)
            recon_ref[:, i * tick_num + j, :] = logits               # (B,S,V) direct
            # argmax (first maximum) + d_embedding row + next input projection,
            # all as a single one-hot matmul against the folded (V,3H) table.
            m = jnp.max(logits, axis=-1, keepdims=True)
            idx = jnp.min(jnp.where(logits == m, col, V), axis=-1, keepdims=True)
            gi_y = jnp.dot((col == idx).astype(jnp.float32), m_yw,
                           preferred_element_type=jnp.float32)


# ----------------------------------------------------------------------------
# Host-side parameter construction and slab packing
# ----------------------------------------------------------------------------
def _init(key, shape, scale=0.05):
    return (scale * jax.random.normal(key, shape)).astype(jnp.float32)


def make_gru_params(key, in_dim, H):
    k1, k2, k3, k4 = jax.random.split(key, 4)
    # pre-transposed: W_ih^T (in,3H), W_hh^T (H,3H); biases packed (2,3H)
    return (_init(k1, (in_dim, 3 * H)),
            _init(k2, (H, 3 * H)),
            jnp.stack([_init(k3, (3 * H,)), _init(k4, (3 * H,))], axis=0))


def make_linear_params(key, in_dim, out_dim):
    k1, k2 = jax.random.split(key)
    return (_init(k1, (in_dim, out_dim)), _init(k2, (1, out_dim)))


def make_polyvae_params(key, cfg):
    V, H, Z, D = cfg["input_dims"], cfg["hidden_dims"], cfg["z_dims"], cfg["vocab_dims"]
    ks = jax.random.split(key, 16)
    return {
        "embedding": _init(ks[0], (V, D)),
        "d_embedding": _init(ks[1], (V, D)),
        "enc_l0_f": make_gru_params(ks[2], D, H),
        "enc_l0_b": make_gru_params(ks[3], D, H),
        "enc_l1_f": make_gru_params(ks[4], 2 * H, H),
        "enc_l1_b": make_gru_params(ks[5], 2 * H, H),
        "linear_mu": make_linear_params(ks[6], 4 * H, Z),
        "linear_var": make_linear_params(ks[7], 4 * H, Z),
        "z_to_beat_hidden": make_linear_params(ks[8], Z, 2 * H),
        "beat_0": jnp.zeros((1, 1), jnp.float32),
        "beat_l0": make_gru_params(ks[9], 1, H),
        "beat_l1": make_gru_params(ks[10], H, H),
        "beat_to_tick_hidden": make_linear_params(ks[11], H, 2 * H),
        "beat_to_tick_input": make_linear_params(ks[12], H, H),
        "tick_0": jnp.zeros((1, D), jnp.float32),
        "tick_l0": make_gru_params(ks[13], D + H, H),
        "tick_l1": make_gru_params(ks[14], H, H),
        "tick_to_note": make_linear_params(ks[15], H, V),
    }


def pack_params(params, cfg):
    """Pack every parameter into one (rows, 128k) f32 slab (one entry DMA)."""
    D = cfg["vocab_dims"]
    mu_w, mu_b = params["linear_mu"]
    var_w, var_b = params["linear_var"]
    t0_w, t0_u, t0_b = params["tick_l0"]

    entries = [("embedding", params["embedding"]),
               ("d_embedding", params["d_embedding"])]
    for name, key in (("e0f", "enc_l0_f"), ("e0b", "enc_l0_b"),
                      ("e1f", "enc_l1_f"), ("e1b", "enc_l1_b")):
        w, u, b = params[key]
        entries += [(name + "_w", w), (name + "_u", u), (name + "_b", b)]
    entries += [
        ("muvar_w", jnp.concatenate([mu_w, var_w], axis=1)),   # (4H, 2Z)
        ("muvar_b", jnp.concatenate([mu_b, var_b], axis=1)),   # (1, 2Z)
        ("zh_w", params["z_to_beat_hidden"][0]),
        ("zh_b", params["z_to_beat_hidden"][1]),
        ("beat_0", params["beat_0"]),
    ]
    for name, key in (("beat_l0", "beat_l0"), ("beat_l1", "beat_l1"),
                      ("t1", "tick_l1")):
        w, u, b = params[key]
        entries += [(name + "_w", w), (name + "_u", u), (name + "_b", b)]
    entries += [
        ("bth_w", params["beat_to_tick_hidden"][0]),
        ("bth_b", params["beat_to_tick_hidden"][1]),
        ("bti_w", params["beat_to_tick_input"][0]),
        ("bti_b", params["beat_to_tick_input"][1]),
        ("tick_0", params["tick_0"]),
        ("t0_wy", t0_w[:D, :]),     # rows hit by the previous-token embedding
        ("t0_wc", t0_w[D:, :]),     # rows hit by the per-beat context c_tick
        ("t0_u", t0_u),
        ("t0_b", t0_b),
        ("note_w", params["tick_to_note"][0]),
        ("note_b", params["tick_to_note"][1]),
    ]

    max_cols = max(a.shape[1] for _, a in entries)
    width = 128 * max(1, -(-max_cols // 128))
    layout = {}
    blocks = []
    off = 0
    for name, a in entries:
        a = jnp.asarray(a, jnp.float32)
        r, c = a.shape
        rp = -(-r // 8) * 8                                   # sublane-align rows
        blocks.append(jnp.pad(a, ((0, rp - r), (0, width - c))))
        layout[name] = (off, r, c)
        off += rp
    return jnp.concatenate(blocks, axis=0), layout


# ----------------------------------------------------------------------------
# PolyVAE forward (eval mode: no dropout, no scheduled sampling)
# ----------------------------------------------------------------------------
# TODO(synk): training-mode scheduled sampling (torch.rand / eps decay), the
# inter-layer GRU dropout and the iteration counter are stochastic
# training-only behaviors; this is the eval-mode forward.
def polyvae_forward(slab, layout, x_tokens, gd_tokens, noise, cfg):
    # gd / d_embedding(gd) feeds only training-mode teacher forcing -> dead here.
    del gd_tokens
    B, T = x_tokens.shape
    H, Z, V = cfg["hidden_dims"], cfg["z_dims"], cfg["input_dims"]
    beat_num, tick_num = cfg["beat_num"], cfg["tick_num"]
    S = beat_num * tick_num

    ids_flat = x_tokens.reshape(B * T, 1).astype(jnp.int32)   # 64-byte reshape only

    kernel = functools.partial(_polyvae_kernel, layout=layout, T=T, H=H, Z=Z,
                               V=V, beat_num=beat_num, tick_num=tick_num)
    muvar, recon = pl.pallas_call(
        kernel,
        out_shape=(jax.ShapeDtypeStruct((B, 2 * Z), jnp.float32),
                   jax.ShapeDtypeStruct((B, S, V), jnp.float32)),
        in_specs=[pl.BlockSpec(memory_space=_VMEM)] * 3,
        out_specs=(pl.BlockSpec(memory_space=_VMEM),
                   pl.BlockSpec(memory_space=_VMEM)),
        scratch_shapes=[pltpu.VMEM((B, T, 2 * H), jnp.float32),       # layer-0 out
                        pltpu.VMEM((B, beat_num, H), jnp.float32)],   # beat_out
    )(ids_flat, noise, slab)
    return recon, (muvar[:, :Z], muvar[:, Z:]), 0


# ----------------------------------------------------------------------------
# Main
# ----------------------------------------------------------------------------
if __name__ == "__main__":
    cfg = dict(
        input_dims=20,    # note vocabulary size
        hidden_dims=32,
        z_dims=64,
        vocab_dims=10,
        seq_len=8,
        beat_num=2,
        tick_num=4,       # beat_num * tick_num == seq_len
    )

    key = jax.random.PRNGKey(0)
    k_params, k_x, k_gd, k_noise = jax.random.split(key, 4)

    params = make_polyvae_params(k_params, cfg)
    slab, layout = pack_params(params, cfg)

    B = 2
    x = jax.random.randint(k_x, (B, cfg["seq_len"]), 0, cfg["input_dims"], dtype=jnp.int32)
    gd = jax.random.randint(k_gd, (B, cfg["seq_len"]), 0, cfg["input_dims"], dtype=jnp.int32)
    noise = jax.random.normal(k_noise, (B, cfg["z_dims"]), dtype=jnp.float32)

    forward = jax.jit(lambda s, xi, gi, ni: polyvae_forward(s, layout, xi, gi, ni, cfg))

    recon, (mu, var), it = forward(slab, x, gd, noise)
    jax.block_until_ready(recon)
    jax.block_until_ready(mu)
    jax.block_until_ready(var)

    assert recon.shape == (B, cfg["beat_num"] * cfg["tick_num"], cfg["input_dims"])
    assert mu.shape == (B, cfg["z_dims"]) and var.shape == (B, cfg["z_dims"])
    print("KERNEL_OK")
</pallas_src>

<mosaic_0001>
module attributes {stable_mosaic.version = 11 : i64} {
  func.func @_polyvae_kernel(%arg0: memref<16x1xi32, #tpu.memory_space<vmem>>, %arg1: memref<2x64xf32, #tpu.memory_space<vmem>>, %arg2: memref<992x128xf32, #tpu.memory_space<vmem>>, %arg3: memref<2x128xf32, #tpu.memory_space<vmem>>, %arg4: memref<2x8x20xf32, #tpu.memory_space<vmem>>, %arg5: memref<2x8x64xf32, #tpu.memory_space<vmem>>, %arg6: memref<2x2x32xf32, #tpu.memory_space<vmem>>) attributes {dimension_semantics = [], scalar_prefetch = 0 : i64, scratch_operands = 2 : i64, tpu.core_type = #tpu.core_type<tc>} {
    %c0 = arith.constant 0 : index
    %c0_0 = arith.constant 0 : index
    %0 = vector.load %arg0[%c0, %c0_0] : memref<16x1xi32, #tpu.memory_space<vmem>>, vector<16x1xi32>
    %1 = tpu.iota {dimensions = array<i32: 1>} : vector<16x20xi32>
    %2 = vector.broadcast %0 : vector<16x1xi32> to vector<16x20xi32>
    %3 = arith.cmpi eq, %1, %2 : vector<16x20xi32>
    %4 = arith.extui %3 : vector<16x20xi1> to vector<16x20xi32>
    %5 = arith.sitofp %4 : vector<16x20xi32> to vector<16x20xf32>
    %c0_1 = arith.constant 0 : index
    %c0_2 = arith.constant 0 : index
    %6 = vector.load %arg2[%c0_1, %c0_2] : memref<992x128xf32, #tpu.memory_space<vmem>>, vector<20x10xf32>
    %c96 = arith.constant 96 : index
    %c0_3 = arith.constant 0 : index
    %7 = vector.load %arg2[%c96, %c0_3] : memref<992x128xf32, #tpu.memory_space<vmem>>, vector<2x96xf32>
    %8 = vector.extract_strided_slice %7 {offsets = [0, 0], sizes = [1, 96], strides = [1, 1]} : vector<2x96xf32> to vector<1x96xf32>
    %9 = vector.extract_strided_slice %7 {offsets = [1, 0], sizes = [1, 96], strides = [1, 1]} : vector<2x96xf32> to vector<1x96xf32>
    %c152 = arith.constant 152 : index
    %c0_4 = arith.constant 0 : index
    %10 = vector.load %arg2[%c152, %c0_4] : memref<992x128xf32, #tpu.memory_space<vmem>>, vector<2x96xf32>
    %11 = vector.extract_strided_slice %10 {offsets = [0, 0], sizes = [1, 96], strides = [1, 1]} : vector<2x96xf32> to vector<1x96xf32>
    %12 = vector.extract_strided_slice %10 {offsets = [1, 0], sizes = [1, 96], strides = [1, 1]} : vector<2x96xf32> to vector<1x96xf32>
    %c48 = arith.constant 48 : index
    %c0_5 = arith.constant 0 : index
    %13 = vector.load %arg2[%c48, %c0_5] : memref<992x128xf32, #tpu.memory_space<vmem>>, vector<10x96xf32>
    %cst = arith.constant dense<0.000000e+00> : vector<20x96xf32>
    %14 = tpu.matmul %6, %13, %cst {dimension_numbers = #tpu.dot_dimension_numbers<[1], [0], [0], [1], [0, 0, 1, 1], [], []>} : vector<20x10xf32>, vector<10x96xf32>, vector<20x96xf32> -> vector<20x96xf32>
    %cst_6 = arith.constant dense<0.000000e+00> : vector<16x96xf32>
    %15 = tpu.matmul %5, %14, %cst_6 {dimension_numbers = #tpu.dot_dimension_numbers<[1], [0], [0], [1], [0, 0, 1, 1], [], []>} : vector<16x20xf32>, vector<20x96xf32>, vector<16x96xf32> -> vector<16x96xf32>
    %16 = vector.broadcast %8 : vector<1x96xf32> to vector<16x96xf32>
    %17 = arith.addf %15, %16 : vector<16x96xf32>
    %18 = vector.shape_cast %17 : vector<16x96xf32> to vector<2x8x96xf32>
    %c104 = arith.constant 104 : index
    %c0_7 = arith.constant 0 : index
    %19 = vector.load %arg2[%c104, %c0_7] : memref<992x128xf32, #tpu.memory_space<vmem>>, vector<10x96xf32>
    %cst_8 = arith.constant dense<0.000000e+00> : vector<20x96xf32>
    %20 = tpu.matmul %6, %19, %cst_8 {dimension_numbers = #tpu.dot_dimension_numbers<[1], [0], [0], [1], [0, 0, 1, 1], [], []>} : vector<20x10xf32>, vector<10x96xf32>, vector<20x96xf32> -> vector<20x96xf32>
    %cst_9 = arith.constant dense<0.000000e+00> : vector<16x96xf32>
    %21 = tpu.matmul %5, %20, %cst_9 {dimension_numbers = #tpu.dot_dimension_numbers<[1], [0], [0], [1], [0, 0, 1, 1], [], []>} : vector<16x20xf32>, vector<20x96xf32>, vector<16x96xf32> -> vector<16x96xf32>
    %22 = vector.broadcast %11 : vector<1x96xf32> to vector<16x96xf32>
    %23 = arith.addf %21, %22 : vector<16x96xf32>
    %24 = vector.shape_cast %23 : vector<16x96xf32> to vector<2x8x96xf32>
    %c64 = arith.constant 64 : index
    %c0_10 = arith.constant 0 : index
    %25 = vector.load %arg2[%c64, %c0_10] : memref<992x128xf32, #tpu.memory_space<vmem>>, vector<32x96xf32>
    %c120 = arith.constant 120 : index
    %c0_11 = arith.constant 0 : index
    %26 = vector.load %arg2[%c120, %c0_11] : memref<992x128xf32, #tpu.memory_space<vmem>>, vector<32x96xf32>
    %cst_12 = arith.constant 0.000000e+00 : f32
    %27 = vector.broadcast %cst_12 : f32 to vector<2x32xf32>
    %28 = vector.extract_strided_slice %18 {offsets = [0, 0, 0], sizes = [2, 1, 96], strides = [1, 1, 1]} : vector<2x8x96xf32> to vector<2x1x96xf32>
    %29 = vector.shape_cast %28 : vector<2x1x96xf32> to vector<2x96xf32>
    %cst_13 = arith.constant dense<0.000000e+00> : vector<2x96xf32>
    %30 = tpu.matmul %27, %25, %cst_13 {dimension_numbers = #tpu.dot_dimension_numbers<[1], [0], [0], [1], [0, 0, 1, 1], [], []>} : vector<2x32xf32>, vector<32x96xf32>, vector<2x96xf32> -> vector<2x96xf32>
    %31 = vector.broadcast %9 : vector<1x96xf32> to vector<2x96xf32>
    %32 = arith.addf %30, %31 : vector<2x96xf32>
    %33 = vector.extract_strided_slice %29 {offsets = [0, 0], sizes = [2, 32], strides = [1, 1]} : vector<2x96xf32> to vector<2x32xf32>
    %34 = vector.extract_strided_slice %32 {offsets = [0, 0], sizes = [2, 32], strides = [1, 1]} : vector<2x96xf32> to vector<2x32xf32>
    %35 = arith.addf %33, %34 : vector<2x32xf32>
    %36 = arith.negf %35 : vector<2x32xf32>
    %37 = math.exp %36 : vector<2x32xf32>
    %cst_14 = arith.constant 1.000000e+00 : f32
    %38 = vector.broadcast %cst_14 : f32 to vector<2x32xf32>
    %39 = arith.addf %38, %37 : vector<2x32xf32>
    %40 = arith.divf %38, %39 : vector<2x32xf32>
    %41 = vector.extract_strided_slice %29 {offsets = [0, 32], sizes = [2, 32], strides = [1, 1]} : vector<2x96xf32> to vector<2x32xf32>
    %42 = vector.extract_strided_slice %32 {offsets = [0, 32], sizes = [2, 32], strides = [1, 1]} : vector<2x96xf32> to vector<2x32xf32>
    %43 = arith.addf %41, %42 : vector<2x32xf32>
    %44 = arith.negf %43 : vector<2x32xf32>
    %45 = math.exp %44 : vector<2x32xf32>
    %cst_15 = arith.constant 1.000000e+00 : f32
    %46 = vector.broadcast %cst_15 : f32 to vector<2x32xf32>
    %47 = arith.addf %46, %45 : vector<2x32xf32>
    %48 = arith.divf %46, %47 : vector<2x32xf32>
    %49 = vector.extract_strided_slice %29 {offsets = [0, 64], sizes = [2, 32], strides = [1, 1]} : vector<2x96xf32> to vector<2x32xf32>
    %50 = vector.extract_strided_slice %32 {offsets = [0, 64], sizes = [2, 32], strides = [1, 1]} : vector<2x96xf32> to vector<2x32xf32>
    %51 = arith.mulf %40, %50 : vector<2x32xf32>
    %52 = arith.addf %49, %51 : vector<2x32xf32>
    %53 = math.tanh %52 : vector<2x32xf32>
    %cst_16 = arith.constant 1.000000e+00 : f32
    %54 = vector.broadcast %cst_16 : f32 to vector<2x32xf32>
    %55 = arith.subf %54, %48 : vector<2x32xf32>
    %56 = arith.mulf %55, %53 : vector<2x32xf32>
    %57 = arith.mulf %48, %27 : vector<2x32xf32>
    %58 = arith.addf %56, %57 : vector<2x32xf32>
    %59 = vector.extract_strided_slice %24 {offsets = [0, 7, 0], sizes = [2, 1, 96], strides = [1, 1, 1]} : vector<2x8x96xf32> to vector<2x1x96xf32>
    %60 = vector.shape_cast %59 : vector<2x1x96xf32> to vector<2x96xf32>
    %cst_17 = arith.constant dense<0.000000e+00> : vector<2x96xf32>
    %61 = tpu.matmul %27, %26, %cst_17 {dimension_numbers = #tpu.dot_dimension_numbers<[1], [0], [0], [1], [0, 0, 1, 1], [], []>} : vector<2x32xf32>, vector<32x96xf32>, vector<2x96xf32> -> vector<2x96xf32>
    %62 = vector.broadcast %12 : vector<1x96xf32> to vector<2x96xf32>
    %63 = arith.addf %61, %62 : vector<2x96xf32>
    %64 = vector.extract_strided_slice %60 {offsets = [0, 0], sizes = [2, 32], strides = [1, 1]} : vector<2x96xf32> to vector<2x32xf32>
    %65 = vector.extract_strided_slice %63 {offsets = [0, 0], sizes = [2, 32], strides = [1, 1]} : vector<2x96xf32> to vector<2x32xf32>
    %66 = arith.addf %64, %65 : vector<2x32xf32>
    %67 = arith.negf %66 : vector<2x32xf32>
    %68 = math.exp %67 : vector<2x32xf32>
    %cst_18 = arith.constant 1.000000e+00 : f32
    %69 = vector.broadcast %cst_18 : f32 to vector<2x32xf32>
    %70 = arith.addf %69, %68 : vector<2x32xf32>
    %71 = arith.divf %69, %70 : vector<2x32xf32>
    %72 = vector.extract_strided_slice %60 {offsets = [0, 32], sizes = [2, 32], strides = [1, 1]} : vector<2x96xf32> to vector<2x32xf32>
    %73 = vector.extract_strided_slice %63 {offsets = [0, 32], sizes = [2, 32], strides = [1, 1]} : vector<2x96xf32> to vector<2x32xf32>
    %74 = arith.addf %72, %73 : vector<2x32xf32>
    %75 = arith.negf %74 : vector<2x32xf32>
    %76 = math.exp %75 : vector<2x32xf32>
    %cst_19 = arith.constant 1.000000e+00 : f32
    %77 = vector.broadcast %cst_19 : f32 to vector<2x32xf32>
    %78 = arith.addf %77, %76 : vector<2x32xf32>
    %79 = arith.divf %77, %78 : vector<2x32xf32>
    %80 = vector.extract_strided_slice %60 {offsets = [0, 64], sizes = [2, 32], strides = [1, 1]} : vector<2x96xf32> to vector<2x32xf32>
    %81 = vector.extract_strided_slice %63 {offsets = [0, 64], sizes = [2, 32], strides = [1, 1]} : vector<2x96xf32> to vector<2x32xf32>
    %82 = arith.mulf %71, %81 : vector<2x32xf32>
    %83 = arith.addf %80, %82 : vector<2x32xf32>
    %84 = math.tanh %83 : vector<2x32xf32>
    %cst_20 = arith.constant 1.000000e+00 : f32
    %85 = vector.broadcast %cst_20 : f32 to vector<2x32xf32>
    %86 = arith.subf %85, %79 : vector<2x32xf32>
    %87 = arith.mulf %86, %84 : vector<2x32xf32>
    %88 = arith.mulf %79, %27 : vector<2x32xf32>
    %89 = arith.addf %87, %88 : vector<2x32xf32>
    %c0_21 = arith.constant 0 : index
    %c0_22 = arith.constant 0 : index
    %c0_23 = arith.constant 0 : index
    %90 = vector.load %arg5[%c0_21, %c0_22, %c0_23] : memref<2x8x64xf32, #tpu.memory_space<vmem>>, vector<2x1x32xf32>
    %91 = vector.shape_cast %90 : vector<2x1x32xf32> to vector<2x32xf32>
    %92 = vector.shape_cast %58 : vector<2x32xf32> to vector<2x1x32xf32>
    tpu.vector_store %arg5[%c0_21, %c0_22, %c0_23], %92 {strides = array<i32>} : memref<2x8x64xf32, #tpu.memory_space<vmem>>, vector<2x1x32xf32>,
    %c0_24 = arith.constant 0 : index
    %c7 = arith.constant 7 : index
    %c32 = arith.constant 32 : index
    %93 = vector.load %arg5[%c0_24, %c7, %c32] : memref<2x8x64xf32, #tpu.memory_space<vmem>>, vector<2x1x32xf32>
    %94 = vector.shape_cast %93 : vector<2x1x32xf32> to vector<2x32xf32>
    %95 = vector.shape_cast %89 : vector<2x32xf32> to vector<2x1x32xf32>
    tpu.vector_store %arg5[%c0_24, %c7, %c32], %95 {strides = array<i32>} : memref<2x8x64xf32, #tpu.memory_space<vmem>>, vector<2x1x32xf32>,
    %96 = vector.extract_strided_slice %18 {offsets = [0, 1, 0], sizes = [2, 1, 96], strides = [1, 1, 1]} : vector<2x8x96xf32> to vector<2x1x96xf32>
    %97 = vector.shape_cast %96 : vector<2x1x96xf32> to vector<2x96xf32>
    %cst_25 = arith.constant dense<0.000000e+00> : vector<2x96xf32>
    %98 = tpu.matmul %58, %25, %cst_25 {dimension_numbers = #tpu.dot_dimension_numbers<[1], [0], [0], [1], [0, 0, 1, 1], [], []>} : vector<2x32xf32>, vector<32x96xf32>, vector<2x96xf32> -> vector<2x96xf32>
    %99 = vector.broadcast %9 : vector<1x96xf32> to vector<2x96xf32>
    %100 = arith.addf %98, %99 : vector<2x96xf32>
    %101 = vector.extract_strided_slice %97 {offsets = [0, 0], sizes = [2, 32], strides = [1, 1]} : vector<2x96xf32> to vector<2x32xf32>
    %102 = vector.extract_strided_slice %100 {offsets = [0, 0], sizes = [2, 32], strides = [1, 1]} : vector<2x96xf32> to vector<2x32xf32>
    %103 = arith.addf %101, %102 : vector<2x32xf32>
    %104 = arith.negf %103 : vector<2x32xf32>
    %105 = math.exp %104 : vector<2x32xf32>
    %cst_26 = arith.constant 1.000000e+00 : f32
    %106 = vector.broadcast %cst_26 : f32 to vector<2x32xf32>
    %107 = arith.addf %106, %105 : vector<2x32xf32>
    %108 = arith.divf %106, %107 : vector<2x32xf32>
    %109 = vector.extract_strided_slice %97 {offsets = [0, 32], sizes = [2, 32], strides = [1, 1]} : vector<2x96xf32> to vector<2x32xf32>
    %110 = vector.extract_strided_slice %100 {offsets = [0, 32], sizes = [2, 32], strides = [1, 1]} : vector<2x96xf32> to vector<2x32xf32>
    %111 = arith.addf %109, %110 : vector<2x32xf32>
    %112 = arith.negf %111 : vector<2x32xf32>
    %113 = math.exp %112 : vector<2x32xf32>
    %cst_27 = arith.constant 1.000000e+00 : f32
    %114 = vector.broadcast %cst_27 : f32 to vector<2x32xf32>
    %115 = arith.addf %114, %113 : vector<2x32xf32>
    %116 = arith.divf %114, %115 : vector<2x32xf32>
    %117 = vector.extract_strided_slice %97 {offsets = [0, 64], sizes = [2, 32], strides = [1, 1]} : vector<2x96xf32> to vector<2x32xf32>
    %118 = vector.extract_strided_slice %100 {offsets = [0, 64], sizes = [2, 32], strides = [1, 1]} : vector<2x96xf32> to vector<2x32xf32>
    %119 = arith.mulf %108, %118 : vector<2x32xf32>
    %120 = arith.addf %117, %119 : vector<2x32xf32>
    %121 = math.tanh %120 : vector<2x32xf32>
    %cst_28 = arith.constant 1.000000e+00 : f32
    %122 = vector.broadcast %cst_28 : f32 to vector<2x32xf32>
    %123 = arith.subf %122, %116 : vector<2x32xf32>
    %124 = arith.mulf %123, %121 : vector<2x32xf32>
    %125 = arith.mulf %116, %58 : vector<2x32xf32>
    %126 = arith.addf %124, %125 : vector<2x32xf32>
    %127 = vector.extract_strided_slice %24 {offsets = [0, 6, 0], sizes = [2, 1, 96], strides = [1, 1, 1]} : vector<2x8x96xf32> to vector<2x1x96xf32>
    %128 = vector.shape_cast %127 : vector<2x1x96xf32> to vector<2x96xf32>
    %cst_29 = arith.constant dense<0.000000e+00> : vector<2x96xf32>
    %129 = tpu.matmul %89, %26, %cst_29 {dimension_numbers = #tpu.dot_dimension_numbers<[1], [0], [0], [1], [0, 0, 1, 1], [], []>} : vector<2x32xf32>, vector<32x96xf32>, vector<2x96xf32> -> vector<2x96xf32>
    %130 = vector.broadcast %12 : vector<1x96xf32> to vector<2x96xf32>
    %131 = arith.addf %129, %130 : vector<2x96xf32>
    %132 = vector.extract_strided_slice %128 {offsets = [0, 0], sizes = [2, 32], strides = [1, 1]} : vector<2x96xf32> to vector<2x32xf32>
    %133 = vector.extract_strided_slice %131 {offsets = [0, 0], sizes = [2, 32], strides = [1, 1]} : vector<2x96xf32> to vector<2x32xf32>
    %134 = arith.addf %132, %133 : vector<2x32xf32>
    %135 = arith.negf %134 : vector<2x32xf32>
    %136 = math.exp %135 : vector<2x32xf32>
    %cst_30 = arith.constant 1.000000e+00 : f32
    %137 = vector.broadcast %cst_30 : f32 to vector<2x32xf32>
    %138 = arith.addf %137, %136 : vector<2x32xf32>
    %139 = arith.divf %137, %138 : vector<2x32xf32>
    %140 = vector.extract_strided_slice %128 {offsets = [0, 32], sizes = [2, 32], strides = [1, 1]} : vector<2x96xf32> to vector<2x32xf32>
    %141 = vector.extract_strided_slice %131 {offsets = [0, 32], sizes = [2, 32], strides = [1, 1]} : vector<2x96xf32> to vector<2x32xf32>
    %142 = arith.addf %140, %141 : vector<2x32xf32>
    %143 = arith.negf %142 : vector<2x32xf32>
    %144 = math.exp %143 : vector<2x32xf32>
    %cst_31 = arith.constant 1.000000e+00 : f32
    %145 = vector.broadcast %cst_31 : f32 to vector<2x32xf32>
    %146 = arith.addf %145, %144 : vector<2x32xf32>
    %147 = arith.divf %145, %146 : vector<2x32xf32>
    %148 = vector.extract_strided_slice %128 {offsets = [0, 64], sizes = [2, 32], strides = [1, 1]} : vector<2x96xf32> to vector<2x32xf32>
    %149 = vector.extract_strided_slice %131 {offsets = [0, 64], sizes = [2, 32], strides = [1, 1]} : vector<2x96xf32> to vector<2x32xf32>
    %150 = arith.mulf %139, %149 : vector<2x32xf32>
    %151 = arith.addf %148, %150 : vector<2x32xf32>
    %152 = math.tanh %151 : vector<2x32xf32>
    %cst_32 = arith.constant 1.000000e+00 : f32
    %153 = vector.broadcast %cst_32 : f32 to vector<2x32xf32>
    %154 = arith.subf %153, %147 : vector<2x32xf32>
    %155 = arith.mulf %154, %152 : vector<2x32xf32>
    %156 = arith.mulf %147, %89 : vector<2x32xf32>
    %157 = arith.addf %155, %156 : vector<2x32xf32>
    %c0_33 = arith.constant 0 : index
    %c1 = arith.constant 1 : index
    %c0_34 = arith.constant 0 : index
    %158 = vector.load %arg5[%c0_33, %c1, %c0_34] : memref<2x8x64xf32, #tpu.memory_space<vmem>>, vector<2x1x32xf32>
    %159 = vector.shape_cast %158 : vector<2x1x32xf32> to vector<2x32xf32>
    %160 = vector.shape_cast %126 : vector<2x32xf32> to vector<2x1x32xf32>
    tpu.vector_store %arg5[%c0_33, %c1, %c0_34], %160 {strides = array<i32>} : memref<2x8x64xf32, #tpu.memory_space<vmem>>, vector<2x1x32xf32>,
    %c0_35 = arith.constant 0 : index
    %c6 = arith.constant 6 : index
    %c32_36 = arith.constant 32 : index
    %161 = vector.load %arg5[%c0_35, %c6, %c32_36] : memref<2x8x64xf32, #tpu.memory_space<vmem>>, vector<2x1x32xf32>
    %162 = vector.shape_cast %161 : vector<2x1x32xf32> to vector<2x32xf32>
    %163 = vector.shape_cast %157 : vector<2x32xf32> to vector<2x1x32xf32>
    tpu.vector_store %arg5[%c0_35, %c6, %c32_36], %163 {strides = array<i32>} : memref<2x8x64xf32, #tpu.memory_space<vmem>>, vector<2x1x32xf32>,
    %164 = vector.extract_strided_slice %18 {offsets = [0, 2, 0], sizes = [2, 1, 96], strides = [1, 1, 1]} : vector<2x8x96xf32> to vector<2x1x96xf32>
    %165 = vector.shape_cast %164 : vector<2x1x96xf32> to vector<2x96xf32>
    %cst_37 = arith.constant dense<0.000000e+00> : vector<2x96xf32>
    %166 = tpu.matmul %126, %25, %cst_37 {dimension_numbers = #tpu.dot_dimension_numbers<[1], [0], [0], [1], [0, 0, 1, 1], [], []>} : vector<2x32xf32>, vector<32x96xf32>, vector<2x96xf32> -> vector<2x96xf32>
    %167 = vector.broadcast %9 : vector<1x96xf32> to vector<2x96xf32>
    %168 = arith.addf %166, %167 : vector<2x96xf32>
    %169 = vector.extract_strided_slice %165 {offsets = [0, 0], sizes = [2, 32], strides = [1, 1]} : vector<2x96xf32> to vector<2x32xf32>
    %170 = vector.extract_strided_slice %168 {offsets = [0, 0], sizes = [2, 32], strides = [1, 1]} : vector<2x96xf32> to vector<2x32xf32>
    %171 = arith.addf %169, %170 : vector<2x32xf32>
    %172 = arith.negf %171 : vector<2x32xf32>
    %173 = math.exp %172 : vector<2x32xf32>
    %cst_38 = arith.constant 1.000000e+00 : f32
    %174 = vector.broadcast %cst_38 : f32 to vector<2x32xf32>
    %175 = arith.addf %174, %173 : vector<2x32xf32>
    %176 = arith.divf %174, %175 : vector<2x32xf32>
    %177 = vector.extract_strided_slice %165 {offsets = [0, 32], sizes = [2, 32], strides = [1, 1]} : vector<2x96xf32> to vector<2x32xf32>
    %178 = vector.extract_strided_slice %168 {offsets = [0, 32], sizes = [2, 32], strides = [1, 1]} : vector<2x96xf32> to vector<2x32xf32>
    %179 = arith.addf %177, %178 : vector<2x32xf32>
    %180 = arith.negf %179 : vector<2x32xf32>
    %181 = math.exp %180 : vector<2x32xf32>
    %cst_39 = arith.constant 1.000000e+00 : f32
    %182 = vector.broadcast %cst_39 : f32 to vector<2x32xf32>
    %183 = arith.addf %182, %181 : vector<2x32xf32>
    %184 = arith.divf %182, %183 : vector<2x32xf32>
    %185 = vector.extract_strided_slice %165 {offsets = [0, 64], sizes = [2, 32], strides = [1, 1]} : vector<2x96xf32> to vector<2x32xf32>
    %186 = vector.extract_strided_slice %168 {offsets = [0, 64], sizes = [2, 32], strides = [1, 1]} : vector<2x96xf32> to vector<2x32xf32>
    %187 = arith.mulf %176, %186 : vector<2x32xf32>
    %188 = arith.addf %185, %187 : vector<2x32xf32>
    %189 = math.tanh %188 : vector<2x32xf32>
    %cst_40 = arith.constant 1.000000e+00 : f32
    %190 = vector.broadcast %cst_40 : f32 to vector<2x32xf32>
    %191 = arith.subf %190, %184 : vector<2x32xf32>
    %192 = arith.mulf %191, %189 : vector<2x32xf32>
    %193 = arith.mulf %184, %126 : vector<2x32xf32>
    %194 = arith.addf %192, %193 : vector<2x32xf32>
    %195 = vector.extract_strided_slice %24 {offsets = [0, 5, 0], sizes = [2, 1, 96], strides = [1, 1, 1]} : vector<2x8x96xf32> to vector<2x1x96xf32>
    %196 = vector.shape_cast %195 : vector<2x1x96xf32> to vector<2x96xf32>
    %cst_41 = arith.constant dense<0.000000e+00> : vector<2x96xf32>
    %197 = tpu.matmul %157, %26, %cst_41 {dimension_numbers = #tpu.dot_dimension_numbers<[1], [0], [0], [1], [0, 0, 1, 1], [], []>} : vector<2x32xf32>, vector<32x96xf32>, vector<2x96xf32> -> vector<2x96xf32>
    %198 = vector.broadcast %12 : vector<1x96xf32> to vector<2x96xf32>
    %199 = arith.addf %197, %198 : vector<2x96xf32>
    %200 = vector.extract_strided_slice %196 {offsets = [0, 0], sizes = [2, 32], strides = [1, 1]} : vector<2x96xf32> to vector<2x32xf32>
    %201 = vector.extract_strided_slice %199 {offsets = [0, 0], sizes = [2, 32], strides = [1, 1]} : vector<2x96xf32> to vector<2x32xf32>
    %202 = arith.addf %200, %201 : vector<2x32xf32>
    %203 = arith.negf %202 : vector<2x32xf32>
    %204 = math.exp %203 : vector<2x32xf32>
    %cst_42 = arith.constant 1.000000e+00 : f32
    %205 = vector.broadcast %cst_42 : f32 to vector<2x32xf32>
    %206 = arith.addf %205, %204 : vector<2x32xf32>
    %207 = arith.divf %205, %206 : vector<2x32xf32>
    %208 = vector.extract_strided_slice %196 {offsets = [0, 32], sizes = [2, 32], strides = [1, 1]} : vector<2x96xf32> to vector<2x32xf32>
    %209 = vector.extract_strided_slice %199 {offsets = [0, 32], sizes = [2, 32], strides = [1, 1]} : vector<2x96xf32> to vector<2x32xf32>
    %210 = arith.addf %208, %209 : vector<2x32xf32>
    %211 = arith.negf %210 : vector<2x32xf32>
    %212 = math.exp %211 : vector<2x32xf32>
    %cst_43 = arith.constant 1.000000e+00 : f32
    %213 = vector.broadcast %cst_43 : f32 to vector<2x32xf32>
    %214 = arith.addf %213, %212 : vector<2x32xf32>
    %215 = arith.divf %213, %214 : vector<2x32xf32>
    %216 = vector.extract_strided_slice %196 {offsets = [0, 64], sizes = [2, 32], strides = [1, 1]} : vector<2x96xf32> to vector<2x32xf32>
    %217 = vector.extract_strided_slice %199 {offsets = [0, 64], sizes = [2, 32], strides = [1, 1]} : vector<2x96xf32> to vector<2x32xf32>
    %218 = arith.mulf %207, %217 : vector<2x32xf32>
    %219 = arith.addf %216, %218 : vector<2x32xf32>
    %220 = math.tanh %219 : vector<2x32xf32>
    %cst_44 = arith.constant 1.000000e+00 : f32
    %221 = vector.broadcast %cst_44 : f32 to vector<2x32xf32>
    %222 = arith.subf %221, %215 : vector<2x32xf32>
    %223 = arith.mulf %222, %220 : vector<2x32xf32>
    %224 = arith.mulf %215, %157 : vector<2x32xf32>
    %225 = arith.addf %223, %224 : vector<2x32xf32>
    %c0_45 = arith.constant 0 : index
    %c2 = arith.constant 2 : index
    %c0_46 = arith.constant 0 : index
    %226 = vector.load %arg5[%c0_45, %c2, %c0_46] : memref<2x8x64xf32, #tpu.memory_space<vmem>>, vector<2x1x32xf32>
    %227 = vector.shape_cast %226 : vector<2x1x32xf32> to vector<2x32xf32>
    %228 = vector.shape_cast %194 : vector<2x32xf32> to vector<2x1x32xf32>
    tpu.vector_store %arg5[%c0_45, %c2, %c0_46], %228 {strides = array<i32>} : memref<2x8x64xf32, #tpu.memory_space<vmem>>, vector<2x1x32xf32>,
    %c0_47 = arith.constant 0 : index
    %c5 = arith.constant 5 : index
    %c32_48 = arith.constant 32 : index
    %229 = vector.load %arg5[%c0_47, %c5, %c32_48] : memref<2x8x64xf32, #tpu.memory_space<vmem>>, vector<2x1x32xf32>
    %230 = vector.shape_cast %229 : vector<2x1x32xf32> to vector<2x32xf32>
    %231 = vector.shape_cast %225 : vector<2x32xf32> to vector<2x1x32xf32>
    tpu.vector_store %arg5[%c0_47, %c5, %c32_48], %231 {strides = array<i32>} : memref<2x8x64xf32, #tpu.memory_space<vmem>>, vector<2x1x32xf32>,
    %232 = vector.extract_strided_slice %18 {offsets = [0, 3, 0], sizes = [2, 1, 96], strides = [1, 1, 1]} : vector<2x8x96xf32> to vector<2x1x96xf32>
    %233 = vector.shape_cast %232 : vector<2x1x96xf32> to vector<2x96xf32>
    %cst_49 = arith.constant dense<0.000000e+00> : vector<2x96xf32>
    %234 = tpu.matmul %194, %25, %cst_49 {dimension_numbers = #tpu.dot_dimension_numbers<[1], [0], [0], [1], [0, 0, 1, 1], [], []>} : vector<2x32xf32>, vector<32x96xf32>, vector<2x96xf32> -> vector<2x96xf32>
    %235 = vector.broadcast %9 : vector<1x96xf32> to vector<2x96xf32>
    %236 = arith.addf %234, %235 : vector<2x96xf32>
    %237 = vector.extract_strided_slice %233 {offsets = [0, 0], sizes = [2, 32], strides = [1, 1]} : vector<2x96xf32> to vector<2x32xf32>
    %238 = vector.extract_strided_slice %236 {offsets = [0, 0], sizes = [2, 32], strides = [1, 1]} : vector<2x96xf32> to vector<2x32xf32>
    %239 = arith.addf %237, %238 : vector<2x32xf32>
    %240 = arith.negf %239 : vector<2x32xf32>
    %241 = math.exp %240 : vector<2x32xf32>
    %cst_50 = arith.constant 1.000000e+00 : f32
    %242 = vector.broadcast %cst_50 : f32 to vector<2x32xf32>
    %243 = arith.addf %242, %241 : vector<2x32xf32>
    %244 = arith.divf %242, %243 : vector<2x32xf32>
    %245 = vector.extract_strided_slice %233 {offsets = [0, 32], sizes = [2, 32], strides = [1, 1]} : vector<2x96xf32> to vector<2x32xf32>
    %246 = vector.extract_strided_slice %236 {offsets = [0, 32], sizes = [2, 32], strides = [1, 1]} : vector<2x96xf32> to vector<2x32xf32>
    %247 = arith.addf %245, %246 : vector<2x32xf32>
    %248 = arith.negf %247 : vector<2x32xf32>
    %249 = math.exp %248 : vector<2x32xf32>
    %cst_51 = arith.constant 1.000000e+00 : f32
    %250 = vector.broadcast %cst_51 : f32 to vector<2x32xf32>
    %251 = arith.addf %250, %249 : vector<2x32xf32>
    %252 = arith.divf %250, %251 : vector<2x32xf32>
    %253 = vector.extract_strided_slice %233 {offsets = [0, 64], sizes = [2, 32], strides = [1, 1]} : vector<2x96xf32> to vector<2x32xf32>
    %254 = vector.extract_strided_slice %236 {offsets = [0, 64], sizes = [2, 32], strides = [1, 1]} : vector<2x96xf32> to vector<2x32xf32>
    %255 = arith.mulf %244, %254 : vector<2x32xf32>
    %256 = arith.addf %253, %255 : vector<2x32xf32>
    %257 = math.tanh %256 : vector<2x32xf32>
    %cst_52 = arith.constant 1.000000e+00 : f32
    %258 = vector.broadcast %cst_52 : f32 to vector<2x32xf32>
    %259 = arith.subf %258, %252 : vector<2x32xf32>
    %260 = arith.mulf %259, %257 : vector<2x32xf32>
    %261 = arith.mulf %252, %194 : vector<2x32xf32>
    %262 = arith.addf %260, %261 : vector<2x32xf32>
    %263 = vector.extract_strided_slice %24 {offsets = [0, 4, 0], sizes = [2, 1, 96], strides = [1, 1, 1]} : vector<2x8x96xf32> to vector<2x1x96xf32>
    %264 = vector.shape_cast %263 : vector<2x1x96xf32> to vector<2x96xf32>
    %cst_53 = arith.constant dense<0.000000e+00> : vector<2x96xf32>
    %265 = tpu.matmul %225, %26, %cst_53 {dimension_numbers = #tpu.dot_dimension_numbers<[1], [0], [0], [1], [0, 0, 1, 1], [], []>} : vector<2x32xf32>, vector<32x96xf32>, vector<2x96xf32> -> vector<2x96xf32>
    %266 = vector.broadcast %12 : vector<1x96xf32> to vector<2x96xf32>
    %267 = arith.addf %265, %266 : vector<2x96xf32>
    %268 = vector.extract_strided_slice %264 {offsets = [0, 0], sizes = [2, 32], strides = [1, 1]} : vector<2x96xf32> to vector<2x32xf32>
    %269 = vector.extract_strided_slice %267 {offsets = [0, 0], sizes = [2, 32], strides = [1, 1]} : vector<2x96xf32> to vector<2x32xf32>
    %270 = arith.addf %268, %269 : vector<2x32xf32>
    %271 = arith.negf %270 : vector<2x32xf32>
    %272 = math.exp %271 : vector<2x32xf32>
    %cst_54 = arith.constant 1.000000e+00 : f32
    %273 = vector.broadcast %cst_54 : f32 to vector<2x32xf32>
    %274 = arith.addf %273, %272 : vector<2x32xf32>
    %275 = arith.divf %273, %274 : vector<2x32xf32>
    %276 = vector.extract_strided_slice %264 {offsets = [0, 32], sizes = [2, 32], strides = [1, 1]} : vector<2x96xf32> to vector<2x32xf32>
    %277 = vector.extract_strided_slice %267 {offsets = [0, 32], sizes = [2, 32], strides = [1, 1]} : vector<2x96xf32> to vector<2x32xf32>
    %278 = arith.addf %276, %277 : vector<2x32xf32>
    %279 = arith.negf %278 : vector<2x32xf32>
    %280 = math.exp %279 : vector<2x32xf32>
    %cst_55 = arith.constant 1.000000e+00 : f32
    %281 = vector.broadcast %cst_55 : f32 to vector<2x32xf32>
    %282 = arith.addf %281, %280 : vector<2x32xf32>
    %283 = arith.divf %281, %282 : vector<2x32xf32>
    %284 = vector.extract_strided_slice %264 {offsets = [0, 64], sizes = [2, 32], strides = [1, 1]} : vector<2x96xf32> to vector<2x32xf32>
    %285 = vector.extract_strided_slice %267 {offsets = [0, 64], sizes = [2, 32], strides = [1, 1]} : vector<2x96xf32> to vector<2x32xf32>
    %286 = arith.mulf %275, %285 : vector<2x32xf32>
    %287 = arith.addf %284, %286 : vector<2x32xf32>
    %288 = math.tanh %287 : vector<2x32xf32>
    %cst_56 = arith.constant 1.000000e+00 : f32
    %289 = vector.broadcast %cst_56 : f32 to vector<2x32xf32>
    %290 = arith.subf %289, %283 : vector<2x32xf32>
    %291 = arith.mulf %290, %288 : vector<2x32xf32>
    %292 = arith.mulf %283, %225 : vector<2x32xf32>
    %293 = arith.addf %291, %292 : vector<2x32xf32>
    %c0_57 = arith.constant 0 : index
    %c3 = arith.constant 3 : index
    %c0_58 = arith.constant 0 : index
    %294 = vector.load %arg5[%c0_57, %c3, %c0_58] : memref<2x8x64xf32, #tpu.memory_space<vmem>>, vector<2x1x32xf32>
    %295 = vector.shape_cast %294 : vector<2x1x32xf32> to vector<2x32xf32>
    %296 = vector.shape_cast %262 : vector<2x32xf32> to vector<2x1x32xf32>
    tpu.vector_store %arg5[%c0_57, %c3, %c0_58], %296 {strides = array<i32>} : memref<2x8x64xf32, #tpu.memory_space<vmem>>, vector<2x1x32xf32>,
    %c0_59 = arith.constant 0 : index
    %c4 = arith.constant 4 : index
    %c32_60 = arith.constant 32 : index
    %297 = vector.load %arg5[%c0_59, %c4, %c32_60] : memref<2x8x64xf32, #tpu.memory_space<vmem>>, vector<2x1x32xf32>
    %298 = vector.shape_cast %297 : vector<2x1x32xf32> to vector<2x32xf32>
    %299 = vector.shape_cast %293 : vector<2x32xf32> to vector<2x1x32xf32>
    tpu.vector_store %arg5[%c0_59, %c4, %c32_60], %299 {strides = array<i32>} : memref<2x8x64xf32, #tpu.memory_space<vmem>>, vector<2x1x32xf32>,
    %300 = vector.extract_strided_slice %18 {offsets = [0, 4, 0], sizes = [2, 1, 96], strides = [1, 1, 1]} : vector<2x8x96xf32> to vector<2x1x96xf32>
    %301 = vector.shape_cast %300 : vector<2x1x96xf32> to vector<2x96xf32>
    %cst_61 = arith.constant dense<0.000000e+00> : vector<2x96xf32>
    %302 = tpu.matmul %262, %25, %cst_61 {dimension_numbers = #tpu.dot_dimension_numbers<[1], [0], [0], [1], [0, 0, 1, 1], [], []>} : vector<2x32xf32>, vector<32x96xf32>, vector<2x96xf32> -> vector<2x96xf32>
    %303 = vector.broadcast %9 : vector<1x96xf32> to vector<2x96xf32>
    %304 = arith.addf %302, %303 : vector<2x96xf32>
    %305 = vector.extract_strided_slice %301 {offsets = [0, 0], sizes = [2, 32], strides = [1, 1]} : vector<2x96xf32> to vector<2x32xf32>
    %306 = vector.extract_strided_slice %304 {offsets = [0, 0], sizes = [2, 32], strides = [1, 1]} : vector<2x96xf32> to vector<2x32xf32>
    %307 = arith.addf %305, %306 : vector<2x32xf32>
    %308 = arith.negf %307 : vector<2x32xf32>
    %309 = math.exp %308 : vector<2x32xf32>
    %cst_62 = arith.constant 1.000000e+00 : f32
    %310 = vector.broadcast %cst_62 : f32 to vector<2x32xf32>
    %311 = arith.addf %310, %309 : vector<2x32xf32>
    %312 = arith.divf %310, %311 : vector<2x32xf32>
    %313 = vector.extract_strided_slice %301 {offsets = [0, 32], sizes = [2, 32], strides = [1, 1]} : vector<2x96xf32> to vector<2x32xf32>
    %314 = vector.extract_strided_slice %304 {offsets = [0, 32], sizes = [2, 32], strides = [1, 1]} : vector<2x96xf32> to vector<2x32xf32>
    %315 = arith.addf %313, %314 : vector<2x32xf32>
    %316 = arith.negf %315 : vector<2x32xf32>
    %317 = math.exp %316 : vector<2x32xf32>
    %cst_63 = arith.constant 1.000000e+00 : f32
    %318 = vector.broadcast %cst_63 : f32 to vector<2x32xf32>
    %319 = arith.addf %318, %317 : vector<2x32xf32>
    %320 = arith.divf %318, %319 : vector<2x32xf32>
    %321 = vector.extract_strided_slice %301 {offsets = [0, 64], sizes = [2, 32], strides = [1, 1]} : vector<2x96xf32> to vector<2x32xf32>
    %322 = vector.extract_strided_slice %304 {offsets = [0, 64], sizes = [2, 32], strides = [1, 1]} : vector<2x96xf32> to vector<2x32xf32>
    %323 = arith.mulf %312, %322 : vector<2x32xf32>
    %324 = arith.addf %321, %323 : vector<2x32xf32>
    %325 = math.tanh %324 : vector<2x32xf32>
    %cst_64 = arith.constant 1.000000e+00 : f32
    %326 = vector.broadcast %cst_64 : f32 to vector<2x32xf32>
    %327 = arith.subf %326, %320 : vector<2x32xf32>
    %328 = arith.mulf %327, %325 : vector<2x32xf32>
    %329 = arith.mulf %320, %262 : vector<2x32xf32>
    %330 = arith.addf %328, %329 : vector<2x32xf32>
    %331 = vector.extract_strided_slice %24 {offsets = [0, 3, 0], sizes = [2, 1, 96], strides = [1, 1, 1]} : vector<2x8x96xf32> to vector<2x1x96xf32>
    %332 = vector.shape_cast %331 : vector<2x1x96xf32> to vector<2x96xf32>
    %cst_65 = arith.constant dense<0.000000e+00> : vector<2x96xf32>
    %333 = tpu.matmul %293, %26, %cst_65 {dimension_numbers = #tpu.dot_dimension_numbers<[1], [0], [0], [1], [0, 0, 1, 1], [], []>} : vector<2x32xf32>, vector<32x96xf32>, vector<2x96xf32> -> vector<2x96xf32>
    %334 = vector.broadcast %12 : vector<1x96xf32> to vector<2x96xf32>
    %335 = arith.addf %333, %334 : vector<2x96xf32>
    %336 = vector.extract_strided_slice %332 {offsets = [0, 0], sizes = [2, 32], strides = [1, 1]} : vector<2x96xf32> to vector<2x32xf32>
    %337 = vector.extract_strided_slice %335 {offsets = [0, 0], sizes = [2, 32], strides = [1, 1]} : vector<2x96xf32> to vector<2x32xf32>
    %338 = arith.addf %336, %337 : vector<2x32xf32>
    %339 = arith.negf %338 : vector<2x32xf32>
    %340 = math.exp %339 : vector<2x32xf32>
    %cst_66 = arith.constant 1.000000e+00 : f32
    %341 = vector.broadcast %cst_66 : f32 to vector<2x32xf32>
    %342 = arith.addf %341, %340 : vector<2x32xf32>
    %343 = arith.divf %341, %342 : vector<2x32xf32>
    %344 = vector.extract_strided_slice %332 {offsets = [0, 32], sizes = [2, 32], strides = [1, 1]} : vector<2x96xf32> to vector<2x32xf32>
    %345 = vector.extract_strided_slice %335 {offsets = [0, 32], sizes = [2, 32], strides = [1, 1]} : vector<2x96xf32> to vector<2x32xf32>
    %346 = arith.addf %344, %345 : vector<2x32xf32>
    %347 = arith.negf %346 : vector<2x32xf32>
    %348 = math.exp %347 : vector<2x32xf32>
    %cst_67 = arith.constant 1.000000e+00 : f32
    %349 = vector.broadcast %cst_67 : f32 to vector<2x32xf32>
    %350 = arith.addf %349, %348 : vector<2x32xf32>
    %351 = arith.divf %349, %350 : vector<2x32xf32>
    %352 = vector.extract_strided_slice %332 {offsets = [0, 64], sizes = [2, 32], strides = [1, 1]} : vector<2x96xf32> to vector<2x32xf32>
    %353 = vector.extract_strided_slice %335 {offsets = [0, 64], sizes = [2, 32], strides = [1, 1]} : vector<2x96xf32> to vector<2x32xf32>
    %354 = arith.mulf %343, %353 : vector<2x32xf32>
    %355 = arith.addf %352, %354 : vector<2x32xf32>
    %356 = math.tanh %355 : vector<2x32xf32>
    %cst_68 = arith.constant 1.000000e+00 : f32
    %357 = vector.broadcast %cst_68 : f32 to vector<2x32xf32>
    %358 = arith.subf %357, %351 : vector<2x32xf32>
    %359 = arith.mulf %358, %356 : vector<2x32xf32>
    %360 = arith.mulf %351, %293 : vector<2x32xf32>
    %361 = arith.addf %359, %360 : vector<2x32xf32>
    %c0_69 = arith.constant 0 : index
    %c4_70 = arith.constant 4 : index
    %c0_71 = arith.constant 0 : index
    %362 = vector.load %arg5[%c0_69, %c4_70, %c0_71] : memref<2x8x64xf32, #tpu.memory_space<vmem>>, vector<2x1x32xf32>
    %363 = vector.shape_cast %362 : vector<2x1x32xf32> to vector<2x32xf32>
    %364 = vector.shape_cast %330 : vector<2x32xf32> to vector<2x1x32xf32>
    tpu.vector_store %arg5[%c0_69, %c4_70, %c0_71], %364 {strides = array<i32>} : memref<2x8x64xf32, #tpu.memory_space<vmem>>, vector<2x1x32xf32>,
    %c0_72 = arith.constant 0 : index
    %c3_73 = arith.constant 3 : index
    %c32_74 = arith.constant 32 : index
    %365 = vector.load %arg5[%c0_72, %c3_73, %c32_74] : memref<2x8x64xf32, #tpu.memory_space<vmem>>, vector<2x1x32xf32>
    %366 = vector.shape_cast %365 : vector<2x1x32xf32> to vector<2x32xf32>
    %367 = vector.shape_cast %361 : vector<2x32xf32> to vector<2x1x32xf32>
    tpu.vector_store %arg5[%c0_72, %c3_73, %c32_74], %367 {strides = array<i32>} : memref<2x8x64xf32, #tpu.memory_space<vmem>>, vector<2x1x32xf32>,
    %368 = vector.extract_strided_slice %18 {offsets = [0, 5, 0], sizes = [2, 1, 96], strides = [1, 1, 1]} : vector<2x8x96xf32> to vector<2x1x96xf32>
    %369 = vector.shape_cast %368 : vector<2x1x96xf32> to vector<2x96xf32>
    %cst_75 = arith.constant dense<0.000000e+00> : vector<2x96xf32>
    %370 = tpu.matmul %330, %25, %cst_75 {dimension_numbers = #tpu.dot_dimension_numbers<[1], [0], [0], [1], [0, 0, 1, 1], [], []>} : vector<2x32xf32>, vector<32x96xf32>, vector<2x96xf32> -> vector<2x96xf32>
    %371 = vector.broadcast %9 : vector<1x96xf32> to vector<2x96xf32>
    %372 = arith.addf %370, %371 : vector<2x96xf32>
    %373 = vector.extract_strided_slice %369 {offsets = [0, 0], sizes = [2, 32], strides = [1, 1]} : vector<2x96xf32> to vector<2x32xf32>
    %374 = vector.extract_strided_slice %372 {offsets = [0, 0], sizes = [2, 32], strides = [1, 1]} : vector<2x96xf32> to vector<2x32xf32>
    %375 = arith.addf %373, %374 : vector<2x32xf32>
    %376 = arith.negf %375 : vector<2x32xf32>
    %377 = math.exp %376 : vector<2x32xf32>
    %cst_76 = arith.constant 1.000000e+00 : f32
    %378 = vector.broadcast %cst_76 : f32 to vector<2x32xf32>
    %379 = arith.addf %378, %377 : vector<2x32xf32>
    %380 = arith.divf %378, %379 : vector<2x32xf32>
    %381 = vector.extract_strided_slice %369 {offsets = [0, 32], sizes = [2, 32], strides = [1, 1]} : vector<2x96xf32> to vector<2x32xf32>
    %382 = vector.extract_strided_slice %372 {offsets = [0, 32], sizes = [2, 32], strides = [1, 1]} : vector<2x96xf32> to vector<2x32xf32>
    %383 = arith.addf %381, %382 : vector<2x32xf32>
    %384 = arith.negf %383 : vector<2x32xf32>
    %385 = math.exp %384 : vector<2x32xf32>
    %cst_77 = arith.constant 1.000000e+00 : f32
    %386 = vector.broadcast %cst_77 : f32 to vector<2x32xf32>
    %387 = arith.addf %386, %385 : vector<2x32xf32>
    %388 = arith.divf %386, %387 : vector<2x32xf32>
    %389 = vector.extract_strided_slice %369 {offsets = [0, 64], sizes = [2, 32], strides = [1, 1]} : vector<2x96xf32> to vector<2x32xf32>
    %390 = vector.extract_strided_slice %372 {offsets = [0, 64], sizes = [2, 32], strides = [1, 1]} : vector<2x96xf32> to vector<2x32xf32>
    %391 = arith.mulf %380, %390 : vector<2x32xf32>
    %392 = arith.addf %389, %391 : vector<2x32xf32>
    %393 = math.tanh %392 : vector<2x32xf32>
    %cst_78 = arith.constant 1.000000e+00 : f32
    %394 = vector.broadcast %cst_78 : f32 to vector<2x32xf32>
    %395 = arith.subf %394, %388 : vector<2x32xf32>
    %396 = arith.mulf %395, %393 : vector<2x32xf32>
    %397 = arith.mulf %388, %330 : vector<2x32xf32>
    %398 = arith.addf %396, %397 : vector<2x32xf32>
    %399 = vector.extract_strided_slice %24 {offsets = [0, 2, 0], sizes = [2, 1, 96], strides = [1, 1, 1]} : vector<2x8x96xf32> to vector<2x1x96xf32>
    %400 = vector.shape_cast %399 : vector<2x1x96xf32> to vector<2x96xf32>
    %cst_79 = arith.constant dense<0.000000e+00> : vector<2x96xf32>
    %401 = tpu.matmul %361, %26, %cst_79 {dimension_numbers = #tpu.dot_dimension_numbers<[1], [0], [0], [1], [0, 0, 1, 1], [], []>} : vector<2x32xf32>, vector<32x96xf32>, vector<2x96xf32> -> vector<2x96xf32>
    %402 = vector.broadcast %12 : vector<1x96xf32> to vector<2x96xf32>
    %403 = arith.addf %401, %402 : vector<2x96xf32>
    %404 = vector.extract_strided_slice %400 {offsets = [0, 0], sizes = [2, 32], strides = [1, 1]} : vector<2x96xf32> to vector<2x32xf32>
    %405 = vector.extract_strided_slice %403 {offsets = [0, 0], sizes = [2, 32], strides = [1, 1]} : vector<2x96xf32> to vector<2x32xf32>
    %406 = arith.addf %404, %405 : vector<2x32xf32>
    %407 = arith.negf %406 : vector<2x32xf32>
    %408 = math.exp %407 : vector<2x32xf32>
    %cst_80 = arith.constant 1.000000e+00 : f32
    %409 = vector.broadcast %cst_80 : f32 to vector<2x32xf32>
    %410 = arith.addf %409, %408 : vector<2x32xf32>
    %411 = arith.divf %409, %410 : vector<2x32xf32>
    %412 = vector.extract_strided_slice %400 {offsets = [0, 32], sizes = [2, 32], strides = [1, 1]} : vector<2x96xf32> to vector<2x32xf32>
    %413 = vector.extract_strided_slice %403 {offsets = [0, 32], sizes = [2, 32], strides = [1, 1]} : vector<2x96xf32> to vector<2x32xf32>
    %414 = arith.addf %412, %413 : vector<2x32xf32>
    %415 = arith.negf %414 : vector<2x32xf32>
    %416 = math.exp %415 : vector<2x32xf32>
    %cst_81 = arith.constant 1.000000e+00 : f32
    %417 = vector.broadcast %cst_81 : f32 to vector<2x32xf32>
    %418 = arith.addf %417, %416 : vector<2x32xf32>
    %419 = arith.divf %417, %418 : vector<2x32xf32>
    %420 = vector.extract_strided_slice %400 {offsets = [0, 64], sizes = [2, 32], strides = [1, 1]} : vector<2x96xf32> to vector<2x32xf32>
    %421 = vector.extract_strided_slice %403 {offsets = [0, 64], sizes = [2, 32], strides = [1, 1]} : vector<2x96xf32> to vector<2x32xf32>
    %422 = arith.mulf %411, %421 : vector<2x32xf32>
    %423 = arith.addf %420, %422 : vector<2x32xf32>
    %424 = math.tanh %423 : vector<2x32xf32>
    %cst_82 = arith.constant 1.000000e+00 : f32
    %425 = vector.broadcast %cst_82 : f32 to vector<2x32xf32>
    %426 = arith.subf %425, %419 : vector<2x32xf32>
    %427 = arith.mulf %426, %424 : vector<2x32xf32>
    %428 = arith.mulf %419, %361 : vector<2x32xf32>
    %429 = arith.addf %427, %428 : vector<2x32xf32>
    %c0_83 = arith.constant 0 : index
    %c5_84 = arith.constant 5 : index
    %c0_85 = arith.constant 0 : index
    %430 = vector.load %arg5[%c0_83, %c5_84, %c0_85] : memref<2x8x64xf32, #tpu.memory_space<vmem>>, vector<2x1x32xf32>
    %431 = vector.shape_cast %430 : vector<2x1x32xf32> to vector<2x32xf32>
    %432 = vector.shape_cast %398 : vector<2x32xf32> to vector<2x1x32xf32>
    tpu.vector_store %arg5[%c0_83, %c5_84, %c0_85], %432 {strides = array<i32>} : memref<2x8x64xf32, #tpu.memory_space<vmem>>, vector<2x1x32xf32>,
    %c0_86 = arith.constant 0 : index
    %c2_87 = arith.constant 2 : index
    %c32_88 = arith.constant 32 : index
    %433 = vector.load %arg5[%c0_86, %c2_87, %c32_88] : memref<2x8x64xf32, #tpu.memory_space<vmem>>, vector<2x1x32xf32>
    %434 = vector.shape_cast %433 : vector<2x1x32xf32> to vector<2x32xf32>
    %435 = vector.shape_cast %429 : vector<2x32xf32> to vector<2x1x32xf32>
    tpu.vector_store %arg5[%c0_86, %c2_87, %c32_88], %435 {strides = array<i32>} : memref<2x8x64xf32, #tpu.memory_space<vmem>>, vector<2x1x32xf32>,
    %436 = vector.extract_strided_slice %18 {offsets = [0, 6, 0], sizes = [2, 1, 96], strides = [1, 1, 1]} : vector<2x8x96xf32> to vector<2x1x96xf32>
    %437 = vector.shape_cast %436 : vector<2x1x96xf32> to vector<2x96xf32>
    %cst_89 = arith.constant dense<0.000000e+00> : vector<2x96xf32>
    %438 = tpu.matmul %398, %25, %cst_89 {dimension_numbers = #tpu.dot_dimension_numbers<[1], [0], [0], [1], [0, 0, 1, 1], [], []>} : vector<2x32xf32>, vector<32x96xf32>, vector<2x96xf32> -> vector<2x96xf32>
    %439 = vector.broadcast %9 : vector<1x96xf32> to vector<2x96xf32>
    %440 = arith.addf %438, %439 : vector<2x96xf32>
    %441 = vector.extract_strided_slice %437 {offsets = [0, 0], sizes = [2, 32], strides = [1, 1]} : vector<2x96xf32> to vector<2x32xf32>
    %442 = vector.extract_strided_slice %440 {offsets = [0, 0], sizes = [2, 32], strides = [1, 1]} : vector<2x96xf32> to vector<2x32xf32>
    %443 = arith.addf %441, %442 : vector<2x32xf32>
    %444 = arith.negf %443 : vector<2x32xf32>
    %445 = math.exp %444 : vector<2x32xf32>
    %cst_90 = arith.constant 1.000000e+00 : f32
    %446 = vector.broadcast %cst_90 : f32 to vector<2x32xf32>
    %447 = arith.addf %446, %445 : vector<2x32xf32>
    %448 = arith.divf %446, %447 : vector<2x32xf32>
    %449 = vector.extract_strided_slice %437 {offsets = [0, 32], sizes = [2, 32], strides = [1, 1]} : vector<2x96xf32> to vector<2x32xf32>
    %450 = vector.extract_strided_slice %440 {offsets = [0, 32], sizes = [2, 32], strides = [1, 1]} : vector<2x96xf32> to vector<2x32xf32>
    %451 = arith.addf %449, %450 : vector<2x32xf32>
    %452 = arith.negf %451 : vector<2x32xf32>
    %453 = math.exp %452 : vector<2x32xf32>
    %cst_91 = arith.constant 1.000000e+00 : f32
    %454 = vector.broadcast %cst_91 : f32 to vector<2x32xf32>
    %455 = arith.addf %454, %453 : vector<2x32xf32>
    %456 = arith.divf %454, %455 : vector<2x32xf32>
    %457 = vector.extract_strided_slice %437 {offsets = [0, 64], sizes = [2, 32], strides = [1, 1]} : vector<2x96xf32> to vector<2x32xf32>
    %458 = vector.extract_strided_slice %440 {offsets = [0, 64], sizes = [2, 32], strides = [1, 1]} : vector<2x96xf32> to vector<2x32xf32>
    %459 = arith.mulf %448, %458 : vector<2x32xf32>
    %460 = arith.addf %457, %459 : vector<2x32xf32>
    %461 = math.tanh %460 : vector<2x32xf32>
    %cst_92 = arith.constant 1.000000e+00 : f32
    %462 = vector.broadcast %cst_92 : f32 to vector<2x32xf32>
    %463 = arith.subf %462, %456 : vector<2x32xf32>
    %464 = arith.mulf %463, %461 : vector<2x32xf32>
    %465 = arith.mulf %456, %398 : vector<2x32xf32>
    %466 = arith.addf %464, %465 : vector<2x32xf32>
    %467 = vector.extract_strided_slice %24 {offsets = [0, 1, 0], sizes = [2, 1, 96], strides = [1, 1, 1]} : vector<2x8x96xf32> to vector<2x1x96xf32>
    %468 = vector.shape_cast %467 : vector<2x1x96xf32> to vector<2x96xf32>
    %cst_93 = arith.constant dense<0.000000e+00> : vector<2x96xf32>
    %469 = tpu.matmul %429, %26, %cst_93 {dimension_numbers = #tpu.dot_dimension_numbers<[1], [0], [0], [1], [0, 0, 1, 1], [], []>} : vector<2x32xf32>, vector<32x96xf32>, vector<2x96xf32> -> vector<2x96xf32>
    %470 = vector.broadcast %12 : vector<1x96xf32> to vector<2x96xf32>
    %471 = arith.addf %469, %470 : vector<2x96xf32>
    %472 = vector.extract_strided_slice %468 {offsets = [0, 0], sizes = [2, 32], strides = [1, 1]} : vector<2x96xf32> to vector<2x32xf32>
    %473 = vector.extract_strided_slice %471 {offsets = [0, 0], sizes = [2, 32], strides = [1, 1]} : vector<2x96xf32> to vector<2x32xf32>
    %474 = arith.addf %472, %473 : vector<2x32xf32>
    %475 = arith.negf %474 : vector<2x32xf32>
    %476 = math.exp %475 : vector<2x32xf32>
    %cst_94 = arith.constant 1.000000e+00 : f32
    %477 = vector.broadcast %cst_94 : f32 to vector<2x32xf32>
    %478 = arith.addf %477, %476 : vector<2x32xf32>
    %479 = arith.divf %477, %478 : vector<2x32xf32>
    %480 = vector.extract_strided_slice %468 {offsets = [0, 32], sizes = [2, 32], strides = [1, 1]} : vector<2x96xf32> to vector<2x32xf32>
    %481 = vector.extract_strided_slice %471 {offsets = [0, 32], sizes = [2, 32], strides = [1, 1]} : vector<2x96xf32> to vector<2x32xf32>
    %482 = arith.addf %480, %481 : vector<2x32xf32>
    %483 = arith.negf %482 : vector<2x32xf32>
    %484 = math.exp %483 : vector<2x32xf32>
    %cst_95 = arith.constant 1.000000e+00 : f32
    %485 = vector.broadcast %cst_95 : f32 to vector<2x32xf32>
    %486 = arith.addf %485, %484 : vector<2x32xf32>
    %487 = arith.divf %485, %486 : vector<2x32xf32>
    %488 = vector.extract_strided_slice %468 {offsets = [0, 64], sizes = [2, 32], strides = [1, 1]} : vector<2x96xf32> to vector<2x32xf32>
    %489 = vector.extract_strided_slice %471 {offsets = [0, 64], sizes = [2, 32], strides = [1, 1]} : vector<2x96xf32> to vector<2x32xf32>
    %490 = arith.mulf %479, %489 : vector<2x32xf32>
    %491 = arith.addf %488, %490 : vector<2x32xf32>
    %492 = math.tanh %491 : vector<2x32xf32>
    %cst_96 = arith.constant 1.000000e+00 : f32
    %493 = vector.broadcast %cst_96 : f32 to vector<2x32xf32>
    %494 = arith.subf %493, %487 : vector<2x32xf32>
    %495 = arith.mulf %494, %492 : vector<2x32xf32>
    %496 = arith.mulf %487, %429 : vector<2x32xf32>
    %497 = arith.addf %495, %496 : vector<2x32xf32>
    %c0_97 = arith.constant 0 : index
    %c6_98 = arith.constant 6 : index
    %c0_99 = arith.constant 0 : index
    %498 = vector.load %arg5[%c0_97, %c6_98, %c0_99] : memref<2x8x64xf32, #tpu.memory_space<vmem>>, vector<2x1x32xf32>
    %499 = vector.shape_cast %498 : vector<2x1x32xf32> to vector<2x32xf32>
    %500 = vector.shape_cast %466 : vector<2x32xf32> to vector<2x1x32xf32>
    tpu.vector_store %arg5[%c0_97, %c6_98, %c0_99], %500 {strides = array<i32>} : memref<2x8x64xf32, #tpu.memory_space<vmem>>, vector<2x1x32xf32>,
    %c0_100 = arith.constant 0 : index
    %c1_101 = arith.constant 1 : index
    %c32_102 = arith.constant 32 : index
    %501 = vector.load %arg5[%c0_100, %c1_101, %c32_102] : memref<2x8x64xf32, #tpu.memory_space<vmem>>, vector<2x1x32xf32>
    %502 = vector.shape_cast %501 : vector<2x1x32xf32> to vector<2x32xf32>
    %503 = vector.shape_cast %497 : vector<2x32xf32> to vector<2x1x32xf32>
    tpu.vector_store %arg5[%c0_100, %c1_101, %c32_102], %503 {strides = array<i32>} : memref<2x8x64xf32, #tpu.memory_space<vmem>>, vector<2x1x32xf32>,
    %504 = vector.extract_strided_slice %18 {offsets = [0, 7, 0], sizes = [2, 1, 96], strides = [1, 1, 1]} : vector<2x8x96xf32> to vector<2x1x96xf32>
    %505 = vector.shape_cast %504 : vector<2x1x96xf32> to vector<2x96xf32>
    %cst_103 = arith.constant dense<0.000000e+00> : vector<2x96xf32>
    %506 = tpu.matmul %466, %25, %cst_103 {dimension_numbers = #tpu.dot_dimension_numbers<[1], [0], [0], [1], [0, 0, 1, 1], [], []>} : vector<2x32xf32>, vector<32x96xf32>, vector<2x96xf32> -> vector<2x96xf32>
    %507 = vector.broadcast %9 : vector<1x96xf32> to vector<2x96xf32>
    %508 = arith.addf %506, %507 : vector<2x96xf32>
    %509 = vector.extract_strided_slice %505 {offsets = [0, 0], sizes = [2, 32], strides = [1, 1]} : vector<2x96xf32> to vector<2x32xf32>
    %510 = vector.extract_strided_slice %508 {offsets = [0, 0], sizes = [2, 32], strides = [1, 1]} : vector<2x96xf32> to vector<2x32xf32>
    %511 = arith.addf %509, %510 : vector<2x32xf32>
    %512 = arith.negf %511 : vector<2x32xf32>
    %513 = math.exp %512 : vector<2x32xf32>
    %cst_104 = arith.constant 1.000000e+00 : f32
    %514 = vector.broadcast %cst_104 : f32 to vector<2x32xf32>
    %515 = arith.addf %514, %513 : vector<2x32xf32>
    %516 = arith.divf %514, %515 : vector<2x32xf32>
    %517 = vector.extract_strided_slice %505 {offsets = [0, 32], sizes = [2, 32], strides = [1, 1]} : vector<2x96xf32> to vector<2x32xf32>
    %518 = vector.extract_strided_slice %508 {offsets = [0, 32], sizes = [2, 32], strides = [1, 1]} : vector<2x96xf32> to vector<2x32xf32>
    %519 = arith.addf %517, %518 : vector<2x32xf32>
    %520 = arith.negf %519 : vector<2x32xf32>
    %521 = math.exp %520 : vector<2x32xf32>
    %cst_105 = arith.constant 1.000000e+00 : f32
    %522 = vector.broadcast %cst_105 : f32 to vector<2x32xf32>
    %523 = arith.addf %522, %521 : vector<2x32xf32>
    %524 = arith.divf %522, %523 : vector<2x32xf32>
    %525 = vector.extract_strided_slice %505 {offsets = [0, 64], sizes = [2, 32], strides = [1, 1]} : vector<2x96xf32> to vector<2x32xf32>
    %526 = vector.extract_strided_slice %508 {offsets = [0, 64], sizes = [2, 32], strides = [1, 1]} : vector<2x96xf32> to vector<2x32xf32>
    %527 = arith.mulf %516, %526 : vector<2x32xf32>
    %528 = arith.addf %525, %527 : vector<2x32xf32>
    %529 = math.tanh %528 : vector<2x32xf32>
    %cst_106 = arith.constant 1.000000e+00 : f32
    %530 = vector.broadcast %cst_106 : f32 to vector<2x32xf32>
    %531 = arith.subf %530, %524 : vector<2x32xf32>
    %532 = arith.mulf %531, %529 : vector<2x32xf32>
    %533 = arith.mulf %524, %466 : vector<2x32xf32>
    %534 = arith.addf %532, %533 : vector<2x32xf32>
    %535 = vector.extract_strided_slice %24 {offsets = [0, 0, 0], sizes = [2, 1, 96], strides = [1, 1, 1]} : vector<2x8x96xf32> to vector<2x1x96xf32>
    %536 = vector.shape_cast %535 : vector<2x1x96xf32> to vector<2x96xf32>
    %cst_107 = arith.constant dense<0.000000e+00> : vector<2x96xf32>
    %537 = tpu.matmul %497, %26, %cst_107 {dimension_numbers = #tpu.dot_dimension_numbers<[1], [0], [0], [1], [0, 0, 1, 1], [], []>} : vector<2x32xf32>, vector<32x96xf32>, vector<2x96xf32> -> vector<2x96xf32>
    %538 = vector.broadcast %12 : vector<1x96xf32> to vector<2x96xf32>
    %539 = arith.addf %537, %538 : vector<2x96xf32>
    %540 = vector.extract_strided_slice %536 {offsets = [0, 0], sizes = [2, 32], strides = [1, 1]} : vector<2x96xf32> to vector<2x32xf32>
    %541 = vector.extract_strided_slice %539 {offsets = [0, 0], sizes = [2, 32], strides = [1, 1]} : vector<2x96xf32> to vector<2x32xf32>
    %542 = arith.addf %540, %541 : vector<2x32xf32>
    %543 = arith.negf %542 : vector<2x32xf32>
    %544 = math.exp %543 : vector<2x32xf32>
    %cst_108 = arith.constant 1.000000e+00 : f32
    %545 = vector.broadcast %cst_108 : f32 to vector<2x32xf32>
    %546 = arith.addf %545, %544 : vector<2x32xf32>
    %547 = arith.divf %545, %546 : vector<2x32xf32>
    %548 = vector.extract_strided_slice %536 {offsets = [0, 32], sizes = [2, 32], strides = [1, 1]} : vector<2x96xf32> to vector<2x32xf32>
    %549 = vector.extract_strided_slice %539 {offsets = [0, 32], sizes = [2, 32], strides = [1, 1]} : vector<2x96xf32> to vector<2x32xf32>
    %550 = arith.addf %548, %549 : vector<2x32xf32>
    %551 = arith.negf %550 : vector<2x32xf32>
    %552 = math.exp %551 : vector<2x32xf32>
    %cst_109 = arith.constant 1.000000e+00 : f32
    %553 = vector.broadcast %cst_109 : f32 to vector<2x32xf32>
    %554 = arith.addf %553, %552 : vector<2x32xf32>
    %555 = arith.divf %553, %554 : vector<2x32xf32>
    %556 = vector.extract_strided_slice %536 {offsets = [0, 64], sizes = [2, 32], strides = [1, 1]} : vector<2x96xf32> to vector<2x32xf32>
    %557 = vector.extract_strided_slice %539 {offsets = [0, 64], sizes = [2, 32], strides = [1, 1]} : vector<2x96xf32> to vector<2x32xf32>
    %558 = arith.mulf %547, %557 : vector<2x32xf32>
    %559 = arith.addf %556, %558 : vector<2x32xf32>
    %560 = math.tanh %559 : vector<2x32xf32>
    %cst_110 = arith.constant 1.000000e+00 : f32
    %561 = vector.broadcast %cst_110 : f32 to vector<2x32xf32>
    %562 = arith.subf %561, %555 : vector<2x32xf32>
    %563 = arith.mulf %562, %560 : vector<2x32xf32>
    %564 = arith.mulf %555, %497 : vector<2x32xf32>
    %565 = arith.addf %563, %564 : vector<2x32xf32>
    %c0_111 = arith.constant 0 : index
    %c7_112 = arith.constant 7 : index
    %c0_113 = arith.constant 0 : index
    %566 = vector.load %arg5[%c0_111, %c7_112, %c0_113] : memref<2x8x64xf32, #tpu.memory_space<vmem>>, vector<2x1x32xf32>
    %567 = vector.shape_cast %566 : vector<2x1x32xf32> to vector<2x32xf32>
    %568 = vector.shape_cast %534 : vector<2x32xf32> to vector<2x1x32xf32>
    tpu.vector_store %arg5[%c0_111, %c7_112, %c0_113], %568 {strides = array<i32>} : memref<2x8x64xf32, #tpu.memory_space<vmem>>, vector<2x1x32xf32>,
    %c0_114 = arith.constant 0 : index
    %c0_115 = arith.constant 0 : index
    %c32_116 = arith.constant 32 : index
    %569 = vector.load %arg5[%c0_114, %c0_115, %c32_116] : memref<2x8x64xf32, #tpu.memory_space<vmem>>, vector<2x1x32xf32>
    %570 = vector.shape_cast %569 : vector<2x1x32xf32> to vector<2x32xf32>
    %571 = vector.shape_cast %565 : vector<2x32xf32> to vector<2x1x32xf32>
    tpu.vector_store %arg5[%c0_114, %c0_115, %c32_116], %571 {strides = array<i32>} : memref<2x8x64xf32, #tpu.memory_space<vmem>>, vector<2x1x32xf32>,
    %c256 = arith.constant 256 : index
    %c0_117 = arith.constant 0 : index
    %572 = vector.load %arg2[%c256, %c0_117] : memref<992x128xf32, #tpu.memory_space<vmem>>, vector<2x96xf32>
    %573 = vector.extract_strided_slice %572 {offsets = [0, 0], sizes = [1, 96], strides = [1, 1]} : vector<2x96xf32> to vector<1x96xf32>
    %574 = vector.extract_strided_slice %572 {offsets = [1, 0], sizes = [1, 96], strides = [1, 1]} : vector<2x96xf32> to vector<1x96xf32>
    %c360 = arith.constant 360 : index
    %c0_118 = arith.constant 0 : index
    %575 = vector.load %arg2[%c360, %c0_118] : memref<992x128xf32, #tpu.memory_space<vmem>>, vector<2x96xf32>
    %576 = vector.extract_strided_slice %575 {offsets = [0, 0], sizes = [1, 96], strides = [1, 1]} : vector<2x96xf32> to vector<1x96xf32>
    %577 = vector.extract_strided_slice %575 {offsets = [1, 0], sizes = [1, 96], strides = [1, 1]} : vector<2x96xf32> to vector<1x96xf32>
    %c0_119 = arith.constant 0 : index
    %c0_120 = arith.constant 0 : index
    %c0_121 = arith.constant 0 : index
    %578 = vector.load %arg5[%c0_119, %c0_120, %c0_121] : memref<2x8x64xf32, #tpu.memory_space<vmem>>, vector<2x8x64xf32>
    %579 = vector.shape_cast %578 : vector<2x8x64xf32> to vector<16x64xf32>
    %c160 = arith.constant 160 : index
    %c0_122 = arith.constant 0 : index
    %580 = vector.load %arg2[%c160, %c0_122] : memref<992x128xf32, #tpu.memory_space<vmem>>, vector<64x96xf32>
    %cst_123 = arith.constant dense<0.000000e+00> : vector<16x96xf32>
    %581 = tpu.matmul %579, %580, %cst_123 {dimension_numbers = #tpu.dot_dimension_numbers<[1], [0], [0], [1], [0, 0, 1, 1], [], []>} : vector<16x64xf32>, vector<64x96xf32>, vector<16x96xf32> -> vector<16x96xf32>
    %582 = vector.broadcast %573 : vector<1x96xf32> to vector<16x96xf32>
    %583 = arith.addf %581, %582 : vector<16x96xf32>
    %584 = vector.shape_cast %583 : vector<16x96xf32> to vector<2x8x96xf32>
    %c264 = arith.constant 264 : index
    %c0_124 = arith.constant 0 : index
    %585 = vector.load %arg2[%c264, %c0_124] : memref<992x128xf32, #tpu.memory_space<vmem>>, vector<64x96xf32>
    %cst_125 = arith.constant dense<0.000000e+00> : vector<16x96xf32>
    %586 = tpu.matmul %579, %585, %cst_125 {dimension_numbers = #tpu.dot_dimension_numbers<[1], [0], [0], [1], [0, 0, 1, 1], [], []>} : vector<16x64xf32>, vector<64x96xf32>, vector<16x96xf32> -> vector<16x96xf32>
    %587 = vector.broadcast %576 : vector<1x96xf32> to vector<16x96xf32>
    %588 = arith.addf %586, %587 : vector<16x96xf32>
    %589 = vector.shape_cast %588 : vector<16x96xf32> to vector<2x8x96xf32>
    %c224 = arith.constant 224 : index
    %c0_126 = arith.constant 0 : index
    %590 = vector.load %arg2[%c224, %c0_126] : memref<992x128xf32, #tpu.memory_space<vmem>>, vector<32x96xf32>
    %c328 = arith.constant 328 : index
    %c0_127 = arith.constant 0 : index
    %591 = vector.load %arg2[%c328, %c0_127] : memref<992x128xf32, #tpu.memory_space<vmem>>, vector<32x96xf32>
    %592 = vector.extract_strided_slice %584 {offsets = [0, 0, 0], sizes = [2, 1, 96], strides = [1, 1, 1]} : vector<2x8x96xf32> to vector<2x1x96xf32>
    %593 = vector.shape_cast %592 : vector<2x1x96xf32> to vector<2x96xf32>
    %cst_128 = arith.constant dense<0.000000e+00> : vector<2x96xf32>
    %594 = tpu.matmul %27, %590, %cst_128 {dimension_numbers = #tpu.dot_dimension_numbers<[1], [0], [0], [1], [0, 0, 1, 1], [], []>} : vector<2x32xf32>, vector<32x96xf32>, vector<2x96xf32> -> vector<2x96xf32>
    %595 = vector.broadcast %574 : vector<1x96xf32> to vector<2x96xf32>
    %596 = arith.addf %594, %595 : vector<2x96xf32>
    %597 = vector.extract_strided_slice %593 {offsets = [0, 0], sizes = [2, 32], strides = [1, 1]} : vector<2x96xf32> to vector<2x32xf32>
    %598 = vector.extract_strided_slice %596 {offsets = [0, 0], sizes = [2, 32], strides = [1, 1]} : vector<2x96xf32> to vector<2x32xf32>
    %599 = arith.addf %597, %598 : vector<2x32xf32>
    %600 = arith.negf %599 : vector<2x32xf32>
    %601 = math.exp %600 : vector<2x32xf32>
    %cst_129 = arith.constant 1.000000e+00 : f32
    %602 = vector.broadcast %cst_129 : f32 to vector<2x32xf32>
    %603 = arith.addf %602, %601 : vector<2x32xf32>
    %604 = arith.divf %602, %603 : vector<2x32xf32>
    %605 = vector.extract_strided_slice %593 {offsets = [0, 32], sizes = [2, 32], strides = [1, 1]} : vector<2x96xf32> to vector<2x32xf32>
    %606 = vector.extract_strided_slice %596 {offsets = [0, 32], sizes = [2, 32], strides = [1, 1]} : vector<2x96xf32> to vector<2x32xf32>
    %607 = arith.addf %605, %606 : vector<2x32xf32>
    %608 = arith.negf %607 : vector<2x32xf32>
    %609 = math.exp %608 : vector<2x32xf32>
    %cst_130 = arith.constant 1.000000e+00 : f32
    %610 = vector.broadcast %cst_130 : f32 to vector<2x32xf32>
    %611 = arith.addf %610, %609 : vector<2x32xf32>
    %612 = arith.divf %610, %611 : vector<2x32xf32>
    %613 = vector.extract_strided_slice %593 {offsets = [0, 64], sizes = [2, 32], strides = [1, 1]} : vector<2x96xf32> to vector<2x32xf32>
    %614 = vector.extract_strided_slice %596 {offsets = [0, 64], sizes = [2, 32], strides = [1, 1]} : vector<2x96xf32> to vector<2x32xf32>
    %615 = arith.mulf %604, %614 : vector<2x32xf32>
    %616 = arith.addf %613, %615 : vector<2x32xf32>
    %617 = math.tanh %616 : vector<2x32xf32>
    %cst_131 = arith.constant 1.000000e+00 : f32
    %618 = vector.broadcast %cst_131 : f32 to vector<2x32xf32>
    %619 = arith.subf %618, %612 : vector<2x32xf32>
    %620 = arith.mulf %619, %617 : vector<2x32xf32>
    %621 = arith.mulf %612, %27 : vector<2x32xf32>
    %622 = arith.addf %620, %621 : vector<2x32xf32>
    %623 = vector.extract_strided_slice %589 {offsets = [0, 7, 0], sizes = [2, 1, 96], strides = [1, 1, 1]} : vector<2x8x96xf32> to vector<2x1x96xf32>
    %624 = vector.shape_cast %623 : vector<2x1x96xf32> to vector<2x96xf32>
    %cst_132 = arith.constant dense<0.000000e+00> : vector<2x96xf32>
    %625 = tpu.matmul %27, %591, %cst_132 {dimension_numbers = #tpu.dot_dimension_numbers<[1], [0], [0], [1], [0, 0, 1, 1], [], []>} : vector<2x32xf32>, vector<32x96xf32>, vector<2x96xf32> -> vector<2x96xf32>
    %626 = vector.broadcast %577 : vector<1x96xf32> to vector<2x96xf32>
    %627 = arith.addf %625, %626 : vector<2x96xf32>
    %628 = vector.extract_strided_slice %624 {offsets = [0, 0], sizes = [2, 32], strides = [1, 1]} : vector<2x96xf32> to vector<2x32xf32>
    %629 = vector.extract_strided_slice %627 {offsets = [0, 0], sizes = [2, 32], strides = [1, 1]} : vector<2x96xf32> to vector<2x32xf32>
    %630 = arith.addf %628, %629 : vector<2x32xf32>
    %631 = arith.negf %630 : vector<2x32xf32>
    %632 = math.exp %631 : vector<2x32xf32>
    %cst_133 = arith.constant 1.000000e+00 : f32
    %633 = vector.broadcast %cst_133 : f32 to vector<2x32xf32>
    %634 = arith.addf %633, %632 : vector<2x32xf32>
    %635 = arith.divf %633, %634 : vector<2x32xf32>
    %636 = vector.extract_strided_slice %624 {offsets = [0, 32], sizes = [2, 32], strides = [1, 1]} : vector<2x96xf32> to vector<2x32xf32>
    %637 = vector.extract_strided_slice %627 {offsets = [0, 32], sizes = [2, 32], strides = [1, 1]} : vector<2x96xf32> to vector<2x32xf32>
    %638 = arith.addf %636, %637 : vector<2x32xf32>
    %639 = arith.negf %638 : vector<2x32xf32>
    %640 = math.exp %639 : vector<2x32xf32>
    %cst_134 = arith.constant 1.000000e+00 : f32
    %641 = vector.broadcast %cst_134 : f32 to vector<2x32xf32>
    %642 = arith.addf %641, %640 : vector<2x32xf32>
    %643 = arith.divf %641, %642 : vector<2x32xf32>
    %644 = vector.extract_strided_slice %624 {offsets = [0, 64], sizes = [2, 32], strides = [1, 1]} : vector<2x96xf32> to vector<2x32xf32>
    %645 = vector.extract_strided_slice %627 {offsets = [0, 64], sizes = [2, 32], strides = [1, 1]} : vector<2x96xf32> to vector<2x32xf32>
    %646 = arith.mulf %635, %645 : vector<2x32xf32>
    %647 = arith.addf %644, %646 : vector<2x32xf32>
    %648 = math.tanh %647 : vector<2x32xf32>
    %cst_135 = arith.constant 1.000000e+00 : f32
    %649 = vector.broadcast %cst_135 : f32 to vector<2x32xf32>
    %650 = arith.subf %649, %643 : vector<2x32xf32>
    %651 = arith.mulf %650, %648 : vector<2x32xf32>
    %652 = arith.mulf %643, %27 : vector<2x32xf32>
    %653 = arith.addf %651, %652 : vector<2x32xf32>
    %654 = vector.extract_strided_slice %584 {offsets = [0, 1, 0], sizes = [2, 1, 96], strides = [1, 1, 1]} : vector<2x8x96xf32> to vector<2x1x96xf32>
    %655 = vector.shape_cast %654 : vector<2x1x96xf32> to vector<2x96xf32>
    %cst_136 = arith.constant dense<0.000000e+00> : vector<2x96xf32>
    %656 = tpu.matmul %622, %590, %cst_136 {dimension_numbers = #tpu.dot_dimension_numbers<[1], [0], [0], [1], [0, 0, 1, 1], [], []>} : vector<2x32xf32>, vector<32x96xf32>, vector<2x96xf32> -> vector<2x96xf32>
    %657 = vector.broadcast %574 : vector<1x96xf32> to vector<2x96xf32>
    %658 = arith.addf %656, %657 : vector<2x96xf32>
    %659 = vector.extract_strided_slice %655 {offsets = [0, 0], sizes = [2, 32], strides = [1, 1]} : vector<2x96xf32> to vector<2x32xf32>
    %660 = vector.extract_strided_slice %658 {offsets = [0, 0], sizes = [2, 32], strides = [1, 1]} : vector<2x96xf32> to vector<2x32xf32>
    %661 = arith.addf %659, %660 : vector<2x32xf32>
    %662 = arith.negf %661 : vector<2x32xf32>
    %663 = math.exp %662 : vector<2x32xf32>
    %cst_137 = arith.constant 1.000000e+00 : f32
    %664 = vector.broadcast %cst_137 : f32 to vector<2x32xf32>
    %665 = arith.addf %664, %663 : vector<2x32xf32>
    %666 = arith.divf %664, %665 : vector<2x32xf32>
    %667 = vector.extract_strided_slice %655 {offsets = [0, 32], sizes = [2, 32], strides = [1, 1]} : vector<2x96xf32> to vector<2x32xf32>
    %668 = vector.extract_strided_slice %658 {offsets = [0, 32], sizes = [2, 32], strides = [1, 1]} : vector<2x96xf32> to vector<2x32xf32>
    %669 = arith.addf %667, %668 : vector<2x32xf32>
    %670 = arith.negf %669 : vector<2x32xf32>
    %671 = math.exp %670 : vector<2x32xf32>
    %cst_138 = arith.constant 1.000000e+00 : f32
    %672 = vector.broadcast %cst_138 : f32 to vector<2x32xf32>
    %673 = arith.addf %672, %671 : vector<2x32xf32>
    %674 = arith.divf %672, %673 : vector<2x32xf32>
    %675 = vector.extract_strided_slice %655 {offsets = [0, 64], sizes = [2, 32], strides = [1, 1]} : vector<2x96xf32> to vector<2x32xf32>
    %676 = vector.extract_strided_slice %658 {offsets = [0, 64], sizes = [2, 32], strides = [1, 1]} : vector<2x96xf32> to vector<2x32xf32>
    %677 = arith.mulf %666, %676 : vector<2x32xf32>
    %678 = arith.addf %675, %677 : vector<2x32xf32>
    %679 = math.tanh %678 : vector<2x32xf32>
    %cst_139 = arith.constant 1.000000e+00 : f32
    %680 = vector.broadcast %cst_139 : f32 to vector<2x32xf32>
    %681 = arith.subf %680, %674 : vector<2x32xf32>
    %682 = arith.mulf %681, %679 : vector<2x32xf32>
    %683 = arith.mulf %674, %622 : vector<2x32xf32>
    %684 = arith.addf %682, %683 : vector<2x32xf32>
    %685 = vector.extract_strided_slice %589 {offsets = [0, 6, 0], sizes = [2, 1, 96], strides = [1, 1, 1]} : vector<2x8x96xf32> to vector<2x1x96xf32>
    %686 = vector.shape_cast %685 : vector<2x1x96xf32> to vector<2x96xf32>
    %cst_140 = arith.constant dense<0.000000e+00> : vector<2x96xf32>
    %687 = tpu.matmul %653, %591, %cst_140 {dimension_numbers = #tpu.dot_dimension_numbers<[1], [0], [0], [1], [0, 0, 1, 1], [], []>} : vector<2x32xf32>, vector<32x96xf32>, vector<2x96xf32> -> vector<2x96xf32>
    %688 = vector.broadcast %577 : vector<1x96xf32> to vector<2x96xf32>
    %689 = arith.addf %687, %688 : vector<2x96xf32>
    %690 = vector.extract_strided_slice %686 {offsets = [0, 0], sizes = [2, 32], strides = [1, 1]} : vector<2x96xf32> to vector<2x32xf32>
    %691 = vector.extract_strided_slice %689 {offsets = [0, 0], sizes = [2, 32], strides = [1, 1]} : vector<2x96xf32> to vector<2x32xf32>
    %692 = arith.addf %690, %691 : vector<2x32xf32>
    %693 = arith.negf %692 : vector<2x32xf32>
    %694 = math.exp %693 : vector<2x32xf32>
    %cst_141 = arith.constant 1.000000e+00 : f32
    %695 = vector.broadcast %cst_141 : f32 to vector<2x32xf32>
    %696 = arith.addf %695, %694 : vector<2x32xf32>
    %697 = arith.divf %695, %696 : vector<2x32xf32>
    %698 = vector.extract_strided_slice %686 {offsets = [0, 32], sizes = [2, 32], strides = [1, 1]} : vector<2x96xf32> to vector<2x32xf32>
    %699 = vector.extract_strided_slice %689 {offsets = [0, 32], sizes = [2, 32], strides = [1, 1]} : vector<2x96xf32> to vector<2x32xf32>
    %700 = arith.addf %698, %699 : vector<2x32xf32>
    %701 = arith.negf %700 : vector<2x32xf32>
    %702 = math.exp %701 : vector<2x32xf32>
    %cst_142 = arith.constant 1.000000e+00 : f32
    %703 = vector.broadcast %cst_142 : f32 to vector<2x32xf32>
    %704 = arith.addf %703, %702 : vector<2x32xf32>
    %705 = arith.divf %703, %704 : vector<2x32xf32>
    %706 = vector.extract_strided_slice %686 {offsets = [0, 64], sizes = [2, 32], strides = [1, 1]} : vector<2x96xf32> to vector<2x32xf32>
    %707 = vector.extract_strided_slice %689 {offsets = [0, 64], sizes = [2, 32], strides = [1, 1]} : vector<2x96xf32> to vector<2x32xf32>
    %708 = arith.mulf %697, %707 : vector<2x32xf32>
    %709 = arith.addf %706, %708 : vector<2x32xf32>
    %710 = math.tanh %709 : vector<2x32xf32>
    %cst_143 = arith.constant 1.000000e+00 : f32
    %711 = vector.broadcast %cst_143 : f32 to vector<2x32xf32>
    %712 = arith.subf %711, %705 : vector<2x32xf32>
    %713 = arith.mulf %712, %710 : vector<2x32xf32>
    %714 = arith.mulf %705, %653 : vector<2x32xf32>
    %715 = arith.addf %713, %714 : vector<2x32xf32>
    %716 = vector.extract_strided_slice %584 {offsets = [0, 2, 0], sizes = [2, 1, 96], strides = [1, 1, 1]} : vector<2x8x96xf32> to vector<2x1x96xf32>
    %717 = vector.shape_cast %716 : vector<2x1x96xf32> to vector<2x96xf32>
    %cst_144 = arith.constant dense<0.000000e+00> : vector<2x96xf32>
    %718 = tpu.matmul %684, %590, %cst_144 {dimension_numbers = #tpu.dot_dimension_numbers<[1], [0], [0], [1], [0, 0, 1, 1], [], []>} : vector<2x32xf32>, vector<32x96xf32>, vector<2x96xf32> -> vector<2x96xf32>
    %719 = vector.broadcast %574 : vector<1x96xf32> to vector<2x96xf32>
    %720 = arith.addf %718, %719 : vector<2x96xf32>
    %721 = vector.extract_strided_slice %717 {offsets = [0, 0], sizes = [2, 32], strides = [1, 1]} : vector<2x96xf32> to vector<2x32xf32>
    %722 = vector.extract_strided_slice %720 {offsets = [0, 0], sizes = [2, 32], strides = [1, 1]} : vector<2x96xf32> to vector<2x32xf32>
    %723 = arith.addf %721, %722 : vector<2x32xf32>
    %724 = arith.negf %723 : vector<2x32xf32>
    %725 = math.exp %724 : vector<2x32xf32>
    %cst_145 = arith.constant 1.000000e+00 : f32
    %726 = vector.broadcast %cst_145 : f32 to vector<2x32xf32>
    %727 = arith.addf %726, %725 : vector<2x32xf32>
    %728 = arith.divf %726, %727 : vector<2x32xf32>
    %729 = vector.extract_strided_slice %717 {offsets = [0, 32], sizes = [2, 32], strides = [1, 1]} : vector<2x96xf32> to vector<2x32xf32>
    %730 = vector.extract_strided_slice %720 {offsets = [0, 32], sizes = [2, 32], strides = [1, 1]} : vector<2x96xf32> to vector<2x32xf32>
    %731 = arith.addf %729, %730 : vector<2x32xf32>
    %732 = arith.negf %731 : vector<2x32xf32>
    %733 = math.exp %732 : vector<2x32xf32>
    %cst_146 = arith.constant 1.000000e+00 : f32
    %734 = vector.broadcast %cst_146 : f32 to vector<2x32xf32>
    %735 = arith.addf %734, %733 : vector<2x32xf32>
    %736 = arith.divf %734, %735 : vector<2x32xf32>
    %737 = vector.extract_strided_slice %717 {offsets = [0, 64], sizes = [2, 32], strides = [1, 1]} : vector<2x96xf32> to vector<2x32xf32>
    %738 = vector.extract_strided_slice %720 {offsets = [0, 64], sizes = [2, 32], strides = [1, 1]} : vector<2x96xf32> to vector<2x32xf32>
    %739 = arith.mulf %728, %738 : vector<2x32xf32>
    %740 = arith.addf %737, %739 : vector<2x32xf32>
    %741 = math.tanh %740 : vector<2x32xf32>
    %cst_147 = arith.constant 1.000000e+00 : f32
    %742 = vector.broadcast %cst_147 : f32 to vector<2x32xf32>
    %743 = arith.subf %742, %736 : vector<2x32xf32>
    %744 = arith.mulf %743, %741 : vector<2x32xf32>
    %745 = arith.mulf %736, %684 : vector<2x32xf32>
    %746 = arith.addf %744, %745 : vector<2x32xf32>
    %747 = vector.extract_strided_slice %589 {offsets = [0, 5, 0], sizes = [2, 1, 96], strides = [1, 1, 1]} : vector<2x8x96xf32> to vector<2x1x96xf32>
    %748 = vector.shape_cast %747 : vector<2x1x96xf32> to vector<2x96xf32>
    %cst_148 = arith.constant dense<0.000000e+00> : vector<2x96xf32>
    %749 = tpu.matmul %715, %591, %cst_148 {dimension_numbers = #tpu.dot_dimension_numbers<[1], [0], [0], [1], [0, 0, 1, 1], [], []>} : vector<2x32xf32>, vector<32x96xf32>, vector<2x96xf32> -> vector<2x96xf32>
    %750 = vector.broadcast %577 : vector<1x96xf32> to vector<2x96xf32>
    %751 = arith.addf %749, %750 : vector<2x96xf32>
    %752 = vector.extract_strided_slice %748 {offsets = [0, 0], sizes = [2, 32], strides = [1, 1]} : vector<2x96xf32> to vector<2x32xf32>
    %753 = vector.extract_strided_slice %751 {offsets = [0, 0], sizes = [2, 32], strides = [1, 1]} : vector<2x96xf32> to vector<2x32xf32>
    %754 = arith.addf %752, %753 : vector<2x32xf32>
    %755 = arith.negf %754 : vector<2x32xf32>
    %756 = math.exp %755 : vector<2x32xf32>
    %cst_149 = arith.constant 1.000000e+00 : f32
    %757 = vector.broadcast %cst_149 : f32 to vector<2x32xf32>
    %758 = arith.addf %757, %756 : vector<2x32xf32>
    %759 = arith.divf %757, %758 : vector<2x32xf32>
    %760 = vector.extract_strided_slice %748 {offsets = [0, 32], sizes = [2, 32], strides = [1, 1]} : vector<2x96xf32> to vector<2x32xf32>
    %761 = vector.extract_strided_slice %751 {offsets = [0, 32], sizes = [2, 32], strides = [1, 1]} : vector<2x96xf32> to vector<2x32xf32>
    %762 = arith.addf %760, %761 : vector<2x32xf32>
    %763 = arith.negf %762 : vector<2x32xf32>
    %764 = math.exp %763 : vector<2x32xf32>
    %cst_150 = arith.constant 1.000000e+00 : f32
    %765 = vector.broadcast %cst_150 : f32 to vector<2x32xf32>
    %766 = arith.addf %765, %764 : vector<2x32xf32>
    %767 = arith.divf %765, %766 : vector<2x32xf32>
    %768 = vector.extract_strided_slice %748 {offsets = [0, 64], sizes = [2, 32], strides = [1, 1]} : vector<2x96xf32> to vector<2x32xf32>
    %769 = vector.extract_strided_slice %751 {offsets = [0, 64], sizes = [2, 32], strides = [1, 1]} : vector<2x96xf32> to vector<2x32xf32>
    %770 = arith.mulf %759, %769 : vector<2x32xf32>
    %771 = arith.addf %768, %770 : vector<2x32xf32>
    %772 = math.tanh %771 : vector<2x32xf32>
    %cst_151 = arith.constant 1.000000e+00 : f32
    %773 = vector.broadcast %cst_151 : f32 to vector<2x32xf32>
    %774 = arith.subf %773, %767 : vector<2x32xf32>
    %775 = arith.mulf %774, %772 : vector<2x32xf32>
    %776 = arith.mulf %767, %715 : vector<2x32xf32>
    %777 = arith.addf %775, %776 : vector<2x32xf32>
    %778 = vector.extract_strided_slice %584 {offsets = [0, 3, 0], sizes = [2, 1, 96], strides = [1, 1, 1]} : vector<2x8x96xf32> to vector<2x1x96xf32>
    %779 = vector.shape_cast %778 : vector<2x1x96xf32> to vector<2x96xf32>
    %cst_152 = arith.constant dense<0.000000e+00> : vector<2x96xf32>
    %780 = tpu.matmul %746, %590, %cst_152 {dimension_numbers = #tpu.dot_dimension_numbers<[1], [0], [0], [1], [0, 0, 1, 1], [], []>} : vector<2x32xf32>, vector<32x96xf32>, vector<2x96xf32> -> vector<2x96xf32>
    %781 = vector.broadcast %574 : vector<1x96xf32> to vector<2x96xf32>
    %782 = arith.addf %780, %781 : vector<2x96xf32>
    %783 = vector.extract_strided_slice %779 {offsets = [0, 0], sizes = [2, 32], strides = [1, 1]} : vector<2x96xf32> to vector<2x32xf32>
    %784 = vector.extract_strided_slice %782 {offsets = [0, 0], sizes = [2, 32], strides = [1, 1]} : vector<2x96xf32> to vector<2x32xf32>
    %785 = arith.addf %783, %784 : vector<2x32xf32>
    %786 = arith.negf %785 : vector<2x32xf32>
    %787 = math.exp %786 : vector<2x32xf32>
    %cst_153 = arith.constant 1.000000e+00 : f32
    %788 = vector.broadcast %cst_153 : f32 to vector<2x32xf32>
    %789 = arith.addf %788, %787 : vector<2x32xf32>
    %790 = arith.divf %788, %789 : vector<2x32xf32>
    %791 = vector.extract_strided_slice %779 {offsets = [0, 32], sizes = [2, 32], strides = [1, 1]} : vector<2x96xf32> to vector<2x32xf32>
    %792 = vector.extract_strided_slice %782 {offsets = [0, 32], sizes = [2, 32], strides = [1, 1]} : vector<2x96xf32> to vector<2x32xf32>
    %793 = arith.addf %791, %792 : vector<2x32xf32>
    %794 = arith.negf %793 : vector<2x32xf32>
    %795 = math.exp %794 : vector<2x32xf32>
    %cst_154 = arith.constant 1.000000e+00 : f32
    %796 = vector.broadcast %cst_154 : f32 to vector<2x32xf32>
    %797 = arith.addf %796, %795 : vector<2x32xf32>
    %798 = arith.divf %796, %797 : vector<2x32xf32>
    %799 = vector.extract_strided_slice %779 {offsets = [0, 64], sizes = [2, 32], strides = [1, 1]} : vector<2x96xf32> to vector<2x32xf32>
    %800 = vector.extract_strided_slice %782 {offsets = [0, 64], sizes = [2, 32], strides = [1, 1]} : vector<2x96xf32> to vector<2x32xf32>
    %801 = arith.mulf %790, %800 : vector<2x32xf32>
    %802 = arith.addf %799, %801 : vector<2x32xf32>
    %803 = math.tanh %802 : vector<2x32xf32>
    %cst_155 = arith.constant 1.000000e+00 : f32
    %804 = vector.broadcast %cst_155 : f32 to vector<2x32xf32>
    %805 = arith.subf %804, %798 : vector<2x32xf32>
    %806 = arith.mulf %805, %803 : vector<2x32xf32>
    %807 = arith.mulf %798, %746 : vector<2x32xf32>
    %808 = arith.addf %806, %807 : vector<2x32xf32>
    %809 = vector.extract_strided_slice %589 {offsets = [0, 4, 0], sizes = [2, 1, 96], strides = [1, 1, 1]} : vector<2x8x96xf32> to vector<2x1x96xf32>
    %810 = vector.shape_cast %809 : vector<2x1x96xf32> to vector<2x96xf32>
    %cst_156 = arith.constant dense<0.000000e+00> : vector<2x96xf32>
    %811 = tpu.matmul %777, %591, %cst_156 {dimension_numbers = #tpu.dot_dimension_numbers<[1], [0], [0], [1], [0, 0, 1, 1], [], []>} : vector<2x32xf32>, vector<32x96xf32>, vector<2x96xf32> -> vector<2x96xf32>
    %812 = vector.broadcast %577 : vector<1x96xf32> to vector<2x96xf32>
    %813 = arith.addf %811, %812 : vector<2x96xf32>
    %814 = vector.extract_strided_slice %810 {offsets = [0, 0], sizes = [2, 32], strides = [1, 1]} : vector<2x96xf32> to vector<2x32xf32>
    %815 = vector.extract_strided_slice %813 {offsets = [0, 0], sizes = [2, 32], strides = [1, 1]} : vector<2x96xf32> to vector<2x32xf32>
    %816 = arith.addf %814, %815 : vector<2x32xf32>
    %817 = arith.negf %816 : vector<2x32xf32>
    %818 = math.exp %817 : vector<2x32xf32>
    %cst_157 = arith.constant 1.000000e+00 : f32
    %819 = vector.broadcast %cst_157 : f32 to vector<2x32xf32>
    %820 = arith.addf %819, %818 : vector<2x32xf32>
    %821 = arith.divf %819, %820 : vector<2x32xf32>
    %822 = vector.extract_strided_slice %810 {offsets = [0, 32], sizes = [2, 32], strides = [1, 1]} : vector<2x96xf32> to vector<2x32xf32>
    %823 = vector.extract_strided_slice %813 {offsets = [0, 32], sizes = [2, 32], strides = [1, 1]} : vector<2x96xf32> to vector<2x32xf32>
    %824 = arith.addf %822, %823 : vector<2x32xf32>
    %825 = arith.negf %824 : vector<2x32xf32>
    %826 = math.exp %825 : vector<2x32xf32>
    %cst_158 = arith.constant 1.000000e+00 : f32
    %827 = vector.broadcast %cst_158 : f32 to vector<2x32xf32>
    %828 = arith.addf %827, %826 : vector<2x32xf32>
    %829 = arith.divf %827, %828 : vector<2x32xf32>
    %830 = vector.extract_strided_slice %810 {offsets = [0, 64], sizes = [2, 32], strides = [1, 1]} : vector<2x96xf32> to vector<2x32xf32>
    %831 = vector.extract_strided_slice %813 {offsets = [0, 64], sizes = [2, 32], strides = [1, 1]} : vector<2x96xf32> to vector<2x32xf32>
    %832 = arith.mulf %821, %831 : vector<2x32xf32>
    %833 = arith.addf %830, %832 : vector<2x32xf32>
    %834 = math.tanh %833 : vector<2x32xf32>
    %cst_159 = arith.constant 1.000000e+00 : f32
    %835 = vector.broadcast %cst_159 : f32 to vector<2x32xf32>
    %836 = arith.subf %835, %829 : vector<2x32xf32>
    %837 = arith.mulf %836, %834 : vector<2x32xf32>
    %838 = arith.mulf %829, %777 : vector<2x32xf32>
    %839 = arith.addf %837, %838 : vector<2x32xf32>
    %840 = vector.extract_strided_slice %584 {offsets = [0, 4, 0], sizes = [2, 1, 96], strides = [1, 1, 1]} : vector<2x8x96xf32> to vector<2x1x96xf32>
    %841 = vector.shape_cast %840 : vector<2x1x96xf32> to vector<2x96xf32>
    %cst_160 = arith.constant dense<0.000000e+00> : vector<2x96xf32>
    %842 = tpu.matmul %808, %590, %cst_160 {dimension_numbers = #tpu.dot_dimension_numbers<[1], [0], [0], [1], [0, 0, 1, 1], [], []>} : vector<2x32xf32>, vector<32x96xf32>, vector<2x96xf32> -> vector<2x96xf32>
    %843 = vector.broadcast %574 : vector<1x96xf32> to vector<2x96xf32>
    %844 = arith.addf %842, %843 : vector<2x96xf32>
    %845 = vector.extract_strided_slice %841 {offsets = [0, 0], sizes = [2, 32], strides = [1, 1]} : vector<2x96xf32> to vector<2x32xf32>
    %846 = vector.extract_strided_slice %844 {offsets = [0, 0], sizes = [2, 32], strides = [1, 1]} : vector<2x96xf32> to vector<2x32xf32>
    %847 = arith.addf %845, %846 : vector<2x32xf32>
    %848 = arith.negf %847 : vector<2x32xf32>
    %849 = math.exp %848 : vector<2x32xf32>
    %cst_161 = arith.constant 1.000000e+00 : f32
    %850 = vector.broadcast %cst_161 : f32 to vector<2x32xf32>
    %851 = arith.addf %850, %849 : vector<2x32xf32>
    %852 = arith.divf %850, %851 : vector<2x32xf32>
    %853 = vector.extract_strided_slice %841 {offsets = [0, 32], sizes = [2, 32], strides = [1, 1]} : vector<2x96xf32> to vector<2x32xf32>
    %854 = vector.extract_strided_slice %844 {offsets = [0, 32], sizes = [2, 32], strides = [1, 1]} : vector<2x96xf32> to vector<2x32xf32>
    %855 = arith.addf %853, %854 : vector<2x32xf32>
    %856 = arith.negf %855 : vector<2x32xf32>
    %857 = math.exp %856 : vector<2x32xf32>
    %cst_162 = arith.constant 1.000000e+00 : f32
    %858 = vector.broadcast %cst_162 : f32 to vector<2x32xf32>
    %859 = arith.addf %858, %857 : vector<2x32xf32>
    %860 = arith.divf %858, %859 : vector<2x32xf32>
    %861 = vector.extract_strided_slice %841 {offsets = [0, 64], sizes = [2, 32], strides = [1, 1]} : vector<2x96xf32> to vector<2x32xf32>
    %862 = vector.extract_strided_slice %844 {offsets = [0, 64], sizes = [2, 32], strides = [1, 1]} : vector<2x96xf32> to vector<2x32xf32>
    %863 = arith.mulf %852, %862 : vector<2x32xf32>
    %864 = arith.addf %861, %863 : vector<2x32xf32>
    %865 = math.tanh %864 : vector<2x32xf32>
    %cst_163 = arith.constant 1.000000e+00 : f32
    %866 = vector.broadcast %cst_163 : f32 to vector<2x32xf32>
    %867 = arith.subf %866, %860 : vector<2x32xf32>
    %868 = arith.mulf %867, %865 : vector<2x32xf32>
    %869 = arith.mulf %860, %808 : vector<2x32xf32>
    %870 = arith.addf %868, %869 : vector<2x32xf32>
    %871 = vector.extract_strided_slice %589 {offsets = [0, 3, 0], sizes = [2, 1, 96], strides = [1, 1, 1]} : vector<2x8x96xf32> to vector<2x1x96xf32>
    %872 = vector.shape_cast %871 : vector<2x1x96xf32> to vector<2x96xf32>
    %cst_164 = arith.constant dense<0.000000e+00> : vector<2x96xf32>
    %873 = tpu.matmul %839, %591, %cst_164 {dimension_numbers = #tpu.dot_dimension_numbers<[1], [0], [0], [1], [0, 0, 1, 1], [], []>} : vector<2x32xf32>, vector<32x96xf32>, vector<2x96xf32> -> vector<2x96xf32>
    %874 = vector.broadcast %577 : vector<1x96xf32> to vector<2x96xf32>
    %875 = arith.addf %873, %874 : vector<2x96xf32>
    %876 = vector.extract_strided_slice %872 {offsets = [0, 0], sizes = [2, 32], strides = [1, 1]} : vector<2x96xf32> to vector<2x32xf32>
    %877 = vector.extract_strided_slice %875 {offsets = [0, 0], sizes = [2, 32], strides = [1, 1]} : vector<2x96xf32> to vector<2x32xf32>
    %878 = arith.addf %876, %877 : vector<2x32xf32>
    %879 = arith.negf %878 : vector<2x32xf32>
    %880 = math.exp %879 : vector<2x32xf32>
    %cst_165 = arith.constant 1.000000e+00 : f32
    %881 = vector.broadcast %cst_165 : f32 to vector<2x32xf32>
    %882 = arith.addf %881, %880 : vector<2x32xf32>
    %883 = arith.divf %881, %882 : vector<2x32xf32>
    %884 = vector.extract_strided_slice %872 {offsets = [0, 32], sizes = [2, 32], strides = [1, 1]} : vector<2x96xf32> to vector<2x32xf32>
    %885 = vector.extract_strided_slice %875 {offsets = [0, 32], sizes = [2, 32], strides = [1, 1]} : vector<2x96xf32> to vector<2x32xf32>
    %886 = arith.addf %884, %885 : vector<2x32xf32>
    %887 = arith.negf %886 : vector<2x32xf32>
    %888 = math.exp %887 : vector<2x32xf32>
    %cst_166 = arith.constant 1.000000e+00 : f32
    %889 = vector.broadcast %cst_166 : f32 to vector<2x32xf32>
    %890 = arith.addf %889, %888 : vector<2x32xf32>
    %891 = arith.divf %889, %890 : vector<2x32xf32>
    %892 = vector.extract_strided_slice %872 {offsets = [0, 64], sizes = [2, 32], strides = [1, 1]} : vector<2x96xf32> to vector<2x32xf32>
    %893 = vector.extract_strided_slice %875 {offsets = [0, 64], sizes = [2, 32], strides = [1, 1]} : vector<2x96xf32> to vector<2x32xf32>
    %894 = arith.mulf %883, %893 : vector<2x32xf32>
    %895 = arith.addf %892, %894 : vector<2x32xf32>
    %896 = math.tanh %895 : vector<2x32xf32>
    %cst_167 = arith.constant 1.000000e+00 : f32
    %897 = vector.broadcast %cst_167 : f32 to vector<2x32xf32>
    %898 = arith.subf %897, %891 : vector<2x32xf32>
    %899 = arith.mulf %898, %896 : vector<2x32xf32>
    %900 = arith.mulf %891, %839 : vector<2x32xf32>
    %901 = arith.addf %899, %900 : vector<2x32xf32>
    %902 = vector.extract_strided_slice %584 {offsets = [0, 5, 0], sizes = [2, 1, 96], strides = [1, 1, 1]} : vector<2x8x96xf32> to vector<2x1x96xf32>
    %903 = vector.shape_cast %902 : vector<2x1x96xf32> to vector<2x96xf32>
    %cst_168 = arith.constant dense<0.000000e+00> : vector<2x96xf32>
    %904 = tpu.matmul %870, %590, %cst_168 {dimension_numbers = #tpu.dot_dimension_numbers<[1], [0], [0], [1], [0, 0, 1, 1], [], []>} : vector<2x32xf32>, vector<32x96xf32>, vector<2x96xf32> -> vector<2x96xf32>
    %905 = vector.broadcast %574 : vector<1x96xf32> to vector<2x96xf32>
    %906 = arith.addf %904, %905 : vector<2x96xf32>
    %907 = vector.extract_strided_slice %903 {offsets = [0, 0], sizes = [2, 32], strides = [1, 1]} : vector<2x96xf32> to vector<2x32xf32>
    %908 = vector.extract_strided_slice %906 {offsets = [0, 0], sizes = [2, 32], strides = [1, 1]} : vector<2x96xf32> to vector<2x32xf32>
    %909 = arith.addf %907, %908 : vector<2x32xf32>
    %910 = arith.negf %909 : vector<2x32xf32>
    %911 = math.exp %910 : vector<2x32xf32>
    %cst_169 = arith.constant 1.000000e+00 : f32
    %912 = vector.broadcast %cst_169 : f32 to vector<2x32xf32>
    %913 = arith.addf %912, %911 : vector<2x32xf32>
    %914 = arith.divf %912, %913 : vector<2x32xf32>
    %915 = vector.extract_strided_slice %903 {offsets = [0, 32], sizes = [2, 32], strides = [1, 1]} : vector<2x96xf32> to vector<2x32xf32>
    %916 = vector.extract_strided_slice %906 {offsets = [0, 32], sizes = [2, 32], strides = [1, 1]} : vector<2x96xf32> to vector<2x32xf32>
    %917 = arith.addf %915, %916 : vector<2x32xf32>
    %918 = arith.negf %917 : vector<2x32xf32>
    %919 = math.exp %918 : vector<2x32xf32>
    %cst_170 = arith.constant 1.000000e+00 : f32
    %920 = vector.broadcast %cst_170 : f32 to vector<2x32xf32>
    %921 = arith.addf %920, %919 : vector<2x32xf32>
    %922 = arith.divf %920, %921 : vector<2x32xf32>
    %923 = vector.extract_strided_slice %903 {offsets = [0, 64], sizes = [2, 32], strides = [1, 1]} : vector<2x96xf32> to vector<2x32xf32>
    %924 = vector.extract_strided_slice %906 {offsets = [0, 64], sizes = [2, 32], strides = [1, 1]} : vector<2x96xf32> to vector<2x32xf32>
    %925 = arith.mulf %914, %924 : vector<2x32xf32>
    %926 = arith.addf %923, %925 : vector<2x32xf32>
    %927 = math.tanh %926 : vector<2x32xf32>
    %cst_171 = arith.constant 1.000000e+00 : f32
    %928 = vector.broadcast %cst_171 : f32 to vector<2x32xf32>
    %929 = arith.subf %928, %922 : vector<2x32xf32>
    %930 = arith.mulf %929, %927 : vector<2x32xf32>
    %931 = arith.mulf %922, %870 : vector<2x32xf32>
    %932 = arith.addf %930, %931 : vector<2x32xf32>
    %933 = vector.extract_strided_slice %589 {offsets = [0, 2, 0], sizes = [2, 1, 96], strides = [1, 1, 1]} : vector<2x8x96xf32> to vector<2x1x96xf32>
    %934 = vector.shape_cast %933 : vector<2x1x96xf32> to vector<2x96xf32>
    %cst_172 = arith.constant dense<0.000000e+00> : vector<2x96xf32>
    %935 = tpu.matmul %901, %591, %cst_172 {dimension_numbers = #tpu.dot_dimension_numbers<[1], [0], [0], [1], [0, 0, 1, 1], [], []>} : vector<2x32xf32>, vector<32x96xf32>, vector<2x96xf32> -> vector<2x96xf32>
    %936 = vector.broadcast %577 : vector<1x96xf32> to vector<2x96xf32>
    %937 = arith.addf %935, %936 : vector<2x96xf32>
    %938 = vector.extract_strided_slice %934 {offsets = [0, 0], sizes = [2, 32], strides = [1, 1]} : vector<2x96xf32> to vector<2x32xf32>
    %939 = vector.extract_strided_slice %937 {offsets = [0, 0], sizes = [2, 32], strides = [1, 1]} : vector<2x96xf32> to vector<2x32xf32>
    %940 = arith.addf %938, %939 : vector<2x32xf32>
    %941 = arith.negf %940 : vector<2x32xf32>
    %942 = math.exp %941 : vector<2x32xf32>
    %cst_173 = arith.constant 1.000000e+00 : f32
    %943 = vector.broadcast %cst_173 : f32 to vector<2x32xf32>
    %944 = arith.addf %943, %942 : vector<2x32xf32>
    %945 = arith.divf %943, %944 : vector<2x32xf32>
    %946 = vector.extract_strided_slice %934 {offsets = [0, 32], sizes = [2, 32], strides = [1, 1]} : vector<2x96xf32> to vector<2x32xf32>
    %947 = vector.extract_strided_slice %937 {offsets = [0, 32], sizes = [2, 32], strides = [1, 1]} : vector<2x96xf32> to vector<2x32xf32>
    %948 = arith.addf %946, %947 : vector<2x32xf32>
    %949 = arith.negf %948 : vector<2x32xf32>
    %950 = math.exp %949 : vector<2x32xf32>
    %cst_174 = arith.constant 1.000000e+00 : f32
    %951 = vector.broadcast %cst_174 : f32 to vector<2x32xf32>
    %952 = arith.addf %951, %950 : vector<2x32xf32>
    %953 = arith.divf %951, %952 : vector<2x32xf32>
    %954 = vector.extract_strided_slice %934 {offsets = [0, 64], sizes = [2, 32], strides = [1, 1]} : vector<2x96xf32> to vector<2x32xf32>
    %955 = vector.extract_strided_slice %937 {offsets = [0, 64], sizes = [2, 32], strides = [1, 1]} : vector<2x96xf32> to vector<2x32xf32>
    %956 = arith.mulf %945, %955 : vector<2x32xf32>
    %957 = arith.addf %954, %956 : vector<2x32xf32>
    %958 = math.tanh %957 : vector<2x32xf32>
    %cst_175 = arith.constant 1.000000e+00 : f32
    %959 = vector.broadcast %cst_175 : f32 to vector<2x32xf32>
    %960 = arith.subf %959, %953 : vector<2x32xf32>
    %961 = arith.mulf %960, %958 : vector<2x32xf32>
    %962 = arith.mulf %953, %901 : vector<2x32xf32>
    %963 = arith.addf %961, %962 : vector<2x32xf32>
    %964 = vector.extract_strided_slice %584 {offsets = [0, 6, 0], sizes = [2, 1, 96], strides = [1, 1, 1]} : vector<2x8x96xf32> to vector<2x1x96xf32>
    %965 = vector.shape_cast %964 : vector<2x1x96xf32> to vector<2x96xf32>
    %cst_176 = arith.constant dense<0.000000e+00> : vector<2x96xf32>
    %966 = tpu.matmul %932, %590, %cst_176 {dimension_numbers = #tpu.dot_dimension_numbers<[1], [0], [0], [1], [0, 0, 1, 1], [], []>} : vector<2x32xf32>, vector<32x96xf32>, vector<2x96xf32> -> vector<2x96xf32>
    %967 = vector.broadcast %574 : vector<1x96xf32> to vector<2x96xf32>
    %968 = arith.addf %966, %967 : vector<2x96xf32>
    %969 = vector.extract_strided_slice %965 {offsets = [0, 0], sizes = [2, 32], strides = [1, 1]} : vector<2x96xf32> to vector<2x32xf32>
    %970 = vector.extract_strided_slice %968 {offsets = [0, 0], sizes = [2, 32], strides = [1, 1]} : vector<2x96xf32> to vector<2x32xf32>
    %971 = arith.addf %969, %970 : vector<2x32xf32>
    %972 = arith.negf %971 : vector<2x32xf32>
    %973 = math.exp %972 : vector<2x32xf32>
    %cst_177 = arith.constant 1.000000e+00 : f32
    %974 = vector.broadcast %cst_177 : f32 to vector<2x32xf32>
    %975 = arith.addf %974, %973 : vector<2x32xf32>
    %976 = arith.divf %974, %975 : vector<2x32xf32>
    %977 = vector.extract_strided_slice %965 {offsets = [0, 32], sizes = [2, 32], strides = [1, 1]} : vector<2x96xf32> to vector<2x32xf32>
    %978 = vector.extract_strided_slice %968 {offsets = [0, 32], sizes = [2, 32], strides = [1, 1]} : vector<2x96xf32> to vector<2x32xf32>
    %979 = arith.addf %977, %978 : vector<2x32xf32>
    %980 = arith.negf %979 : vector<2x32xf32>
    %981 = math.exp %980 : vector<2x32xf32>
    %cst_178 = arith.constant 1.000000e+00 : f32
    %982 = vector.broadcast %cst_178 : f32 to vector<2x32xf32>
    %983 = arith.addf %982, %981 : vector<2x32xf32>
    %984 = arith.divf %982, %983 : vector<2x32xf32>
    %985 = vector.extract_strided_slice %965 {offsets = [0, 64], sizes = [2, 32], strides = [1, 1]} : vector<2x96xf32> to vector<2x32xf32>
    %986 = vector.extract_strided_slice %968 {offsets = [0, 64], sizes = [2, 32], strides = [1, 1]} : vector<2x96xf32> to vector<2x32xf32>
    %987 = arith.mulf %976, %986 : vector<2x32xf32>
    %988 = arith.addf %985, %987 : vector<2x32xf32>
    %989 = math.tanh %988 : vector<2x32xf32>
    %cst_179 = arith.constant 1.000000e+00 : f32
    %990 = vector.broadcast %cst_179 : f32 to vector<2x32xf32>
    %991 = arith.subf %990, %984 : vector<2x32xf32>
    %992 = arith.mulf %991, %989 : vector<2x32xf32>
    %993 = arith.mulf %984, %932 : vector<2x32xf32>
    %994 = arith.addf %992, %993 : vector<2x32xf32>
    %995 = vector.extract_strided_slice %589 {offsets = [0, 1, 0], sizes = [2, 1, 96], strides = [1, 1, 1]} : vector<2x8x96xf32> to vector<2x1x96xf32>
    %996 = vector.shape_cast %995 : vector<2x1x96xf32> to vector<2x96xf32>
    %cst_180 = arith.constant dense<0.000000e+00> : vector<2x96xf32>
    %997 = tpu.matmul %963, %591, %cst_180 {dimension_numbers = #tpu.dot_dimension_numbers<[1], [0], [0], [1], [0, 0, 1, 1], [], []>} : vector<2x32xf32>, vector<32x96xf32>, vector<2x96xf32> -> vector<2x96xf32>
    %998 = vector.broadcast %577 : vector<1x96xf32> to vector<2x96xf32>
    %999 = arith.addf %997, %998 : vector<2x96xf32>
    %1000 = vector.extract_strided_slice %996 {offsets = [0, 0], sizes = [2, 32], strides = [1, 1]} : vector<2x96xf32> to vector<2x32xf32>
    %1001 = vector.extract_strided_slice %999 {offsets = [0, 0], sizes = [2, 32], strides = [1, 1]} : vector<2x96xf32> to vector<2x32xf32>
    %1002 = arith.addf %1000, %1001 : vector<2x32xf32>
    %1003 = arith.negf %1002 : vector<2x32xf32>
    %1004 = math.exp %1003 : vector<2x32xf32>
    %cst_181 = arith.constant 1.000000e+00 : f32
    %1005 = vector.broadcast %cst_181 : f32 to vector<2x32xf32>
    %1006 = arith.addf %1005, %1004 : vector<2x32xf32>
    %1007 = arith.divf %1005, %1006 : vector<2x32xf32>
    %1008 = vector.extract_strided_slice %996 {offsets = [0, 32], sizes = [2, 32], strides = [1, 1]} : vector<2x96xf32> to vector<2x32xf32>
    %1009 = vector.extract_strided_slice %999 {offsets = [0, 32], sizes = [2, 32], strides = [1, 1]} : vector<2x96xf32> to vector<2x32xf32>
    %1010 = arith.addf %1008, %1009 : vector<2x32xf32>
    %1011 = arith.negf %1010 : vector<2x32xf32>
    %1012 = math.exp %1011 : vector<2x32xf32>
    %cst_182 = arith.constant 1.000000e+00 : f32
    %1013 = vector.broadcast %cst_182 : f32 to vector<2x32xf32>
    %1014 = arith.addf %1013, %1012 : vector<2x32xf32>
    %1015 = arith.divf %1013, %1014 : vector<2x32xf32>
    %1016 = vector.extract_strided_slice %996 {offsets = [0, 64], sizes = [2, 32], strides = [1, 1]} : vector<2x96xf32> to vector<2x32xf32>
    %1017 = vector.extract_strided_slice %999 {offsets = [0, 64], sizes = [2, 32], strides = [1, 1]} : vector<2x96xf32> to vector<2x32xf32>
    %1018 = arith.mulf %1007, %1017 : vector<2x32xf32>
    %1019 = arith.addf %1016, %1018 : vector<2x32xf32>
    %1020 = math.tanh %1019 : vector<2x32xf32>
    %cst_183 = arith.constant 1.000000e+00 : f32
    %1021 = vector.broadcast %cst_183 : f32 to vector<2x32xf32>
    %1022 = arith.subf %1021, %1015 : vector<2x32xf32>
    %1023 = arith.mulf %1022, %1020 : vector<2x32xf32>
    %1024 = arith.mulf %1015, %963 : vector<2x32xf32>
    %1025 = arith.addf %1023, %1024 : vector<2x32xf32>
    %1026 = vector.extract_strided_slice %584 {offsets = [0, 7, 0], sizes = [2, 1, 96], strides = [1, 1, 1]} : vector<2x8x96xf32> to vector<2x1x96xf32>
    %1027 = vector.shape_cast %1026 : vector<2x1x96xf32> to vector<2x96xf32>
    %cst_184 = arith.constant dense<0.000000e+00> : vector<2x96xf32>
    %1028 = tpu.matmul %994, %590, %cst_184 {dimension_numbers = #tpu.dot_dimension_numbers<[1], [0], [0], [1], [0, 0, 1, 1], [], []>} : vector<2x32xf32>, vector<32x96xf32>, vector<2x96xf32> -> vector<2x96xf32>
    %1029 = vector.broadcast %574 : vector<1x96xf32> to vector<2x96xf32>
    %1030 = arith.addf %1028, %1029 : vector<2x96xf32>
    %1031 = vector.extract_strided_slice %1027 {offsets = [0, 0], sizes = [2, 32], strides = [1, 1]} : vector<2x96xf32> to vector<2x32xf32>
    %1032 = vector.extract_strided_slice %1030 {offsets = [0, 0], sizes = [2, 32], strides = [1, 1]} : vector<2x96xf32> to vector<2x32xf32>
    %1033 = arith.addf %1031, %1032 : vector<2x32xf32>
    %1034 = arith.negf %1033 : vector<2x32xf32>
    %1035 = math.exp %1034 : vector<2x32xf32>
    %cst_185 = arith.constant 1.000000e+00 : f32
    %1036 = vector.broadcast %cst_185 : f32 to vector<2x32xf32>
    %1037 = arith.addf %1036, %1035 : vector<2x32xf32>
    %1038 = arith.divf %1036, %1037 : vector<2x32xf32>
    %1039 = vector.extract_strided_slice %1027 {offsets = [0, 32], sizes = [2, 32], strides = [1, 1]} : vector<2x96xf32> to vector<2x32xf32>
    %1040 = vector.extract_strided_slice %1030 {offsets = [0, 32], sizes = [2, 32], strides = [1, 1]} : vector<2x96xf32> to vector<2x32xf32>
    %1041 = arith.addf %1039, %1040 : vector<2x32xf32>
    %1042 = arith.negf %1041 : vector<2x32xf32>
    %1043 = math.exp %1042 : vector<2x32xf32>
    %cst_186 = arith.constant 1.000000e+00 : f32
    %1044 = vector.broadcast %cst_186 : f32 to vector<2x32xf32>
    %1045 = arith.addf %1044, %1043 : vector<2x32xf32>
    %1046 = arith.divf %1044, %1045 : vector<2x32xf32>
    %1047 = vector.extract_strided_slice %1027 {offsets = [0, 64], sizes = [2, 32], strides = [1, 1]} : vector<2x96xf32> to vector<2x32xf32>
    %1048 = vector.extract_strided_slice %1030 {offsets = [0, 64], sizes = [2, 32], strides = [1, 1]} : vector<2x96xf32> to vector<2x32xf32>
    %1049 = arith.mulf %1038, %1048 : vector<2x32xf32>
    %1050 = arith.addf %1047, %1049 : vector<2x32xf32>
    %1051 = math.tanh %1050 : vector<2x32xf32>
    %cst_187 = arith.constant 1.000000e+00 : f32
    %1052 = vector.broadcast %cst_187 : f32 to vector<2x32xf32>
    %1053 = arith.subf %1052, %1046 : vector<2x32xf32>
    %1054 = arith.mulf %1053, %1051 : vector<2x32xf32>
    %1055 = arith.mulf %1046, %994 : vector<2x32xf32>
    %1056 = arith.addf %1054, %1055 : vector<2x32xf32>
    %1057 = vector.extract_strided_slice %589 {offsets = [0, 0, 0], sizes = [2, 1, 96], strides = [1, 1, 1]} : vector<2x8x96xf32> to vector<2x1x96xf32>
    %1058 = vector.shape_cast %1057 : vector<2x1x96xf32> to vector<2x96xf32>
    %cst_188 = arith.constant dense<0.000000e+00> : vector<2x96xf32>
    %1059 = tpu.matmul %1025, %591, %cst_188 {dimension_numbers = #tpu.dot_dimension_numbers<[1], [0], [0], [1], [0, 0, 1, 1], [], []>} : vector<2x32xf32>, vector<32x96xf32>, vector<2x96xf32> -> vector<2x96xf32>
    %1060 = vector.broadcast %577 : vector<1x96xf32> to vector<2x96xf32>
    %1061 = arith.addf %1059, %1060 : vector<2x96xf32>
    %1062 = vector.extract_strided_slice %1058 {offsets = [0, 0], sizes = [2, 32], strides = [1, 1]} : vector<2x96xf32> to vector<2x32xf32>
    %1063 = vector.extract_strided_slice %1061 {offsets = [0, 0], sizes = [2, 32], strides = [1, 1]} : vector<2x96xf32> to vector<2x32xf32>
    %1064 = arith.addf %1062, %1063 : vector<2x32xf32>
    %1065 = arith.negf %1064 : vector<2x32xf32>
    %1066 = math.exp %1065 : vector<2x32xf32>
    %cst_189 = arith.constant 1.000000e+00 : f32
    %1067 = vector.broadcast %cst_189 : f32 to vector<2x32xf32>
    %1068 = arith.addf %1067, %1066 : vector<2x32xf32>
    %1069 = arith.divf %1067, %1068 : vector<2x32xf32>
    %1070 = vector.extract_strided_slice %1058 {offsets = [0, 32], sizes = [2, 32], strides = [1, 1]} : vector<2x96xf32> to vector<2x32xf32>
    %1071 = vector.extract_strided_slice %1061 {offsets = [0, 32], sizes = [2, 32], strides = [1, 1]} : vector<2x96xf32> to vector<2x32xf32>
    %1072 = arith.addf %1070, %1071 : vector<2x32xf32>
    %1073 = arith.negf %1072 : vector<2x32xf32>
    %1074 = math.exp %1073 : vector<2x32xf32>
    %cst_190 = arith.constant 1.000000e+00 : f32
    %1075 = vector.broadcast %cst_190 : f32 to vector<2x32xf32>
    %1076 = arith.addf %1075, %1074 : vector<2x32xf32>
    %1077 = arith.divf %1075, %1076 : vector<2x32xf32>
    %1078 = vector.extract_strided_slice %1058 {offsets = [0, 64], sizes = [2, 32], strides = [1, 1]} : vector<2x96xf32> to vector<2x32xf32>
    %1079 = vector.extract_strided_slice %1061 {offsets = [0, 64], sizes = [2, 32], strides = [1, 1]} : vector<2x96xf32> to vector<2x32xf32>
    %1080 = arith.mulf %1069, %1079 : vector<2x32xf32>
    %1081 = arith.addf %1078, %1080 : vector<2x32xf32>
    %1082 = math.tanh %1081 : vector<2x32xf32>
    %cst_191 = arith.constant 1.000000e+00 : f32
    %1083 = vector.broadcast %cst_191 : f32 to vector<2x32xf32>
    %1084 = arith.subf %1083, %1077 : vector<2x32xf32>
    %1085 = arith.mulf %1084, %1082 : vector<2x32xf32>
    %1086 = arith.mulf %1077, %1025 : vector<2x32xf32>
    %1087 = arith.addf %1085, %1086 : vector<2x32xf32>
    %1088 = tpu.concatenate %534, %565, %1056, %1087 in 1 : vector<2x32xf32>, vector<2x32xf32>, vector<2x32xf32>, vector<2x32xf32> -> vector<2x128xf32>
    %c368 = arith.constant 368 : index
    %c0_192 = arith.constant 0 : index
    %1089 = vector.load %arg2[%c368, %c0_192] : memref<992x128xf32, #tpu.memory_space<vmem>>, vector<128x128xf32>
    %cst_193 = arith.constant dense<0.000000e+00> : vector<2x128xf32>
    %1090 = tpu.matmul %1088, %1089, %cst_193 {dimension_numbers = #tpu.dot_dimension_numbers<[1], [0], [0], [1], [0, 0, 1, 1], [], []>} : vector<2x128xf32>, vector<128x128xf32>, vector<2x128xf32> -> vector<2x128xf32>
    %c496 = arith.constant 496 : index
    %c0_194 = arith.constant 0 : index
    %1091 = vector.load %arg2[%c496, %c0_194] : memref<992x128xf32, #tpu.memory_space<vmem>>, vector<1x128xf32>
    %1092 = vector.broadcast %1091 : vector<1x128xf32> to vector<2x128xf32>
    %1093 = arith.addf %1090, %1092 : vector<2x128xf32>
    %c0_195 = arith.constant 0 : index
    %c0_196 = arith.constant 0 : index
    %1094 = vector.load %arg3[%c0_195, %c0_196] : memref<2x128xf32, #tpu.memory_space<vmem>>, vector<2x128xf32>
    tpu.vector_store %arg3[%c0_195, %c0_196], %1093 {strides = array<i32>} : memref<2x128xf32, #tpu.memory_space<vmem>>, vector<2x128xf32>,
    %1095 = vector.extract_strided_slice %1093 {offsets = [0, 0], sizes = [2, 64], strides = [1, 1]} : vector<2x128xf32> to vector<2x64xf32>
    %1096 = vector.extract_strided_slice %1093 {offsets = [0, 64], sizes = [2, 64], strides = [1, 1]} : vector<2x128xf32> to vector<2x64xf32>
    %c0_197 = arith.constant 0 : index
    %c0_198 = arith.constant 0 : index
    %1097 = vector.load %arg1[%c0_197, %c0_198] : memref<2x64xf32, #tpu.memory_space<vmem>>, vector<2x64xf32>
    %1098 = arith.mulf %1096, %1097 : vector<2x64xf32>
    %1099 = arith.addf %1095, %1098 : vector<2x64xf32>
    %c504 = arith.constant 504 : index
    %c0_199 = arith.constant 0 : index
    %1100 = vector.load %arg2[%c504, %c0_199] : memref<992x128xf32, #tpu.memory_space<vmem>>, vector<64x64xf32>
    %cst_200 = arith.constant dense<0.000000e+00> : vector<2x64xf32>
    %1101 = tpu.matmul %1099, %1100, %cst_200 {dimension_numbers = #tpu.dot_dimension_numbers<[1], [0], [0], [1], [0, 0, 1, 1], [], []>} : vector<2x64xf32>, vector<64x64xf32>, vector<2x64xf32> -> vector<2x64xf32>
    %c568 = arith.constant 568 : index
    %c0_201 = arith.constant 0 : index
    %1102 = vector.load %arg2[%c568, %c0_201] : memref<992x128xf32, #tpu.memory_space<vmem>>, vector<1x64xf32>
    %1103 = vector.broadcast %1102 : vector<1x64xf32> to vector<2x64xf32>
    %1104 = arith.addf %1101, %1103 : vector<2x64xf32>
    %cst_202 = arith.constant 0.000000e+00 : f32
    %1105 = vector.broadcast %cst_202 : f32 to vector<2x64xf32>
    %1106 = arith.cmpf ogt, %1104, %1105 : vector<2x64xf32>
    %1107 = math.exp %1104 : vector<2x64xf32>
    %cst_203 = arith.constant 1.000000e+00 : f32
    %1108 = vector.broadcast %cst_203 : f32 to vector<2x64xf32>
    %1109 = arith.subf %1107, %1108 : vector<2x64xf32>
    %cst_204 = arith.constant 1.67326319 : f32
    %1110 = vector.broadcast %cst_204 : f32 to vector<2x64xf32>
    %1111 = arith.mulf %1110, %1109 : vector<2x64xf32>
    %1112 = arith.select %1106, %1104, %1111 : vector<2x64xi1>, vector<2x64xf32>
    %cst_205 = arith.constant 1.05070102 : f32
    %1113 = vector.broadcast %cst_205 : f32 to vector<2x64xf32>
    %1114 = arith.mulf %1113, %1112 : vector<2x64xf32>
    %1115 = vector.extract_strided_slice %1114 {offsets = [0, 0], sizes = [2, 32], strides = [1, 1]} : vector<2x64xf32> to vector<2x32xf32>
    %1116 = vector.extract_strided_slice %1114 {offsets = [0, 32], sizes = [2, 32], strides = [1, 1]} : vector<2x64xf32> to vector<2x32xf32>
    %c624 = arith.constant 624 : index
    %c0_206 = arith.constant 0 : index
    %1117 = vector.load %arg2[%c624, %c0_206] : memref<992x128xf32, #tpu.memory_space<vmem>>, vector<2x96xf32>
    %1118 = vector.extract_strided_slice %1117 {offsets = [0, 0], sizes = [1, 96], strides = [1, 1]} : vector<2x96xf32> to vector<1x96xf32>
    %1119 = vector.extract_strided_slice %1117 {offsets = [1, 0], sizes = [1, 96], strides = [1, 1]} : vector<2x96xf32> to vector<1x96xf32>
    %c696 = arith.constant 696 : index
    %c0_207 = arith.constant 0 : index
    %1120 = vector.load %arg2[%c696, %c0_207] : memref<992x128xf32, #tpu.memory_space<vmem>>, vector<2x96xf32>
    %1121 = vector.extract_strided_slice %1120 {offsets = [0, 0], sizes = [1, 96], strides = [1, 1]} : vector<2x96xf32> to vector<1x96xf32>
    %1122 = vector.extract_strided_slice %1120 {offsets = [1, 0], sizes = [1, 96], strides = [1, 1]} : vector<2x96xf32> to vector<1x96xf32>
    %c576 = arith.constant 576 : index
    %c0_208 = arith.constant 0 : index
    %1123 = vector.load %arg2[%c576, %c0_208] : memref<992x128xf32, #tpu.memory_space<vmem>>, vector<1x1xf32>
    %c584 = arith.constant 584 : index
    %c0_209 = arith.constant 0 : index
    %1124 = vector.load %arg2[%c584, %c0_209] : memref<992x128xf32, #tpu.memory_space<vmem>>, vector<1x96xf32>
    %1125 = vector.broadcast %1123 : vector<1x1xf32> to vector<1x96xf32>
    %1126 = arith.mulf %1125, %1124 : vector<1x96xf32>
    %1127 = arith.addf %1126, %1118 : vector<1x96xf32>
    %c592 = arith.constant 592 : index
    %c0_210 = arith.constant 0 : index
    %1128 = vector.load %arg2[%c592, %c0_210] : memref<992x128xf32, #tpu.memory_space<vmem>>, vector<32x96xf32>
    %c632 = arith.constant 632 : index
    %c0_211 = arith.constant 0 : index
    %1129 = vector.load %arg2[%c632, %c0_211] : memref<992x128xf32, #tpu.memory_space<vmem>>, vector<32x96xf32>
    %c664 = arith.constant 664 : index
    %c0_212 = arith.constant 0 : index
    %1130 = vector.load %arg2[%c664, %c0_212] : memref<992x128xf32, #tpu.memory_space<vmem>>, vector<32x96xf32>
    %cst_213 = arith.constant dense<0.000000e+00> : vector<2x96xf32>
    %1131 = tpu.matmul %1115, %1128, %cst_213 {dimension_numbers = #tpu.dot_dimension_numbers<[1], [0], [0], [1], [0, 0, 1, 1], [], []>} : vector<2x32xf32>, vector<32x96xf32>, vector<2x96xf32> -> vector<2x96xf32>
    %1132 = vector.broadcast %1119 : vector<1x96xf32> to vector<2x96xf32>
    %1133 = arith.addf %1131, %1132 : vector<2x96xf32>
    %1134 = vector.extract_strided_slice %1127 {offsets = [0, 0], sizes = [1, 32], strides = [1, 1]} : vector<1x96xf32> to vector<1x32xf32>
    %1135 = vector.extract_strided_slice %1133 {offsets = [0, 0], sizes = [2, 32], strides = [1, 1]} : vector<2x96xf32> to vector<2x32xf32>
    %1136 = vector.broadcast %1134 : vector<1x32xf32> to vector<2x32xf32>
    %1137 = arith.addf %1136, %1135 : vector<2x32xf32>
    %1138 = arith.negf %1137 : vector<2x32xf32>
    %1139 = math.exp %1138 : vector<2x32xf32>
    %cst_214 = arith.constant 1.000000e+00 : f32
    %1140 = vector.broadcast %cst_214 : f32 to vector<2x32xf32>
    %1141 = arith.addf %1140, %1139 : vector<2x32xf32>
    %1142 = arith.divf %1140, %1141 : vector<2x32xf32>
    %1143 = vector.extract_strided_slice %1127 {offsets = [0, 32], sizes = [1, 32], strides = [1, 1]} : vector<1x96xf32> to vector<1x32xf32>
    %1144 = vector.extract_strided_slice %1133 {offsets = [0, 32], sizes = [2, 32], strides = [1, 1]} : vector<2x96xf32> to vector<2x32xf32>
    %1145 = vector.broadcast %1143 : vector<1x32xf32> to vector<2x32xf32>
    %1146 = arith.addf %1145, %1144 : vector<2x32xf32>
    %1147 = arith.negf %1146 : vector<2x32xf32>
    %1148 = math.exp %1147 : vector<2x32xf32>
    %cst_215 = arith.constant 1.000000e+00 : f32
    %1149 = vector.broadcast %cst_215 : f32 to vector<2x32xf32>
    %1150 = arith.addf %1149, %1148 : vector<2x32xf32>
    %1151 = arith.divf %1149, %1150 : vector<2x32xf32>
    %1152 = vector.extract_strided_slice %1127 {offsets = [0, 64], sizes = [1, 32], strides = [1, 1]} : vector<1x96xf32> to vector<1x32xf32>
    %1153 = vector.extract_strided_slice %1133 {offsets = [0, 64], sizes = [2, 32], strides = [1, 1]} : vector<2x96xf32> to vector<2x32xf32>
    %1154 = arith.mulf %1142, %1153 : vector<2x32xf32>
    %1155 = vector.broadcast %1152 : vector<1x32xf32> to vector<2x32xf32>
    %1156 = arith.addf %1155, %1154 : vector<2x32xf32>
    %1157 = math.tanh %1156 : vector<2x32xf32>
    %cst_216 = arith.constant 1.000000e+00 : f32
    %1158 = vector.broadcast %cst_216 : f32 to vector<2x32xf32>
    %1159 = arith.subf %1158, %1151 : vector<2x32xf32>
    %1160 = arith.mulf %1159, %1157 : vector<2x32xf32>
    %1161 = arith.mulf %1151, %1115 : vector<2x32xf32>
    %1162 = arith.addf %1160, %1161 : vector<2x32xf32>
    %cst_217 = arith.constant dense<0.000000e+00> : vector<2x96xf32>
    %1163 = tpu.matmul %1162, %1129, %cst_217 {dimension_numbers = #tpu.dot_dimension_numbers<[1], [0], [0], [1], [0, 0, 1, 1], [], []>} : vector<2x32xf32>, vector<32x96xf32>, vector<2x96xf32> -> vector<2x96xf32>
    %1164 = vector.broadcast %1121 : vector<1x96xf32> to vector<2x96xf32>
    %1165 = arith.addf %1163, %1164 : vector<2x96xf32>
    %cst_218 = arith.constant dense<0.000000e+00> : vector<2x96xf32>
    %1166 = tpu.matmul %1116, %1130, %cst_218 {dimension_numbers = #tpu.dot_dimension_numbers<[1], [0], [0], [1], [0, 0, 1, 1], [], []>} : vector<2x32xf32>, vector<32x96xf32>, vector<2x96xf32> -> vector<2x96xf32>
    %1167 = vector.broadcast %1122 : vector<1x96xf32> to vector<2x96xf32>
    %1168 = arith.addf %1166, %1167 : vector<2x96xf32>
    %1169 = vector.extract_strided_slice %1165 {offsets = [0, 0], sizes = [2, 32], strides = [1, 1]} : vector<2x96xf32> to vector<2x32xf32>
    %1170 = vector.extract_strided_slice %1168 {offsets = [0, 0], sizes = [2, 32], strides = [1, 1]} : vector<2x96xf32> to vector<2x32xf32>
    %1171 = arith.addf %1169, %1170 : vector<2x32xf32>
    %1172 = arith.negf %1171 : vector<2x32xf32>
    %1173 = math.exp %1172 : vector<2x32xf32>
    %cst_219 = arith.constant 1.000000e+00 : f32
    %1174 = vector.broadcast %cst_219 : f32 to vector<2x32xf32>
    %1175 = arith.addf %1174, %1173 : vector<2x32xf32>
    %1176 = arith.divf %1174, %1175 : vector<2x32xf32>
    %1177 = vector.extract_strided_slice %1165 {offsets = [0, 32], sizes = [2, 32], strides = [1, 1]} : vector<2x96xf32> to vector<2x32xf32>
    %1178 = vector.extract_strided_slice %1168 {offsets = [0, 32], sizes = [2, 32], strides = [1, 1]} : vector<2x96xf32> to vector<2x32xf32>
    %1179 = arith.addf %1177, %1178 : vector<2x32xf32>
    %1180 = arith.negf %1179 : vector<2x32xf32>
    %1181 = math.exp %1180 : vector<2x32xf32>
    %cst_220 = arith.constant 1.000000e+00 : f32
    %1182 = vector.broadcast %cst_220 : f32 to vector<2x32xf32>
    %1183 = arith.addf %1182, %1181 : vector<2x32xf32>
    %1184 = arith.divf %1182, %1183 : vector<2x32xf32>
    %1185 = vector.extract_strided_slice %1165 {offsets = [0, 64], sizes = [2, 32], strides = [1, 1]} : vector<2x96xf32> to vector<2x32xf32>
    %1186 = vector.extract_strided_slice %1168 {offsets = [0, 64], sizes = [2, 32], strides = [1, 1]} : vector<2x96xf32> to vector<2x32xf32>
    %1187 = arith.mulf %1176, %1186 : vector<2x32xf32>
    %1188 = arith.addf %1185, %1187 : vector<2x32xf32>
    %1189 = math.tanh %1188 : vector<2x32xf32>
    %cst_221 = arith.constant 1.000000e+00 : f32
    %1190 = vector.broadcast %cst_221 : f32 to vector<2x32xf32>
    %1191 = arith.subf %1190, %1184 : vector<2x32xf32>
    %1192 = arith.mulf %1191, %1189 : vector<2x32xf32>
    %1193 = arith.mulf %1184, %1116 : vector<2x32xf32>
    %1194 = arith.addf %1192, %1193 : vector<2x32xf32>
    %c0_222 = arith.constant 0 : index
    %c0_223 = arith.constant 0 : index
    %c0_224 = arith.constant 0 : index
    %1195 = vector.load %arg6[%c0_222, %c0_223, %c0_224] : memref<2x2x32xf32, #tpu.memory_space<vmem>>, vector<2x1x32xf32>
    %1196 = vector.shape_cast %1195 : vector<2x1x32xf32> to vector<2x32xf32>
    %1197 = vector.shape_cast %1194 : vector<2x32xf32> to vector<2x1x32xf32>
    tpu.vector_store %arg6[%c0_222, %c0_223, %c0_224], %1197 {strides = array<i32>} : memref<2x2x32xf32, #tpu.memory_space<vmem>>, vector<2x1x32xf32>,
    %cst_225 = arith.constant dense<0.000000e+00> : vector<2x96xf32>
    %1198 = tpu.matmul %1162, %1128, %cst_225 {dimension_numbers = #tpu.dot_dimension_numbers<[1], [0], [0], [1], [0, 0, 1, 1], [], []>} : vector<2x32xf32>, vector<32x96xf32>, vector<2x96xf32> -> vector<2x96xf32>
    %1199 = vector.broadcast %1119 : vector<1x96xf32> to vector<2x96xf32>
    %1200 = arith.addf %1198, %1199 : vector<2x96xf32>
    %1201 = vector.extract_strided_slice %1127 {offsets = [0, 0], sizes = [1, 32], strides = [1, 1]} : vector<1x96xf32> to vector<1x32xf32>
    %1202 = vector.extract_strided_slice %1200 {offsets = [0, 0], sizes = [2, 32], strides = [1, 1]} : vector<2x96xf32> to vector<2x32xf32>
    %1203 = vector.broadcast %1201 : vector<1x32xf32> to vector<2x32xf32>
    %1204 = arith.addf %1203, %1202 : vector<2x32xf32>
    %1205 = arith.negf %1204 : vector<2x32xf32>
    %1206 = math.exp %1205 : vector<2x32xf32>
    %cst_226 = arith.constant 1.000000e+00 : f32
    %1207 = vector.broadcast %cst_226 : f32 to vector<2x32xf32>
    %1208 = arith.addf %1207, %1206 : vector<2x32xf32>
    %1209 = arith.divf %1207, %1208 : vector<2x32xf32>
    %1210 = vector.extract_strided_slice %1127 {offsets = [0, 32], sizes = [1, 32], strides = [1, 1]} : vector<1x96xf32> to vector<1x32xf32>
    %1211 = vector.extract_strided_slice %1200 {offsets = [0, 32], sizes = [2, 32], strides = [1, 1]} : vector<2x96xf32> to vector<2x32xf32>
    %1212 = vector.broadcast %1210 : vector<1x32xf32> to vector<2x32xf32>
    %1213 = arith.addf %1212, %1211 : vector<2x32xf32>
    %1214 = arith.negf %1213 : vector<2x32xf32>
    %1215 = math.exp %1214 : vector<2x32xf32>
    %cst_227 = arith.constant 1.000000e+00 : f32
    %1216 = vector.broadcast %cst_227 : f32 to vector<2x32xf32>
    %1217 = arith.addf %1216, %1215 : vector<2x32xf32>
    %1218 = arith.divf %1216, %1217 : vector<2x32xf32>
    %1219 = vector.extract_strided_slice %1127 {offsets = [0, 64], sizes = [1, 32], strides = [1, 1]} : vector<1x96xf32> to vector<1x32xf32>
    %1220 = vector.extract_strided_slice %1200 {offsets = [0, 64], sizes = [2, 32], strides = [1, 1]} : vector<2x96xf32> to vector<2x32xf32>
    %1221 = arith.mulf %1209, %1220 : vector<2x32xf32>
    %1222 = vector.broadcast %1219 : vector<1x32xf32> to vector<2x32xf32>
    %1223 = arith.addf %1222, %1221 : vector<2x32xf32>
    %1224 = math.tanh %1223 : vector<2x32xf32>
    %cst_228 = arith.constant 1.000000e+00 : f32
    %1225 = vector.broadcast %cst_228 : f32 to vector<2x32xf32>
    %1226 = arith.subf %1225, %1218 : vector<2x32xf32>
    %1227 = arith.mulf %1226, %1224 : vector<2x32xf32>
    %1228 = arith.mulf %1218, %1162 : vector<2x32xf32>
    %1229 = arith.addf %1227, %1228 : vector<2x32xf32>
    %cst_229 = arith.constant dense<0.000000e+00> : vector<2x96xf32>
    %1230 = tpu.matmul %1229, %1129, %cst_229 {dimension_numbers = #tpu.dot_dimension_numbers<[1], [0], [0], [1], [0, 0, 1, 1], [], []>} : vector<2x32xf32>, vector<32x96xf32>, vector<2x96xf32> -> vector<2x96xf32>
    %1231 = vector.broadcast %1121 : vector<1x96xf32> to vector<2x96xf32>
    %1232 = arith.addf %1230, %1231 : vector<2x96xf32>
    %cst_230 = arith.constant dense<0.000000e+00> : vector<2x96xf32>
    %1233 = tpu.matmul %1194, %1130, %cst_230 {dimension_numbers = #tpu.dot_dimension_numbers<[1], [0], [0], [1], [0, 0, 1, 1], [], []>} : vector<2x32xf32>, vector<32x96xf32>, vector<2x96xf32> -> vector<2x96xf32>
    %1234 = vector.broadcast %1122 : vector<1x96xf32> to vector<2x96xf32>
    %1235 = arith.addf %1233, %1234 : vector<2x96xf32>
    %1236 = vector.extract_strided_slice %1232 {offsets = [0, 0], sizes = [2, 32], strides = [1, 1]} : vector<2x96xf32> to vector<2x32xf32>
    %1237 = vector.extract_strided_slice %1235 {offsets = [0, 0], sizes = [2, 32], strides = [1, 1]} : vector<2x96xf32> to vector<2x32xf32>
    %1238 = arith.addf %1236, %1237 : vector<2x32xf32>
    %1239 = arith.negf %1238 : vector<2x32xf32>
    %1240 = math.exp %1239 : vector<2x32xf32>
    %cst_231 = arith.constant 1.000000e+00 : f32
    %1241 = vector.broadcast %cst_231 : f32 to vector<2x32xf32>
    %1242 = arith.addf %1241, %1240 : vector<2x32xf32>
    %1243 = arith.divf %1241, %1242 : vector<2x32xf32>
    %1244 = vector.extract_strided_slice %1232 {offsets = [0, 32], sizes = [2, 32], strides = [1, 1]} : vector<2x96xf32> to vector<2x32xf32>
    %1245 = vector.extract_strided_slice %1235 {offsets = [0, 32], sizes = [2, 32], strides = [1, 1]} : vector<2x96xf32> to vector<2x32xf32>
    %1246 = arith.addf %1244, %1245 : vector<2x32xf32>
    %1247 = arith.negf %1246 : vector<2x32xf32>
    %1248 = math.exp %1247 : vector<2x32xf32>
    %cst_232 = arith.constant 1.000000e+00 : f32
    %1249 = vector.broadcast %cst_232 : f32 to vector<2x32xf32>
    %1250 = arith.addf %1249, %1248 : vector<2x32xf32>
    %1251 = arith.divf %1249, %1250 : vector<2x32xf32>
    %1252 = vector.extract_strided_slice %1232 {offsets = [0, 64], sizes = [2, 32], strides = [1, 1]} : vector<2x96xf32> to vector<2x32xf32>
    %1253 = vector.extract_strided_slice %1235 {offsets = [0, 64], sizes = [2, 32], strides = [1, 1]} : vector<2x96xf32> to vector<2x32xf32>
    %1254 = arith.mulf %1243, %1253 : vector<2x32xf32>
    %1255 = arith.addf %1252, %1254 : vector<2x32xf32>
    %1256 = math.tanh %1255 : vector<2x32xf32>
    %cst_233 = arith.constant 1.000000e+00 : f32
    %1257 = vector.broadcast %cst_233 : f32 to vector<2x32xf32>
    %1258 = arith.subf %1257, %1251 : vector<2x32xf32>
    %1259 = arith.mulf %1258, %1256 : vector<2x32xf32>
    %1260 = arith.mulf %1251, %1194 : vector<2x32xf32>
    %1261 = arith.addf %1259, %1260 : vector<2x32xf32>
    %c0_234 = arith.constant 0 : index
    %c1_235 = arith.constant 1 : index
    %c0_236 = arith.constant 0 : index
    %1262 = vector.load %arg6[%c0_234, %c1_235, %c0_236] : memref<2x2x32xf32, #tpu.memory_space<vmem>>, vector<2x1x32xf32>
    %1263 = vector.shape_cast %1262 : vector<2x1x32xf32> to vector<2x32xf32>
    %1264 = vector.shape_cast %1261 : vector<2x32xf32> to vector<2x1x32xf32>
    tpu.vector_store %arg6[%c0_234, %c1_235, %c0_236], %1264 {strides = array<i32>} : memref<2x2x32xf32, #tpu.memory_space<vmem>>, vector<2x1x32xf32>,
    %c944 = arith.constant 944 : index
    %c0_237 = arith.constant 0 : index
    %1265 = vector.load %arg2[%c944, %c0_237] : memref<992x128xf32, #tpu.memory_space<vmem>>, vector<2x96xf32>
    %1266 = vector.extract_strided_slice %1265 {offsets = [0, 0], sizes = [1, 96], strides = [1, 1]} : vector<2x96xf32> to vector<1x96xf32>
    %1267 = vector.extract_strided_slice %1265 {offsets = [1, 0], sizes = [1, 96], strides = [1, 1]} : vector<2x96xf32> to vector<1x96xf32>
    %c768 = arith.constant 768 : index
    %c0_238 = arith.constant 0 : index
    %1268 = vector.load %arg2[%c768, %c0_238] : memref<992x128xf32, #tpu.memory_space<vmem>>, vector<2x96xf32>
    %1269 = vector.extract_strided_slice %1268 {offsets = [0, 0], sizes = [1, 96], strides = [1, 1]} : vector<2x96xf32> to vector<1x96xf32>
    %1270 = vector.extract_strided_slice %1268 {offsets = [1, 0], sizes = [1, 96], strides = [1, 1]} : vector<2x96xf32> to vector<1x96xf32>
    %c0_239 = arith.constant 0 : index
    %c0_240 = arith.constant 0 : index
    %c0_241 = arith.constant 0 : index
    %1271 = vector.load %arg6[%c0_239, %c0_240, %c0_241] : memref<2x2x32xf32, #tpu.memory_space<vmem>>, vector<2x2x32xf32>
    %1272 = vector.shape_cast %1271 : vector<2x2x32xf32> to vector<4x32xf32>
    %c776 = arith.constant 776 : index
    %c0_242 = arith.constant 0 : index
    %1273 = vector.load %arg2[%c776, %c0_242] : memref<992x128xf32, #tpu.memory_space<vmem>>, vector<32x64xf32>
    %cst_243 = arith.constant dense<0.000000e+00> : vector<4x64xf32>
    %1274 = tpu.matmul %1272, %1273, %cst_243 {dimension_numbers = #tpu.dot_dimension_numbers<[1], [0], [0], [1], [0, 0, 1, 1], [], []>} : vector<4x32xf32>, vector<32x64xf32>, vector<4x64xf32> -> vector<4x64xf32>
    %c808 = arith.constant 808 : index
    %c0_244 = arith.constant 0 : index
    %1275 = vector.load %arg2[%c808, %c0_244] : memref<992x128xf32, #tpu.memory_space<vmem>>, vector<1x64xf32>
    %1276 = vector.broadcast %1275 : vector<1x64xf32> to vector<4x64xf32>
    %1277 = arith.addf %1274, %1276 : vector<4x64xf32>
    %cst_245 = arith.constant 0.000000e+00 : f32
    %1278 = vector.broadcast %cst_245 : f32 to vector<4x64xf32>
    %1279 = arith.cmpf ogt, %1277, %1278 : vector<4x64xf32>
    %1280 = math.exp %1277 : vector<4x64xf32>
    %cst_246 = arith.constant 1.000000e+00 : f32
    %1281 = vector.broadcast %cst_246 : f32 to vector<4x64xf32>
    %1282 = arith.subf %1280, %1281 : vector<4x64xf32>
    %cst_247 = arith.constant 1.67326319 : f32
    %1283 = vector.broadcast %cst_247 : f32 to vector<4x64xf32>
    %1284 = arith.mulf %1283, %1282 : vector<4x64xf32>
    %1285 = arith.select %1279, %1277, %1284 : vector<4x64xi1>, vector<4x64xf32>
    %cst_248 = arith.constant 1.05070102 : f32
    %1286 = vector.broadcast %cst_248 : f32 to vector<4x64xf32>
    %1287 = arith.mulf %1286, %1285 : vector<4x64xf32>
    %1288 = vector.shape_cast %1287 : vector<4x64xf32> to vector<2x2x64xf32>
    %c816 = arith.constant 816 : index
    %c0_249 = arith.constant 0 : index
    %1289 = vector.load %arg2[%c816, %c0_249] : memref<992x128xf32, #tpu.memory_space<vmem>>, vector<32x32xf32>
    %cst_250 = arith.constant dense<0.000000e+00> : vector<4x32xf32>
    %1290 = tpu.matmul %1272, %1289, %cst_250 {dimension_numbers = #tpu.dot_dimension_numbers<[1], [0], [0], [1], [0, 0, 1, 1], [], []>} : vector<4x32xf32>, vector<32x32xf32>, vector<4x32xf32> -> vector<4x32xf32>
    %c848 = arith.constant 848 : index
    %c0_251 = arith.constant 0 : index
    %1291 = vector.load %arg2[%c848, %c0_251] : memref<992x128xf32, #tpu.memory_space<vmem>>, vector<1x32xf32>
    %1292 = vector.broadcast %1291 : vector<1x32xf32> to vector<4x32xf32>
    %1293 = arith.addf %1290, %1292 : vector<4x32xf32>
    %cst_252 = arith.constant 0.000000e+00 : f32
    %1294 = vector.broadcast %cst_252 : f32 to vector<4x32xf32>
    %1295 = arith.cmpf ogt, %1293, %1294 : vector<4x32xf32>
    %1296 = math.exp %1293 : vector<4x32xf32>
    %cst_253 = arith.constant 1.000000e+00 : f32
    %1297 = vector.broadcast %cst_253 : f32 to vector<4x32xf32>
    %1298 = arith.subf %1296, %1297 : vector<4x32xf32>
    %cst_254 = arith.constant 1.67326319 : f32
    %1299 = vector.broadcast %cst_254 : f32 to vector<4x32xf32>
    %1300 = arith.mulf %1299, %1298 : vector<4x32xf32>
    %1301 = arith.select %1295, %1293, %1300 : vector<4x32xi1>, vector<4x32xf32>
    %cst_255 = arith.constant 1.05070102 : f32
    %1302 = vector.broadcast %cst_255 : f32 to vector<4x32xf32>
    %1303 = arith.mulf %1302, %1301 : vector<4x32xf32>
    %c880 = arith.constant 880 : index
    %c0_256 = arith.constant 0 : index
    %1304 = vector.load %arg2[%c880, %c0_256] : memref<992x128xf32, #tpu.memory_space<vmem>>, vector<32x96xf32>
    %cst_257 = arith.constant dense<0.000000e+00> : vector<4x96xf32>
    %1305 = tpu.matmul %1303, %1304, %cst_257 {dimension_numbers = #tpu.dot_dimension_numbers<[1], [0], [0], [1], [0, 0, 1, 1], [], []>} : vector<4x32xf32>, vector<32x96xf32>, vector<4x96xf32> -> vector<4x96xf32>
    %1306 = vector.broadcast %1266 : vector<1x96xf32> to vector<4x96xf32>
    %1307 = arith.addf %1305, %1306 : vector<4x96xf32>
    %1308 = vector.shape_cast %1307 : vector<4x96xf32> to vector<2x2x96xf32>
    %c864 = arith.constant 864 : index
    %c0_258 = arith.constant 0 : index
    %1309 = vector.load %arg2[%c864, %c0_258] : memref<992x128xf32, #tpu.memory_space<vmem>>, vector<10x96xf32>
    %c24 = arith.constant 24 : index
    %c0_259 = arith.constant 0 : index
    %1310 = vector.load %arg2[%c24, %c0_259] : memref<992x128xf32, #tpu.memory_space<vmem>>, vector<20x10xf32>
    %cst_260 = arith.constant dense<0.000000e+00> : vector<20x96xf32>
    %1311 = tpu.matmul %1310, %1309, %cst_260 {dimension_numbers = #tpu.dot_dimension_numbers<[1], [0], [0], [1], [0, 0, 1, 1], [], []>} : vector<20x10xf32>, vector<10x96xf32>, vector<20x96xf32> -> vector<20x96xf32>
    %c856 = arith.constant 856 : index
    %c0_261 = arith.constant 0 : index
    %1312 = vector.load %arg2[%c856, %c0_261] : memref<992x128xf32, #tpu.memory_space<vmem>>, vector<1x10xf32>
    %cst_262 = arith.constant dense<0.000000e+00> : vector<1x96xf32>
    %1313 = tpu.matmul %1312, %1309, %cst_262 {dimension_numbers = #tpu.dot_dimension_numbers<[1], [0], [0], [1], [0, 0, 1, 1], [], []>} : vector<1x10xf32>, vector<10x96xf32>, vector<1x96xf32> -> vector<1x96xf32>
    %c912 = arith.constant 912 : index
    %c0_263 = arith.constant 0 : index
    %1314 = vector.load %arg2[%c912, %c0_263] : memref<992x128xf32, #tpu.memory_space<vmem>>, vector<32x96xf32>
    %c704 = arith.constant 704 : index
    %c0_264 = arith.constant 0 : index
    %1315 = vector.load %arg2[%c704, %c0_264] : memref<992x128xf32, #tpu.memory_space<vmem>>, vector<32x96xf32>
    %c736 = arith.constant 736 : index
    %c0_265 = arith.constant 0 : index
    %1316 = vector.load %arg2[%c736, %c0_265] : memref<992x128xf32, #tpu.memory_space<vmem>>, vector<32x96xf32>
    %c952 = arith.constant 952 : index
    %c0_266 = arith.constant 0 : index
    %1317 = vector.load %arg2[%c952, %c0_266] : memref<992x128xf32, #tpu.memory_space<vmem>>, vector<32x20xf32>
    %c984 = arith.constant 984 : index
    %c0_267 = arith.constant 0 : index
    %1318 = vector.load %arg2[%c984, %c0_267] : memref<992x128xf32, #tpu.memory_space<vmem>>, vector<1x20xf32>
    %1319 = tpu.iota {dimensions = array<i32: 1>} : vector<2x20xi32>
    %1320 = vector.extract_strided_slice %1288 {offsets = [0, 0, 0], sizes = [2, 1, 32], strides = [1, 1, 1]} : vector<2x2x64xf32> to vector<2x1x32xf32>
    %1321 = vector.shape_cast %1320 : vector<2x1x32xf32> to vector<2x32xf32>
    %1322 = vector.extract_strided_slice %1288 {offsets = [0, 0, 32], sizes = [2, 1, 32], strides = [1, 1, 1]} : vector<2x2x64xf32> to vector<2x1x32xf32>
    %1323 = vector.shape_cast %1322 : vector<2x1x32xf32> to vector<2x32xf32>
    %1324 = vector.extract_strided_slice %1308 {offsets = [0, 0, 0], sizes = [2, 1, 96], strides = [1, 1, 1]} : vector<2x2x96xf32> to vector<2x1x96xf32>
    %1325 = vector.shape_cast %1324 : vector<2x1x96xf32> to vector<2x96xf32>
    %1326 = vector.broadcast %1313 : vector<1x96xf32> to vector<2x96xf32>
    %1327 = arith.addf %1326, %1325 : vector<2x96xf32>
    %cst_268 = arith.constant dense<0.000000e+00> : vector<2x96xf32>
    %1328 = tpu.matmul %1321, %1314, %cst_268 {dimension_numbers = #tpu.dot_dimension_numbers<[1], [0], [0], [1], [0, 0, 1, 1], [], []>} : vector<2x32xf32>, vector<32x96xf32>, vector<2x96xf32> -> vector<2x96xf32>
    %1329 = vector.broadcast %1267 : vector<1x96xf32> to vector<2x96xf32>
    %1330 = arith.addf %1328, %1329 : vector<2x96xf32>
    %1331 = vector.extract_strided_slice %1327 {offsets = [0, 0], sizes = [2, 32], strides = [1, 1]} : vector<2x96xf32> to vector<2x32xf32>
    %1332 = vector.extract_strided_slice %1330 {offsets = [0, 0], sizes = [2, 32], strides = [1, 1]} : vector<2x96xf32> to vector<2x32xf32>
    %1333 = arith.addf %1331, %1332 : vector<2x32xf32>
    %1334 = arith.negf %1333 : vector<2x32xf32>
    %1335 = math.exp %1334 : vector<2x32xf32>
    %cst_269 = arith.constant 1.000000e+00 : f32
    %1336 = vector.broadcast %cst_269 : f32 to vector<2x32xf32>
    %1337 = arith.addf %1336, %1335 : vector<2x32xf32>
    %1338 = arith.divf %1336, %1337 : vector<2x32xf32>
    %1339 = vector.extract_strided_slice %1327 {offsets = [0, 32], sizes = [2, 32], strides = [1, 1]} : vector<2x96xf32> to vector<2x32xf32>
    %1340 = vector.extract_strided_slice %1330 {offsets = [0, 32], sizes = [2, 32], strides = [1, 1]} : vector<2x96xf32> to vector<2x32xf32>
    %1341 = arith.addf %1339, %1340 : vector<2x32xf32>
    %1342 = arith.negf %1341 : vector<2x32xf32>
    %1343 = math.exp %1342 : vector<2x32xf32>
    %cst_270 = arith.constant 1.000000e+00 : f32
    %1344 = vector.broadcast %cst_270 : f32 to vector<2x32xf32>
    %1345 = arith.addf %1344, %1343 : vector<2x32xf32>
    %1346 = arith.divf %1344, %1345 : vector<2x32xf32>
    %1347 = vector.extract_strided_slice %1327 {offsets = [0, 64], sizes = [2, 32], strides = [1, 1]} : vector<2x96xf32> to vector<2x32xf32>
    %1348 = vector.extract_strided_slice %1330 {offsets = [0, 64], sizes = [2, 32], strides = [1, 1]} : vector<2x96xf32> to vector<2x32xf32>
    %1349 = arith.mulf %1338, %1348 : vector<2x32xf32>
    %1350 = arith.addf %1347, %1349 : vector<2x32xf32>
    %1351 = math.tanh %1350 : vector<2x32xf32>
    %cst_271 = arith.constant 1.000000e+00 : f32
    %1352 = vector.broadcast %cst_271 : f32 to vector<2x32xf32>
    %1353 = arith.subf %1352, %1346 : vector<2x32xf32>
    %1354 = arith.mulf %1353, %1351 : vector<2x32xf32>
    %1355 = arith.mulf %1346, %1321 : vector<2x32xf32>
    %1356 = arith.addf %1354, %1355 : vector<2x32xf32>
    %cst_272 = arith.constant dense<0.000000e+00> : vector<2x96xf32>
    %1357 = tpu.matmul %1356, %1315, %cst_272 {dimension_numbers = #tpu.dot_dimension_numbers<[1], [0], [0], [1], [0, 0, 1, 1], [], []>} : vector<2x32xf32>, vector<32x96xf32>, vector<2x96xf32> -> vector<2x96xf32>
    %1358 = vector.broadcast %1269 : vector<1x96xf32> to vector<2x96xf32>
    %1359 = arith.addf %1357, %1358 : vector<2x96xf32>
    %cst_273 = arith.constant dense<0.000000e+00> : vector<2x96xf32>
    %1360 = tpu.matmul %1323, %1316, %cst_273 {dimension_numbers = #tpu.dot_dimension_numbers<[1], [0], [0], [1], [0, 0, 1, 1], [], []>} : vector<2x32xf32>, vector<32x96xf32>, vector<2x96xf32> -> vector<2x96xf32>
    %1361 = vector.broadcast %1270 : vector<1x96xf32> to vector<2x96xf32>
    %1362 = arith.addf %1360, %1361 : vector<2x96xf32>
    %1363 = vector.extract_strided_slice %1359 {offsets = [0, 0], sizes = [2, 32], strides = [1, 1]} : vector<2x96xf32> to vector<2x32xf32>
    %1364 = vector.extract_strided_slice %1362 {offsets = [0, 0], sizes = [2, 32], strides = [1, 1]} : vector<2x96xf32> to vector<2x32xf32>
    %1365 = arith.addf %1363, %1364 : vector<2x32xf32>
    %1366 = arith.negf %1365 : vector<2x32xf32>
    %1367 = math.exp %1366 : vector<2x32xf32>
    %cst_274 = arith.constant 1.000000e+00 : f32
    %1368 = vector.broadcast %cst_274 : f32 to vector<2x32xf32>
    %1369 = arith.addf %1368, %1367 : vector<2x32xf32>
    %1370 = arith.divf %1368, %1369 : vector<2x32xf32>
    %1371 = vector.extract_strided_slice %1359 {offsets = [0, 32], sizes = [2, 32], strides = [1, 1]} : vector<2x96xf32> to vector<2x32xf32>
    %1372 = vector.extract_strided_slice %1362 {offsets = [0, 32], sizes = [2, 32], strides = [1, 1]} : vector<2x96xf32> to vector<2x32xf32>
    %1373 = arith.addf %1371, %1372 : vector<2x32xf32>
    %1374 = arith.negf %1373 : vector<2x32xf32>
    %1375 = math.exp %1374 : vector<2x32xf32>
    %cst_275 = arith.constant 1.000000e+00 : f32
    %1376 = vector.broadcast %cst_275 : f32 to vector<2x32xf32>
    %1377 = arith.addf %1376, %1375 : vector<2x32xf32>
    %1378 = arith.divf %1376, %1377 : vector<2x32xf32>
    %1379 = vector.extract_strided_slice %1359 {offsets = [0, 64], sizes = [2, 32], strides = [1, 1]} : vector<2x96xf32> to vector<2x32xf32>
    %1380 = vector.extract_strided_slice %1362 {offsets = [0, 64], sizes = [2, 32], strides = [1, 1]} : vector<2x96xf32> to vector<2x32xf32>
    %1381 = arith.mulf %1370, %1380 : vector<2x32xf32>
    %1382 = arith.addf %1379, %1381 : vector<2x32xf32>
    %1383 = math.tanh %1382 : vector<2x32xf32>
    %cst_276 = arith.constant 1.000000e+00 : f32
    %1384 = vector.broadcast %cst_276 : f32 to vector<2x32xf32>
    %1385 = arith.subf %1384, %1378 : vector<2x32xf32>
    %1386 = arith.mulf %1385, %1383 : vector<2x32xf32>
    %1387 = arith.mulf %1378, %1323 : vector<2x32xf32>
    %1388 = arith.addf %1386, %1387 : vector<2x32xf32>
    %cst_277 = arith.constant dense<0.000000e+00> : vector<2x20xf32>
    %1389 = tpu.matmul %1388, %1317, %cst_277 {dimension_numbers = #tpu.dot_dimension_numbers<[1], [0], [0], [1], [0, 0, 1, 1], [], []>} : vector<2x32xf32>, vector<32x20xf32>, vector<2x20xf32> -> vector<2x20xf32>
    %1390 = vector.broadcast %1318 : vector<1x20xf32> to vector<2x20xf32>
    %1391 = arith.addf %1389, %1390 : vector<2x20xf32>
    %cst_278 = arith.constant 0.000000e+00 : f32
    %1392 = vector.broadcast %cst_278 : f32 to vector<2x20xf32>
    %1393 = arith.maximumf %1391, %1392 : vector<2x20xf32>
    %c0_279 = arith.constant 0 : index
    %c0_280 = arith.constant 0 : index
    %c0_281 = arith.constant 0 : index
    %1394 = vector.load %arg4[%c0_279, %c0_280, %c0_281] : memref<2x8x20xf32, #tpu.memory_space<vmem>>, vector<2x1x20xf32>
    %1395 = vector.shape_cast %1394 : vector<2x1x20xf32> to vector<2x20xf32>
    %1396 = vector.shape_cast %1393 : vector<2x20xf32> to vector<2x1x20xf32>
    tpu.vector_store %arg4[%c0_279, %c0_280, %c0_281], %1396 {strides = array<i32>} : memref<2x8x20xf32, #tpu.memory_space<vmem>>, vector<2x1x20xf32>,
    %cst_282 = arith.constant dense<0xFF800000> : vector<2xf32>
    %1397 = vector.multi_reduction <maximumf>, %1393, %cst_282 [1] : vector<2x20xf32> to vector<2xf32>
    %1398 = vector.shape_cast %1397 : vector<2xf32> to vector<2x1xf32>
    %1399 = vector.broadcast %1398 : vector<2x1xf32> to vector<2x20xf32>
    %1400 = arith.cmpf oeq, %1393, %1399 : vector<2x20xf32>
    %c20_i32 = arith.constant 20 : i32
    %1401 = vector.broadcast %c20_i32 : i32 to vector<2x20xi32>
    %1402 = arith.select %1400, %1319, %1401 : vector<2x20xi1>, vector<2x20xi32>
    %cst_283 = arith.constant dense<2147483647> : vector<2xi32>
    %1403 = vector.multi_reduction <minsi>, %1402, %cst_283 [1] : vector<2x20xi32> to vector<2xi32>
    %1404 = vector.shape_cast %1403 : vector<2xi32> to vector<2x1xi32>
    %1405 = vector.broadcast %1404 : vector<2x1xi32> to vector<2x20xi32>
    %1406 = arith.cmpi eq, %1319, %1405 : vector<2x20xi32>
    %1407 = arith.extui %1406 : vector<2x20xi1> to vector<2x20xi32>
    %1408 = arith.sitofp %1407 : vector<2x20xi32> to vector<2x20xf32>
    %cst_284 = arith.constant dense<0.000000e+00> : vector<2x96xf32>
    %1409 = tpu.matmul %1408, %1311, %cst_284 {dimension_numbers = #tpu.dot_dimension_numbers<[1], [0], [0], [1], [0, 0, 1, 1], [], []>} : vector<2x20xf32>, vector<20x96xf32>, vector<2x96xf32> -> vector<2x96xf32>
    %1410 = arith.addf %1409, %1325 : vector<2x96xf32>
    %cst_285 = arith.constant dense<0.000000e+00> : vector<2x96xf32>
    %1411 = tpu.matmul %1356, %1314, %cst_285 {dimension_numbers = #tpu.dot_dimension_numbers<[1], [0], [0], [1], [0, 0, 1, 1], [], []>} : vector<2x32xf32>, vector<32x96xf32>, vector<2x96xf32> -> vector<2x96xf32>
    %1412 = vector.broadcast %1267 : vector<1x96xf32> to vector<2x96xf32>
    %1413 = arith.addf %1411, %1412 : vector<2x96xf32>
    %1414 = vector.extract_strided_slice %1410 {offsets = [0, 0], sizes = [2, 32], strides = [1, 1]} : vector<2x96xf32> to vector<2x32xf32>
    %1415 = vector.extract_strided_slice %1413 {offsets = [0, 0], sizes = [2, 32], strides = [1, 1]} : vector<2x96xf32> to vector<2x32xf32>
    %1416 = arith.addf %1414, %1415 : vector<2x32xf32>
    %1417 = arith.negf %1416 : vector<2x32xf32>
    %1418 = math.exp %1417 : vector<2x32xf32>
    %cst_286 = arith.constant 1.000000e+00 : f32
    %1419 = vector.broadcast %cst_286 : f32 to vector<2x32xf32>
    %1420 = arith.addf %1419, %1418 : vector<2x32xf32>
    %1421 = arith.divf %1419, %1420 : vector<2x32xf32>
    %1422 = vector.extract_strided_slice %1410 {offsets = [0, 32], sizes = [2, 32], strides = [1, 1]} : vector<2x96xf32> to vector<2x32xf32>
    %1423 = vector.extract_strided_slice %1413 {offsets = [0, 32], sizes = [2, 32], strides = [1, 1]} : vector<2x96xf32> to vector<2x32xf32>
    %1424 = arith.addf %1422, %1423 : vector<2x32xf32>
    %1425 = arith.negf %1424 : vector<2x32xf32>
    %1426 = math.exp %1425 : vector<2x32xf32>
    %cst_287 = arith.constant 1.000000e+00 : f32
    %1427 = vector.broadcast %cst_287 : f32 to vector<2x32xf32>
    %1428 = arith.addf %1427, %1426 : vector<2x32xf32>
    %1429 = arith.divf %1427, %1428 : vector<2x32xf32>
    %1430 = vector.extract_strided_slice %1410 {offsets = [0, 64], sizes = [2, 32], strides = [1, 1]} : vector<2x96xf32> to vector<2x32xf32>
    %1431 = vector.extract_strided_slice %1413 {offsets = [0, 64], sizes = [2, 32], strides = [1, 1]} : vector<2x96xf32> to vector<2x32xf32>
    %1432 = arith.mulf %1421, %1431 : vector<2x32xf32>
    %1433 = arith.addf %1430, %1432 : vector<2x32xf32>
    %1434 = math.tanh %1433 : vector<2x32xf32>
    %cst_288 = arith.constant 1.000000e+00 : f32
    %1435 = vector.broadcast %cst_288 : f32 to vector<2x32xf32>
    %1436 = arith.subf %1435, %1429 : vector<2x32xf32>
    %1437 = arith.mulf %1436, %1434 : vector<2x32xf32>
    %1438 = arith.mulf %1429, %1356 : vector<2x32xf32>
    %1439 = arith.addf %1437, %1438 : vector<2x32xf32>
    %cst_289 = arith.constant dense<0.000000e+00> : vector<2x96xf32>
    %1440 = tpu.matmul %1439, %1315, %cst_289 {dimension_numbers = #tpu.dot_dimension_numbers<[1], [0], [0], [1], [0, 0, 1, 1], [], []>} : vector<2x32xf32>, vector<32x96xf32>, vector<2x96xf32> -> vector<2x96xf32>
    %1441 = vector.broadcast %1269 : vector<1x96xf32> to vector<2x96xf32>
    %1442 = arith.addf %1440, %1441 : vector<2x96xf32>
    %cst_290 = arith.constant dense<0.000000e+00> : vector<2x96xf32>
    %1443 = tpu.matmul %1388, %1316, %cst_290 {dimension_numbers = #tpu.dot_dimension_numbers<[1], [0], [0], [1], [0, 0, 1, 1], [], []>} : vector<2x32xf32>, vector<32x96xf32>, vector<2x96xf32> -> vector<2x96xf32>
    %1444 = vector.broadcast %1270 : vector<1x96xf32> to vector<2x96xf32>
    %1445 = arith.addf %1443, %1444 : vector<2x96xf32>
    %1446 = vector.extract_strided_slice %1442 {offsets = [0, 0], sizes = [2, 32], strides = [1, 1]} : vector<2x96xf32> to vector<2x32xf32>
    %1447 = vector.extract_strided_slice %1445 {offsets = [0, 0], sizes = [2, 32], strides = [1, 1]} : vector<2x96xf32> to vector<2x32xf32>
    %1448 = arith.addf %1446, %1447 : vector<2x32xf32>
    %1449 = arith.negf %1448 : vector<2x32xf32>
    %1450 = math.exp %1449 : vector<2x32xf32>
    %cst_291 = arith.constant 1.000000e+00 : f32
    %1451 = vector.broadcast %cst_291 : f32 to vector<2x32xf32>
    %1452 = arith.addf %1451, %1450 : vector<2x32xf32>
    %1453 = arith.divf %1451, %1452 : vector<2x32xf32>
    %1454 = vector.extract_strided_slice %1442 {offsets = [0, 32], sizes = [2, 32], strides = [1, 1]} : vector<2x96xf32> to vector<2x32xf32>
    %1455 = vector.extract_strided_slice %1445 {offsets = [0, 32], sizes = [2, 32], strides = [1, 1]} : vector<2x96xf32> to vector<2x32xf32>
    %1456 = arith.addf %1454, %1455 : vector<2x32xf32>
    %1457 = arith.negf %1456 : vector<2x32xf32>
    %1458 = math.exp %1457 : vector<2x32xf32>
    %cst_292 = arith.constant 1.000000e+00 : f32
    %1459 = vector.broadcast %cst_292 : f32 to vector<2x32xf32>
    %1460 = arith.addf %1459, %1458 : vector<2x32xf32>
    %1461 = arith.divf %1459, %1460 : vector<2x32xf32>
    %1462 = vector.extract_strided_slice %1442 {offsets = [0, 64], sizes = [2, 32], strides = [1, 1]} : vector<2x96xf32> to vector<2x32xf32>
    %1463 = vector.extract_strided_slice %1445 {offsets = [0, 64], sizes = [2, 32], strides = [1, 1]} : vector<2x96xf32> to vector<2x32xf32>
    %1464 = arith.mulf %1453, %1463 : vector<2x32xf32>
    %1465 = arith.addf %1462, %1464 : vector<2x32xf32>
    %1466 = math.tanh %1465 : vector<2x32xf32>
    %cst_293 = arith.constant 1.000000e+00 : f32
    %1467 = vector.broadcast %cst_293 : f32 to vector<2x32xf32>
    %1468 = arith.subf %1467, %1461 : vector<2x32xf32>
    %1469 = arith.mulf %1468, %1466 : vector<2x32xf32>
    %1470 = arith.mulf %1461, %1388 : vector<2x32xf32>
    %1471 = arith.addf %1469, %1470 : vector<2x32xf32>
    %cst_294 = arith.constant dense<0.000000e+00> : vector<2x20xf32>
    %1472 = tpu.matmul %1471, %1317, %cst_294 {dimension_numbers = #tpu.dot_dimension_numbers<[1], [0], [0], [1], [0, 0, 1, 1], [], []>} : vector<2x32xf32>, vector<32x20xf32>, vector<2x20xf32> -> vector<2x20xf32>
    %1473 = vector.broadcast %1318 : vector<1x20xf32> to vector<2x20xf32>
    %1474 = arith.addf %1472, %1473 : vector<2x20xf32>
    %cst_295 = arith.constant 0.000000e+00 : f32
    %1475 = vector.broadcast %cst_295 : f32 to vector<2x20xf32>
    %1476 = arith.maximumf %1474, %1475 : vector<2x20xf32>
    %c0_296 = arith.constant 0 : index
    %c1_297 = arith.constant 1 : index
    %c0_298 = arith.constant 0 : index
    %1477 = vector.load %arg4[%c0_296, %c1_297, %c0_298] : memref<2x8x20xf32, #tpu.memory_space<vmem>>, vector<2x1x20xf32>
    %1478 = vector.shape_cast %1477 : vector<2x1x20xf32> to vector<2x20xf32>
    %1479 = vector.shape_cast %1476 : vector<2x20xf32> to vector<2x1x20xf32>
    tpu.vector_store %arg4[%c0_296, %c1_297, %c0_298], %1479 {strides = array<i32>} : memref<2x8x20xf32, #tpu.memory_space<vmem>>, vector<2x1x20xf32>,
    %cst_299 = arith.constant dense<0xFF800000> : vector<2xf32>
    %1480 = vector.multi_reduction <maximumf>, %1476, %cst_299 [1] : vector<2x20xf32> to vector<2xf32>
    %1481 = vector.shape_cast %1480 : vector<2xf32> to vector<2x1xf32>
    %1482 = vector.broadcast %1481 : vector<2x1xf32> to vector<2x20xf32>
    %1483 = arith.cmpf oeq, %1476, %1482 : vector<2x20xf32>
    %c20_i32_300 = arith.constant 20 : i32
    %1484 = vector.broadcast %c20_i32_300 : i32 to vector<2x20xi32>
    %1485 = arith.select %1483, %1319, %1484 : vector<2x20xi1>, vector<2x20xi32>
    %cst_301 = arith.constant dense<2147483647> : vector<2xi32>
    %1486 = vector.multi_reduction <minsi>, %1485, %cst_301 [1] : vector<2x20xi32> to vector<2xi32>
    %1487 = vector.shape_cast %1486 : vector<2xi32> to vector<2x1xi32>
    %1488 = vector.broadcast %1487 : vector<2x1xi32> to vector<2x20xi32>
    %1489 = arith.cmpi eq, %1319, %1488 : vector<2x20xi32>
    %1490 = arith.extui %1489 : vector<2x20xi1> to vector<2x20xi32>
    %1491 = arith.sitofp %1490 : vector<2x20xi32> to vector<2x20xf32>
    %cst_302 = arith.constant dense<0.000000e+00> : vector<2x96xf32>
    %1492 = tpu.matmul %1491, %1311, %cst_302 {dimension_numbers = #tpu.dot_dimension_numbers<[1], [0], [0], [1], [0, 0, 1, 1], [], []>} : vector<2x20xf32>, vector<20x96xf32>, vector<2x96xf32> -> vector<2x96xf32>
    %1493 = arith.addf %1492, %1325 : vector<2x96xf32>
    %cst_303 = arith.constant dense<0.000000e+00> : vector<2x96xf32>
    %1494 = tpu.matmul %1439, %1314, %cst_303 {dimension_numbers = #tpu.dot_dimension_numbers<[1], [0], [0], [1], [0, 0, 1, 1], [], []>} : vector<2x32xf32>, vector<32x96xf32>, vector<2x96xf32> -> vector<2x96xf32>
    %1495 = vector.broadcast %1267 : vector<1x96xf32> to vector<2x96xf32>
    %1496 = arith.addf %1494, %1495 : vector<2x96xf32>
    %1497 = vector.extract_strided_slice %1493 {offsets = [0, 0], sizes = [2, 32], strides = [1, 1]} : vector<2x96xf32> to vector<2x32xf32>
    %1498 = vector.extract_strided_slice %1496 {offsets = [0, 0], sizes = [2, 32], strides = [1, 1]} : vector<2x96xf32> to vector<2x32xf32>
    %1499 = arith.addf %1497, %1498 : vector<2x32xf32>
    %1500 = arith.negf %1499 : vector<2x32xf32>
    %1501 = math.exp %1500 : vector<2x32xf32>
    %cst_304 = arith.constant 1.000000e+00 : f32
    %1502 = vector.broadcast %cst_304 : f32 to vector<2x32xf32>
    %1503 = arith.addf %1502, %1501 : vector<2x32xf32>
    %1504 = arith.divf %1502, %1503 : vector<2x32xf32>
    %1505 = vector.extract_strided_slice %1493 {offsets = [0, 32], sizes = [2, 32], strides = [1, 1]} : vector<2x96xf32> to vector<2x32xf32>
    %1506 = vector.extract_strided_slice %1496 {offsets = [0, 32], sizes = [2, 32], strides = [1, 1]} : vector<2x96xf32> to vector<2x32xf32>
    %1507 = arith.addf %1505, %1506 : vector<2x32xf32>
    %1508 = arith.negf %1507 : vector<2x32xf32>
    %1509 = math.exp %1508 : vector<2x32xf32>
    %cst_305 = arith.constant 1.000000e+00 : f32
    %1510 = vector.broadcast %cst_305 : f32 to vector<2x32xf32>
    %1511 = arith.addf %1510, %1509 : vector<2x32xf32>
    %1512 = arith.divf %1510, %1511 : vector<2x32xf32>
    %1513 = vector.extract_strided_slice %1493 {offsets = [0, 64], sizes = [2, 32], strides = [1, 1]} : vector<2x96xf32> to vector<2x32xf32>
    %1514 = vector.extract_strided_slice %1496 {offsets = [0, 64], sizes = [2, 32], strides = [1, 1]} : vector<2x96xf32> to vector<2x32xf32>
    %1515 = arith.mulf %1504, %1514 : vector<2x32xf32>
    %1516 = arith.addf %1513, %1515 : vector<2x32xf32>
    %1517 = math.tanh %1516 : vector<2x32xf32>
    %cst_306 = arith.constant 1.000000e+00 : f32
    %1518 = vector.broadcast %cst_306 : f32 to vector<2x32xf32>
    %1519 = arith.subf %1518, %1512 : vector<2x32xf32>
    %1520 = arith.mulf %1519, %1517 : vector<2x32xf32>
    %1521 = arith.mulf %1512, %1439 : vector<2x32xf32>
    %1522 = arith.addf %1520, %1521 : vector<2x32xf32>
    %cst_307 = arith.constant dense<0.000000e+00> : vector<2x96xf32>
    %1523 = tpu.matmul %1522, %1315, %cst_307 {dimension_numbers = #tpu.dot_dimension_numbers<[1], [0], [0], [1], [0, 0, 1, 1], [], []>} : vector<2x32xf32>, vector<32x96xf32>, vector<2x96xf32> -> vector<2x96xf32>
    %1524 = vector.broadcast %1269 : vector<1x96xf32> to vector<2x96xf32>
    %1525 = arith.addf %1523, %1524 : vector<2x96xf32>
    %cst_308 = arith.constant dense<0.000000e+00> : vector<2x96xf32>
    %1526 = tpu.matmul %1471, %1316, %cst_308 {dimension_numbers = #tpu.dot_dimension_numbers<[1], [0], [0], [1], [0, 0, 1, 1], [], []>} : vector<2x32xf32>, vector<32x96xf32>, vector<2x96xf32> -> vector<2x96xf32>
    %1527 = vector.broadcast %1270 : vector<1x96xf32> to vector<2x96xf32>
    %1528 = arith.addf %1526, %1527 : vector<2x96xf32>
    %1529 = vector.extract_strided_slice %1525 {offsets = [0, 0], sizes = [2, 32], strides = [1, 1]} : vector<2x96xf32> to vector<2x32xf32>
    %1530 = vector.extract_strided_slice %1528 {offsets = [0, 0], sizes = [2, 32], strides = [1, 1]} : vector<2x96xf32> to vector<2x32xf32>
    %1531 = arith.addf %1529, %1530 : vector<2x32xf32>
    %1532 = arith.negf %1531 : vector<2x32xf32>
    %1533 = math.exp %1532 : vector<2x32xf32>
    %cst_309 = arith.constant 1.000000e+00 : f32
    %1534 = vector.broadcast %cst_309 : f32 to vector<2x32xf32>
    %1535 = arith.addf %1534, %1533 : vector<2x32xf32>
    %1536 = arith.divf %1534, %1535 : vector<2x32xf32>
    %1537 = vector.extract_strided_slice %1525 {offsets = [0, 32], sizes = [2, 32], strides = [1, 1]} : vector<2x96xf32> to vector<2x32xf32>
    %1538 = vector.extract_strided_slice %1528 {offsets = [0, 32], sizes = [2, 32], strides = [1, 1]} : vector<2x96xf32> to vector<2x32xf32>
    %1539 = arith.addf %1537, %1538 : vector<2x32xf32>
    %1540 = arith.negf %1539 : vector<2x32xf32>
    %1541 = math.exp %1540 : vector<2x32xf32>
    %cst_310 = arith.constant 1.000000e+00 : f32
    %1542 = vector.broadcast %cst_310 : f32 to vector<2x32xf32>
    %1543 = arith.addf %1542, %1541 : vector<2x32xf32>
    %1544 = arith.divf %1542, %1543 : vector<2x32xf32>
    %1545 = vector.extract_strided_slice %1525 {offsets = [0, 64], sizes = [2, 32], strides = [1, 1]} : vector<2x96xf32> to vector<2x32xf32>
    %1546 = vector.extract_strided_slice %1528 {offsets = [0, 64], sizes = [2, 32], strides = [1, 1]} : vector<2x96xf32> to vector<2x32xf32>
    %1547 = arith.mulf %1536, %1546 : vector<2x32xf32>
    %1548 = arith.addf %1545, %1547 : vector<2x32xf32>
    %1549 = math.tanh %1548 : vector<2x32xf32>
    %cst_311 = arith.constant 1.000000e+00 : f32
    %1550 = vector.broadcast %cst_311 : f32 to vector<2x32xf32>
    %1551 = arith.subf %1550, %1544 : vector<2x32xf32>
    %1552 = arith.mulf %1551, %1549 : vector<2x32xf32>
    %1553 = arith.mulf %1544, %1471 : vector<2x32xf32>
    %1554 = arith.addf %1552, %1553 : vector<2x32xf32>
    %cst_312 = arith.constant dense<0.000000e+00> : vector<2x20xf32>
    %1555 = tpu.matmul %1554, %1317, %cst_312 {dimension_numbers = #tpu.dot_dimension_numbers<[1], [0], [0], [1], [0, 0, 1, 1], [], []>} : vector<2x32xf32>, vector<32x20xf32>, vector<2x20xf32> -> vector<2x20xf32>
    %1556 = vector.broadcast %1318 : vector<1x20xf32> to vector<2x20xf32>
    %1557 = arith.addf %1555, %1556 : vector<2x20xf32>
    %cst_313 = arith.constant 0.000000e+00 : f32
    %1558 = vector.broadcast %cst_313 : f32 to vector<2x20xf32>
    %1559 = arith.maximumf %1557, %1558 : vector<2x20xf32>
    %c0_314 = arith.constant 0 : index
    %c2_315 = arith.constant 2 : index
    %c0_316 = arith.constant 0 : index
    %1560 = vector.load %arg4[%c0_314, %c2_315, %c0_316] : memref<2x8x20xf32, #tpu.memory_space<vmem>>, vector<2x1x20xf32>
    %1561 = vector.shape_cast %1560 : vector<2x1x20xf32> to vector<2x20xf32>
    %1562 = vector.shape_cast %1559 : vector<2x20xf32> to vector<2x1x20xf32>
    tpu.vector_store %arg4[%c0_314, %c2_315, %c0_316], %1562 {strides = array<i32>} : memref<2x8x20xf32, #tpu.memory_space<vmem>>, vector<2x1x20xf32>,
    %cst_317 = arith.constant dense<0xFF800000> : vector<2xf32>
    %1563 = vector.multi_reduction <maximumf>, %1559, %cst_317 [1] : vector<2x20xf32> to vector<2xf32>
    %1564 = vector.shape_cast %1563 : vector<2xf32> to vector<2x1xf32>
    %1565 = vector.broadcast %1564 : vector<2x1xf32> to vector<2x20xf32>
    %1566 = arith.cmpf oeq, %1559, %1565 : vector<2x20xf32>
    %c20_i32_318 = arith.constant 20 : i32
    %1567 = vector.broadcast %c20_i32_318 : i32 to vector<2x20xi32>
    %1568 = arith.select %1566, %1319, %1567 : vector<2x20xi1>, vector<2x20xi32>
    %cst_319 = arith.constant dense<2147483647> : vector<2xi32>
    %1569 = vector.multi_reduction <minsi>, %1568, %cst_319 [1] : vector<2x20xi32> to vector<2xi32>
    %1570 = vector.shape_cast %1569 : vector<2xi32> to vector<2x1xi32>
    %1571 = vector.broadcast %1570 : vector<2x1xi32> to vector<2x20xi32>
    %1572 = arith.cmpi eq, %1319, %1571 : vector<2x20xi32>
    %1573 = arith.extui %1572 : vector<2x20xi1> to vector<2x20xi32>
    %1574 = arith.sitofp %1573 : vector<2x20xi32> to vector<2x20xf32>
    %cst_320 = arith.constant dense<0.000000e+00> : vector<2x96xf32>
    %1575 = tpu.matmul %1574, %1311, %cst_320 {dimension_numbers = #tpu.dot_dimension_numbers<[1], [0], [0], [1], [0, 0, 1, 1], [], []>} : vector<2x20xf32>, vector<20x96xf32>, vector<2x96xf32> -> vector<2x96xf32>
    %1576 = arith.addf %1575, %1325 : vector<2x96xf32>
    %cst_321 = arith.constant dense<0.000000e+00> : vector<2x96xf32>
    %1577 = tpu.matmul %1522, %1314, %cst_321 {dimension_numbers = #tpu.dot_dimension_numbers<[1], [0], [0], [1], [0, 0, 1, 1], [], []>} : vector<2x32xf32>, vector<32x96xf32>, vector<2x96xf32> -> vector<2x96xf32>
    %1578 = vector.broadcast %1267 : vector<1x96xf32> to vector<2x96xf32>
    %1579 = arith.addf %1577, %1578 : vector<2x96xf32>
    %1580 = vector.extract_strided_slice %1576 {offsets = [0, 0], sizes = [2, 32], strides = [1, 1]} : vector<2x96xf32> to vector<2x32xf32>
    %1581 = vector.extract_strided_slice %1579 {offsets = [0, 0], sizes = [2, 32], strides = [1, 1]} : vector<2x96xf32> to vector<2x32xf32>
    %1582 = arith.addf %1580, %1581 : vector<2x32xf32>
    %1583 = arith.negf %1582 : vector<2x32xf32>
    %1584 = math.exp %1583 : vector<2x32xf32>
    %cst_322 = arith.constant 1.000000e+00 : f32
    %1585 = vector.broadcast %cst_322 : f32 to vector<2x32xf32>
    %1586 = arith.addf %1585, %1584 : vector<2x32xf32>
    %1587 = arith.divf %1585, %1586 : vector<2x32xf32>
    %1588 = vector.extract_strided_slice %1576 {offsets = [0, 32], sizes = [2, 32], strides = [1, 1]} : vector<2x96xf32> to vector<2x32xf32>
    %1589 = vector.extract_strided_slice %1579 {offsets = [0, 32], sizes = [2, 32], strides = [1, 1]} : vector<2x96xf32> to vector<2x32xf32>
    %1590 = arith.addf %1588, %1589 : vector<2x32xf32>
    %1591 = arith.negf %1590 : vector<2x32xf32>
    %1592 = math.exp %1591 : vector<2x32xf32>
    %cst_323 = arith.constant 1.000000e+00 : f32
    %1593 = vector.broadcast %cst_323 : f32 to vector<2x32xf32>
    %1594 = arith.addf %1593, %1592 : vector<2x32xf32>
    %1595 = arith.divf %1593, %1594 : vector<2x32xf32>
    %1596 = vector.extract_strided_slice %1576 {offsets = [0, 64], sizes = [2, 32], strides = [1, 1]} : vector<2x96xf32> to vector<2x32xf32>
    %1597 = vector.extract_strided_slice %1579 {offsets = [0, 64], sizes = [2, 32], strides = [1, 1]} : vector<2x96xf32> to vector<2x32xf32>
    %1598 = arith.mulf %1587, %1597 : vector<2x32xf32>
    %1599 = arith.addf %1596, %1598 : vector<2x32xf32>
    %1600 = math.tanh %1599 : vector<2x32xf32>
    %cst_324 = arith.constant 1.000000e+00 : f32
    %1601 = vector.broadcast %cst_324 : f32 to vector<2x32xf32>
    %1602 = arith.subf %1601, %1595 : vector<2x32xf32>
    %1603 = arith.mulf %1602, %1600 : vector<2x32xf32>
    %1604 = arith.mulf %1595, %1522 : vector<2x32xf32>
    %1605 = arith.addf %1603, %1604 : vector<2x32xf32>
    %cst_325 = arith.constant dense<0.000000e+00> : vector<2x96xf32>
    %1606 = tpu.matmul %1605, %1315, %cst_325 {dimension_numbers = #tpu.dot_dimension_numbers<[1], [0], [0], [1], [0, 0, 1, 1], [], []>} : vector<2x32xf32>, vector<32x96xf32>, vector<2x96xf32> -> vector<2x96xf32>
    %1607 = vector.broadcast %1269 : vector<1x96xf32> to vector<2x96xf32>
    %1608 = arith.addf %1606, %1607 : vector<2x96xf32>
    %cst_326 = arith.constant dense<0.000000e+00> : vector<2x96xf32>
    %1609 = tpu.matmul %1554, %1316, %cst_326 {dimension_numbers = #tpu.dot_dimension_numbers<[1], [0], [0], [1], [0, 0, 1, 1], [], []>} : vector<2x32xf32>, vector<32x96xf32>, vector<2x96xf32> -> vector<2x96xf32>
    %1610 = vector.broadcast %1270 : vector<1x96xf32> to vector<2x96xf32>
    %1611 = arith.addf %1609, %1610 : vector<2x96xf32>
    %1612 = vector.extract_strided_slice %1608 {offsets = [0, 0], sizes = [2, 32], strides = [1, 1]} : vector<2x96xf32> to vector<2x32xf32>
    %1613 = vector.extract_strided_slice %1611 {offsets = [0, 0], sizes = [2, 32], strides = [1, 1]} : vector<2x96xf32> to vector<2x32xf32>
    %1614 = arith.addf %1612, %1613 : vector<2x32xf32>
    %1615 = arith.negf %1614 : vector<2x32xf32>
    %1616 = math.exp %1615 : vector<2x32xf32>
    %cst_327 = arith.constant 1.000000e+00 : f32
    %1617 = vector.broadcast %cst_327 : f32 to vector<2x32xf32>
    %1618 = arith.addf %1617, %1616 : vector<2x32xf32>
    %1619 = arith.divf %1617, %1618 : vector<2x32xf32>
    %1620 = vector.extract_strided_slice %1608 {offsets = [0, 32], sizes = [2, 32], strides = [1, 1]} : vector<2x96xf32> to vector<2x32xf32>
    %1621 = vector.extract_strided_slice %1611 {offsets = [0, 32], sizes = [2, 32], strides = [1, 1]} : vector<2x96xf32> to vector<2x32xf32>
    %1622 = arith.addf %1620, %1621 : vector<2x32xf32>
    %1623 = arith.negf %1622 : vector<2x32xf32>
    %1624 = math.exp %1623 : vector<2x32xf32>
    %cst_328 = arith.constant 1.000000e+00 : f32
    %1625 = vector.broadcast %cst_328 : f32 to vector<2x32xf32>
    %1626 = arith.addf %1625, %1624 : vector<2x32xf32>
    %1627 = arith.divf %1625, %1626 : vector<2x32xf32>
    %1628 = vector.extract_strided_slice %1608 {offsets = [0, 64], sizes = [2, 32], strides = [1, 1]} : vector<2x96xf32> to vector<2x32xf32>
    %1629 = vector.extract_strided_slice %1611 {offsets = [0, 64], sizes = [2, 32], strides = [1, 1]} : vector<2x96xf32> to vector<2x32xf32>
    %1630 = arith.mulf %1619, %1629 : vector<2x32xf32>
    %1631 = arith.addf %1628, %1630 : vector<2x32xf32>
    %1632 = math.tanh %1631 : vector<2x32xf32>
    %cst_329 = arith.constant 1.000000e+00 : f32
    %1633 = vector.broadcast %cst_329 : f32 to vector<2x32xf32>
    %1634 = arith.subf %1633, %1627 : vector<2x32xf32>
    %1635 = arith.mulf %1634, %1632 : vector<2x32xf32>
    %1636 = arith.mulf %1627, %1554 : vector<2x32xf32>
    %1637 = arith.addf %1635, %1636 : vector<2x32xf32>
    %cst_330 = arith.constant dense<0.000000e+00> : vector<2x20xf32>
    %1638 = tpu.matmul %1637, %1317, %cst_330 {dimension_numbers = #tpu.dot_dimension_numbers<[1], [0], [0], [1], [0, 0, 1, 1], [], []>} : vector<2x32xf32>, vector<32x20xf32>, vector<2x20xf32> -> vector<2x20xf32>
    %1639 = vector.broadcast %1318 : vector<1x20xf32> to vector<2x20xf32>
    %1640 = arith.addf %1638, %1639 : vector<2x20xf32>
    %cst_331 = arith.constant 0.000000e+00 : f32
    %1641 = vector.broadcast %cst_331 : f32 to vector<2x20xf32>
    %1642 = arith.maximumf %1640, %1641 : vector<2x20xf32>
    %c0_332 = arith.constant 0 : index
    %c3_333 = arith.constant 3 : index
    %c0_334 = arith.constant 0 : index
    %1643 = vector.load %arg4[%c0_332, %c3_333, %c0_334] : memref<2x8x20xf32, #tpu.memory_space<vmem>>, vector<2x1x20xf32>
    %1644 = vector.shape_cast %1643 : vector<2x1x20xf32> to vector<2x20xf32>
    %1645 = vector.shape_cast %1642 : vector<2x20xf32> to vector<2x1x20xf32>
    tpu.vector_store %arg4[%c0_332, %c3_333, %c0_334], %1645 {strides = array<i32>} : memref<2x8x20xf32, #tpu.memory_space<vmem>>, vector<2x1x20xf32>,
    %cst_335 = arith.constant dense<0xFF800000> : vector<2xf32>
    %1646 = vector.multi_reduction <maximumf>, %1642, %cst_335 [1] : vector<2x20xf32> to vector<2xf32>
    %1647 = vector.shape_cast %1646 : vector<2xf32> to vector<2x1xf32>
    %1648 = vector.broadcast %1647 : vector<2x1xf32> to vector<2x20xf32>
    %1649 = arith.cmpf oeq, %1642, %1648 : vector<2x20xf32>
    %c20_i32_336 = arith.constant 20 : i32
    %1650 = vector.broadcast %c20_i32_336 : i32 to vector<2x20xi32>
    %1651 = arith.select %1649, %1319, %1650 : vector<2x20xi1>, vector<2x20xi32>
    %cst_337 = arith.constant dense<2147483647> : vector<2xi32>
    %1652 = vector.multi_reduction <minsi>, %1651, %cst_337 [1] : vector<2x20xi32> to vector<2xi32>
    %1653 = vector.shape_cast %1652 : vector<2xi32> to vector<2x1xi32>
    %1654 = vector.broadcast %1653 : vector<2x1xi32> to vector<2x20xi32>
    %1655 = arith.cmpi eq, %1319, %1654 : vector<2x20xi32>
    %1656 = arith.extui %1655 : vector<2x20xi1> to vector<2x20xi32>
    %1657 = arith.sitofp %1656 : vector<2x20xi32> to vector<2x20xf32>
    %cst_338 = arith.constant dense<0.000000e+00> : vector<2x96xf32>
    %1658 = tpu.matmul %1657, %1311, %cst_338 {dimension_numbers = #tpu.dot_dimension_numbers<[1], [0], [0], [1], [0, 0, 1, 1], [], []>} : vector<2x20xf32>, vector<20x96xf32>, vector<2x96xf32> -> vector<2x96xf32>
    %1659 = vector.extract_strided_slice %1288 {offsets = [0, 1, 0], sizes = [2, 1, 32], strides = [1, 1, 1]} : vector<2x2x64xf32> to vector<2x1x32xf32>
    %1660 = vector.shape_cast %1659 : vector<2x1x32xf32> to vector<2x32xf32>
    %1661 = vector.extract_strided_slice %1288 {offsets = [0, 1, 32], sizes = [2, 1, 32], strides = [1, 1, 1]} : vector<2x2x64xf32> to vector<2x1x32xf32>
    %1662 = vector.shape_cast %1661 : vector<2x1x32xf32> to vector<2x32xf32>
    %1663 = vector.extract_strided_slice %1308 {offsets = [0, 1, 0], sizes = [2, 1, 96], strides = [1, 1, 1]} : vector<2x2x96xf32> to vector<2x1x96xf32>
    %1664 = vector.shape_cast %1663 : vector<2x1x96xf32> to vector<2x96xf32>
    %1665 = arith.addf %1658, %1664 : vector<2x96xf32>
    %cst_339 = arith.constant dense<0.000000e+00> : vector<2x96xf32>
    %1666 = tpu.matmul %1660, %1314, %cst_339 {dimension_numbers = #tpu.dot_dimension_numbers<[1], [0], [0], [1], [0, 0, 1, 1], [], []>} : vector<2x32xf32>, vector<32x96xf32>, vector<2x96xf32> -> vector<2x96xf32>
    %1667 = vector.broadcast %1267 : vector<1x96xf32> to vector<2x96xf32>
    %1668 = arith.addf %1666, %1667 : vector<2x96xf32>
    %1669 = vector.extract_strided_slice %1665 {offsets = [0, 0], sizes = [2, 32], strides = [1, 1]} : vector<2x96xf32> to vector<2x32xf32>
    %1670 = vector.extract_strided_slice %1668 {offsets = [0, 0], sizes = [2, 32], strides = [1, 1]} : vector<2x96xf32> to vector<2x32xf32>
    %1671 = arith.addf %1669, %1670 : vector<2x32xf32>
    %1672 = arith.negf %1671 : vector<2x32xf32>
    %1673 = math.exp %1672 : vector<2x32xf32>
    %cst_340 = arith.constant 1.000000e+00 : f32
    %1674 = vector.broadcast %cst_340 : f32 to vector<2x32xf32>
    %1675 = arith.addf %1674, %1673 : vector<2x32xf32>
    %1676 = arith.divf %1674, %1675 : vector<2x32xf32>
    %1677 = vector.extract_strided_slice %1665 {offsets = [0, 32], sizes = [2, 32], strides = [1, 1]} : vector<2x96xf32> to vector<2x32xf32>
    %1678 = vector.extract_strided_slice %1668 {offsets = [0, 32], sizes = [2, 32], strides = [1, 1]} : vector<2x96xf32> to vector<2x32xf32>
    %1679 = arith.addf %1677, %1678 : vector<2x32xf32>
    %1680 = arith.negf %1679 : vector<2x32xf32>
    %1681 = math.exp %1680 : vector<2x32xf32>
    %cst_341 = arith.constant 1.000000e+00 : f32
    %1682 = vector.broadcast %cst_341 : f32 to vector<2x32xf32>
    %1683 = arith.addf %1682, %1681 : vector<2x32xf32>
    %1684 = arith.divf %1682, %1683 : vector<2x32xf32>
    %1685 = vector.extract_strided_slice %1665 {offsets = [0, 64], sizes = [2, 32], strides = [1, 1]} : vector<2x96xf32> to vector<2x32xf32>
    %1686 = vector.extract_strided_slice %1668 {offsets = [0, 64], sizes = [2, 32], strides = [1, 1]} : vector<2x96xf32> to vector<2x32xf32>
    %1687 = arith.mulf %1676, %1686 : vector<2x32xf32>
    %1688 = arith.addf %1685, %1687 : vector<2x32xf32>
    %1689 = math.tanh %1688 : vector<2x32xf32>
    %cst_342 = arith.constant 1.000000e+00 : f32
    %1690 = vector.broadcast %cst_342 : f32 to vector<2x32xf32>
    %1691 = arith.subf %1690, %1684 : vector<2x32xf32>
    %1692 = arith.mulf %1691, %1689 : vector<2x32xf32>
    %1693 = arith.mulf %1684, %1660 : vector<2x32xf32>
    %1694 = arith.addf %1692, %1693 : vector<2x32xf32>
    %cst_343 = arith.constant dense<0.000000e+00> : vector<2x96xf32>
    %1695 = tpu.matmul %1694, %1315, %cst_343 {dimension_numbers = #tpu.dot_dimension_numbers<[1], [0], [0], [1], [0, 0, 1, 1], [], []>} : vector<2x32xf32>, vector<32x96xf32>, vector<2x96xf32> -> vector<2x96xf32>
    %1696 = vector.broadcast %1269 : vector<1x96xf32> to vector<2x96xf32>
    %1697 = arith.addf %1695, %1696 : vector<2x96xf32>
    %cst_344 = arith.constant dense<0.000000e+00> : vector<2x96xf32>
    %1698 = tpu.matmul %1662, %1316, %cst_344 {dimension_numbers = #tpu.dot_dimension_numbers<[1], [0], [0], [1], [0, 0, 1, 1], [], []>} : vector<2x32xf32>, vector<32x96xf32>, vector<2x96xf32> -> vector<2x96xf32>
    %1699 = vector.broadcast %1270 : vector<1x96xf32> to vector<2x96xf32>
    %1700 = arith.addf %1698, %1699 : vector<2x96xf32>
    %1701 = vector.extract_strided_slice %1697 {offsets = [0, 0], sizes = [2, 32], strides = [1, 1]} : vector<2x96xf32> to vector<2x32xf32>
    %1702 = vector.extract_strided_slice %1700 {offsets = [0, 0], sizes = [2, 32], strides = [1, 1]} : vector<2x96xf32> to vector<2x32xf32>
    %1703 = arith.addf %1701, %1702 : vector<2x32xf32>
    %1704 = arith.negf %1703 : vector<2x32xf32>
    %1705 = math.exp %1704 : vector<2x32xf32>
    %cst_345 = arith.constant 1.000000e+00 : f32
    %1706 = vector.broadcast %cst_345 : f32 to vector<2x32xf32>
    %1707 = arith.addf %1706, %1705 : vector<2x32xf32>
    %1708 = arith.divf %1706, %1707 : vector<2x32xf32>
    %1709 = vector.extract_strided_slice %1697 {offsets = [0, 32], sizes = [2, 32], strides = [1, 1]} : vector<2x96xf32> to vector<2x32xf32>
    %1710 = vector.extract_strided_slice %1700 {offsets = [0, 32], sizes = [2, 32], strides = [1, 1]} : vector<2x96xf32> to vector<2x32xf32>
    %1711 = arith.addf %1709, %1710 : vector<2x32xf32>
    %1712 = arith.negf %1711 : vector<2x32xf32>
    %1713 = math.exp %1712 : vector<2x32xf32>
    %cst_346 = arith.constant 1.000000e+00 : f32
    %1714 = vector.broadcast %cst_346 : f32 to vector<2x32xf32>
    %1715 = arith.addf %1714, %1713 : vector<2x32xf32>
    %1716 = arith.divf %1714, %1715 : vector<2x32xf32>
    %1717 = vector.extract_strided_slice %1697 {offsets = [0, 64], sizes = [2, 32], strides = [1, 1]} : vector<2x96xf32> to vector<2x32xf32>
    %1718 = vector.extract_strided_slice %1700 {offsets = [0, 64], sizes = [2, 32], strides = [1, 1]} : vector<2x96xf32> to vector<2x32xf32>
    %1719 = arith.mulf %1708, %1718 : vector<2x32xf32>
    %1720 = arith.addf %1717, %1719 : vector<2x32xf32>
    %1721 = math.tanh %1720 : vector<2x32xf32>
    %cst_347 = arith.constant 1.000000e+00 : f32
    %1722 = vector.broadcast %cst_347 : f32 to vector<2x32xf32>
    %1723 = arith.subf %1722, %1716 : vector<2x32xf32>
    %1724 = arith.mulf %1723, %1721 : vector<2x32xf32>
    %1725 = arith.mulf %1716, %1662 : vector<2x32xf32>
    %1726 = arith.addf %1724, %1725 : vector<2x32xf32>
    %cst_348 = arith.constant dense<0.000000e+00> : vector<2x20xf32>
    %1727 = tpu.matmul %1726, %1317, %cst_348 {dimension_numbers = #tpu.dot_dimension_numbers<[1], [0], [0], [1], [0, 0, 1, 1], [], []>} : vector<2x32xf32>, vector<32x20xf32>, vector<2x20xf32> -> vector<2x20xf32>
    %1728 = vector.broadcast %1318 : vector<1x20xf32> to vector<2x20xf32>
    %1729 = arith.addf %1727, %1728 : vector<2x20xf32>
    %cst_349 = arith.constant 0.000000e+00 : f32
    %1730 = vector.broadcast %cst_349 : f32 to vector<2x20xf32>
    %1731 = arith.maximumf %1729, %1730 : vector<2x20xf32>
    %c0_350 = arith.constant 0 : index
    %c4_351 = arith.constant 4 : index
    %c0_352 = arith.constant 0 : index
    %1732 = vector.load %arg4[%c0_350, %c4_351, %c0_352] : memref<2x8x20xf32, #tpu.memory_space<vmem>>, vector<2x1x20xf32>
    %1733 = vector.shape_cast %1732 : vector<2x1x20xf32> to vector<2x20xf32>
    %1734 = vector.shape_cast %1731 : vector<2x20xf32> to vector<2x1x20xf32>
    tpu.vector_store %arg4[%c0_350, %c4_351, %c0_352], %1734 {strides = array<i32>} : memref<2x8x20xf32, #tpu.memory_space<vmem>>, vector<2x1x20xf32>,
    %cst_353 = arith.constant dense<0xFF800000> : vector<2xf32>
    %1735 = vector.multi_reduction <maximumf>, %1731, %cst_353 [1] : vector<2x20xf32> to vector<2xf32>
    %1736 = vector.shape_cast %1735 : vector<2xf32> to vector<2x1xf32>
    %1737 = vector.broadcast %1736 : vector<2x1xf32> to vector<2x20xf32>
    %1738 = arith.cmpf oeq, %1731, %1737 : vector<2x20xf32>
    %c20_i32_354 = arith.constant 20 : i32
    %1739 = vector.broadcast %c20_i32_354 : i32 to vector<2x20xi32>
    %1740 = arith.select %1738, %1319, %1739 : vector<2x20xi1>, vector<2x20xi32>
    %cst_355 = arith.constant dense<2147483647> : vector<2xi32>
    %1741 = vector.multi_reduction <minsi>, %1740, %cst_355 [1] : vector<2x20xi32> to vector<2xi32>
    %1742 = vector.shape_cast %1741 : vector<2xi32> to vector<2x1xi32>
    %1743 = vector.broadcast %1742 : vector<2x1xi32> to vector<2x20xi32>
    %1744 = arith.cmpi eq, %1319, %1743 : vector<2x20xi32>
    %1745 = arith.extui %1744 : vector<2x20xi1> to vector<2x20xi32>
    %1746 = arith.sitofp %1745 : vector<2x20xi32> to vector<2x20xf32>
    %cst_356 = arith.constant dense<0.000000e+00> : vector<2x96xf32>
    %1747 = tpu.matmul %1746, %1311, %cst_356 {dimension_numbers = #tpu.dot_dimension_numbers<[1], [0], [0], [1], [0, 0, 1, 1], [], []>} : vector<2x20xf32>, vector<20x96xf32>, vector<2x96xf32> -> vector<2x96xf32>
    %1748 = arith.addf %1747, %1664 : vector<2x96xf32>
    %cst_357 = arith.constant dense<0.000000e+00> : vector<2x96xf32>
    %1749 = tpu.matmul %1694, %1314, %cst_357 {dimension_numbers = #tpu.dot_dimension_numbers<[1], [0], [0], [1], [0, 0, 1, 1], [], []>} : vector<2x32xf32>, vector<32x96xf32>, vector<2x96xf32> -> vector<2x96xf32>
    %1750 = vector.broadcast %1267 : vector<1x96xf32> to vector<2x96xf32>
    %1751 = arith.addf %1749, %1750 : vector<2x96xf32>
    %1752 = vector.extract_strided_slice %1748 {offsets = [0, 0], sizes = [2, 32], strides = [1, 1]} : vector<2x96xf32> to vector<2x32xf32>
    %1753 = vector.extract_strided_slice %1751 {offsets = [0, 0], sizes = [2, 32], strides = [1, 1]} : vector<2x96xf32> to vector<2x32xf32>
    %1754 = arith.addf %1752, %1753 : vector<2x32xf32>
    %1755 = arith.negf %1754 : vector<2x32xf32>
    %1756 = math.exp %1755 : vector<2x32xf32>
    %cst_358 = arith.constant 1.000000e+00 : f32
    %1757 = vector.broadcast %cst_358 : f32 to vector<2x32xf32>
    %1758 = arith.addf %1757, %1756 : vector<2x32xf32>
    %1759 = arith.divf %1757, %1758 : vector<2x32xf32>
    %1760 = vector.extract_strided_slice %1748 {offsets = [0, 32], sizes = [2, 32], strides = [1, 1]} : vector<2x96xf32> to vector<2x32xf32>
    %1761 = vector.extract_strided_slice %1751 {offsets = [0, 32], sizes = [2, 32], strides = [1, 1]} : vector<2x96xf32> to vector<2x32xf32>
    %1762 = arith.addf %1760, %1761 : vector<2x32xf32>
    %1763 = arith.negf %1762 : vector<2x32xf32>
    %1764 = math.exp %1763 : vector<2x32xf32>
    %cst_359 = arith.constant 1.000000e+00 : f32
    %1765 = vector.broadcast %cst_359 : f32 to vector<2x32xf32>
    %1766 = arith.addf %1765, %1764 : vector<2x32xf32>
    %1767 = arith.divf %1765, %1766 : vector<2x32xf32>
    %1768 = vector.extract_strided_slice %1748 {offsets = [0, 64], sizes = [2, 32], strides = [1, 1]} : vector<2x96xf32> to vector<2x32xf32>
    %1769 = vector.extract_strided_slice %1751 {offsets = [0, 64], sizes = [2, 32], strides = [1, 1]} : vector<2x96xf32> to vector<2x32xf32>
    %1770 = arith.mulf %1759, %1769 : vector<2x32xf32>
    %1771 = arith.addf %1768, %1770 : vector<2x32xf32>
    %1772 = math.tanh %1771 : vector<2x32xf32>
    %cst_360 = arith.constant 1.000000e+00 : f32
    %1773 = vector.broadcast %cst_360 : f32 to vector<2x32xf32>
    %1774 = arith.subf %1773, %1767 : vector<2x32xf32>
    %1775 = arith.mulf %1774, %1772 : vector<2x32xf32>
    %1776 = arith.mulf %1767, %1694 : vector<2x32xf32>
    %1777 = arith.addf %1775, %1776 : vector<2x32xf32>
    %cst_361 = arith.constant dense<0.000000e+00> : vector<2x96xf32>
    %1778 = tpu.matmul %1777, %1315, %cst_361 {dimension_numbers = #tpu.dot_dimension_numbers<[1], [0], [0], [1], [0, 0, 1, 1], [], []>} : vector<2x32xf32>, vector<32x96xf32>, vector<2x96xf32> -> vector<2x96xf32>
    %1779 = vector.broadcast %1269 : vector<1x96xf32> to vector<2x96xf32>
    %1780 = arith.addf %1778, %1779 : vector<2x96xf32>
    %cst_362 = arith.constant dense<0.000000e+00> : vector<2x96xf32>
    %1781 = tpu.matmul %1726, %1316, %cst_362 {dimension_numbers = #tpu.dot_dimension_numbers<[1], [0], [0], [1], [0, 0, 1, 1], [], []>} : vector<2x32xf32>, vector<32x96xf32>, vector<2x96xf32> -> vector<2x96xf32>
    %1782 = vector.broadcast %1270 : vector<1x96xf32> to vector<2x96xf32>
    %1783 = arith.addf %1781, %1782 : vector<2x96xf32>
    %1784 = vector.extract_strided_slice %1780 {offsets = [0, 0], sizes = [2, 32], strides = [1, 1]} : vector<2x96xf32> to vector<2x32xf32>
    %1785 = vector.extract_strided_slice %1783 {offsets = [0, 0], sizes = [2, 32], strides = [1, 1]} : vector<2x96xf32> to vector<2x32xf32>
    %1786 = arith.addf %1784, %1785 : vector<2x32xf32>
    %1787 = arith.negf %1786 : vector<2x32xf32>
    %1788 = math.exp %1787 : vector<2x32xf32>
    %cst_363 = arith.constant 1.000000e+00 : f32
    %1789 = vector.broadcast %cst_363 : f32 to vector<2x32xf32>
    %1790 = arith.addf %1789, %1788 : vector<2x32xf32>
    %1791 = arith.divf %1789, %1790 : vector<2x32xf32>
    %1792 = vector.extract_strided_slice %1780 {offsets = [0, 32], sizes = [2, 32], strides = [1, 1]} : vector<2x96xf32> to vector<2x32xf32>
    %1793 = vector.extract_strided_slice %1783 {offsets = [0, 32], sizes = [2, 32], strides = [1, 1]} : vector<2x96xf32> to vector<2x32xf32>
    %1794 = arith.addf %1792, %1793 : vector<2x32xf32>
    %1795 = arith.negf %1794 : vector<2x32xf32>
    %1796 = math.exp %1795 : vector<2x32xf32>
    %cst_364 = arith.constant 1.000000e+00 : f32
    %1797 = vector.broadcast %cst_364 : f32 to vector<2x32xf32>
    %1798 = arith.addf %1797, %1796 : vector<2x32xf32>
    %1799 = arith.divf %1797, %1798 : vector<2x32xf32>
    %1800 = vector.extract_strided_slice %1780 {offsets = [0, 64], sizes = [2, 32], strides = [1, 1]} : vector<2x96xf32> to vector<2x32xf32>
    %1801 = vector.extract_strided_slice %1783 {offsets = [0, 64], sizes = [2, 32], strides = [1, 1]} : vector<2x96xf32> to vector<2x32xf32>
    %1802 = arith.mulf %1791, %1801 : vector<2x32xf32>
    %1803 = arith.addf %1800, %1802 : vector<2x32xf32>
    %1804 = math.tanh %1803 : vector<2x32xf32>
    %cst_365 = arith.constant 1.000000e+00 : f32
    %1805 = vector.broadcast %cst_365 : f32 to vector<2x32xf32>
    %1806 = arith.subf %1805, %1799 : vector<2x32xf32>
    %1807 = arith.mulf %1806, %1804 : vector<2x32xf32>
    %1808 = arith.mulf %1799, %1726 : vector<2x32xf32>
    %1809 = arith.addf %1807, %1808 : vector<2x32xf32>
    %cst_366 = arith.constant dense<0.000000e+00> : vector<2x20xf32>
    %1810 = tpu.matmul %1809, %1317, %cst_366 {dimension_numbers = #tpu.dot_dimension_numbers<[1], [0], [0], [1], [0, 0, 1, 1], [], []>} : vector<2x32xf32>, vector<32x20xf32>, vector<2x20xf32> -> vector<2x20xf32>
    %1811 = vector.broadcast %1318 : vector<1x20xf32> to vector<2x20xf32>
    %1812 = arith.addf %1810, %1811 : vector<2x20xf32>
    %cst_367 = arith.constant 0.000000e+00 : f32
    %1813 = vector.broadcast %cst_367 : f32 to vector<2x20xf32>
    %1814 = arith.maximumf %1812, %1813 : vector<2x20xf32>
    %c0_368 = arith.constant 0 : index
    %c5_369 = arith.constant 5 : index
    %c0_370 = arith.constant 0 : index
    %1815 = vector.load %arg4[%c0_368, %c5_369, %c0_370] : memref<2x8x20xf32, #tpu.memory_space<vmem>>, vector<2x1x20xf32>
    %1816 = vector.shape_cast %1815 : vector<2x1x20xf32> to vector<2x20xf32>
    %1817 = vector.shape_cast %1814 : vector<2x20xf32> to vector<2x1x20xf32>
    tpu.vector_store %arg4[%c0_368, %c5_369, %c0_370], %1817 {strides = array<i32>} : memref<2x8x20xf32, #tpu.memory_space<vmem>>, vector<2x1x20xf32>,
    %cst_371 = arith.constant dense<0xFF800000> : vector<2xf32>
    %1818 = vector.multi_reduction <maximumf>, %1814, %cst_371 [1] : vector<2x20xf32> to vector<2xf32>
    %1819 = vector.shape_cast %1818 : vector<2xf32> to vector<2x1xf32>
    %1820 = vector.broadcast %1819 : vector<2x1xf32> to vector<2x20xf32>
    %1821 = arith.cmpf oeq, %1814, %1820 : vector<2x20xf32>
    %c20_i32_372 = arith.constant 20 : i32
    %1822 = vector.broadcast %c20_i32_372 : i32 to vector<2x20xi32>
    %1823 = arith.select %1821, %1319, %1822 : vector<2x20xi1>, vector<2x20xi32>
    %cst_373 = arith.constant dense<2147483647> : vector<2xi32>
    %1824 = vector.multi_reduction <minsi>, %1823, %cst_373 [1] : vector<2x20xi32> to vector<2xi32>
    %1825 = vector.shape_cast %1824 : vector<2xi32> to vector<2x1xi32>
    %1826 = vector.broadcast %1825 : vector<2x1xi32> to vector<2x20xi32>
    %1827 = arith.cmpi eq, %1319, %1826 : vector<2x20xi32>
    %1828 = arith.extui %1827 : vector<2x20xi1> to vector<2x20xi32>
    %1829 = arith.sitofp %1828 : vector<2x20xi32> to vector<2x20xf32>
    %cst_374 = arith.constant dense<0.000000e+00> : vector<2x96xf32>
    %1830 = tpu.matmul %1829, %1311, %cst_374 {dimension_numbers = #tpu.dot_dimension_numbers<[1], [0], [0], [1], [0, 0, 1, 1], [], []>} : vector<2x20xf32>, vector<20x96xf32>, vector<2x96xf32> -> vector<2x96xf32>
    %1831 = arith.addf %1830, %1664 : vector<2x96xf32>
    %cst_375 = arith.constant dense<0.000000e+00> : vector<2x96xf32>
    %1832 = tpu.matmul %1777, %1314, %cst_375 {dimension_numbers = #tpu.dot_dimension_numbers<[1], [0], [0], [1], [0, 0, 1, 1], [], []>} : vector<2x32xf32>, vector<32x96xf32>, vector<2x96xf32> -> vector<2x96xf32>
    %1833 = vector.broadcast %1267 : vector<1x96xf32> to vector<2x96xf32>
    %1834 = arith.addf %1832, %1833 : vector<2x96xf32>
    %1835 = vector.extract_strided_slice %1831 {offsets = [0, 0], sizes = [2, 32], strides = [1, 1]} : vector<2x96xf32> to vector<2x32xf32>
    %1836 = vector.extract_strided_slice %1834 {offsets = [0, 0], sizes = [2, 32], strides = [1, 1]} : vector<2x96xf32> to vector<2x32xf32>
    %1837 = arith.addf %1835, %1836 : vector<2x32xf32>
    %1838 = arith.negf %1837 : vector<2x32xf32>
    %1839 = math.exp %1838 : vector<2x32xf32>
    %cst_376 = arith.constant 1.000000e+00 : f32
    %1840 = vector.broadcast %cst_376 : f32 to vector<2x32xf32>
    %1841 = arith.addf %1840, %1839 : vector<2x32xf32>
    %1842 = arith.divf %1840, %1841 : vector<2x32xf32>
    %1843 = vector.extract_strided_slice %1831 {offsets = [0, 32], sizes = [2, 32], strides = [1, 1]} : vector<2x96xf32> to vector<2x32xf32>
    %1844 = vector.extract_strided_slice %1834 {offsets = [0, 32], sizes = [2, 32], strides = [1, 1]} : vector<2x96xf32> to vector<2x32xf32>
    %1845 = arith.addf %1843, %1844 : vector<2x32xf32>
    %1846 = arith.negf %1845 : vector<2x32xf32>
    %1847 = math.exp %1846 : vector<2x32xf32>
    %cst_377 = arith.constant 1.000000e+00 : f32
    %1848 = vector.broadcast %cst_377 : f32 to vector<2x32xf32>
    %1849 = arith.addf %1848, %1847 : vector<2x32xf32>
    %1850 = arith.divf %1848, %1849 : vector<2x32xf32>
    %1851 = vector.extract_strided_slice %1831 {offsets = [0, 64], sizes = [2, 32], strides = [1, 1]} : vector<2x96xf32> to vector<2x32xf32>
    %1852 = vector.extract_strided_slice %1834 {offsets = [0, 64], sizes = [2, 32], strides = [1, 1]} : vector<2x96xf32> to vector<2x32xf32>
    %1853 = arith.mulf %1842, %1852 : vector<2x32xf32>
    %1854 = arith.addf %1851, %1853 : vector<2x32xf32>
    %1855 = math.tanh %1854 : vector<2x32xf32>
    %cst_378 = arith.constant 1.000000e+00 : f32
    %1856 = vector.broadcast %cst_378 : f32 to vector<2x32xf32>
    %1857 = arith.subf %1856, %1850 : vector<2x32xf32>
    %1858 = arith.mulf %1857, %1855 : vector<2x32xf32>
    %1859 = arith.mulf %1850, %1777 : vector<2x32xf32>
    %1860 = arith.addf %1858, %1859 : vector<2x32xf32>
    %cst_379 = arith.constant dense<0.000000e+00> : vector<2x96xf32>
    %1861 = tpu.matmul %1860, %1315, %cst_379 {dimension_numbers = #tpu.dot_dimension_numbers<[1], [0], [0], [1], [0, 0, 1, 1], [], []>} : vector<2x32xf32>, vector<32x96xf32>, vector<2x96xf32> -> vector<2x96xf32>
    %1862 = vector.broadcast %1269 : vector<1x96xf32> to vector<2x96xf32>
    %1863 = arith.addf %1861, %1862 : vector<2x96xf32>
    %cst_380 = arith.constant dense<0.000000e+00> : vector<2x96xf32>
    %1864 = tpu.matmul %1809, %1316, %cst_380 {dimension_numbers = #tpu.dot_dimension_numbers<[1], [0], [0], [1], [0, 0, 1, 1], [], []>} : vector<2x32xf32>, vector<32x96xf32>, vector<2x96xf32> -> vector<2x96xf32>
    %1865 = vector.broadcast %1270 : vector<1x96xf32> to vector<2x96xf32>
    %1866 = arith.addf %1864, %1865 : vector<2x96xf32>
    %1867 = vector.extract_strided_slice %1863 {offsets = [0, 0], sizes = [2, 32], strides = [1, 1]} : vector<2x96xf32> to vector<2x32xf32>
    %1868 = vector.extract_strided_slice %1866 {offsets = [0, 0], sizes = [2, 32], strides = [1, 1]} : vector<2x96xf32> to vector<2x32xf32>
    %1869 = arith.addf %1867, %1868 : vector<2x32xf32>
    %1870 = arith.negf %1869 : vector<2x32xf32>
    %1871 = math.exp %1870 : vector<2x32xf32>
    %cst_381 = arith.constant 1.000000e+00 : f32
    %1872 = vector.broadcast %cst_381 : f32 to vector<2x32xf32>
    %1873 = arith.addf %1872, %1871 : vector<2x32xf32>
    %1874 = arith.divf %1872, %1873 : vector<2x32xf32>
    %1875 = vector.extract_strided_slice %1863 {offsets = [0, 32], sizes = [2, 32], strides = [1, 1]} : vector<2x96xf32> to vector<2x32xf32>
    %1876 = vector.extract_strided_slice %1866 {offsets = [0, 32], sizes = [2, 32], strides = [1, 1]} : vector<2x96xf32> to vector<2x32xf32>
    %1877 = arith.addf %1875, %1876 : vector<2x32xf32>
    %1878 = arith.negf %1877 : vector<2x32xf32>
    %1879 = math.exp %1878 : vector<2x32xf32>
    %cst_382 = arith.constant 1.000000e+00 : f32
    %1880 = vector.broadcast %cst_382 : f32 to vector<2x32xf32>
    %1881 = arith.addf %1880, %1879 : vector<2x32xf32>
    %1882 = arith.divf %1880, %1881 : vector<2x32xf32>
    %1883 = vector.extract_strided_slice %1863 {offsets = [0, 64], sizes = [2, 32], strides = [1, 1]} : vector<2x96xf32> to vector<2x32xf32>
    %1884 = vector.extract_strided_slice %1866 {offsets = [0, 64], sizes = [2, 32], strides = [1, 1]} : vector<2x96xf32> to vector<2x32xf32>
    %1885 = arith.mulf %1874, %1884 : vector<2x32xf32>
    %1886 = arith.addf %1883, %1885 : vector<2x32xf32>
    %1887 = math.tanh %1886 : vector<2x32xf32>
    %cst_383 = arith.constant 1.000000e+00 : f32
    %1888 = vector.broadcast %cst_383 : f32 to vector<2x32xf32>
    %1889 = arith.subf %1888, %1882 : vector<2x32xf32>
    %1890 = arith.mulf %1889, %1887 : vector<2x32xf32>
    %1891 = arith.mulf %1882, %1809 : vector<2x32xf32>
    %1892 = arith.addf %1890, %1891 : vector<2x32xf32>
    %cst_384 = arith.constant dense<0.000000e+00> : vector<2x20xf32>
    %1893 = tpu.matmul %1892, %1317, %cst_384 {dimension_numbers = #tpu.dot_dimension_numbers<[1], [0], [0], [1], [0, 0, 1, 1], [], []>} : vector<2x32xf32>, vector<32x20xf32>, vector<2x20xf32> -> vector<2x20xf32>
    %1894 = vector.broadcast %1318 : vector<1x20xf32> to vector<2x20xf32>
    %1895 = arith.addf %1893, %1894 : vector<2x20xf32>
    %cst_385 = arith.constant 0.000000e+00 : f32
    %1896 = vector.broadcast %cst_385 : f32 to vector<2x20xf32>
    %1897 = arith.maximumf %1895, %1896 : vector<2x20xf32>
    %c0_386 = arith.constant 0 : index
    %c6_387 = arith.constant 6 : index
    %c0_388 = arith.constant 0 : index
    %1898 = vector.load %arg4[%c0_386, %c6_387, %c0_388] : memref<2x8x20xf32, #tpu.memory_space<vmem>>, vector<2x1x20xf32>
    %1899 = vector.shape_cast %1898 : vector<2x1x20xf32> to vector<2x20xf32>
    %1900 = vector.shape_cast %1897 : vector<2x20xf32> to vector<2x1x20xf32>
    tpu.vector_store %arg4[%c0_386, %c6_387, %c0_388], %1900 {strides = array<i32>} : memref<2x8x20xf32, #tpu.memory_space<vmem>>, vector<2x1x20xf32>,
    %cst_389 = arith.constant dense<0xFF800000> : vector<2xf32>
    %1901 = vector.multi_reduction <maximumf>, %1897, %cst_389 [1] : vector<2x20xf32> to vector<2xf32>
    %1902 = vector.shape_cast %1901 : vector<2xf32> to vector<2x1xf32>
    %1903 = vector.broadcast %1902 : vector<2x1xf32> to vector<2x20xf32>
    %1904 = arith.cmpf oeq, %1897, %1903 : vector<2x20xf32>
    %c20_i32_390 = arith.constant 20 : i32
    %1905 = vector.broadcast %c20_i32_390 : i32 to vector<2x20xi32>
    %1906 = arith.select %1904, %1319, %1905 : vector<2x20xi1>, vector<2x20xi32>
    %cst_391 = arith.constant dense<2147483647> : vector<2xi32>
    %1907 = vector.multi_reduction <minsi>, %1906, %cst_391 [1] : vector<2x20xi32> to vector<2xi32>
    %1908 = vector.shape_cast %1907 : vector<2xi32> to vector<2x1xi32>
    %1909 = vector.broadcast %1908 : vector<2x1xi32> to vector<2x20xi32>
    %1910 = arith.cmpi eq, %1319, %1909 : vector<2x20xi32>
    %1911 = arith.extui %1910 : vector<2x20xi1> to vector<2x20xi32>
    %1912 = arith.sitofp %1911 : vector<2x20xi32> to vector<2x20xf32>
    %cst_392 = arith.constant dense<0.000000e+00> : vector<2x96xf32>
    %1913 = tpu.matmul %1912, %1311, %cst_392 {dimension_numbers = #tpu.dot_dimension_numbers<[1], [0], [0], [1], [0, 0, 1, 1], [], []>} : vector<2x20xf32>, vector<20x96xf32>, vector<2x96xf32> -> vector<2x96xf32>
    %1914 = arith.addf %1913, %1664 : vector<2x96xf32>
    %cst_393 = arith.constant dense<0.000000e+00> : vector<2x96xf32>
    %1915 = tpu.matmul %1860, %1314, %cst_393 {dimension_numbers = #tpu.dot_dimension_numbers<[1], [0], [0], [1], [0, 0, 1, 1], [], []>} : vector<2x32xf32>, vector<32x96xf32>, vector<2x96xf32> -> vector<2x96xf32>
    %1916 = vector.broadcast %1267 : vector<1x96xf32> to vector<2x96xf32>
    %1917 = arith.addf %1915, %1916 : vector<2x96xf32>
    %1918 = vector.extract_strided_slice %1914 {offsets = [0, 0], sizes = [2, 32], strides = [1, 1]} : vector<2x96xf32> to vector<2x32xf32>
    %1919 = vector.extract_strided_slice %1917 {offsets = [0, 0], sizes = [2, 32], strides = [1, 1]} : vector<2x96xf32> to vector<2x32xf32>
    %1920 = arith.addf %1918, %1919 : vector<2x32xf32>
    %1921 = arith.negf %1920 : vector<2x32xf32>
    %1922 = math.exp %1921 : vector<2x32xf32>
    %cst_394 = arith.constant 1.000000e+00 : f32
    %1923 = vector.broadcast %cst_394 : f32 to vector<2x32xf32>
    %1924 = arith.addf %1923, %1922 : vector<2x32xf32>
    %1925 = arith.divf %1923, %1924 : vector<2x32xf32>
    %1926 = vector.extract_strided_slice %1914 {offsets = [0, 32], sizes = [2, 32], strides = [1, 1]} : vector<2x96xf32> to vector<2x32xf32>
    %1927 = vector.extract_strided_slice %1917 {offsets = [0, 32], sizes = [2, 32], strides = [1, 1]} : vector<2x96xf32> to vector<2x32xf32>
    %1928 = arith.addf %1926, %1927 : vector<2x32xf32>
    %1929 = arith.negf %1928 : vector<2x32xf32>
    %1930 = math.exp %1929 : vector<2x32xf32>
    %cst_395 = arith.constant 1.000000e+00 : f32
    %1931 = vector.broadcast %cst_395 : f32 to vector<2x32xf32>
    %1932 = arith.addf %1931, %1930 : vector<2x32xf32>
    %1933 = arith.divf %1931, %1932 : vector<2x32xf32>
    %1934 = vector.extract_strided_slice %1914 {offsets = [0, 64], sizes = [2, 32], strides = [1, 1]} : vector<2x96xf32> to vector<2x32xf32>
    %1935 = vector.extract_strided_slice %1917 {offsets = [0, 64], sizes = [2, 32], strides = [1, 1]} : vector<2x96xf32> to vector<2x32xf32>
    %1936 = arith.mulf %1925, %1935 : vector<2x32xf32>
    %1937 = arith.addf %1934, %1936 : vector<2x32xf32>
    %1938 = math.tanh %1937 : vector<2x32xf32>
    %cst_396 = arith.constant 1.000000e+00 : f32
    %1939 = vector.broadcast %cst_396 : f32 to vector<2x32xf32>
    %1940 = arith.subf %1939, %1933 : vector<2x32xf32>
    %1941 = arith.mulf %1940, %1938 : vector<2x32xf32>
    %1942 = arith.mulf %1933, %1860 : vector<2x32xf32>
    %1943 = arith.addf %1941, %1942 : vector<2x32xf32>
    %cst_397 = arith.constant dense<0.000000e+00> : vector<2x96xf32>
    %1944 = tpu.matmul %1943, %1315, %cst_397 {dimension_numbers = #tpu.dot_dimension_numbers<[1], [0], [0], [1], [0, 0, 1, 1], [], []>} : vector<2x32xf32>, vector<32x96xf32>, vector<2x96xf32> -> vector<2x96xf32>
    %1945 = vector.broadcast %1269 : vector<1x96xf32> to vector<2x96xf32>
    %1946 = arith.addf %1944, %1945 : vector<2x96xf32>
    %cst_398 = arith.constant dense<0.000000e+00> : vector<2x96xf32>
    %1947 = tpu.matmul %1892, %1316, %cst_398 {dimension_numbers = #tpu.dot_dimension_numbers<[1], [0], [0], [1], [0, 0, 1, 1], [], []>} : vector<2x32xf32>, vector<32x96xf32>, vector<2x96xf32> -> vector<2x96xf32>
    %1948 = vector.broadcast %1270 : vector<1x96xf32> to vector<2x96xf32>
    %1949 = arith.addf %1947, %1948 : vector<2x96xf32>
    %1950 = vector.extract_strided_slice %1946 {offsets = [0, 0], sizes = [2, 32], strides = [1, 1]} : vector<2x96xf32> to vector<2x32xf32>
    %1951 = vector.extract_strided_slice %1949 {offsets = [0, 0], sizes = [2, 32], strides = [1, 1]} : vector<2x96xf32> to vector<2x32xf32>
    %1952 = arith.addf %1950, %1951 : vector<2x32xf32>
    %1953 = arith.negf %1952 : vector<2x32xf32>
    %1954 = math.exp %1953 : vector<2x32xf32>
    %cst_399 = arith.constant 1.000000e+00 : f32
    %1955 = vector.broadcast %cst_399 : f32 to vector<2x32xf32>
    %1956 = arith.addf %1955, %1954 : vector<2x32xf32>
    %1957 = arith.divf %1955, %1956 : vector<2x32xf32>
    %1958 = vector.extract_strided_slice %1946 {offsets = [0, 32], sizes = [2, 32], strides = [1, 1]} : vector<2x96xf32> to vector<2x32xf32>
    %1959 = vector.extract_strided_slice %1949 {offsets = [0, 32], sizes = [2, 32], strides = [1, 1]} : vector<2x96xf32> to vector<2x32xf32>
    %1960 = arith.addf %1958, %1959 : vector<2x32xf32>
    %1961 = arith.negf %1960 : vector<2x32xf32>
    %1962 = math.exp %1961 : vector<2x32xf32>
    %cst_400 = arith.constant 1.000000e+00 : f32
    %1963 = vector.broadcast %cst_400 : f32 to vector<2x32xf32>
    %1964 = arith.addf %1963, %1962 : vector<2x32xf32>
    %1965 = arith.divf %1963, %1964 : vector<2x32xf32>
    %1966 = vector.extract_strided_slice %1946 {offsets = [0, 64], sizes = [2, 32], strides = [1, 1]} : vector<2x96xf32> to vector<2x32xf32>
    %1967 = vector.extract_strided_slice %1949 {offsets = [0, 64], sizes = [2, 32], strides = [1, 1]} : vector<2x96xf32> to vector<2x32xf32>
    %1968 = arith.mulf %1957, %1967 : vector<2x32xf32>
    %1969 = arith.addf %1966, %1968 : vector<2x32xf32>
    %1970 = math.tanh %1969 : vector<2x32xf32>
    %cst_401 = arith.constant 1.000000e+00 : f32
    %1971 = vector.broadcast %cst_401 : f32 to vector<2x32xf32>
    %1972 = arith.subf %1971, %1965 : vector<2x32xf32>
    %1973 = arith.mulf %1972, %1970 : vector<2x32xf32>
    %1974 = arith.mulf %1965, %1892 : vector<2x32xf32>
    %1975 = arith.addf %1973, %1974 : vector<2x32xf32>
    %cst_402 = arith.constant dense<0.000000e+00> : vector<2x20xf32>
    %1976 = tpu.matmul %1975, %1317, %cst_402 {dimension_numbers = #tpu.dot_dimension_numbers<[1], [0], [0], [1], [0, 0, 1, 1], [], []>} : vector<2x32xf32>, vector<32x20xf32>, vector<2x20xf32> -> vector<2x20xf32>
    %1977 = vector.broadcast %1318 : vector<1x20xf32> to vector<2x20xf32>
    %1978 = arith.addf %1976, %1977 : vector<2x20xf32>
    %cst_403 = arith.constant 0.000000e+00 : f32
    %1979 = vector.broadcast %cst_403 : f32 to vector<2x20xf32>
    %1980 = arith.maximumf %1978, %1979 : vector<2x20xf32>
    %c0_404 = arith.constant 0 : index
    %c7_405 = arith.constant 7 : index
    %c0_406 = arith.constant 0 : index
    %1981 = vector.load %arg4[%c0_404, %c7_405, %c0_406] : memref<2x8x20xf32, #tpu.memory_space<vmem>>, vector<2x1x20xf32>
    %1982 = vector.shape_cast %1981 : vector<2x1x20xf32> to vector<2x20xf32>
    %1983 = vector.shape_cast %1980 : vector<2x20xf32> to vector<2x1x20xf32>
    tpu.vector_store %arg4[%c0_404, %c7_405, %c0_406], %1983 {strides = array<i32>} : memref<2x8x20xf32, #tpu.memory_space<vmem>>, vector<2x1x20xf32>,
    return
  }
}

</mosaic_0001>

<bundles_post_ra>
// kernel: _lambda_.1
= control target key start
LH: loop header
LB: loop body
LE: loop exit
PB: predicated region body
PF: predicated region fallthrough
CT: control target
= control target key end

     0   :  { %10 = vsyncpa [#allocation5], 0  ;;  %s9035_s0 = inlined_call_operand.vmem [shape: s32[16,1], index: 0, kind: input, shape index: {}]   ;;  %s9036_s1 = inlined_call_operand.vmem [shape: f32[2,64], index: 1, kind: input, shape index: {}]   ;;  %s9037_s2 = inlined_call_operand.hbm [shape: f32[992,128], index: 2, kind: input, shape index: {}]   ;;  %s9038_s3 = inlined_call_operand.vmem [shape: f32[2,128], index: 3, kind: output, shape index: {0}]   ;;  %s9039_s4 = inlined_call_operand.hbm [shape: f32[2,8,20], index: 4, kind: output, shape index: {1}]  }
   0x1   :  { %11 = vsyncpa [#allocation6], 0  ;;  %s20_s17 = sshll.u32 %s9037_s2, 4  ;;  %s7251_s18 = smov [#allocation4]   ;;  %s21_s17 = int_to_ptr.hbm [resolvable:$true] %s20_s17 }
   0x2   :  { %s22_s19 = sshll.u32 %s7251_s18, 4  ;;  %s7252_s20 = smov 128   ;;  %s23_s19 = int_to_ptr.vmem [resolvable:$true] %s22_s19 }
   0x3   :  { %s7253_s21 = smov 8  }
   0x4   :  { %28 = dma.hbm_to_vmem [thread:$0]  %s21_s17, 15872, %s23_s19, [#allocation5], %s7252_s20, %s7252_s20, %s7253_s21  }
   0x5   :  { %7247 = dma.done.wait [#allocation5], 15872  }
   0x6   :  { %7248 = vsyncadd [#allocation5], 4294951424  ;;  %v7254_v0 = vmov 0   ;;  %vm66_vm0 = vcmask 1041408   ;;  %v55_v1 = vld [vmem:[#allocation4 + $0x38] sm:$0x3]  ;;  %v35_v21 = vlaneseq }
   0x7   :  { %6640 = vset.pattern.permute.xlu0 %v7254_v0  ;;  %v132_v2 = vld [vmem:[#allocation4 + $0x70] sm:$0x3]  ;;  %6429 = vmatpush.msk.msra.mxu0 %vm66_vm0, %v55_v1  ;;  %v131_v4 = vld [vmem:[#allocation4 + $0x68] sm:$0xff]  ;;  %v49_v5 = vld [vmem:[#allocation4] sm:$0xff]  ;;  %vm56_vm1 = vcmask 80896   ;;  %vm104_vm2 = vcmask 1043456  }
   0x8   :  { %v54_v3 = vld [vmem:[#allocation4 + $0x30] sm:$0xff]  ;;  %6436 = vmatpush.msk.msra.mxu2 %vm66_vm0, %v132_v2  ;;  %v33_v6 = vld [vmem:[%s9035_s0] sm:$0xff]  ;;  %v7308_v11 = vld [vmem:[#allocation4 + $0x58] sm:$0xff]  ;;  %v7334_v22 = vand.u32 127, %v35_v21  ;;  %v7255_v26 = vmov 0.0   ;;  %vm9040_vm4 = vcmask 162816  }
   0x9   :  { %85 = vmatpush.msra.mxu0 %v54_v3  ;;  %38 = vperm.xlu0 %6640, %v33_v6   ;;  %v50_v7 = vld [vmem:[#allocation4 + $0x8] sm:$0xff]  ;;  %v51_v9 = vld [vmem:[#allocation4 + $0x10] sm:$0xf]  ;;  %v7320_v16 = vld [vmem:[#allocation4 + $0x80] sm:$0xff]  ;;  %s7257_s25 = smov 96   ;;  %s7258_s26 = smov 32  }
   0xa   :  { %151 = vmatpush.msra.mxu2 %v131_v4  ;;  %6430 = vmatmul.msk.f32.vlgmr.msra.gmra.mxu0 %vm56_vm1, %v49_v5  ;;  %v34_v8 = vld [vmem:[%s9035_s0 + $0x8] sm:$0xff]  ;;  %v7322_v17 = vld [vmem:[#allocation4 + $0x40] sm:$0xff]  ;;  %v7326_v19 = vld [vmem:[#allocation4 + $0x78] sm:$0xff]  ;;  %s7256_s0 = smov 64   ;;  %s6412_s7 = sshll.u32 %s9039_s4, 4  ;;  %s6413_s7 = int_to_ptr.hbm [resolvable:$true] %s6412_s7 }
   0xb   :  { %6437 = vmatmul.msk.f32.vlgmr.msra.gmra.mxu2 %vm56_vm1, %v49_v5  ;;  %v7305_v10 = vld [vmem:[#allocation4 + $0x90] sm:$0xff]  ;;  %v7310_v12 = vld [vmem:[#allocation4 + $0x88] sm:$0xff]  ;;  %437 = vmatpush.msrb.mxu0 %v7308_v11  ;;  %v52_v33 = vld [vmem:[#allocation4 + $0x60] sm:$0x3] }
   0xc   :  { %549 = vmatpush.msrb.mxu2 %v7305_v10  ;;  %v7314_v14 = vld [vmem:[#allocation4 + $0x50] sm:$0xff]  ;;  %v7317_v15 = vld [vmem:[#allocation4 + $0x48] sm:$0xff]  ;;  %v7375_v35 = vperm.slane %v52_v33, 1  ;;  %v53_v36 = vld [vmem:[#allocation4 + $0x98] sm:$0x3]  ;;  %v96_v48 = vperm.slane %v52_v33, 0 }
   0xd   :  { %438 = vmatpush.msrb.mxu0 %v7314_v14  ;;  %v162_v39 = vperm.slane %v53_v36, 0  ;;  %v7381_v43 = vperm.slane %v53_v36, 1 }
   0xe   :  { %550 = vmatpush.msrb.mxu2 %v7310_v12 }
   0xf   :  { %439 = vmatpush.msrb.mxu0 %v7317_v15 }
  0x10   :  { %551 = vmatpush.msrb.mxu2 %v7320_v16 }
  0x11   :  { %41 = vperm.xlu0 %6640, %v34_v8   ;;  %440 = vmatpush.msrb.mxu0 %v7322_v17 }
  0x12   :  { %6431 = vmatmul.msk.f32.gmra.mxu0 %vm56_vm1, %v50_v7  ;;  %552 = vmatpush.msrb.mxu2 %v7326_v19 }
  0x13   :  { %6438 = vmatmul.msk.f32.gmra.mxu2 %vm56_vm1, %v50_v7  ;;  %914 = vmatpush.msra.mxu0 %v7308_v11 }
  0x14   :  { %1028 = vmatpush.msra.mxu2 %v7305_v10 }
  0x15   :  { %915 = vmatpush.msra.mxu0 %v7314_v14 }
  0x16   :  { %1029 = vmatpush.msra.mxu2 %v7310_v12 }
  0x17   :  { %916 = vmatpush.msra.mxu0 %v7317_v15 }
  0x18   :  { %1030 = vmatpush.msra.mxu2 %v7320_v16 }
  0x19   :  { %917 = vmatpush.msra.mxu0 %v7322_v17 }
  0x1a   :  { %6432 = vmatmul.msk.f32.gmra.mxu0 %vm56_vm1, %v51_v9  ;;  %1031 = vmatpush.msra.mxu2 %v7326_v19 }
  0x1b   :  { %6439 = vmatmul.msk.f32.gmra.mxu2 %vm56_vm1, %v51_v9 }
  0x7b   :  { %v39_v23 = vpop.permute.xlu0 %38 }
  0x7c   :  { %vm43_vm3 = vcmp.eq.s32.totalorder %v7334_v22, %v39_v23 }
  0x7d   :  { %v6427_v27 = vsel %vm43_vm3, 1.0, %v7255_v26 }
  0x83   :  { %v42_v29 = vpop.permute.xlu0 %41 }
  0x84   :  { %vm44_vm5 = vcmp.eq.s32.totalorder %v7334_v22, %v42_v29 }
  0x85   :  { %v6428_v30 = vsel %vm44_vm5, 1.0, %v7255_v26 }
  0x87   :  { %v87_v13 = vpop.f32.mrf.mxu0 }
  0x8e   :  { %v153_v18 = vpop.f32.mrf.mxu2 }
  0x8f   :  { %v90_v20 = vpop.f32.mrf.mxu0 }
  0x96   :  { %v156_v24 = vpop.f32.mrf.mxu2 }
  0x97   :  { %v93_v25 = vpop.f32.mrf.mxu0 }
  0x98   :  { %6433 = vmatpush.msk.msra.mxu1 %vm104_vm2, %v93_v25 }
  0x9a   :  { %122 = vmatpush.msra.mxu1 %v90_v20 }
  0x9c   :  { %123 = vmatpush.msra.mxu1 %v87_v13 }
  0x9d   :  { %6434 = vmatmul.msk.f32.vlgmr.msra.gmra.mxu1 %vm9040_vm4, %v6427_v27 }
  0x9e   :  { %v159_v28 = vpop.f32.mrf.mxu2  ;;  %214 = vmatpush.msrb.mxu1 %v7308_v11 }
  0x9f   :  { %6440 = vmatpush.msk.msra.mxu3 %vm104_vm2, %v159_v28 }
  0xa0   :  { %215 = vmatpush.msrb.mxu1 %v7314_v14 }
  0xa1   :  { %180 = vmatpush.msra.mxu3 %v156_v24 }
  0xa2   :  { %216 = vmatpush.msrb.mxu1 %v7317_v15 }
  0xa3   :  { %181 = vmatpush.msra.mxu3 %v153_v18 }
  0xa4   :  { %6441 = vmatmul.msk.f32.vlgmr.msra.gmra.mxu3 %vm9040_vm4, %v6427_v27  ;;  %217 = vmatpush.msrb.mxu1 %v7322_v17 }
  0xa5   :  { %315 = vmatpush.msrb.mxu3 %v7305_v10  ;;  %6435 = vmatmul.msk.f32.gmra.mxu1 %vm9040_vm4, %v6428_v30 }
  0xa6   :  { %674 = vmatpush.msra.mxu1 %v7308_v11 }
  0xa7   :  { %316 = vmatpush.msrb.mxu3 %v7310_v12 }
  0xa8   :  { %675 = vmatpush.msra.mxu1 %v7314_v14 }
  0xa9   :  { %317 = vmatpush.msrb.mxu3 %v7320_v16 }
  0xaa   :  { %676 = vmatpush.msra.mxu1 %v7317_v15 }
  0xab   :  { %318 = vmatpush.msrb.mxu3 %v7326_v19 }
  0xac   :  { %6442 = vmatmul.msk.f32.gmra.mxu3 %vm9040_vm4, %v6428_v30  ;;  %677 = vmatpush.msra.mxu1 %v7322_v17 }
  0xad   :  { %788 = vmatpush.msra.mxu3 %v7305_v10  ;;  %218 = vmatmul.f32.vlgmr.msrb.gmra.mxu1 %v7255_v26 }
  0xae   :  { %1154 = vmatpush.msrb.mxu1 %v7308_v11 }
  0xaf   :  { %789 = vmatpush.msra.mxu3 %v7310_v12 }
  0xb0   :  { %1155 = vmatpush.msrb.mxu1 %v7314_v14 }
  0xb1   :  { %790 = vmatpush.msra.mxu3 %v7320_v16 }
  0xb2   :  { %1156 = vmatpush.msrb.mxu1 %v7317_v15 }
  0xb3   :  { %791 = vmatpush.msra.mxu3 %v7326_v19 }
  0xb4   :  { %319 = vmatmul.f32.vlgmr.msrb.gmra.mxu3 %v7255_v26  ;;  %1157 = vmatpush.msrb.mxu1 %v7322_v17 }
  0xb5   :  { %1268 = vmatpush.msrb.mxu3 %v7305_v10 }
  0xb7   :  { %1269 = vmatpush.msrb.mxu3 %v7310_v12 }
  0xb9   :  { %1270 = vmatpush.msrb.mxu3 %v7320_v16 }
  0xbb   :  { %1271 = vmatpush.msrb.mxu3 %v7326_v19 }
 0x11a   :  { %v125_v31 = vpop.f32.mrf.mxu1 }
 0x11b   :  { %v7393_v61 = vadd.f32 %v125_v31, %v96_v48 }
 0x122   :  { %v128_v32 = vpop.f32.mrf.mxu1 }
 0x123   :  { %v7387_v49 = vadd.f32 %v128_v32, %v96_v48 }
 0x127   :  { %v183_v34 = vpop.f32.mrf.mxu3 }
 0x128   :  { %v7390_v56 = vadd.f32 %v183_v34, %v162_v39 }
 0x12a   :  { %v219_v37 = vpop.f32.mrf.mxu1 }
 0x12b   :  { %v220_v38 = vadd.f32 %v219_v37, %v7375_v35 }
 0x12d   :  { %v223_v40 = vrot.slane %v220_v38, 1  ;;  %v226_v63 = vadd.f32 %v220_v38, %v7393_v61 }
 0x12f   :  { %v186_v41 = vpop.f32.mrf.mxu3  ;;  %268 = vrot.lane.b32.xlu2 %v223_v40, %s7256_s0  ;;  %v227_v50 = vadd.f32 %v223_v40, %v7387_v49  ;;  %v6443_v4 = vmul.f32 -1.442695, %v226_v63 }
 0x130   :  { %v7378_v42 = vadd.f32 %v186_v41, %v162_v39 }
 0x131   :  { %v6444_v51 = vmul.f32 -1.442695, %v227_v50 }
 0x133   :  { %6656 = vpow2.f32 %v6444_v51 }
 0x137   :  { %v320_v44 = vpop.f32.mrf.mxu3  ;;  %266 = vrot.lane.b32.xlu2 %v220_v38, %s7256_s0 }
 0x138   :  { %v321_v45 = vadd.f32 %v320_v44, %v7381_v43 }
 0x139   :  { %v6657_v52 = vpop.eup %6656 }
 0x13a   :  { %v324_v46 = vrot.slane %v321_v45, 1  ;;  %v325_v47 = vrot.slane %v321_v45, 2  ;;  %v235_v53 = vadd.f32 1.0, %v6657_v52 }
 0x13c   :  { %368 = vrot.lane.b32.xlu1 %v324_v46, %s7256_s0  ;;  %6658 = vrcp.f32 %v235_v53  ;;  %v328_v58 = vadd.f32 %v324_v46, %v7390_v56  ;;  %v262_v0 = vand.u32 2147483648, %v235_v53  ;;  %v329_v1 = vadd.f32 %v325_v47, %v7378_v42 }
 0x13d   :  { %vm256_vm7 = vweird.f32 %v235_v53  ;;  %v260_v2 = vand.u32 2147483647, %v235_v53 }
 0x13e   :  { %v6445_v60 = vmul.f32 -1.442695, %v328_v58  ;;  %v263_v5 = vor.u32 1.1754944e-38, %v262_v0  ;;  %v6446_v6 = vmul.f32 -1.442695, %v329_v1 }
 0x13f   :  { %vm261_vm9 = vcmp.eq.f32.partialorder %v260_v2, 8.507059e+37 }
 0x140   :  { %6660 = vpow2.f32 %v6445_v60 }
 0x141   :  { %6662 = vpow2.f32 %v6443_v4 }
 0x142   :  { %v6659_v54 = vpop.eup %6658  ;;  %6664 = vpow2.f32 %v6446_v6 }
 0x143   :  { %v252_v55 = vmul.f32 %v6659_v54, %v235_v53  ;;  %vm257_vm6 = vweird.f32 %v6659_v54 }
 0x144   :  { %370 = vrot.lane.b32.xlu1 %v325_v47, %s7256_s0  ;;  %vm258_vm8 = vmor %vm256_vm7, %vm257_vm6 }
 0x145   :  { %v253_v57 = vsub.f32 1.0, %v252_v55 }
 0x146   :  { %v6661_v9 = vpop.eup %6660 }
 0x147   :  { %v254_v59 = vmul.f32 %v6659_v54, %v253_v57  ;;  %v336_v18 = vadd.f32 1.0, %v6661_v9  ;;  %v6663_v20 = vpop.eup %6662 }
 0x148   :  { %v6665_v21 = vpop.eup %6664  ;;  %v234_v23 = vadd.f32 1.0, %v6663_v20 }
 0x149   :  { %v255_v62 = vadd.f32 %v6659_v54, %v254_v59  ;;  %6666 = vrcp.f32 %v336_v18  ;;  %v337_v24 = vadd.f32 1.0, %v6665_v21  ;;  %v349_v38 = vand.u32 2147483648, %v336_v18 }
 0x14a   :  { %6668 = vrcp.f32 %v234_v23  ;;  %vm343_vm11 = vweird.f32 %v336_v18  ;;  %v347_v39 = vand.u32 2147483647, %v336_v18  ;;  %vm241_vm3 = vweird.f32 %v234_v23 }
 0x14b   :  { %v259_v3 = vsel %vm258_vm8, %v6659_v54, %v255_v62  ;;  %6670 = vrcp.f32 %v337_v24  ;;  %v350_v45 = vor.u32 1.1754944e-38, %v349_v38  ;;  %v247_v52 = vand.u32 2147483648, %v234_v23 }
 0x14c   :  { %v7397_v8 = vsel %vm261_vm9, %v263_v5, %v259_v3  ;;  %vm348_vm13 = vcmp.eq.f32.partialorder %v347_v39, 8.507059e+37  ;;  %v364_v53 = vand.u32 2147483648, %v337_v24  ;;  %v245_v54 = vand.u32 2147483647, %v234_v23 }
 0x14d   :  { %vm358_vm6 = vweird.f32 %v337_v24  ;;  %v362_v55 = vand.u32 2147483647, %v337_v24  ;;  %v248_v59 = vor.u32 1.1754944e-38, %v247_v52  ;;  %v287_v38 = vsub.f32 1.0, %v7397_v8 }
 0x14e   :  { %v365_v62 = vor.u32 1.1754944e-38, %v364_v53  ;;  %vm246_vm8 = vcmp.eq.f32.partialorder %v245_v54, 8.507059e+37 }
 0x14f   :  { %v6667_v25 = vpop.eup %6666  ;;  %vm363_vm9 = vcmp.eq.f32.partialorder %v362_v55, 8.507059e+37 }
 0x150   :  { %v339_v27 = vmul.f32 %v6667_v25, %v336_v18  ;;  %v6669_v28 = vpop.eup %6668  ;;  %vm344_vm10 = vweird.f32 %v6667_v25 }
 0x151   :  { %v6671_v30 = vpop.eup %6670  ;;  %v237_v31 = vmul.f32 %v6669_v28, %v234_v23  ;;  %vm345_vm12 = vmor %vm343_vm11, %vm344_vm10  ;;  %vm242_vm14 = vweird.f32 %v6669_v28  ;;  %vm415_vm10 = vcmask 523527   ;;  %vm419_vm11 = vcmask 1041409  }
 0x152   :  { %v340_v29 = vsub.f32 1.0, %v339_v27  ;;  %v354_v33 = vmul.f32 %v6671_v30, %v337_v24  ;;  %vm359_vm15 = vweird.f32 %v6671_v30  ;;  %vm243_vm5 = vmor %vm241_vm3, %vm242_vm14 }
 0x153   :  { %v238_v34 = vsub.f32 1.0, %v237_v31  ;;  %vm360_vm7 = vmor %vm358_vm6, %vm359_vm15 }
 0x154   :  { %v341_v32 = vmul.f32 %v6667_v25, %v340_v29  ;;  %v355_v37 = vsub.f32 1.0, %v354_v33 }
 0x155   :  { %v239_v40 = vmul.f32 %v6669_v28, %v238_v34 }
 0x156   :  { %v342_v36 = vadd.f32 %v6667_v25, %v341_v32  ;;  %v356_v44 = vmul.f32 %v6671_v30, %v355_v37 }
 0x157   :  { %v240_v48 = vadd.f32 %v6669_v28, %v239_v40 }
 0x158   :  { %v346_v41 = vsel %vm345_vm12, %v6667_v25, %v342_v36  ;;  %v357_v51 = vadd.f32 %v6671_v30, %v356_v44  ;;  %vm198_vm12 = vcmask 261120  }
 0x159   :  { %v351_v47 = vsel %vm348_vm13, %v350_v45, %v346_v41  ;;  %v244_v57 = vsel %vm243_vm5, %v6669_v28, %v240_v48  ;;  %v299_v45 = vmul.f32 0.0, %v7397_v8 }
 0x15a   :  { %v361_v58 = vsel %vm360_vm7, %v6671_v30, %v357_v51  ;;  %v249_v63 = vsel %vm246_vm8, %v248_v59, %v244_v57  ;;  %v388_v32 = vsub.f32 1.0, %v351_v47  ;;  %v400_v36 = vmul.f32 0.0, %v351_v47 }
 0x15b   :  { %v366_v1 = vsel %vm363_vm9, %v365_v62, %v361_v58  ;;  %v298_v51 = vmul.f32 0.0, %v249_v63 }
 0x15c   :  { %v389_v27 = vsub.f32 1.0, %v366_v1  ;;  %v401_v29 = vmul.f32 0.0, %v366_v1 }
 0x189   :  { %v269_v7 = vpop.permute.xlu2 %268 }
 0x18a   :  { %v273_v13 = vmul.f32 %v269_v7, %v7397_v8 }
 0x18c   :  { %278 = vrot.lane.b32.xlu2 %v273_v13, %s7256_s0 }
 0x191   :  { %v267_v60 = vpop.permute.xlu2 %266 }
 0x192   :  { %v272_v2 = vmul.f32 %v267_v60, %v249_v63 }
 0x1ae   :  { %v369_v46 = vpop.permute.xlu1 %368 }
 0x1af   :  { %v374_v50 = vmul.f32 %v369_v46, %v351_v47  ;;  %v286_v47 = vsub.f32 1.0, %v249_v63 }
 0x1b1   :  { %378 = vrot.lane.b32.xlu0 %v374_v50, %s7256_s0 }
 0x1b6   :  { %v371_v0 = vpop.permute.xlu1 %370 }
 0x1b7   :  { %v375_v3 = vmul.f32 %v371_v0, %v366_v1 }
 0x1b9   :  { %380 = vrot.lane.b32.xlu1 %v375_v3, %s7256_s0  ;;  %276 = vrot.lane.b32.xlu0 %v272_v2, %s7256_s0 }
 0x1e6   :  { %v279_v4 = vpop.permute.xlu2 %278 }
 0x1e7   :  { %v283_v5 = vadd.f32 %v279_v4, %v7387_v49 }
 0x1e9   :  { %6672 = vtanh.f32 %v283_v5 }
 0x1ef   :  { %v6673_v6 = vpop.eup %6672 }
 0x1f0   :  { %292 = vrot.lane.b32.xlu0 %v6673_v6, %s7257_s25 }
 0x223   :  { %v379_v7 = vpop.permute.xlu0 %378 }
 0x224   :  { %v384_v9 = vadd.f32 %v379_v7, %v7390_v56 }
 0x226   :  { %6674 = vtanh.f32 %v384_v9 }
 0x22b   :  { %v381_v13 = vpop.permute.xlu1 %380  ;;  %v277_v18 = vpop.permute.xlu0 %276 }
 0x22c   :  { %v6675_v20 = vpop.eup %6674  ;;  %v385_v21 = vadd.f32 %v381_v13, %v7378_v42  ;;  %v282_v23 = vadd.f32 %v277_v18, %v7393_v61 }
 0x22d   :  { %392 = vrot.lane.b32.xlu1 %v6675_v20, %s7257_s25 }
 0x22e   :  { %6676 = vtanh.f32 %v385_v21 }
 0x22f   :  { %6678 = vtanh.f32 %v282_v23 }
 0x234   :  { %v6677_v24 = vpop.eup %6676 }
 0x235   :  { %v6679_v25 = vpop.eup %6678  ;;  %394 = vrot.lane.b32.xlu2 %v6677_v24, %s7257_s25 }
 0x236   :  { %290 = vrot.lane.b32.xlu1 %v6679_v25, %s7257_s25 }
 0x262   :  { %v293_v34 = vpop.permute.xlu0 %292 }
 0x263   :  { %v297_v40 = vmul.f32 %v293_v34, %v287_v38 }
 0x265   :  { %v7423_v48 = vadd.f32 %v299_v45, %v297_v40 }
 0x267   :  { %v418_v53 = vrot.slane %v7423_v48, 7 }
 0x28f   :  { %v395_v28 = vpop.permute.xlu2 %394 }
 0x290   :  { %v399_v30 = vmul.f32 %v395_v28, %v389_v27 }
 0x292   :  { %v7412_v31 = vadd.f32 %v401_v29, %v399_v30 }
 0x294   :  { %417 = vst.msk [vmem:[#allocation2 + $0x8] sm:$0x80] %vm415_vm10, %v7412_v31  ;;  %v531_v44 = vrot.slane %v7412_v31, 6 }
 0x29f   :  { %v393_v33 = vpop.permute.xlu1 %392 }
 0x2a0   :  { %v398_v37 = vmul.f32 %v393_v33, %v388_v32 }
 0x2a2   :  { %v7416_v39 = vadd.f32 %v400_v36, %v398_v37 }
 0x2a4   :  { %v530_v41 = vrot.slane %v7416_v39, 7  ;;  %416 = vst.msk [vmem:[#allocation2] sm:$0x80] %vm415_vm10, %v7416_v39 }
 0x2a6   :  { %v532_v46 = vsel %vm419_vm11, %v531_v44, %v530_v41 }
 0x2a7   :  { %533 = vrot.lane.b32.xlu2 %v532_v46, %s7257_s25 }
 0x2a8   :  { %v291_v50 = vpop.permute.xlu1 %290 }
 0x2a9   :  { %v296_v52 = vmul.f32 %v291_v50, %v286_v47 }
 0x2ab   :  { %v7427_v54 = vadd.f32 %v298_v51, %v296_v52 }
 0x2ad   :  { %v420_v55 = vsel %vm419_vm11, %v418_v53, %v7427_v54 }
 0x2ae   :  { %421 = vrot.lane.b32.xlu0 %v420_v55, %s7257_s25 }
 0x301   :  { %v534_v8 = vpop.permute.xlu2 %533 }
 0x302   :  { %6450 = vmatmul.msk.f32.vlgmr.msrb.gmra.mxu2 %vm198_vm12, %v534_v8 }
 0x303   :  { %1508 = vmatpush.msrb.mxu2 %v7305_v10 }
 0x305   :  { %1509 = vmatpush.msrb.mxu2 %v7310_v12 }
 0x307   :  { %1510 = vmatpush.msrb.mxu2 %v7320_v16 }
 0x309   :  { %1511 = vmatpush.msrb.mxu2 %v7326_v19 }
 0x320   :  { %v422_v57 = vpop.permute.xlu0 %421 }
 0x321   :  { %6447 = vmatmul.msk.f32.vlgmr.msrb.gmra.mxu0 %vm198_vm12, %v422_v57 }
 0x322   :  { %1394 = vmatpush.msrb.mxu0 %v7308_v11 }
 0x324   :  { %1395 = vmatpush.msrb.mxu0 %v7314_v14 }
 0x326   :  { %1396 = vmatpush.msrb.mxu0 %v7317_v15 }
 0x328   :  { %1397 = vmatpush.msrb.mxu0 %v7322_v17 }
 0x385   :  { %v554_v58 = vpop.f32.mrf.mxu2 }
 0x386   :  { %v555_v59 = vadd.f32 %v554_v58, %v7381_v43 }
 0x388   :  { %v558_v60 = vrot.slane %v555_v59, 2  ;;  %v559_v1 = vrot.slane %v555_v59, 3 }
 0x38a   :  { %602 = vrot.lane.b32.xlu0 %v558_v60, %s7256_s0  ;;  %v562_v3 = vadd.f32 %v558_v60, %v7390_v56  ;;  %v563_v27 = vadd.f32 %v559_v1, %v7378_v42 }
 0x38c   :  { %v6451_v5 = vmul.f32 -1.442695, %v562_v3  ;;  %v6452_v30 = vmul.f32 -1.442695, %v563_v27 }
 0x39e   :  { %v442_v62 = vpop.f32.mrf.mxu0 }
 0x39f   :  { %v443_v63 = vadd.f32 %v442_v62, %v7375_v35 }
 0x3a1   :  { %491 = vrot.lane.b32.xlu2 %v443_v63, %s7256_s0  ;;  %v446_v0 = vrot.slane %v443_v63, 7  ;;  %v450_v2 = vadd.f32 %v443_v63, %v7387_v49 }
 0x3a3   :  { %489 = vrot.lane.b32.xlu1 %v446_v0, %s7256_s0  ;;  %v6449_v4 = vmul.f32 -1.442695, %v450_v2  ;;  %v449_v18 = vadd.f32 %v446_v0, %v7393_v61 }
 0x3a5   :  { %6680 = vpow2.f32 %v6449_v4  ;;  %v6448_v23 = vmul.f32 -1.442695, %v449_v18 }
 0x3a6   :  { %6682 = vpow2.f32 %v6451_v5 }
 0x3ab   :  { %604 = vrot.lane.b32.xlu1 %v559_v1, %s7256_s0  ;;  %v6681_v6 = vpop.eup %6680 }
 0x3ac   :  { %v6683_v7 = vpop.eup %6682  ;;  %v458_v9 = vadd.f32 1.0, %v6681_v6 }
 0x3ad   :  { %v570_v13 = vadd.f32 1.0, %v6683_v7 }
 0x3ae   :  { %6684 = vrcp.f32 %v458_v9  ;;  %v485_v38 = vand.u32 2147483648, %v458_v9  ;;  %vm479_vm15 = vweird.f32 %v458_v9  ;;  %v483_v41 = vand.u32 2147483647, %v458_v9 }
 0x3af   :  { %6686 = vrcp.f32 %v570_v13  ;;  %v583_v44 = vand.u32 2147483648, %v570_v13  ;;  %vm577_vm5 = vweird.f32 %v570_v13  ;;  %v581_v45 = vand.u32 2147483647, %v570_v13 }
 0x3b0   :  { %6688 = vpow2.f32 %v6448_v23  ;;  %v486_v47 = vor.u32 1.1754944e-38, %v485_v38  ;;  %vm484_vm7 = vcmp.eq.f32.partialorder %v483_v41, 8.507059e+37 }
 0x3b1   :  { %6690 = vpow2.f32 %v6452_v30  ;;  %v584_v52 = vor.u32 1.1754944e-38, %v583_v44  ;;  %vm582_vm8 = vcmp.eq.f32.partialorder %v581_v45, 8.507059e+37 }
 0x3b4   :  { %v6685_v20 = vpop.eup %6684 }
 0x3b5   :  { %v6687_v21 = vpop.eup %6686  ;;  %v475_v24 = vmul.f32 %v6685_v20, %v458_v9  ;;  %vm480_vm13 = vweird.f32 %v6685_v20 }
 0x3b6   :  { %v573_v25 = vmul.f32 %v6687_v21, %v570_v13  ;;  %v6689_v34 = vpop.eup %6688  ;;  %vm578_vm14 = vweird.f32 %v6687_v21  ;;  %vm481_vm3 = vmor %vm479_vm15, %vm480_vm13 }
 0x3b7   :  { %v476_v28 = vsub.f32 1.0, %v475_v24  ;;  %v457_v37 = vadd.f32 1.0, %v6689_v34  ;;  %vm579_vm6 = vmor %vm577_vm5, %vm578_vm14  ;;  %v6691_v51 = vpop.eup %6690 }
 0x3b8   :  { %v574_v29 = vsub.f32 1.0, %v573_v25  ;;  %v571_v60 = vadd.f32 1.0, %v6691_v51 }
 0x3b9   :  { %v477_v32 = vmul.f32 %v6685_v20, %v476_v28  ;;  %6692 = vrcp.f32 %v457_v37  ;;  %v470_v7 = vand.u32 2147483648, %v457_v37  ;;  %vm464_vm10 = vweird.f32 %v457_v37 }
 0x3ba   :  { %v575_v33 = vmul.f32 %v6687_v21, %v574_v29  ;;  %6694 = vrcp.f32 %v571_v60  ;;  %v468_v9 = vand.u32 2147483647, %v457_v37  ;;  %v598_v27 = vand.u32 2147483648, %v571_v60 }
 0x3bb   :  { %v478_v36 = vadd.f32 %v6685_v20, %v477_v32  ;;  %v596_v28 = vand.u32 2147483647, %v571_v60 }
 0x3bc   :  { %v576_v40 = vadd.f32 %v6687_v21, %v575_v33  ;;  %vm469_vm14 = vcmp.eq.f32.partialorder %v468_v9, 8.507059e+37  ;;  %v599_v30 = vor.u32 1.1754944e-38, %v598_v27 }
 0x3bd   :  { %v482_v46 = vsel %vm481_vm3, %v6685_v20, %v478_v36  ;;  %v471_v20 = vor.u32 1.1754944e-38, %v470_v7  ;;  %vm592_vm3 = vweird.f32 %v571_v60 }
 0x3be   :  { %v580_v50 = vsel %vm579_vm6, %v6687_v21, %v576_v40  ;;  %v7454_v55 = vsel %vm484_vm7, %v486_v47, %v482_v46  ;;  %vm597_vm6 = vcmp.eq.f32.partialorder %v596_v28, 8.507059e+37  ;;  %vm653_vm7 = vcmask 522502  }
 0x3bf   :  { %v7457_v59 = vsel %vm582_vm8, %v584_v52, %v580_v50  ;;  %v6693_v63 = vpop.eup %6692 }
 0x3c0   :  { %v460_v0 = vmul.f32 %v6693_v63, %v457_v37  ;;  %v6695_v2 = vpop.eup %6694  ;;  %vm465_vm9 = vweird.f32 %v6693_v63 }
 0x3c1   :  { %v588_v4 = vmul.f32 %v6695_v2, %v571_v60  ;;  %vm466_vm13 = vmor %vm464_vm10, %vm465_vm9  ;;  %vm593_vm15 = vweird.f32 %v6695_v2 }
 0x3c2   :  { %v461_v1 = vsub.f32 1.0, %v460_v0  ;;  %vm594_vm5 = vmor %vm592_vm3, %vm593_vm15 }
 0x3c3   :  { %v589_v6 = vsub.f32 1.0, %v588_v4 }
 0x3c4   :  { %v462_v3 = vmul.f32 %v6693_v63, %v461_v1  ;;  %v510_v1 = vsub.f32 1.0, %v7454_v55 }
 0x3c5   :  { %v590_v18 = vmul.f32 %v6695_v2, %v589_v6 }
 0x3c6   :  { %v463_v5 = vadd.f32 %v6693_v63, %v462_v3  ;;  %v521_v3 = vrot.slane %v7427_v54, 7 }
 0x3c7   :  { %v591_v25 = vadd.f32 %v6695_v2, %v590_v18 }
 0x3c8   :  { %v467_v13 = vsel %vm466_vm13, %v6693_v63, %v463_v5 }
 0x3c9   :  { %v472_v23 = vsel %vm469_vm14, %v471_v20, %v467_v13  ;;  %v595_v29 = vsel %vm594_vm5, %v6695_v2, %v591_v25 }
 0x3ca   :  { %v600_v33 = vsel %vm597_vm6, %v599_v30, %v595_v29  ;;  %v509_v2 = vsub.f32 1.0, %v472_v23  ;;  %v524_v6 = vmul.f32 %v521_v3, %v472_v23 }
 0x3cb   :  { %v623_v20 = vsub.f32 1.0, %v600_v33 }
 0x3fb   :  { %v492_v8 = vpop.permute.xlu2 %491 }
 0x3fc   :  { %v496_v57 = vmul.f32 %v492_v8, %v7454_v55  ;;  %v603_v58 = vpop.permute.xlu0 %602  ;;  %v622_v8 = vsub.f32 1.0, %v7457_v59 }
 0x3fd   :  { %v608_v62 = vmul.f32 %v603_v58, %v7457_v59 }
 0x3fe   :  { %501 = vrot.lane.b32.xlu0 %v496_v57, %s7256_s0  ;;  %v634_v57 = vrot.slane %v7416_v39, 1 }
 0x3ff   :  { %612 = vrot.lane.b32.xlu1 %v608_v62, %s7256_s0 }
 0x400   :  { %v638_v60 = vmul.f32 %v634_v57, %v7457_v59  ;;  %v525_v59 = vmul.f32 %v7454_v55, %v418_v53 }
 0x415   :  { %v490_v21 = vpop.permute.xlu1 %489 }
 0x416   :  { %v495_v24 = vmul.f32 %v490_v21, %v472_v23  ;;  %v635_v21 = vrot.slane %v7412_v31, 1 }
 0x418   :  { %499 = vrot.lane.b32.xlu2 %v495_v24, %s7256_s0  ;;  %v639_v24 = vmul.f32 %v635_v21, %v600_v33 }
 0x41d   :  { %v605_v32 = vpop.permute.xlu1 %604 }
 0x41e   :  { %v609_v34 = vmul.f32 %v605_v32, %v600_v33 }
 0x420   :  { %614 = vrot.lane.b32.xlu2 %v609_v34, %s7256_s0 }
 0x470   :  { %v502_v36 = vpop.permute.xlu0 %501 }
 0x471   :  { %v506_v37 = vadd.f32 %v502_v36, %v7387_v49  ;;  %v613_v38 = vpop.permute.xlu1 %612 }
 0x472   :  { %v618_v40 = vadd.f32 %v613_v38, %v7390_v56  ;;  %v500_v41 = vpop.permute.xlu2 %499 }
 0x473   :  { %6696 = vtanh.f32 %v506_v37  ;;  %v505_v44 = vadd.f32 %v500_v41, %v7393_v61 }
 0x474   :  { %6698 = vtanh.f32 %v618_v40 }
 0x475   :  { %6700 = vtanh.f32 %v505_v44 }
 0x479   :  { %v6697_v45 = vpop.eup %6696 }
 0x47a   :  { %v6699_v46 = vpop.eup %6698  ;;  %515 = vrot.lane.b32.xlu1 %v6697_v45, %s7257_s25  ;;  %v615_v47 = vpop.permute.xlu2 %614 }
 0x47b   :  { %v6701_v50 = vpop.eup %6700  ;;  %v619_v51 = vadd.f32 %v615_v47, %v7378_v42  ;;  %626 = vrot.lane.b32.xlu2 %v6699_v46, %s7257_s25 }
 0x47c   :  { %513 = vrot.lane.b32.xlu0 %v6701_v50, %s7257_s25 }
 0x47d   :  { %6702 = vtanh.f32 %v619_v51 }
 0x483   :  { %v6703_v52 = vpop.eup %6702 }
 0x484   :  { %628 = vrot.lane.b32.xlu0 %v6703_v52, %s7257_s25 }
 0x4d5   :  { %v627_v58 = vpop.permute.xlu2 %626 }
 0x4d6   :  { %v632_v62 = vmul.f32 %v627_v58, %v622_v8 }
 0x4d8   :  { %v7475_v63 = vadd.f32 %v638_v60, %v632_v62 }
 0x4da   :  { %654 = vst.msk [vmem:[#allocation2] sm:$0x40] %vm653_vm7, %v7475_v63  ;;  %v769_v53 = vrot.slane %v7475_v63, 6  ;;  %v873_v50 = vrot.slane %v7475_v63, 1 }
 0x4ec   :  { %v516_v0 = vpop.permute.xlu1 %515 }
 0x4ed   :  { %v520_v5 = vmul.f32 %v516_v0, %v510_v1 }
 0x4ee   :  { %v514_v4 = vpop.permute.xlu0 %513 }
 0x4ef   :  { %v519_v39 = vmul.f32 %v514_v4, %v509_v2  ;;  %v7486_v9 = vadd.f32 %v525_v59, %v520_v5 }
 0x4f1   :  { %v7484_v7 = vadd.f32 %v524_v6, %v519_v39 }
 0x4f3   :  { %v656_v13 = vrot.slane %v7484_v7, 1 }
 0x4f5   :  { %v657_v18 = vsel %vm419_vm11, %v7486_v9, %v656_v13 }
 0x4f6   :  { %658 = vrot.lane.b32.xlu1 %v657_v18, %s7257_s25  ;;  %v629_v23 = vpop.permute.xlu0 %628 }
 0x4f7   :  { %v633_v25 = vmul.f32 %v629_v23, %v623_v20 }
 0x4f9   :  { %v7493_v27 = vadd.f32 %v639_v24, %v633_v25 }
 0x4fb   :  { %v770_v55 = vrot.slane %v7493_v27, 5  ;;  %655 = vst.msk [vmem:[#allocation2 + $0x8] sm:$0x40] %vm653_vm7, %v7493_v27 }
 0x4fd   :  { %v771_v28 = vsel %vm419_vm11, %v770_v55, %v769_v53 }
 0x4fe   :  { %772 = vrot.lane.b32.xlu2 %v771_v28, %s7257_s25 }
 0x558   :  { %v773_v29 = vpop.permute.xlu2 %772 }
 0x559   :  { %6456 = vmatmul.msk.f32.vlgmr.msra.gmra.mxu3 %vm198_vm12, %v773_v29 }
 0x55a   :  { %1748 = vmatpush.msra.mxu3 %v7305_v10 }
 0x55c   :  { %1749 = vmatpush.msra.mxu3 %v7310_v12 }
 0x55e   :  { %1750 = vmatpush.msra.mxu3 %v7320_v16 }
 0x560   :  { %1751 = vmatpush.msra.mxu3 %v7326_v19 }
 0x568   :  { %v659_v31 = vpop.permute.xlu1 %658 }
 0x569   :  { %6453 = vmatmul.msk.f32.vlgmr.msra.gmra.mxu1 %vm198_vm12, %v659_v31 }
 0x56a   :  { %1634 = vmatpush.msra.mxu1 %v7308_v11 }
 0x56c   :  { %1635 = vmatpush.msra.mxu1 %v7314_v14 }
 0x56e   :  { %1636 = vmatpush.msra.mxu1 %v7317_v15 }
 0x570   :  { %1637 = vmatpush.msra.mxu1 %v7322_v17 }
 0x5dc   :  { %v793_v30 = vpop.f32.mrf.mxu3 }
 0x5dd   :  { %v794_v10 = vadd.f32 %v793_v30, %v7381_v43 }
 0x5df   :  { %v797_v32 = vrot.slane %v794_v10, 3  ;;  %v798_v17 = vrot.slane %v794_v10, 4 }
 0x5e1   :  { %v801_v12 = vadd.f32 %v797_v32, %v7390_v56  ;;  %841 = vrot.lane.b32.xlu2 %v797_v32, %s7256_s0  ;;  %v802_v62 = vadd.f32 %v798_v17, %v7378_v42 }
 0x5e3   :  { %v6457_v16 = vmul.f32 -1.442695, %v801_v12  ;;  %v6458_v0 = vmul.f32 -1.442695, %v802_v62 }
 0x5e5   :  { %6704 = vpow2.f32 %v6457_v16 }
 0x5e6   :  { %v679_v19 = vpop.f32.mrf.mxu1 }
 0x5e7   :  { %v680_v33 = vadd.f32 %v679_v19, %v7375_v35 }
 0x5e9   :  { %v683_v11 = vrot.slane %v680_v33, 6  ;;  %v684_v34 = vrot.slane %v680_v33, 7 }
 0x5eb   :  { %v6705_v14 = vpop.eup %6704  ;;  %729 = vrot.lane.b32.xlu1 %v684_v34, %s7256_s0  ;;  %727 = vrot.lane.b32.xlu0 %v683_v11, %s7256_s0  ;;  %v687_v8 = vadd.f32 %v683_v11, %v7393_v61  ;;  %v688_v57 = vadd.f32 %v684_v34, %v7387_v49 }
 0x5ec   :  { %v809_v15 = vadd.f32 1.0, %v6705_v14 }
 0x5ed   :  { %v6454_v58 = vmul.f32 -1.442695, %v687_v8  ;;  %v6455_v60 = vmul.f32 -1.442695, %v688_v57 }
 0x5ee   :  { %6706 = vrcp.f32 %v809_v15  ;;  %v822_v40 = vand.u32 2147483648, %v809_v15  ;;  %v820_v44 = vand.u32 2147483647, %v809_v15  ;;  %vm816_vm9 = vweird.f32 %v809_v15 }
 0x5ef   :  { %6708 = vpow2.f32 %v6454_v58 }
 0x5f0   :  { %v823_v46 = vor.u32 1.1754944e-38, %v822_v40  ;;  %vm821_vm13 = vcmp.eq.f32.partialorder %v820_v44, 8.507059e+37  ;;  %6710 = vpow2.f32 %v6455_v60 }
 0x5f1   :  { %6712 = vpow2.f32 %v6458_v0 }
 0x5f3   :  { %843 = vrot.lane.b32.xlu0 %v798_v17, %s7256_s0 }
 0x5f4   :  { %v6707_v36 = vpop.eup %6706 }
 0x5f5   :  { %v812_v37 = vmul.f32 %v6707_v36, %v809_v15  ;;  %vm817_vm8 = vweird.f32 %v6707_v36  ;;  %v6709_v1 = vpop.eup %6708 }
 0x5f6   :  { %vm818_vm10 = vmor %vm816_vm9, %vm817_vm8  ;;  %v6711_v2 = vpop.eup %6710  ;;  %v695_v63 = vadd.f32 1.0, %v6709_v1 }
 0x5f7   :  { %v813_v38 = vsub.f32 1.0, %v812_v37  ;;  %v696_v5 = vadd.f32 1.0, %v6711_v2  ;;  %v6713_v6 = vpop.eup %6712 }
 0x5f8   :  { %6714 = vrcp.f32 %v695_v63  ;;  %v810_v39 = vadd.f32 1.0, %v6713_v6  ;;  %vm702_vm3 = vweird.f32 %v695_v63  ;;  %v708_v10 = vand.u32 2147483648, %v695_v63 }
 0x5f9   :  { %v814_v41 = vmul.f32 %v6707_v36, %v813_v38  ;;  %6716 = vrcp.f32 %v696_v5  ;;  %v723_v30 = vand.u32 2147483648, %v696_v5  ;;  %vm717_vm5 = vweird.f32 %v696_v5 }
 0x5fa   :  { %6718 = vrcp.f32 %v810_v39  ;;  %v721_v32 = vand.u32 2147483647, %v696_v5  ;;  %v706_v12 = vand.u32 2147483647, %v695_v63  ;;  %v709_v34 = vor.u32 1.1754944e-38, %v708_v10 }
 0x5fb   :  { %v815_v45 = vadd.f32 %v6707_v36, %v814_v41  ;;  %v724_v11 = vor.u32 1.1754944e-38, %v723_v30  ;;  %v837_v41 = vand.u32 2147483648, %v810_v39  ;;  %v835_v44 = vand.u32 2147483647, %v810_v39 }
 0x5fc   :  { %vm722_vm8 = vcmp.eq.f32.partialorder %v721_v32, 8.507059e+37  ;;  %vm707_vm9 = vcmp.eq.f32.partialorder %v706_v12, 8.507059e+37  ;;  %v874_v12 = vrot.slane %v7493_v27, 1  ;;  %v7166_v27 = vld [vmem:[#allocation4 + $0x58] sm:$0xff] }
 0x5fd   :  { %v819_v47 = vsel %vm818_vm10, %v6707_v36, %v815_v45 }
 0x5fe   :  { %v7519_v51 = vsel %vm821_vm13, %v823_v46, %v819_v47  ;;  %v6715_v59 = vpop.eup %6714  ;;  %vm831_vm13 = vweird.f32 %v810_v39  ;;  %v838_v46 = vor.u32 1.1754944e-38, %v837_v41  ;;  %v7169_v41 = vld [vmem:[#allocation4 + $0x40] sm:$0xff] }
 0x5ff   :  { %v7522_v52 = vmul.f32 %v873_v50, %v7519_v51  ;;  %v6717_v13 = vpop.eup %6716  ;;  %v698_v20 = vmul.f32 %v6715_v59, %v695_v63  ;;  %vm703_vm14 = vweird.f32 %v6715_v59 }
 0x600   :  { %v713_v18 = vmul.f32 %v6717_v13, %v696_v5  ;;  %v6719_v24 = vpop.eup %6718  ;;  %vm718_vm15 = vweird.f32 %v6717_v13  ;;  %vm704_vm6 = vmor %vm702_vm3, %vm703_vm14  ;;  %vm892_vm3 = vcmask 521477  }
 0x601   :  { %v699_v23 = vsub.f32 1.0, %v698_v20  ;;  %v827_v55 = vmul.f32 %v6719_v24, %v810_v39  ;;  %vm719_vm7 = vmor %vm717_vm5, %vm718_vm15  ;;  %vm832_vm10 = vweird.f32 %v6719_v24  ;;  %vm836_vm15 = vcmp.eq.f32.partialorder %v835_v44, 8.507059e+37  ;;  %v7170_v44 = vld [vmem:[#allocation4 + $0x90] sm:$0xff] }
 0x602   :  { %v714_v21 = vsub.f32 1.0, %v713_v18  ;;  %vm833_vm14 = vmor %vm831_vm13, %vm832_vm10  ;;  %v861_v39 = vsub.f32 1.0, %v7519_v51 }
 0x603   :  { %v700_v53 = vmul.f32 %v6715_v59, %v699_v23  ;;  %v828_v31 = vsub.f32 1.0, %v827_v55 }
 0x604   :  { %v715_v25 = vmul.f32 %v6717_v13, %v714_v21  ;;  %v759_v21 = vrot.slane %v7484_v7, 7 }
 0x605   :  { %v701_v29 = vadd.f32 %v6715_v59, %v700_v53  ;;  %v829_v33 = vmul.f32 %v6719_v24, %v828_v31 }
 0x606   :  { %v716_v28 = vadd.f32 %v6717_v13, %v715_v25 }
 0x607   :  { %v705_v19 = vsel %vm704_vm6, %v6715_v59, %v701_v29  ;;  %v830_v40 = vadd.f32 %v6719_v24, %v829_v33 }
 0x608   :  { %v720_v16 = vsel %vm719_vm7, %v6717_v13, %v716_v28  ;;  %v710_v17 = vsel %vm707_vm9, %v709_v34, %v705_v19 }
 0x609   :  { %v725_v15 = vsel %vm722_vm8, %v724_v11, %v720_v16  ;;  %v834_v45 = vsel %vm833_vm14, %v6719_v24, %v830_v40  ;;  %v747_v20 = vsub.f32 1.0, %v710_v17  ;;  %v760_v24 = vrot.slane %v7486_v9, 7 }
 0x60a   :  { %v839_v50 = vsel %vm836_vm15, %v838_v46, %v834_v45  ;;  %v748_v23 = vsub.f32 1.0, %v725_v15  ;;  %v763_v55 = vmul.f32 %v759_v21, %v710_v17  ;;  %v7171_v45 = vld [vmem:[#allocation4 + $0x88] sm:$0xff]  ;;  %v7172_v46 = vld [vmem:[#allocation4 + $0x80] sm:$0xff] }
 0x60b   :  { %v862_v32 = vsub.f32 1.0, %v839_v50  ;;  %v878_v33 = vmul.f32 %v874_v12, %v839_v50 }
 0x63b   :  { %v842_v3 = vpop.permute.xlu2 %841 }
 0x63c   :  { %v847_v4 = vmul.f32 %v842_v3, %v7519_v51  ;;  %v764_v51 = vmul.f32 %v760_v24, %v725_v15 }
 0x63e   :  { %851 = vrot.lane.b32.xlu0 %v847_v4, %s7256_s0 }
 0x65d   :  { %v730_v14 = vpop.permute.xlu1 %729  ;;  %v728_v36 = vpop.permute.xlu0 %727 }
 0x65e   :  { %v734_v37 = vmul.f32 %v730_v14, %v725_v15  ;;  %v733_v38 = vmul.f32 %v728_v36, %v710_v17 }
 0x660   :  { %737 = vrot.lane.b32.xlu1 %v733_v38, %s7256_s0  ;;  %739 = vrot.lane.b32.xlu2 %v734_v37, %s7256_s0  ;;  %v7167_v37 = vld [vmem:[#allocation4 + $0x50] sm:$0xff]  ;;  %v7168_v38 = vld [vmem:[#allocation4 + $0x48] sm:$0xff] }
 0x665   :  { %v844_v47 = vpop.permute.xlu0 %843 }
 0x666   :  { %v848_v8 = vmul.f32 %v844_v47, %v839_v50  ;;  %v7173_v47 = vld [vmem:[#allocation4 + $0x78] sm:$0xff] }
 0x668   :  { %853 = vrot.lane.b32.xlu1 %v848_v8, %s7256_s0 }
 0x6b0   :  { %v852_v57 = vpop.permute.xlu0 %851 }
 0x6b1   :  { %v857_v58 = vadd.f32 %v852_v57, %v7390_v56 }
 0x6b3   :  { %6720 = vtanh.f32 %v857_v58 }
 0x6b9   :  { %v6721_v60 = vpop.eup %6720 }
 0x6ba   :  { %v740_v62 = vpop.permute.xlu2 %739  ;;  %865 = vrot.lane.b32.xlu1 %v6721_v60, %s7257_s25 }
 0x6bb   :  { %v744_v0 = vadd.f32 %v740_v62, %v7387_v49 }
 0x6bd   :  { %6722 = vtanh.f32 %v744_v0 }
 0x6c3   :  { %v6723_v1 = vpop.eup %6722 }
 0x6c4   :  { %753 = vrot.lane.b32.xlu0 %v6723_v1, %s7257_s25 }
 0x6d2   :  { %v738_v2 = vpop.permute.xlu1 %737 }
 0x6d3   :  { %v743_v3 = vadd.f32 %v738_v2, %v7393_v61 }
 0x6d5   :  { %6724 = vtanh.f32 %v743_v3 }
 0x6da   :  { %v854_v63 = vpop.permute.xlu1 %853 }
 0x6db   :  { %v6725_v4 = vpop.eup %6724  ;;  %v858_v5 = vadd.f32 %v854_v63, %v7378_v42 }
 0x6dc   :  { %751 = vrot.lane.b32.xlu2 %v6725_v4, %s7257_s25 }
 0x6dd   :  { %6726 = vtanh.f32 %v858_v5 }
 0x6e3   :  { %v6727_v6 = vpop.eup %6726 }
 0x6e4   :  { %867 = vrot.lane.b32.xlu2 %v6727_v6, %s7257_s25 }
 0x72c   :  { %v866_v59 = vpop.permute.xlu1 %865 }
 0x72d   :  { %v871_v13 = vmul.f32 %v866_v59, %v861_v39 }
 0x72f   :  { %v7542_v18 = vadd.f32 %v7522_v52, %v871_v13 }
 0x731   :  { %893 = vst.msk [vmem:[#allocation2] sm:$0x20] %vm892_vm3, %v7542_v18  ;;  %v1009_v14 = vrot.slane %v7542_v18, 5 }
 0x736   :  { %v752_v25 = vpop.permute.xlu2 %751  ;;  %v754_v53 = vpop.permute.xlu0 %753 }
 0x737   :  { %v757_v28 = vmul.f32 %v752_v25, %v747_v20  ;;  %v758_v29 = vmul.f32 %v754_v53, %v748_v23 }
 0x739   :  { %v7548_v31 = vadd.f32 %v763_v55, %v757_v28  ;;  %v7550_v30 = vadd.f32 %v764_v51, %v758_v29 }
 0x73b   :  { %v895_v52 = vrot.slane %v7548_v31, 2  ;;  %v896_v10 = vrot.slane %v7550_v30, 1 }
 0x73d   :  { %v897_v16 = vsel %vm419_vm11, %v896_v10, %v895_v52 }
 0x73e   :  { %v868_v19 = vpop.permute.xlu2 %867  ;;  %898 = vrot.lane.b32.xlu0 %v897_v16, %s7257_s25 }
 0x73f   :  { %v872_v11 = vmul.f32 %v868_v19, %v862_v32 }
 0x741   :  { %v880_v34 = vadd.f32 %v878_v33, %v872_v11 }
 0x743   :  { %v1010_v15 = vrot.slane %v880_v34, 4  ;;  %894 = vst.msk [vmem:[#allocation2 + $0x8] sm:$0x20] %vm892_vm3, %v880_v34  ;;  %v1114_v53 = vrot.slane %v880_v34, 1 }
 0x745   :  { %v1011_v17 = vsel %vm419_vm11, %v1010_v15, %v1009_v14 }
 0x746   :  { %1012 = vrot.lane.b32.xlu1 %v1011_v17, %s7257_s25 }
 0x7b0   :  { %v899_v36 = vpop.permute.xlu0 %898 }
 0x7b1   :  { %6459 = vmatmul.msk.f32.vlgmr.msra.gmra.mxu0 %vm198_vm12, %v899_v36 }
 0x7b2   :  { %1872 = vmatpush.msra.mxu0 %v7166_v27 }
 0x7b4   :  { %1873 = vmatpush.msra.mxu0 %v7167_v37 }
 0x7b6   :  { %1874 = vmatpush.msra.mxu0 %v7168_v38 }
 0x7b8   :  { %v1013_v40 = vpop.permute.xlu1 %1012  ;;  %1875 = vmatpush.msra.mxu0 %v7169_v41 }
 0x7b9   :  { %6462 = vmatmul.msk.f32.vlgmr.msra.gmra.mxu2 %vm198_vm12, %v1013_v40 }
 0x7ba   :  { %1985 = vmatpush.msra.mxu2 %v7170_v44 }
 0x7bc   :  { %1986 = vmatpush.msra.mxu2 %v7171_v45 }
 0x7be   :  { %1987 = vmatpush.msra.mxu2 %v7172_v46 }
 0x7c0   :  { %1988 = vmatpush.msra.mxu2 %v7173_v47 }
 0x82e   :  { %v919_v50 = vpop.f32.mrf.mxu0 }
 0x82f   :  { %v920_v8 = vadd.f32 %v919_v50, %v7375_v35 }
 0x831   :  { %v923_v57 = vrot.slane %v920_v8, 5  ;;  %v924_v58 = vrot.slane %v920_v8, 6 }
 0x833   :  { %969 = vrot.lane.b32.xlu0 %v924_v58, %s7256_s0  ;;  %967 = vrot.lane.b32.xlu2 %v923_v57, %s7256_s0  ;;  %v927_v21 = vadd.f32 %v923_v57, %v7393_v61  ;;  %v928_v10 = vadd.f32 %v924_v58, %v7387_v49 }
 0x835   :  { %v6460_v28 = vmul.f32 -1.442695, %v927_v21  ;;  %v6461_v12 = vmul.f32 -1.442695, %v928_v10 }
 0x83c   :  { %v1033_v60 = vpop.f32.mrf.mxu2 }
 0x83d   :  { %v1034_v62 = vadd.f32 %v1033_v60, %v7381_v43 }
 0x83f   :  { %v1037_v0 = vrot.slane %v1034_v62, 4  ;;  %v1038_v1 = vrot.slane %v1034_v62, 5 }
 0x841   :  { %v1042_v2 = vadd.f32 %v1038_v1, %v7378_v42  ;;  %1081 = vrot.lane.b32.xlu1 %v1037_v0, %s7256_s0  ;;  %1083 = vrot.lane.b32.xlu2 %v1038_v1, %s7256_s0  ;;  %v1041_v11 = vadd.f32 %v1037_v0, %v7390_v56 }
 0x843   :  { %v6464_v3 = vmul.f32 -1.442695, %v1042_v2  ;;  %v6463_v15 = vmul.f32 -1.442695, %v1041_v11 }
 0x845   :  { %6728 = vpow2.f32 %v6464_v3 }
 0x84b   :  { %v6729_v63 = vpop.eup %6728 }
 0x84c   :  { %v1050_v4 = vadd.f32 1.0, %v6729_v63 }
 0x84e   :  { %6730 = vrcp.f32 %v1050_v4  ;;  %v1077_v59 = vand.u32 2147483648, %v1050_v4  ;;  %v1075_v20 = vand.u32 2147483647, %v1050_v4  ;;  %vm1071_vm6 = vweird.f32 %v1050_v4 }
 0x84f   :  { %6732 = vpow2.f32 %v6460_v28 }
 0x850   :  { %v1078_v24 = vor.u32 1.1754944e-38, %v1077_v59  ;;  %vm1076_vm8 = vcmp.eq.f32.partialorder %v1075_v20, 8.507059e+37 }
 0x854   :  { %v6731_v5 = vpop.eup %6730 }
 0x855   :  { %v1067_v6 = vmul.f32 %v6731_v5, %v1050_v4  ;;  %vm1072_vm5 = vweird.f32 %v6731_v5  ;;  %v6733_v29 = vpop.eup %6732 }
 0x856   :  { %vm1073_vm7 = vmor %vm1071_vm6, %vm1072_vm5  ;;  %v935_v52 = vadd.f32 1.0, %v6733_v29 }
 0x857   :  { %v1068_v39 = vsub.f32 1.0, %v1067_v6 }
 0x858   :  { %6734 = vrcp.f32 %v935_v52  ;;  %v948_v36 = vand.u32 2147483648, %v935_v52  ;;  %vm942_vm10 = vweird.f32 %v935_v52  ;;  %v946_v27 = vand.u32 2147483647, %v935_v52 }
 0x859   :  { %v1069_v13 = vmul.f32 %v6731_v5, %v1068_v39  ;;  %6736 = vpow2.f32 %v6461_v12 }
 0x85a   :  { %v949_v38 = vor.u32 1.1754944e-38, %v948_v36  ;;  %vm947_vm14 = vcmp.eq.f32.partialorder %v946_v27, 8.507059e+37  ;;  %v1000_v27 = vrot.slane %v7550_v30, 7 }
 0x85b   :  { %v1070_v23 = vadd.f32 %v6731_v5, %v1069_v13 }
 0x85d   :  { %v1074_v25 = vsel %vm1073_vm7, %v6731_v5, %v1070_v23 }
 0x85e   :  { %v7571_v55 = vsel %vm1076_vm8, %v1078_v24, %v1074_v25  ;;  %v6735_v32 = vpop.eup %6734 }
 0x85f   :  { %v7574_v51 = vmul.f32 %v1114_v53, %v7571_v55  ;;  %v938_v16 = vmul.f32 %v6735_v32, %v935_v52  ;;  %v6737_v33 = vpop.eup %6736  ;;  %vm943_vm9 = vweird.f32 %v6735_v32 }
 0x860   :  { %v936_v14 = vadd.f32 1.0, %v6737_v33  ;;  %vm944_vm13 = vmor %vm942_vm10, %vm943_vm9 }
 0x861   :  { %v939_v19 = vsub.f32 1.0, %v938_v16 }
 0x862   :  { %6738 = vrcp.f32 %v936_v14  ;;  %v963_v1 = vand.u32 2147483648, %v936_v14  ;;  %vm957_vm3 = vweird.f32 %v936_v14  ;;  %v961_v2 = vand.u32 2147483647, %v936_v14 }
 0x863   :  { %v940_v34 = vmul.f32 %v6735_v32, %v939_v19  ;;  %6740 = vpow2.f32 %v6463_v15 }
 0x864   :  { %v964_v4 = vor.u32 1.1754944e-38, %v963_v1  ;;  %vm962_vm6 = vcmp.eq.f32.partialorder %v961_v2, 8.507059e+37  ;;  %v1113_v1 = vrot.slane %v7542_v18, 1  ;;  %v1102_v2 = vsub.f32 1.0, %v7571_v55 }
 0x865   :  { %v941_v17 = vadd.f32 %v6735_v32, %v940_v34 }
 0x867   :  { %v945_v37 = vsel %vm944_vm13, %v6735_v32, %v941_v17  ;;  %vm1132_vm13 = vcmask 520452  }
 0x868   :  { %v7578_v41 = vsel %vm947_vm14, %v949_v38, %v945_v37  ;;  %v6739_v45 = vpop.eup %6738  ;;  %v999_v38 = vrot.slane %v7548_v31, 7 }
 0x869   :  { %v6741_v46 = vpop.eup %6740  ;;  %v953_v47 = vmul.f32 %v6739_v45, %v936_v14  ;;  %vm958_vm15 = vweird.f32 %v6739_v45  ;;  %v987_v37 = vsub.f32 1.0, %v7578_v41 }
 0x86a   :  { %v1049_v50 = vadd.f32 1.0, %v6741_v46  ;;  %vm959_vm5 = vmor %vm957_vm3, %vm958_vm15 }
 0x86b   :  { %v954_v8 = vsub.f32 1.0, %v953_v47  ;;  %v1003_v47 = vmul.f32 %v999_v38, %v7578_v41 }
 0x86c   :  { %6742 = vrcp.f32 %v1049_v50  ;;  %v1062_v21 = vand.u32 2147483648, %v1049_v50  ;;  %vm1056_vm8 = vweird.f32 %v1049_v50  ;;  %v1060_v23 = vand.u32 2147483647, %v1049_v50 }
 0x86d   :  { %v955_v57 = vmul.f32 %v6739_v45, %v954_v8 }
 0x86e   :  { %v1063_v25 = vor.u32 1.1754944e-38, %v1062_v21  ;;  %vm1061_vm10 = vcmp.eq.f32.partialorder %v1060_v23, 8.507059e+37 }
 0x86f   :  { %v956_v0 = vadd.f32 %v6739_v45, %v955_v57 }
 0x871   :  { %v960_v63 = vsel %vm959_vm5, %v6739_v45, %v956_v0 }
 0x872   :  { %v6743_v62 = vpop.eup %6742  ;;  %v965_v39 = vsel %vm962_vm6, %v964_v4, %v960_v63 }
 0x873   :  { %v1052_v3 = vmul.f32 %v6743_v62, %v1049_v50  ;;  %vm1057_vm7 = vweird.f32 %v6743_v62  ;;  %v988_v36 = vsub.f32 1.0, %v965_v39  ;;  %v1004_v45 = vmul.f32 %v1000_v27, %v965_v39 }
 0x874   :  { %vm1058_vm9 = vmor %vm1056_vm8, %vm1057_vm7 }
 0x875   :  { %v1053_v5 = vsub.f32 1.0, %v1052_v3 }
 0x877   :  { %v1054_v13 = vmul.f32 %v6743_v62, %v1053_v5 }
 0x879   :  { %v1055_v20 = vadd.f32 %v6743_v62, %v1054_v13 }
 0x87b   :  { %v1059_v24 = vsel %vm1058_vm9, %v6743_v62, %v1055_v20 }
 0x87c   :  { %v1064_v28 = vsel %vm1061_vm10, %v1063_v25, %v1059_v24 }
 0x87d   :  { %v1101_v0 = vsub.f32 1.0, %v1064_v28  ;;  %v1117_v63 = vmul.f32 %v1113_v1, %v1064_v28 }
 0x88d   :  { %v968_v40 = vpop.permute.xlu2 %967 }
 0x88e   :  { %v973_v44 = vmul.f32 %v968_v40, %v7578_v41 }
 0x890   :  { %977 = vrot.lane.b32.xlu0 %v973_v44, %s7256_s0 }
 0x89b   :  { %v1084_v58 = vpop.permute.xlu2 %1083 }
 0x89c   :  { %v1088_v60 = vmul.f32 %v1084_v58, %v7571_v55 }
 0x89e   :  { %1093 = vrot.lane.b32.xlu0 %v1088_v60, %s7256_s0 }
 0x8a5   :  { %v970_v6 = vpop.permute.xlu0 %969 }
 0x8a6   :  { %v974_v59 = vmul.f32 %v970_v6, %v965_v39 }
 0x8a8   :  { %979 = vrot.lane.b32.xlu1 %v974_v59, %s7256_s0 }
 0x8b3   :  { %v1082_v53 = vpop.permute.xlu1 %1081 }
 0x8b4   :  { %v1087_v29 = vmul.f32 %v1082_v53, %v1064_v28 }
 0x8b6   :  { %1091 = vrot.lane.b32.xlu2 %v1087_v29, %s7256_s0 }
 0x902   :  { %v978_v52 = vpop.permute.xlu0 %977 }
 0x903   :  { %v983_v10 = vadd.f32 %v978_v52, %v7393_v61 }
 0x905   :  { %6744 = vtanh.f32 %v983_v10 }
 0x90b   :  { %v6745_v32 = vpop.eup %6744 }
 0x90c   :  { %991 = vrot.lane.b32.xlu1 %v6745_v32, %s7257_s25 }
 0x910   :  { %v1092_v12 = vpop.permute.xlu2 %1091  ;;  %v1094_v16 = vpop.permute.xlu0 %1093 }
 0x911   :  { %v1097_v19 = vadd.f32 %v1092_v12, %v7390_v56  ;;  %v1098_v33 = vadd.f32 %v1094_v16, %v7378_v42 }
 0x913   :  { %6746 = vtanh.f32 %v1097_v19 }
 0x914   :  { %6748 = vtanh.f32 %v1098_v33 }
 0x919   :  { %v6747_v11 = vpop.eup %6746 }
 0x91a   :  { %v6749_v34 = vpop.eup %6748  ;;  %v980_v14 = vpop.permute.xlu1 %979  ;;  %1105 = vrot.lane.b32.xlu0 %v6747_v11, %s7257_s25 }
 0x91b   :  { %v984_v15 = vadd.f32 %v980_v14, %v7387_v49  ;;  %1107 = vrot.lane.b32.xlu1 %v6749_v34, %s7257_s25 }
 0x91d   :  { %6750 = vtanh.f32 %v984_v15 }
 0x923   :  { %v6751_v17 = vpop.eup %6750 }
 0x924   :  { %993 = vrot.lane.b32.xlu2 %v6751_v17, %s7257_s25 }
 0x97e   :  { %v994_v40 = vpop.permute.xlu2 %993  ;;  %v992_v44 = vpop.permute.xlu1 %991 }
 0x97f   :  { %v998_v46 = vmul.f32 %v994_v40, %v988_v36  ;;  %v997_v50 = vmul.f32 %v992_v44, %v987_v37 }
 0x981   :  { %v7598_v8 = vadd.f32 %v1004_v45, %v998_v46  ;;  %v7600_v57 = vadd.f32 %v1003_v47, %v997_v50 }
 0x983   :  { %v1135_v58 = vrot.slane %v7600_v57, 3  ;;  %v1136_v60 = vrot.slane %v7598_v8, 2 }
 0x985   :  { %v1137_v62 = vsel %vm419_vm11, %v1136_v60, %v1135_v58 }
 0x986   :  { %1138 = vrot.lane.b32.xlu2 %v1137_v62, %s7257_s25 }
 0x98c   :  { %v1106_v3 = vpop.permute.xlu0 %1105 }
 0x98d   :  { %v1108_v41 = vpop.permute.xlu1 %1107  ;;  %v1111_v4 = vmul.f32 %v1106_v3, %v1101_v0 }
 0x98e   :  { %v1112_v5 = vmul.f32 %v1108_v41, %v1102_v2 }
 0x98f   :  { %v7608_v6 = vadd.f32 %v1117_v63, %v1111_v4 }
 0x990   :  { %v7611_v39 = vadd.f32 %v7574_v51, %v1112_v5 }
 0x991   :  { %v1249_v59 = vrot.slane %v7608_v6, 4  ;;  %1133 = vst.msk [vmem:[#allocation2] sm:$0x10] %vm1132_vm13, %v7608_v6 }
 0x992   :  { %v1250_v13 = vrot.slane %v7611_v39, 3  ;;  %1134 = vst.msk [vmem:[#allocation2 + $0x8] sm:$0x10] %vm1132_vm13, %v7611_v39 }
 0x994   :  { %v1251_v18 = vsel %vm419_vm11, %v1250_v13, %v1249_v59 }
 0x995   :  { %1252 = vrot.lane.b32.xlu0 %v1251_v18, %s7257_s25 }
 0x9e0   :  { %v1139_v55 = vpop.permute.xlu2 %1138 }
 0x9e1   :  { %6465 = vmatmul.msk.f32.vlgmr.msrb.gmra.mxu1 %vm198_vm12, %v1139_v55 }
 0xa07   :  { %v1253_v20 = vpop.permute.xlu0 %1252 }
 0xa08   :  { %6468 = vmatmul.msk.f32.vlgmr.msrb.gmra.mxu3 %vm198_vm12, %v1253_v20 }
 0xa5e   :  { %v1159_v51 = vpop.f32.mrf.mxu1 }
 0xa5f   :  { %v1160_v21 = vadd.f32 %v1159_v51, %v7375_v35 }
 0xa61   :  { %v1163_v23 = vrot.slane %v1160_v21, 4  ;;  %v1164_v24 = vrot.slane %v1160_v21, 5 }
 0xa63   :  { %1209 = vrot.lane.b32.xlu2 %v1164_v24, %s7256_s0  ;;  %1207 = vrot.lane.b32.xlu1 %v1163_v23, %s7256_s0  ;;  %v1168_v53 = vadd.f32 %v1164_v24, %v7387_v49  ;;  %v1167_v16 = vadd.f32 %v1163_v23, %v7393_v61 }
 0xa65   :  { %v6467_v10 = vmul.f32 -1.442695, %v1168_v53  ;;  %v6466_v33 = vmul.f32 -1.442695, %v1167_v16 }
 0xa67   :  { %6752 = vpow2.f32 %v6467_v10 }
 0xa6d   :  { %v6753_v32 = vpop.eup %6752 }
 0xa6e   :  { %v1176_v12 = vadd.f32 1.0, %v6753_v32 }
 0xa70   :  { %6754 = vrcp.f32 %v1176_v12  ;;  %v1203_v27 = vand.u32 2147483648, %v1176_v12  ;;  %vm1197_vm15 = vweird.f32 %v1176_v12  ;;  %v1201_v37 = vand.u32 2147483647, %v1176_v12 }
 0xa71   :  { %6756 = vpow2.f32 %v6466_v33 }
 0xa72   :  { %v1204_v40 = vor.u32 1.1754944e-38, %v1203_v27  ;;  %vm1202_vm5 = vcmp.eq.f32.partialorder %v1201_v37, 8.507059e+37 }
 0xa76   :  { %v6755_v19 = vpop.eup %6754 }
 0xa77   :  { %v1193_v11 = vmul.f32 %v6755_v19, %v1176_v12  ;;  %v6757_v14 = vpop.eup %6756  ;;  %vm1198_vm14 = vweird.f32 %v6755_v19 }
 0xa78   :  { %v1175_v17 = vadd.f32 1.0, %v6757_v14  ;;  %vm1199_vm3 = vmor %vm1197_vm15, %vm1198_vm14 }
 0xa79   :  { %v1194_v34 = vsub.f32 1.0, %v1193_v11 }
 0xa7a   :  { %6758 = vrcp.f32 %v1175_v17  ;;  %v1188_v0 = vand.u32 2147483648, %v1175_v17  ;;  %vm1182_vm7 = vweird.f32 %v1175_v17  ;;  %v1186_v2 = vand.u32 2147483647, %v1175_v17 }
 0xa7b   :  { %v1195_v15 = vmul.f32 %v6755_v19, %v1194_v34 }
 0xa7c   :  { %v1189_v63 = vor.u32 1.1754944e-38, %v1188_v0  ;;  %vm1187_vm9 = vcmp.eq.f32.partialorder %v1186_v2, 8.507059e+37 }
 0xa7d   :  { %v1196_v36 = vadd.f32 %v6755_v19, %v1195_v15 }
 0xa7f   :  { %v1200_v38 = vsel %vm1199_vm3, %v6755_v19, %v1196_v36 }
 0xa80   :  { %v7629_v45 = vsel %vm1202_vm5, %v1204_v40, %v1200_v38  ;;  %v6759_v47 = vpop.eup %6758 }
 0xa81   :  { %v1178_v50 = vmul.f32 %v6759_v47, %v1175_v17  ;;  %vm1183_vm6 = vweird.f32 %v6759_v47 }
 0xa82   :  { %vm1184_vm8 = vmor %vm1182_vm7, %vm1183_vm6 }
 0xa83   :  { %v1179_v58 = vsub.f32 1.0, %v1178_v50 }
 0xa85   :  { %v1180_v60 = vmul.f32 %v6759_v47, %v1179_v58 }
 0xa87   :  { %v1181_v62 = vadd.f32 %v6759_v47, %v1180_v60 }
 0xa89   :  { %v1185_v41 = vsel %vm1184_vm8, %v6759_v47, %v1181_v62 }
 0xa8a   :  { %v7635_v59 = vsel %vm1187_vm9, %v1189_v63, %v1185_v41 }
 0xa8b   :  { %v1273_v25 = vpop.f32.mrf.mxu3 }
 0xa8c   :  { %v1274_v28 = vadd.f32 %v1273_v25, %v7381_v43 }
 0xa8e   :  { %v1277_v29 = vrot.slane %v1274_v28, 5  ;;  %v1278_v52 = vrot.slane %v1274_v28, 6 }
 0xa90   :  { %1323 = vrot.lane.b32.xlu1 %v1278_v52, %s7256_s0  ;;  %1321 = vrot.lane.b32.xlu0 %v1277_v29, %s7256_s0  ;;  %v1281_v1 = vadd.f32 %v1277_v29, %v7390_v56  ;;  %v1282_v3 = vadd.f32 %v1278_v52, %v7378_v42 }
 0xa92   :  { %v6469_v4 = vmul.f32 -1.442695, %v1281_v1  ;;  %v6470_v5 = vmul.f32 -1.442695, %v1282_v3 }
 0xa94   :  { %6760 = vpow2.f32 %v6469_v4  ;;  %v1227_v4 = vsub.f32 1.0, %v7635_v59 }
 0xa95   :  { %6762 = vpow2.f32 %v6470_v5  ;;  %v1239_v5 = vrot.slane %v7600_v57, 7 }
 0xa9a   :  { %v6761_v55 = vpop.eup %6760 }
 0xa9b   :  { %v6763_v20 = vpop.eup %6762  ;;  %v1289_v51 = vadd.f32 1.0, %v6761_v55  ;;  %v1240_v55 = vrot.slane %v7598_v8, 7 }
 0xa9c   :  { %v1290_v21 = vadd.f32 1.0, %v6763_v20  ;;  %v1243_v20 = vmul.f32 %v1239_v5, %v7635_v59 }
 0xa9d   :  { %6764 = vrcp.f32 %v1289_v51  ;;  %vm1296_vm14 = vweird.f32 %v1289_v51  ;;  %v1302_v19 = vand.u32 2147483648, %v1289_v51  ;;  %v1300_v11 = vand.u32 2147483647, %v1289_v51 }
 0xa9e   :  { %6766 = vrcp.f32 %v1290_v21  ;;  %v1317_v16 = vand.u32 2147483648, %v1290_v21  ;;  %vm1311_vm15 = vweird.f32 %v1290_v21  ;;  %v1315_v33 = vand.u32 2147483647, %v1290_v21 }
 0xa9f   :  { %v1303_v17 = vor.u32 1.1754944e-38, %v1302_v19  ;;  %vm1301_vm7 = vcmp.eq.f32.partialorder %v1300_v11, 8.507059e+37 }
 0xaa0   :  { %v1318_v15 = vor.u32 1.1754944e-38, %v1317_v16  ;;  %vm1316_vm6 = vcmp.eq.f32.partialorder %v1315_v33, 8.507059e+37 }
 0xaa3   :  { %v6765_v23 = vpop.eup %6764 }
 0xaa4   :  { %v6767_v24 = vpop.eup %6766  ;;  %v1292_v53 = vmul.f32 %v6765_v23, %v1289_v51  ;;  %vm1297_vm10 = vweird.f32 %v6765_v23 }
 0xaa5   :  { %v1307_v25 = vmul.f32 %v6767_v24, %v1290_v21  ;;  %vm1312_vm13 = vweird.f32 %v6767_v24  ;;  %vm1298_vm3 = vmor %vm1296_vm14, %vm1297_vm10 }
 0xaa6   :  { %v1293_v29 = vsub.f32 1.0, %v1292_v53  ;;  %vm1313_vm5 = vmor %vm1311_vm15, %vm1312_vm13 }
 0xaa7   :  { %v1308_v28 = vsub.f32 1.0, %v1307_v25 }
 0xaa8   :  { %v1294_v10 = vmul.f32 %v6765_v23, %v1293_v29 }
 0xaa9   :  { %v1309_v52 = vmul.f32 %v6767_v24, %v1308_v28 }
 0xaaa   :  { %v1295_v12 = vadd.f32 %v6765_v23, %v1294_v10 }
 0xaab   :  { %v1310_v32 = vadd.f32 %v6767_v24, %v1309_v52 }
 0xaac   :  { %v1299_v14 = vsel %vm1298_vm3, %v6765_v23, %v1295_v12  ;;  %v1244_v23 = vmul.f32 %v1240_v55, %v7629_v45  ;;  %v1353_v12 = vrot.slane %v7608_v6, 1 }
 0xaad   :  { %v1314_v34 = vsel %vm1313_vm5, %v6767_v24, %v1310_v32  ;;  %v1304_v38 = vsel %vm1301_vm7, %v1303_v17, %v1299_v14 }
 0xaae   :  { %v1319_v27 = vsel %vm1316_vm6, %v1318_v15, %v1314_v34  ;;  %v1341_v32 = vsub.f32 1.0, %v1304_v38  ;;  %v1357_v11 = vmul.f32 %v1353_v12, %v1304_v38 }
 0xaaf   :  { %v1342_v10 = vsub.f32 1.0, %v1319_v27 }
 0xabd   :  { %v1210_v44 = vpop.permute.xlu2 %1209 }
 0xabe   :  { %v1214_v46 = vmul.f32 %v1210_v44, %v7629_v45 }
 0xac0   :  { %1219 = vrot.lane.b32.xlu0 %v1214_v46, %s7256_s0 }
 0xad5   :  { %v1208_v13 = vpop.permute.xlu1 %1207 }
 0xad6   :  { %v1213_v18 = vmul.f32 %v1208_v13, %v7635_v59  ;;  %v1354_v59 = vrot.slane %v7611_v39, 1 }
 0xad8   :  { %1217 = vrot.lane.b32.xlu2 %v1213_v18, %s7256_s0  ;;  %v1228_v18 = vsub.f32 1.0, %v7629_v45  ;;  %v1358_v19 = vmul.f32 %v1354_v59, %v1319_v27 }
 0xb02   :  { %v1324_v36 = vpop.permute.xlu1 %1323  ;;  %v1322_v37 = vpop.permute.xlu0 %1321 }
 0xb03   :  { %v1328_v40 = vmul.f32 %v1324_v36, %v1319_v27  ;;  %v1327_v44 = vmul.f32 %v1322_v37, %v1304_v38 }
 0xb05   :  { %1333 = vrot.lane.b32.xlu2 %v1328_v40, %s7256_s0  ;;  %1331 = vrot.lane.b32.xlu1 %v1327_v44, %s7256_s0 }
 0xb32   :  { %v1218_v46 = vpop.permute.xlu2 %1217  ;;  %v1220_v47 = vpop.permute.xlu0 %1219 }
 0xb33   :  { %v1223_v50 = vadd.f32 %v1218_v46, %v7393_v61  ;;  %v1224_v58 = vadd.f32 %v1220_v47, %v7387_v49 }
 0xb35   :  { %6768 = vtanh.f32 %v1223_v50 }
 0xb36   :  { %6770 = vtanh.f32 %v1224_v58 }
 0xb3b   :  { %v6769_v60 = vpop.eup %6768 }
 0xb3c   :  { %v6771_v62 = vpop.eup %6770  ;;  %1231 = vrot.lane.b32.xlu0 %v6769_v60, %s7257_s25 }
 0xb3d   :  { %1233 = vrot.lane.b32.xlu1 %v6771_v62, %s7257_s25 }
 0xb5f   :  { %v1334_v0 = vpop.permute.xlu2 %1333 }
 0xb60   :  { %v1338_v1 = vadd.f32 %v1334_v0, %v7378_v42 }
 0xb62   :  { %6772 = vtanh.f32 %v1338_v1 }
 0xb68   :  { %v6773_v2 = vpop.eup %6772 }
 0xb69   :  { %1347 = vrot.lane.b32.xlu0 %v6773_v2, %s7257_s25 }
 0xb77   :  { %v1332_v3 = vpop.permute.xlu1 %1331 }
 0xb78   :  { %v1337_v41 = vadd.f32 %v1332_v3, %v7390_v56 }
 0xb7a   :  { %6774 = vtanh.f32 %v1337_v41 }
 0xb80   :  { %v6775_v63 = vpop.eup %6774 }
 0xb81   :  { %1345 = vrot.lane.b32.xlu2 %v6775_v63, %s7257_s25 }
 0xbae   :  { %v1232_v13 = vpop.permute.xlu0 %1231 }
 0xbaf   :  { %v1237_v51 = vmul.f32 %v1232_v13, %v1227_v4  ;;  %v1234_v21 = vpop.permute.xlu1 %1233 }
 0xbb0   :  { %v1238_v24 = vmul.f32 %v1234_v21, %v1228_v18 }
 0xbb1   :  { %v7655_v25 = vadd.f32 %v1243_v20, %v1237_v51 }
 0xbb2   :  { %v7657_v53 = vadd.f32 %v1244_v23, %v1238_v24 }
 0xbb3   :  { %v1375_v28 = vrot.slane %v7655_v25, 4 }
 0xbb4   :  { %v1376_v29 = vrot.slane %v7657_v53, 3 }
 0xbb6   :  { %v1377_v52 = vsel %vm419_vm11, %v1376_v29, %v1375_v28 }
 0xbb7   :  { %1378 = vrot.lane.b32.xlu1 %v1377_v52, %s7257_s25 }
 0xbdb   :  { %v1348_v45 = vpop.permute.xlu0 %1347  ;;  %v1346_v16 = vpop.permute.xlu2 %1345 }
 0xbdc   :  { %v1352_v33 = vmul.f32 %v1348_v45, %v1342_v10  ;;  %v1351_v34 = vmul.f32 %v1346_v16, %v1341_v32 }
 0xbde   :  { %v7665_v14 = vadd.f32 %v1358_v19, %v1352_v33  ;;  %v7667_v15 = vadd.f32 %v1357_v11, %v1351_v34 }
 0xbe0   :  { %v1489_v17 = vrot.slane %v7667_v15, 3  ;;  %v1490_v36 = vrot.slane %v7665_v14, 2 }
 0xbe2   :  { %v1491_v37 = vsel %vm419_vm11, %v1490_v36, %v1489_v17 }
 0xbe3   :  { %1492 = vrot.lane.b32.xlu2 %v1491_v37, %s7257_s25 }
 0xc29   :  { %v1379_v39 = vpop.permute.xlu1 %1378 }
 0xc2a   :  { %6471 = vmatmul.msk.f32.vlgmr.msrb.gmra.mxu0 %vm198_vm12, %v1379_v39  ;;  %v1480_v39 = vrot.slane %v7657_v53, 7 }
 0xc3d   :  { %v1493_v6 = vpop.permute.xlu2 %1492 }
 0xc3e   :  { %6474 = vmatmul.msk.f32.vlgmr.msrb.gmra.mxu2 %vm198_vm12, %v1493_v6 }
 0xca7   :  { %v1399_v27 = vpop.f32.mrf.mxu0 }
 0xca8   :  { %v1400_v38 = vadd.f32 %v1399_v27, %v7375_v35 }
 0xcaa   :  { %v1403_v40 = vrot.slane %v1400_v38, 3  ;;  %v1404_v44 = vrot.slane %v1400_v38, 4 }
 0xcac   :  { %1449 = vrot.lane.b32.xlu1 %v1404_v44, %s7256_s0  ;;  %1447 = vrot.lane.b32.xlu0 %v1403_v40, %s7256_s0  ;;  %v1407_v60 = vadd.f32 %v1403_v40, %v7393_v61  ;;  %v1408_v62 = vadd.f32 %v1404_v44, %v7387_v49 }
 0xcae   :  { %v6472_v1 = vmul.f32 -1.442695, %v1407_v60  ;;  %v6473_v2 = vmul.f32 -1.442695, %v1408_v62 }
 0xcb0   :  { %6776 = vpow2.f32 %v6472_v1 }
 0xcb1   :  { %6778 = vpow2.f32 %v6473_v2 }
 0xcb6   :  { %v6777_v41 = vpop.eup %6776 }
 0xcb7   :  { %v6779_v63 = vpop.eup %6778  ;;  %v1415_v5 = vadd.f32 1.0, %v6777_v41 }
 0xcb8   :  { %v1416_v13 = vadd.f32 1.0, %v6779_v63 }
 0xcb9   :  { %vm1422_vm10 = vweird.f32 %v1415_v5  ;;  %v1426_v17 = vand.u32 2147483647, %v1415_v5  ;;  %v1428_v36 = vand.u32 2147483648, %v1415_v5 }
 0xcba   :  { %v1443_v34 = vand.u32 2147483648, %v1416_v13  ;;  %vm1437_vm13 = vweird.f32 %v1416_v13  ;;  %v1441_v37 = vand.u32 2147483647, %v1416_v13 }
 0xcbb   :  { %vm1427_vm4 = vcmp.eq.f32.partialorder %v1426_v17, 8.507059e+37 }
 0xcbc   :  { %vm1442_vm7 = vcmp.eq.f32.partialorder %v1441_v37, 8.507059e+37 }
 0xcc1   :  { %v1513_v46 = vpop.f32.mrf.mxu2 }
 0xcc2   :  { %v1514_v47 = vadd.f32 %v1513_v46, %v7381_v43  ;;  %v1444_v46 = vor.u32 1.1754944e-38, %v1443_v34 }
 0xcc4   :  { %v1517_v50 = vrot.slane %v1514_v47, 6  ;;  %v1518_v58 = vrot.slane %v1514_v47, 7  ;;  %v1429_v47 = vor.u32 1.1754944e-38, %v1428_v36 }
 0xcc6   :  { %1561 = vrot.lane.b32.xlu2 %v1517_v50, %s7256_s0  ;;  %1563 = vrot.lane.b32.xlu0 %v1518_v58, %s7256_s0  ;;  %v1521_v0 = vadd.f32 %v1517_v50, %v7390_v56  ;;  %v1522_v20 = vadd.f32 %v1518_v58, %v7378_v42 }
 0xcc8   :  { %v6475_v3 = vmul.f32 -1.442695, %v1521_v0  ;;  %v6476_v23 = vmul.f32 -1.442695, %v1522_v20 }
 0xcca   :  { %6780 = vpow2.f32 %v6475_v3 }
 0xccb   :  { %6782 = vrcp.f32 %v1415_v5 }
 0xccc   :  { %6784 = vrcp.f32 %v1416_v13 }
 0xcd0   :  { %v6781_v4 = vpop.eup %6780 }
 0xcd1   :  { %v1529_v18 = vadd.f32 1.0, %v6781_v4  ;;  %v6783_v55 = vpop.eup %6782 }
 0xcd2   :  { %v6785_v51 = vpop.eup %6784  ;;  %v1418_v28 = vmul.f32 %v6783_v55, %v1415_v5  ;;  %vm1423_vm8 = vweird.f32 %v6783_v55 }
 0xcd3   :  { %6786 = vrcp.f32 %v1529_v18  ;;  %v1433_v24 = vmul.f32 %v6785_v51, %v1416_v13  ;;  %vm1438_vm9 = vweird.f32 %v6785_v51  ;;  %vm7685_vm14 = vmor %vm1422_vm10, %vm1423_vm8  ;;  %v1542_v27 = vand.u32 2147483648, %v1529_v18 }
 0xcd4   :  { %6788 = vpow2.f32 %v6476_v23  ;;  %v1419_v10 = vsub.f32 1.0, %v1418_v28  ;;  %vm1439_vm3 = vmor %vm1437_vm13, %vm1438_vm9  ;;  %vm1536_vm5 = vweird.f32 %v1529_v18  ;;  %v1540_v44 = vand.u32 2147483647, %v1529_v18 }
 0xcd5   :  { %v1434_v52 = vsub.f32 1.0, %v1433_v24  ;;  %v1543_v1 = vor.u32 1.1754944e-38, %v1542_v27  ;;  %v1479_v27 = vrot.slane %v7655_v25, 7 }
 0xcd6   :  { %v1420_v12 = vmul.f32 %v6783_v55, %v1419_v10  ;;  %vm1541_vm8 = vcmp.eq.f32.partialorder %v1540_v44, 8.507059e+37 }
 0xcd7   :  { %v1435_v32 = vmul.f32 %v6785_v51, %v1434_v52 }
 0xcd8   :  { %v1421_v33 = vadd.f32 %v6783_v55, %v1420_v12 }
 0xcd9   :  { %v6787_v21 = vpop.eup %6786  ;;  %v1436_v19 = vadd.f32 %v6785_v51, %v1435_v32 }
 0xcda   :  { %v1532_v29 = vmul.f32 %v6787_v21, %v1529_v18  ;;  %v6789_v45 = vpop.eup %6788  ;;  %vm1537_vm15 = vweird.f32 %v6787_v21  ;;  %v1425_v40 = vsel %vm7685_vm14, %v6783_v55, %v1421_v33 }
 0xcdb   :  { %v1530_v11 = vadd.f32 1.0, %v6789_v45  ;;  %v1440_v38 = vsel %vm1439_vm3, %v6785_v51, %v1436_v19  ;;  %vm1538_vm6 = vmor %vm1536_vm5, %vm1537_vm15  ;;  %v1430_v0 = vsel %vm1427_vm4, %v1429_v47, %v1425_v40 }
 0xcdc   :  { %v1533_v59 = vsub.f32 1.0, %v1532_v29  ;;  %v1445_v60 = vsel %vm1442_vm7, %v1444_v46, %v1440_v38  ;;  %v1483_v47 = vmul.f32 %v1479_v27, %v1430_v0 }
 0xcdd   :  { %6790 = vrcp.f32 %v1530_v11  ;;  %v1557_v51 = vand.u32 2147483648, %v1530_v11  ;;  %vm1551_vm9 = vweird.f32 %v1530_v11  ;;  %v1468_v37 = vsub.f32 1.0, %v1445_v60 }
 0xcde   :  { %v1534_v16 = vmul.f32 %v6787_v21, %v1533_v59  ;;  %v1484_v44 = vmul.f32 %v1480_v39, %v1445_v60 }
 0xcdf   :  { %v1558_v24 = vor.u32 1.1754944e-38, %v1557_v51 }
 0xce0   :  { %v1535_v6 = vadd.f32 %v6787_v21, %v1534_v16 }
 0xce2   :  { %v1539_v50 = vsel %vm1538_vm6, %v6787_v21, %v1535_v6  ;;  %v1555_v21 = vand.u32 2147483647, %v1530_v11  ;;  %v1467_v6 = vsub.f32 1.0, %v1430_v0 }
 0xce3   :  { %v7691_v63 = vsel %vm1541_vm8, %v1543_v1, %v1539_v50  ;;  %v6791_v5 = vpop.eup %6790 }
 0xce4   :  { %v1547_v13 = vmul.f32 %v6791_v5, %v1530_v11  ;;  %vm1552_vm4 = vweird.f32 %v6791_v5  ;;  %vm1556_vm13 = vcmp.eq.f32.partialorder %v1555_v21, 8.507059e+37 }
 0xce5   :  { %vm1553_vm10 = vmor %vm1551_vm9, %vm1552_vm4 }
 0xce6   :  { %v1548_v18 = vsub.f32 1.0, %v1547_v13 }
 0xce8   :  { %v1549_v55 = vmul.f32 %v6791_v5, %v1548_v18 }
 0xcea   :  { %v1550_v20 = vadd.f32 %v6791_v5, %v1549_v55 }
 0xcec   :  { %v1554_v23 = vsel %vm1553_vm10, %v6791_v5, %v1550_v20 }
 0xced   :  { %v1559_v28 = vsel %vm1556_vm13, %v1558_v24, %v1554_v23 }
 0xd1e   :  { %v1450_v58 = vpop.permute.xlu1 %1449  ;;  %v1448_v62 = vpop.permute.xlu0 %1447 }
 0xd1f   :  { %v1454_v2 = vmul.f32 %v1450_v58, %v1445_v60  ;;  %v1453_v3 = vmul.f32 %v1448_v62, %v1430_v0  ;;  %v1581_v60 = vsub.f32 1.0, %v7691_v63  ;;  %v1593_v0 = vrot.slane %v7667_v15, 1 }
 0xd20   :  { %v1562_v41 = vpop.permute.xlu2 %1561 }
 0xd21   :  { %v1567_v4 = vmul.f32 %v1562_v41, %v7691_v63  ;;  %1459 = vrot.lane.b32.xlu2 %v1454_v2, %s7256_s0  ;;  %1457 = vrot.lane.b32.xlu1 %v1453_v3, %s7256_s0  ;;  %v1582_v41 = vsub.f32 1.0, %v1559_v28  ;;  %v1597_v20 = vmul.f32 %v1593_v0, %v7691_v63 }
 0xd23   :  { %1571 = vrot.lane.b32.xlu0 %v1567_v4, %s7256_s0  ;;  %v1594_v4 = vrot.slane %v7665_v14, 1 }
 0xd25   :  { %v1598_v18 = vmul.f32 %v1594_v4, %v1559_v28 }
 0xd38   :  { %v1564_v29 = vpop.permute.xlu0 %1563 }
 0xd39   :  { %v1568_v52 = vmul.f32 %v1564_v29, %v1559_v28 }
 0xd3b   :  { %1573 = vrot.lane.b32.xlu1 %v1568_v52, %s7256_s0 }
 0xd7b   :  { %v1460_v10 = vpop.permute.xlu2 %1459 }
 0xd7c   :  { %v1464_v59 = vadd.f32 %v1460_v10, %v7387_v49 }
 0xd7e   :  { %6792 = vtanh.f32 %v1464_v59 }
 0xd84   :  { %v6793_v32 = vpop.eup %6792 }
 0xd85   :  { %1473 = vrot.lane.b32.xlu0 %v6793_v32, %s7257_s25 }
 0xd93   :  { %v1458_v12 = vpop.permute.xlu1 %1457 }
 0xd94   :  { %v1463_v45 = vadd.f32 %v1458_v12, %v7393_v61 }
 0xd95   :  { %v1572_v16 = vpop.permute.xlu0 %1571 }
 0xd96   :  { %6794 = vtanh.f32 %v1463_v45  ;;  %v1577_v19 = vadd.f32 %v1572_v16, %v7390_v56 }
 0xd98   :  { %6796 = vtanh.f32 %v1577_v19 }
 0xd9c   :  { %v6795_v33 = vpop.eup %6794 }
 0xd9d   :  { %1471 = vrot.lane.b32.xlu2 %v6795_v33, %s7257_s25 }
 0xd9e   :  { %v6797_v11 = vpop.eup %6796 }
 0xd9f   :  { %1585 = vrot.lane.b32.xlu1 %v6797_v11, %s7257_s25 }
 0xdad   :  { %v1574_v34 = vpop.permute.xlu1 %1573 }
 0xdae   :  { %v1578_v17 = vadd.f32 %v1574_v34, %v7378_v42 }
 0xdb0   :  { %6798 = vtanh.f32 %v1578_v17 }
 0xdb6   :  { %v6799_v36 = vpop.eup %6798 }
 0xdb7   :  { %1587 = vrot.lane.b32.xlu2 %v6799_v36, %s7257_s25 }
 0xdf7   :  { %v1474_v38 = vpop.permute.xlu0 %1473  ;;  %v1472_v40 = vpop.permute.xlu2 %1471 }
 0xdf8   :  { %v1478_v46 = vmul.f32 %v1474_v38, %v1468_v37  ;;  %v1477_v50 = vmul.f32 %v1472_v40, %v1467_v6 }
 0xdfa   :  { %v7708_v58 = vadd.f32 %v1484_v44, %v1478_v46  ;;  %v7710_v62 = vadd.f32 %v1483_v47, %v1477_v50 }
 0xdfc   :  { %v1615_v1 = vrot.slane %v7710_v62, 5  ;;  %v1616_v2 = vrot.slane %v7708_v58, 4 }
 0xdfe   :  { %v1617_v3 = vsel %vm419_vm11, %v1616_v2, %v1615_v1 }
 0xdff   :  { %1618 = vrot.lane.b32.xlu0 %v1617_v3, %s7257_s25 }
 0xe11   :  { %v1588_v5 = vpop.permute.xlu2 %1587  ;;  %v1586_v13 = vpop.permute.xlu1 %1585 }
 0xe12   :  { %v1592_v55 = vmul.f32 %v1588_v5, %v1582_v41  ;;  %v1591_v51 = vmul.f32 %v1586_v13, %v1581_v60 }
 0xe14   :  { %v7720_v21 = vadd.f32 %v1598_v18, %v1592_v55  ;;  %v7722_v23 = vadd.f32 %v1597_v20, %v1591_v51 }
 0xe16   :  { %v1730_v24 = vrot.slane %v7720_v21, 1  ;;  %v1729_v29 = vrot.slane %v7722_v23, 2 }
 0xe18   :  { %v1731_v52 = vsel %vm419_vm11, %v1730_v24, %v1729_v29 }
 0xe19   :  { %1732 = vrot.lane.b32.xlu1 %v1731_v52, %s7257_s25 }
 0xe71   :  { %v1619_v10 = vpop.permute.xlu0 %1618 }
 0xe72   :  { %6477 = vmatmul.msk.f32.vlgmr.msra.gmra.mxu1 %vm198_vm12, %v1619_v10 }
 0xe8b   :  { %v1733_v28 = vpop.permute.xlu1 %1732 }
 0xe8c   :  { %6480 = vmatmul.msk.f32.vlgmr.msra.gmra.mxu3 %vm198_vm12, %v1733_v28 }
 0xeef   :  { %v1639_v63 = vpop.f32.mrf.mxu1 }
 0xef0   :  { %v1640_v59 = vadd.f32 %v1639_v63, %v7375_v35 }
 0xef2   :  { %v1643_v32 = vrot.slane %v1640_v59, 2  ;;  %v1644_v12 = vrot.slane %v1640_v59, 3 }
 0xef4   :  { %1689 = vrot.lane.b32.xlu0 %v1644_v12, %s7256_s0  ;;  %1687 = vrot.lane.b32.xlu2 %v1643_v32, %s7256_s0  ;;  %v1647_v33 = vadd.f32 %v1643_v32, %v7393_v61  ;;  %v1648_v36 = vadd.f32 %v1644_v12, %v7387_v49 }
 0xef6   :  { %v6478_v11 = vmul.f32 -1.442695, %v1647_v33  ;;  %v6479_v39 = vmul.f32 -1.442695, %v1648_v36 }
 0xef8   :  { %6800 = vpow2.f32 %v6478_v11 }
 0xefe   :  { %v6801_v34 = vpop.eup %6800 }
 0xeff   :  { %v1655_v17 = vadd.f32 1.0, %v6801_v34 }
 0xf01   :  { %6802 = vrcp.f32 %v1655_v17  ;;  %v1668_v1 = vand.u32 2147483648, %v1655_v17  ;;  %vm1662_vm15 = vweird.f32 %v1655_v17  ;;  %v1666_v3 = vand.u32 2147483647, %v1655_v17 }
 0xf02   :  { %6804 = vpow2.f32 %v6479_v39 }
 0xf03   :  { %v1669_v60 = vor.u32 1.1754944e-38, %v1668_v1  ;;  %vm1667_vm5 = vcmp.eq.f32.partialorder %v1666_v3, 8.507059e+37 }
 0xf07   :  { %v6803_v37 = vpop.eup %6802 }
 0xf08   :  { %v1658_v27 = vmul.f32 %v6803_v37, %v1655_v17  ;;  %v6805_v44 = vpop.eup %6804  ;;  %vm1663_vm14 = vweird.f32 %v6803_v37 }
 0xf09   :  { %v1656_v47 = vadd.f32 1.0, %v6805_v44  ;;  %vm1664_vm3 = vmor %vm1662_vm15, %vm1663_vm14 }
 0xf0a   :  { %v1659_v40 = vsub.f32 1.0, %v1658_v27 }
 0xf0b   :  { %v1683_v32 = vand.u32 2147483648, %v1656_v47  ;;  %vm1677_vm7 = vweird.f32 %v1656_v47  ;;  %v1681_v12 = vand.u32 2147483647, %v1656_v47 }
 0xf0c   :  { %v1660_v46 = vmul.f32 %v6803_v37, %v1659_v40 }
 0xf0d   :  { %v1684_v11 = vor.u32 1.1754944e-38, %v1683_v32  ;;  %vm1682_vm4 = vcmp.eq.f32.partialorder %v1681_v12, 8.507059e+37 }
 0xf0e   :  { %v1661_v50 = vadd.f32 %v6803_v37, %v1660_v46 }
 0xf0f   :  { %v1753_v45 = vpop.f32.mrf.mxu3 }
 0xf10   :  { %v1754_v16 = vadd.f32 %v1753_v45, %v7381_v43  ;;  %v1665_v41 = vsel %vm1664_vm3, %v6803_v37, %v1661_v50 }
 0xf11   :  { %v7741_v0 = vsel %vm1667_vm5, %v1669_v60, %v1665_v41 }
 0xf12   :  { %1802 = vrot.lane.b32.xlu2 %v1754_v16, %s7256_s0  ;;  %v1757_v19 = vrot.slane %v1754_v16, 7  ;;  %v1761_v6 = vadd.f32 %v1754_v16, %v7378_v42 }
 0xf14   :  { %1800 = vrot.lane.b32.xlu1 %v1757_v19, %s7256_s0  ;;  %v6482_v38 = vmul.f32 -1.442695, %v1761_v6  ;;  %v1760_v20 = vadd.f32 %v1757_v19, %v7390_v56 }
 0xf16   :  { %6806 = vpow2.f32 %v6482_v38  ;;  %v6481_v52 = vmul.f32 -1.442695, %v1760_v20 }
 0xf17   :  { %6808 = vrcp.f32 %v1656_v47 }
 0xf1c   :  { %v6807_v2 = vpop.eup %6806 }
 0xf1d   :  { %v1769_v4 = vadd.f32 1.0, %v6807_v2  ;;  %v6809_v18 = vpop.eup %6808 }
 0xf1e   :  { %v1673_v55 = vmul.f32 %v6809_v18, %v1656_v47  ;;  %vm1678_vm6 = vweird.f32 %v6809_v18 }
 0xf1f   :  { %6810 = vrcp.f32 %v1769_v4  ;;  %vm1679_vm8 = vmor %vm1677_vm7, %vm1678_vm6  ;;  %v1796_v37 = vand.u32 2147483648, %v1769_v4  ;;  %vm1790_vm10 = vweird.f32 %v1769_v4  ;;  %v1794_v6 = vand.u32 2147483647, %v1769_v4 }
 0xf20   :  { %v1674_v29 = vsub.f32 1.0, %v1673_v55  ;;  %6812 = vpow2.f32 %v6481_v52 }
 0xf21   :  { %v1797_v38 = vor.u32 1.1754944e-38, %v1796_v37  ;;  %vm1795_vm14 = vcmp.eq.f32.partialorder %v1794_v6, 8.507059e+37 }
 0xf22   :  { %v1675_v28 = vmul.f32 %v6809_v18, %v1674_v29 }
 0xf24   :  { %v1676_v59 = vadd.f32 %v6809_v18, %v1675_v28 }
 0xf25   :  { %v6811_v51 = vpop.eup %6810 }
 0xf26   :  { %v1786_v10 = vmul.f32 %v6811_v51, %v1769_v4  ;;  %v6813_v16 = vpop.eup %6812  ;;  %v1680_v33 = vsel %vm1679_vm8, %v6809_v18, %v1676_v59  ;;  %vm1791_vm9 = vweird.f32 %v6811_v51 }
 0xf27   :  { %v1768_v19 = vadd.f32 1.0, %v6813_v16  ;;  %v1685_v36 = vsel %vm1682_vm4, %v1684_v11, %v1680_v33  ;;  %vm1792_vm13 = vmor %vm1790_vm10, %vm1791_vm9  ;;  %v1707_v33 = vsub.f32 1.0, %v7741_v0  ;;  %v1719_v11 = vrot.slane %v7710_v62, 7 }
 0xf28   :  { %v1787_v63 = vsub.f32 1.0, %v1786_v10 }
 0xf29   :  { %6814 = vrcp.f32 %v1768_v19  ;;  %v1781_v41 = vand.u32 2147483648, %v1768_v19  ;;  %vm1775_vm3 = vweird.f32 %v1768_v19  ;;  %v1779_v4 = vand.u32 2147483647, %v1768_v19 }
 0xf2a   :  { %v1788_v45 = vmul.f32 %v6811_v51, %v1787_v63 }
 0xf2b   :  { %vm1780_vm6 = vcmp.eq.f32.partialorder %v1779_v4, 8.507059e+37 }
 0xf2c   :  { %v1789_v34 = vadd.f32 %v6811_v51, %v1788_v45 }
 0xf2e   :  { %v1793_v27 = vsel %vm1792_vm13, %v6811_v51, %v1789_v34  ;;  %v1708_v34 = vsub.f32 1.0, %v1685_v36 }
 0xf2f   :  { %v7747_v44 = vsel %vm1795_vm14, %v1797_v38, %v1793_v27  ;;  %v6815_v47 = vpop.eup %6814 }
 0xf30   :  { %v1771_v50 = vmul.f32 %v6815_v47, %v1768_v19  ;;  %vm1776_vm15 = vweird.f32 %v6815_v47  ;;  %v1720_v19 = vrot.slane %v7708_v58, 7 }
 0xf31   :  { %vm1777_vm5 = vmor %vm1775_vm3, %vm1776_vm15 }
 0xf32   :  { %v1772_v1 = vsub.f32 1.0, %v1771_v50  ;;  %v1724_v27 = vmul.f32 %v1720_v19, %v1685_v36 }
 0xf34   :  { %v1773_v2 = vmul.f32 %v6815_v47, %v1772_v1 }
 0xf36   :  { %v1774_v3 = vadd.f32 %v6815_v47, %v1773_v2 }
 0xf38   :  { %v1778_v60 = vsel %vm1777_vm5, %v6815_v47, %v1774_v3  ;;  %v1821_v3 = vsub.f32 1.0, %v7747_v44 }
 0xf4e   :  { %v1688_v5 = vpop.permute.xlu2 %1687 }
 0xf4f   :  { %v1693_v13 = vmul.f32 %v1688_v5, %v7741_v0  ;;  %v1782_v5 = vor.u32 1.1754944e-38, %v1781_v41 }
 0xf51   :  { %1697 = vrot.lane.b32.xlu0 %v1693_v13, %s7256_s0  ;;  %v1783_v18 = vsel %vm1780_vm6, %v1782_v5, %v1778_v60 }
 0xf52   :  { %v1820_v41 = vsub.f32 1.0, %v1783_v18 }
 0xf66   :  { %v1690_v17 = vpop.permute.xlu0 %1689 }
 0xf67   :  { %v1694_v39 = vmul.f32 %v1690_v17, %v1685_v36 }
 0xf69   :  { %1699 = vrot.lane.b32.xlu1 %v1694_v39, %s7256_s0  ;;  %v1723_v39 = vmul.f32 %v1719_v11, %v7741_v0  ;;  %v1832_v0 = vrot.slane %v7722_v23, 1 }
 0xf6b   :  { %v1835_v60 = vmul.f32 %v1832_v0, %v1783_v18 }
 0xf6c   :  { %v1803_v40 = vpop.permute.xlu2 %1802 }
 0xf6d   :  { %v1807_v46 = vmul.f32 %v1803_v40, %v7747_v44 }
 0xf6f   :  { %1812 = vrot.lane.b32.xlu0 %v1807_v46, %s7256_s0 }
 0xf86   :  { %v1801_v13 = vpop.permute.xlu1 %1800 }
 0xf87   :  { %v1806_v55 = vmul.f32 %v1801_v13, %v1783_v18  ;;  %v1836_v13 = vmul.f32 %v7747_v44, %v1730_v24 }
 0xf89   :  { %1810 = vrot.lane.b32.xlu2 %v1806_v55, %s7256_s0 }
 0xfc3   :  { %v1698_v20 = vpop.permute.xlu0 %1697 }
 0xfc4   :  { %v1703_v51 = vadd.f32 %v1698_v20, %v7393_v61 }
 0xfc6   :  { %6816 = vtanh.f32 %v1703_v51 }
 0xfcc   :  { %v6817_v29 = vpop.eup %6816 }
 0xfcd   :  { %1711 = vrot.lane.b32.xlu1 %v6817_v29, %s7257_s25 }
 0xfdb   :  { %v1700_v52 = vpop.permute.xlu1 %1699 }
 0xfdc   :  { %v1704_v10 = vadd.f32 %v1700_v52, %v7387_v49 }
 0xfde   :  { %6818 = vtanh.f32 %v1704_v10 }
 0xfe1   :  { %v1813_v28 = vpop.permute.xlu0 %1812 }
 0xfe2   :  { %v1817_v63 = vadd.f32 %v1813_v28, %v7378_v42 }
 0xfe3   :  { %v1811_v59 = vpop.permute.xlu2 %1810 }
 0xfe4   :  { %v6819_v32 = vpop.eup %6818  ;;  %6820 = vtanh.f32 %v1817_v63  ;;  %v1816_v12 = vadd.f32 %v1811_v59, %v7390_v56 }
 0xfe5   :  { %1713 = vrot.lane.b32.xlu2 %v6819_v32, %s7257_s25 }
 0xfe6   :  { %6822 = vtanh.f32 %v1816_v12 }
 0xfea   :  { %v6821_v45 = vpop.eup %6820 }
 0xfeb   :  { %1826 = vrot.lane.b32.xlu1 %v6821_v45, %s7257_s25 }
 0xfec   :  { %v6823_v16 = vpop.eup %6822 }
 0xfed   :  { %1824 = vrot.lane.b32.xlu0 %v6823_v16, %s7257_s25 }
0x103f   :  { %v1712_v17 = vpop.permute.xlu1 %1711  ;;  %v1714_v37 = vpop.permute.xlu2 %1713 }
0x1040   :  { %v1717_v6 = vmul.f32 %v1712_v17, %v1707_v33  ;;  %v1718_v38 = vmul.f32 %v1714_v37, %v1708_v34 }
0x1042   :  { %v7764_v40 = vadd.f32 %v1723_v39, %v1717_v6  ;;  %v7766_v46 = vadd.f32 %v1724_v27, %v1718_v38 }
0x1044   :  { %v1853_v47 = vrot.slane %v7764_v40, 6  ;;  %v1854_v50 = vrot.slane %v7766_v46, 5 }
0x1046   :  { %v1855_v1 = vsel %vm419_vm11, %v1854_v50, %v1853_v47 }
0x1047   :  { %1856 = vrot.lane.b32.xlu2 %v1855_v1, %s7257_s25 }
0x105d   :  { %v1827_v2 = vpop.permute.xlu1 %1826 }
0x105e   :  { %v1831_v4 = vmul.f32 %v1827_v2, %v1821_v3 }
0x105f   :  { %v1825_v36 = vpop.permute.xlu0 %1824 }
0x1060   :  { %v1830_v5 = vmul.f32 %v1825_v36, %v1820_v41  ;;  %v7779_v20 = vadd.f32 %v1836_v13, %v1831_v4 }
0x1062   :  { %v7777_v55 = vadd.f32 %v1835_v60, %v1830_v5 }
0x1064   :  { %v1967_v51 = vrot.slane %v7777_v55, 1 }
0x1066   :  { %v1968_v29 = vsel %vm419_vm11, %v7779_v20, %v1967_v51 }
0x1067   :  { %1969 = vrot.lane.b32.xlu0 %v1968_v29, %s7257_s25 }
0x10a1   :  { %v1857_v52 = vpop.permute.xlu2 %1856 }
0x10a2   :  { %6483 = vmatmul.msk.f32.vlgmr.msra.gmra.mxu0 %vm198_vm12, %v1857_v52 }
0x10d9   :  { %v1970_v18 = vpop.permute.xlu0 %1969 }
0x10da   :  { %6486 = vmatmul.msk.f32.vlgmr.msra.gmra.mxu2 %vm198_vm12, %v1970_v18 }
0x111f   :  { %v1877_v24 = vpop.f32.mrf.mxu0 }
0x1120   :  { %v1878_v44 = vadd.f32 %v1877_v24, %v7375_v35 }
0x1122   :  { %v1881_v10 = vrot.slane %v1878_v44, 1  ;;  %v1882_v28 = vrot.slane %v1878_v44, 2 }
0x1124   :  { %1927 = vrot.lane.b32.xlu2 %v1882_v28, %s7256_s0  ;;  %1925 = vrot.lane.b32.xlu1 %v1881_v10, %s7256_s0  ;;  %v1886_v63 = vadd.f32 %v1882_v28, %v7387_v49  ;;  %v1885_v35 = vadd.f32 %v1881_v10, %v7393_v61 }
0x1126   :  { %v6485_v59 = vmul.f32 -1.442695, %v1886_v63  ;;  %v6484_v34 = vmul.f32 -1.442695, %v1885_v35 }
0x1128   :  { %6824 = vpow2.f32 %v6485_v59 }
0x112e   :  { %v6825_v32 = vpop.eup %6824 }
0x112f   :  { %v1894_v45 = vadd.f32 1.0, %v6825_v32 }
0x1131   :  { %6826 = vrcp.f32 %v1894_v45  ;;  %v1921_v38 = vand.u32 2147483648, %v1894_v45  ;;  %vm1915_vm8 = vweird.f32 %v1894_v45 }
0x1132   :  { %6828 = vpow2.f32 %v6484_v34 }
0x1133   :  { %v1922_v50 = vor.u32 1.1754944e-38, %v1921_v38 }
0x1137   :  { %v6827_v11 = vpop.eup %6826 }
0x1138   :  { %v1911_v19 = vmul.f32 %v6827_v11, %v1894_v45  ;;  %v6829_v37 = vpop.eup %6828  ;;  %vm1916_vm7 = vweird.f32 %v6827_v11 }
0x1139   :  { %v1893_v6 = vadd.f32 1.0, %v6829_v37  ;;  %vm1917_vm4 = vmor %vm1915_vm8, %vm1916_vm7 }
0x113a   :  { %v1912_v17 = vsub.f32 1.0, %v1911_v19 }
0x113b   :  { %6830 = vrcp.f32 %v1893_v6  ;;  %v1906_v29 = vand.u32 2147483648, %v1893_v6  ;;  %vm1900_vm13 = vweird.f32 %v1893_v6  ;;  %v1904_v52 = vand.u32 2147483647, %v1893_v6 }
0x113c   :  { %v1913_v39 = vmul.f32 %v6827_v11, %v1912_v17 }
0x113d   :  { %v1907_v24 = vor.u32 1.1754944e-38, %v1906_v29  ;;  %vm1905_vm15 = vcmp.eq.f32.partialorder %v1904_v52, 8.507059e+37 }
0x113e   :  { %v1914_v27 = vadd.f32 %v6827_v11, %v1913_v39 }
0x1140   :  { %v1918_v47 = vsel %vm1917_vm4, %v6827_v11, %v1914_v27 }
0x1141   :  { %v6831_v41 = vpop.eup %6830 }
0x1142   :  { %v1896_v0 = vmul.f32 %v6831_v41, %v1893_v6  ;;  %vm1901_vm10 = vweird.f32 %v6831_v41 }
0x1143   :  { %vm1902_vm14 = vmor %vm1900_vm13, %vm1901_vm10  ;;  %vm889_vm13 = vcmask 256002  }
0x1144   :  { %v1897_v36 = vsub.f32 1.0, %v1896_v0 }
0x1146   :  { %v1898_v60 = vmul.f32 %v6831_v41, %v1897_v36 }
0x1148   :  { %v1899_v13 = vadd.f32 %v6831_v41, %v1898_v60 }
0x114a   :  { %v1903_v18 = vsel %vm1902_vm14, %v6831_v41, %v1899_v13  ;;  %vm1612_vm14 = vcmask 518402  }
0x114b   :  { %v7802_v10 = vsel %vm1905_vm15, %v1907_v24, %v1903_v18  ;;  %vm1609_vm15 = vcmask 259077  }
0x115d   :  { %v1990_v12 = vpop.f32.mrf.mxu2 }
0x115e   :  { %v1991_v16 = vadd.f32 %v1990_v12, %v7381_v43  ;;  %v1919_v43 = vand.u32 2147483647, %v1894_v45 }
0x1160   :  { %2037 = vrot.lane.b32.xlu0 %v1991_v16, %s7256_s0  ;;  %v1994_v33 = vrot.slane %v1991_v16, 1  ;;  %vm1920_vm9 = vcmp.eq.f32.partialorder %v1919_v43, 8.507059e+37  ;;  %v1997_v32 = vadd.f32 %v1991_v16, %v7390_v56 }
0x1161   :  { %v7797_v2 = vsel %vm1920_vm9, %v1922_v50, %v1918_v47 }
0x1162   :  { %2039 = vrot.lane.b32.xlu2 %v1994_v33, %s7256_s0  ;;  %v1998_v4 = vadd.f32 %v1994_v33, %v7378_v42  ;;  %v6487_v12 = vmul.f32 -1.442695, %v1997_v32  ;;  %v1946_v32 = vsub.f32 1.0, %v7797_v2 }
0x1164   :  { %v6488_v5 = vmul.f32 -1.442695, %v1998_v4 }
0x1166   :  { %6832 = vpow2.f32 %v6488_v5 }
0x116c   :  { %v6833_v63 = vpop.eup %6832 }
0x116d   :  { %v2006_v59 = vadd.f32 1.0, %v6833_v63 }
0x116f   :  { %6834 = vrcp.f32 %v2006_v59  ;;  %v2033_v37 = vand.u32 2147483648, %v2006_v59  ;;  %vm2027_vm5 = vweird.f32 %v2006_v59  ;;  %v2031_v39 = vand.u32 2147483647, %v2006_v59 }
0x1170   :  { %6836 = vpow2.f32 %v6487_v12  ;;  %v1958_v12 = vrot.slane %v7766_v46, 7 }
0x1171   :  { %v2034_v27 = vor.u32 1.1754944e-38, %v2033_v37  ;;  %vm2032_vm7 = vcmp.eq.f32.partialorder %v2031_v39, 8.507059e+37  ;;  %v7889_v39 = vld [vmem:[#allocation4 + $0xe0] sm:$0xff] }
0x1175   :  { %v6835_v45 = vpop.eup %6834 }
0x1176   :  { %v2023_v33 = vmul.f32 %v6835_v45, %v2006_v59  ;;  %v6837_v11 = vpop.eup %6836  ;;  %vm2028_vm3 = vweird.f32 %v6835_v45 }
0x1177   :  { %v2005_v19 = vadd.f32 1.0, %v6837_v11  ;;  %vm2029_vm6 = vmor %vm2027_vm5, %vm2028_vm3  ;;  %vm650_vm3 = vcmask 254977   ;;  %vm1850_vm5 = vcmask 517377   ;;  %v7868_v11 = vld [vmem:[#allocation4 + $0xf8] sm:$0xff] }
0x1178   :  { %v2024_v35 = vsub.f32 1.0, %v2023_v33  ;;  %2186 = vmatpush.msrb.mxu0 %v7868_v11 }
0x1179   :  { %6838 = vrcp.f32 %v2005_v19  ;;  %v2018_v0 = vand.u32 2147483648, %v2005_v19  ;;  %vm2012_vm4 = vweird.f32 %v2005_v19  ;;  %v2016_v36 = vand.u32 2147483647, %v2005_v19 }
0x117a   :  { %v2025_v34 = vmul.f32 %v6835_v45, %v2024_v35 }
0x117b   :  { %v2019_v60 = vor.u32 1.1754944e-38, %v2018_v0  ;;  %vm2017_vm10 = vcmp.eq.f32.partialorder %v2016_v36, 8.507059e+37 }
0x117c   :  { %v2026_v17 = vadd.f32 %v6835_v45, %v2025_v34  ;;  %v7870_v34 = vld [vmem:[#allocation4 + $0x160] sm:$0xff] }
0x117d   :  { %2287 = vmatpush.msrb.mxu2 %v7870_v34 }
0x117e   :  { %v1928_v1 = vpop.permute.xlu2 %1927  ;;  %v2030_v6 = vsel %vm2029_vm6, %v6835_v45, %v2026_v17  ;;  %vm1369_vm6 = vcmask 258052   ;;  %v7884_v17 = vld [vmem:[#allocation4 + $0x150] sm:$0xff] }
0x117f   :  { %v1932_v3 = vmul.f32 %v1928_v1, %v7797_v2  ;;  %v6839_v38 = vpop.eup %6838  ;;  %v7807_v16 = vsel %vm2032_vm7, %v2034_v27, %v2030_v6  ;;  %vm412_vm7 = vcmask 253952   ;;  %v7891_v6 = vld [vmem:[#allocation4 + $0x148] sm:$0xff]  ;;  %v2101_v27 = vld [vmem:[#allocation4 + $0xd8] sm:$0xff] }
0x1180   :  { %v2008_v50 = vmul.f32 %v6839_v38, %v2005_v19  ;;  %vm2013_vm8 = vweird.f32 %v6839_v38  ;;  %v7872_v19 = vld [vmem:[#allocation4 + $0xf0] sm:$0xff]  ;;  %2118 = vmatpush.msrb.mxu1 %v2101_v27 }
0x1181   :  { %1937 = vrot.lane.b32.xlu0 %v1932_v3, %s7256_s0  ;;  %vm2014_vm9 = vmor %vm2012_vm4, %vm2013_vm8  ;;  %vm1129_vm8 = vcmask 257027   ;;  %2187 = vmatpush.msrb.mxu0 %v7872_v19  ;;  %vm1372_vm4 = vcmask 519427  }
0x1182   :  { %v2009_v1 = vsub.f32 1.0, %v2008_v50  ;;  %v2138_v50 = vld [vmem:[#allocation4 + $0x130] sm:$0xff] }
0x1184   :  { %v2010_v3 = vmul.f32 %v6839_v38, %v2009_v1 }
0x1186   :  { %v2011_v41 = vadd.f32 %v6839_v38, %v2010_v3  ;;  %v2098_v3 = vld [vmem:[#allocation4 + $0xc0] sm:$0xff] }
0x1188   :  { %v2015_v4 = vsel %vm2014_vm9, %v6839_v38, %v2011_v41  ;;  %v2140_v38 = vld [vmem:[#allocation4 + $0x140] sm:$0xff]  ;;  %vm1847_vm9 = vcmask 260102   ;;  %v2137_v41 = vld [vmem:[#allocation4 + $0x128] sm:$0xff] }
0x1189   :  { %v7815_v13 = vsel %vm2017_vm10, %v2019_v60, %v2015_v4  ;;  %2150 = vmatpush.msrb.mxu3 %v2140_v38  ;;  %vm2087_vm10 = vcmask 516352  }
0x118a   :  { %v2057_v36 = vsub.f32 1.0, %v7815_v13  ;;  %v2072_v60 = vmul.f32 %v7815_v13, %v1967_v51 }
0x1196   :  { %v1926_v44 = vpop.permute.xlu1 %1925 }
0x1197   :  { %v1931_v28 = vmul.f32 %v1926_v44, %v7802_v10 }
0x1199   :  { %1935 = vrot.lane.b32.xlu1 %v1931_v28, %s7256_s0 }
0x11bc   :  { %v2040_v43 = vpop.permute.xlu2 %2039 }
0x11bd   :  { %v2044_v47 = vmul.f32 %v2040_v43, %v7807_v16  ;;  %v2100_v43 = vld [vmem:[#allocation4 + $0xd0] sm:$0xff] }
0x11be   :  { %2119 = vmatpush.msrb.mxu1 %v2100_v43 }
0x11bf   :  { %2049 = vrot.lane.b32.xlu2 %v2044_v47, %s7256_s0  ;;  %v2139_v47 = vld [vmem:[#allocation4 + $0x138] sm:$0xff] }
0x11c0   :  { %2151 = vmatpush.msrb.mxu3 %v2139_v47 }
0x11c2   :  { %2152 = vmatpush.msrb.mxu3 %v2138_v50 }
0x11c4   :  { %2153 = vmatpush.msrb.mxu3 %v2137_v41 }
0x11c7   :  { %883 = vrot.lane.b32.xlu2 %v7548_v31, %s7257_s25 }
0x11cf   :  { %1603 = vrot.lane.b32.xlu2 %v7710_v62, %s7257_s25 }
0x11d2   :  { %v2038_v5 = vpop.permute.xlu0 %2037 }
0x11d3   :  { %v2043_v29 = vmul.f32 %v2038_v5, %v7815_v13 }
0x11d5   :  { %2047 = vrot.lane.b32.xlu1 %v2043_v29, %s7256_s0 }
0x11d7   :  { %885 = vrot.lane.b32.xlu2 %v7550_v30, %s7257_s25 }
0x11f3   :  { %v1938_v31 = vpop.permute.xlu0 %1937 }
0x11f4   :  { %v1942_v52 = vadd.f32 %v1938_v31, %v7387_v49 }
0x11f6   :  { %6840 = vtanh.f32 %v1942_v52  ;;  %v2058_v52 = vsub.f32 1.0, %v7807_v16 }
0x11fc   :  { %v6841_v18 = vpop.eup %6840 }
0x11fd   :  { %1951 = vrot.lane.b32.xlu1 %v6841_v18, %s7257_s25  ;;  %v2069_v18 = vrot.slane %v7779_v20, 1 }
0x1205   :  { %644 = vrot.lane.b32.xlu1 %v7484_v7, %s7257_s25 }
0x120b   :  { %v1936_v62 = vpop.permute.xlu1 %1935 }
0x120c   :  { %v1941_v24 = vadd.f32 %v1936_v62, %v7393_v61 }
0x120d   :  { %1363 = vrot.lane.b32.xlu1 %v7655_v25, %s7257_s25 }
0x120e   :  { %6842 = vtanh.f32 %v1941_v24 }
0x1214   :  { %v6843_v44 = vpop.eup %6842 }
0x1215   :  { %646 = vrot.lane.b32.xlu1 %v7486_v9, %s7257_s25  ;;  %1949 = vrot.lane.b32.xlu0 %v6843_v44, %s7257_s25 }
0x1219   :  { %v2050_v49 = vpop.permute.xlu2 %2049 }
0x121d   :  { %1365 = vrot.lane.b32.xlu1 %v7657_v53, %s7257_s25  ;;  %406 = vrot.lane.b32.xlu0 %v7427_v54, %s7257_s25 }
0x1221   :  { %v884_v61 = vpop.permute.xlu2 %883 }
0x1222   :  { %890 = vst.msk [vmem:[#allocation2] sm:$0x4] %vm889_vm13, %v884_v61  ;;  %v2096_v61 = vld [vmem:[#allocation4 + $0xb0] sm:$0xff] }
0x1223   :  { %1613 = vst.msk [vmem:[#allocation2] sm:$0x4] %vm1612_vm14, %v7722_v23 }
0x1225   :  { %1123 = vrot.lane.b32.xlu0 %v7600_v57, %s7257_s25  ;;  %v2054_v57 = vadd.f32 %v2050_v49, %v7378_v42  ;;  %v1945_v42 = vsub.f32 1.0, %v7802_v10  ;;  %v2097_v49 = vld [vmem:[#allocation4 + $0xb8] sm:$0xff] }
0x1229   :  { %v1604_v7 = vpop.permute.xlu2 %1603 }
0x122a   :  { %1610 = vst.msk [vmem:[#allocation2] sm:$0x20] %vm1609_vm15, %v1604_v7  ;;  %v2095_v7 = vld [vmem:[#allocation4 + $0xa8] sm:$0xff] }
0x122d   :  { %1841 = vrot.lane.b32.xlu0 %v7764_v40, %s7257_s25 }
0x1231   :  { %v886_v9 = vpop.permute.xlu2 %885 }
0x1232   :  { %891 = vst.msk [vmem:[#allocation2 + $0x8] sm:$0x4] %vm889_vm13, %v886_v9  ;;  %v2134_v9 = vld [vmem:[#allocation4 + $0x110] sm:$0xff]  ;;  %vm2084_vm13 = vcmask 261127  }
0x1233   :  { %1614 = vst.msk [vmem:[#allocation2 + $0x8] sm:$0x4] %vm1612_vm14, %v7720_v21  ;;  %v1957_v21 = vrot.slane %v7764_v40, 7  ;;  %v1962_v40 = vmul.f32 %v1958_v12, %v7797_v2  ;;  %v7882_v2 = vld [vmem:[#allocation4 + $0xe8] sm:$0xff]  ;;  %vm2103_vm14 = vcmask 523264  }
0x1234   :  { %2188 = vmatpush.msrb.mxu0 %v7882_v2 }
0x1235   :  { %408 = vrot.lane.b32.xlu0 %v7423_v48, %s7257_s25  ;;  %v1961_v63 = vmul.f32 %v1957_v21, %v7802_v10 }
0x1236   :  { %2189 = vmatpush.msrb.mxu0 %v7889_v39 }
0x1237   :  { %2190 = vmatmul.f32.vlgmr.msrb.gmra.mxu0 %v7255_v26 }
0x1238   :  { %2396 = vmatpush.msra.mxu0 %v7868_v11 }
0x123a   :  { %2397 = vmatpush.msra.mxu0 %v7872_v19 }
0x123c   :  { %2398 = vmatpush.msra.mxu0 %v7882_v2 }
0x123d   :  { %1125 = vrot.lane.b32.xlu0 %v7598_v8, %s7257_s25 }
0x123e   :  { %2399 = vmatpush.msra.mxu0 %v7889_v39 }
0x1240   :  { %2621 = vmatpush.msrb.mxu0 %v7868_v11 }
0x1242   :  { %2622 = vmatpush.msrb.mxu0 %v7872_v19 }
0x1244   :  { %2623 = vmatpush.msrb.mxu0 %v7882_v2 }
0x1245   :  { %1843 = vrot.lane.b32.xlu0 %v7766_v46, %s7257_s25  ;;  %v7876_v46 = vld [vmem:[#allocation4 + $0x158] sm:$0xff] }
0x1246   :  { %2288 = vmatpush.msrb.mxu2 %v7876_v46  ;;  %2624 = vmatpush.msrb.mxu0 %v7889_v39 }
0x1247   :  { %v2048_v54 = vpop.permute.xlu1 %2047 }
0x1248   :  { %v2053_v30 = vadd.f32 %v2048_v54, %v7390_v56  ;;  %2289 = vmatpush.msrb.mxu2 %v7884_v17  ;;  %v2133_v54 = vld [vmem:[#allocation4 + $0x108] sm:$0xff] }
0x124a   :  { %6844 = vtanh.f32 %v2053_v30  ;;  %2290 = vmatpush.msrb.mxu2 %v7891_v6 }
0x124b   :  { %6846 = vtanh.f32 %v2054_v57  ;;  %2291 = vmatmul.f32.vlgmr.msrb.gmra.mxu2 %v7255_v26 }
0x124c   :  { %2508 = vmatpush.msra.mxu2 %v7870_v34 }
0x124e   :  { %2509 = vmatpush.msra.mxu2 %v7876_v46 }
0x1250   :  { %v6845_v25 = vpop.eup %6844  ;;  %2510 = vmatpush.msra.mxu2 %v7884_v17 }
0x1251   :  { %2061 = vrot.lane.b32.xlu2 %v6845_v25, %s7257_s25  ;;  %v6847_v53 = vpop.eup %6846 }
0x1252   :  { %2511 = vmatpush.msra.mxu2 %v7891_v6 }
0x1254   :  { %2735 = vmatpush.msrb.mxu2 %v7870_v34 }
0x1256   :  { %2736 = vmatpush.msrb.mxu2 %v7876_v46 }
0x1258   :  { %2737 = vmatpush.msrb.mxu2 %v7884_v17 }
0x1259   :  { %2063 = vrot.lane.b32.xlu2 %v6847_v53, %s7257_s25 }
0x125a   :  { %2738 = vmatpush.msrb.mxu2 %v7891_v6 }
0x1261   :  { %1605 = vrot.lane.b32.xlu2 %v7708_v58, %s7257_s25 }
0x126f   :  { %v1952_v48 = vpop.permute.xlu1 %1951 }
0x1270   :  { %v1956_v45 = vmul.f32 %v1952_v48, %v1946_v32  ;;  %v2090_v48 = vld [vmem:[#allocation4 + $0x100] sm:$0x3] }
0x1271   :  { %v2102_v12 = vperm.slane %v2090_v48, 0 }
0x1272   :  { %v7866_v10 = vadd.f32 %v1962_v40, %v1956_v45 }
0x1277   :  { %v645_v8 = vpop.permute.xlu1 %644 }
0x1278   :  { %651 = vst.msk [vmem:[#allocation2] sm:$0x2] %vm650_vm3, %v645_v8  ;;  %v7958_v8 = vperm.slane %v2090_v48, 1 }
0x1279   :  { %1851 = vst.msk [vmem:[#allocation2] sm:$0x2] %vm1850_vm5, %v7777_v55  ;;  %v2073_v55 = vmul.f32 %v2069_v18, %v7807_v16  ;;  %v2094_v16 = vld [vmem:[#allocation4 + $0xa0] sm:$0xff] }
0x127f   :  { %v1364_v56 = vpop.permute.xlu1 %1363 }
0x1280   :  { %1370 = vst.msk [vmem:[#allocation2] sm:$0x10] %vm1369_vm6, %v1364_v56 }
0x1287   :  { %v1950_v23 = vpop.permute.xlu0 %1949  ;;  %v647_v28 = vpop.permute.xlu1 %646 }
0x1288   :  { %v1955_v58 = vmul.f32 %v1950_v23, %v1945_v42  ;;  %652 = vst.msk [vmem:[#allocation2 + $0x8] sm:$0x2] %vm650_vm3, %v647_v28  ;;  %v2091_v42 = vld [vmem:[#allocation4 + $0x168] sm:$0x3] }
0x1289   :  { %1852 = vst.msk [vmem:[#allocation2 + $0x8] sm:$0x2] %vm1850_vm5, %v7779_v20  ;;  %v2135_v20 = vld [vmem:[#allocation4 + $0x118] sm:$0xff]  ;;  %v7961_v28 = vperm.slane %v2091_v42, 1 }
0x128a   :  { %v1963_v59 = vadd.f32 %v1961_v63, %v1955_v58 }
0x128c   :  { %2078 = vrot.lane.b32.xlu1 %v1963_v59, %s7257_s25 }
0x128f   :  { %v407_v33 = vpop.permute.xlu0 %406  ;;  %v1366_v35 = vpop.permute.xlu1 %1365 }
0x1290   :  { %413 = vst.msk [vmem:[#allocation2] sm:$0x1] %vm412_vm7, %v407_v33 }
0x1291   :  { %1371 = vst.msk [vmem:[#allocation2 + $0x8] sm:$0x10] %vm1369_vm6, %v1366_v35  ;;  %v2141_v35 = vperm.slane %v2091_v42, 0 }
0x1294   :  { %2080 = vrot.lane.b32.xlu1 %v7866_v10, %s7257_s25 }
0x1297   :  { %v1124_v37 = vpop.permute.xlu0 %1123 }
0x1298   :  { %1130 = vst.msk [vmem:[#allocation2] sm:$0x8] %vm1129_vm8, %v1124_v37 }
0x1299   :  { %1373 = vst.msk [vmem:[#allocation2] sm:$0x8] %vm1372_vm4, %v7667_v15  ;;  %v2099_v15 = vld [vmem:[#allocation4 + $0xc8] sm:$0xff] }
0x129a   :  { %2120 = vmatpush.msrb.mxu1 %v2099_v15 }
0x129c   :  { %2121 = vmatpush.msrb.mxu1 %v2098_v3 }
0x129e   :  { %2122 = vmatpush.msrb.mxu1 %v2097_v49 }
0x129f   :  { %v1842_v1 = vpop.permute.xlu0 %1841 }
0x12a0   :  { %1848 = vst.msk [vmem:[#allocation2] sm:$0x40] %vm1847_vm9, %v1842_v1  ;;  %2123 = vmatpush.msrb.mxu1 %v2096_v61 }
0x12a2   :  { %2124 = vmatpush.msrb.mxu1 %v2095_v7 }
0x12a4   :  { %2125 = vmatpush.msrb.mxu1 %v2094_v16 }
0x12a6   :  { %2849 = vmatpush.msra.mxu1 %v7868_v11 }
0x12a7   :  { %v409_v0 = vpop.permute.xlu0 %408 }
0x12a8   :  { %414 = vst.msk [vmem:[#allocation2 + $0x8] sm:$0x1] %vm412_vm7, %v409_v0  ;;  %2850 = vmatpush.msra.mxu1 %v7872_v19 }
0x12aa   :  { %2851 = vmatpush.msra.mxu1 %v7882_v2 }
0x12ab   :  { %v2062_v4 = vpop.permute.xlu2 %2061 }
0x12ac   :  { %v2067_v5 = vmul.f32 %v2062_v4, %v2057_v36  ;;  %2852 = vmatpush.msra.mxu1 %v7889_v39 }
0x12ae   :  { %v7921_v29 = vadd.f32 %v2072_v60, %v2067_v5 }
0x12af   :  { %v1126_v31 = vpop.permute.xlu0 %1125 }
0x12b0   :  { %2088 = vst.msk [vmem:[#allocation2] sm:$0x1] %vm2087_vm10, %v7921_v29 }
0x12b1   :  { %1131 = vst.msk [vmem:[#allocation2 + $0x8] sm:$0x8] %vm1129_vm8, %v1126_v31 }
0x12b2   :  { %1374 = vst.msk [vmem:[#allocation2 + $0x8] sm:$0x8] %vm1372_vm4, %v7665_v14  ;;  %v2136_v14 = vld [vmem:[#allocation4 + $0x120] sm:$0xff] }
0x12b3   :  { %v2064_v62 = vpop.permute.xlu2 %2063  ;;  %2154 = vmatpush.msrb.mxu3 %v2136_v14 }
0x12b4   :  { %v2068_v51 = vmul.f32 %v2064_v62, %v2058_v52  ;;  %v2191_v56 = vpop.f32.mrf.mxu0 }
0x12b5   :  { %2155 = vmatpush.msrb.mxu3 %v2135_v20  ;;  %v2192_v21 = vadd.f32 %v2191_v56, %v7958_v8 }
0x12b6   :  { %v7930_v13 = vadd.f32 %v2073_v55, %v2068_v51 }
0x12b7   :  { %v1844_v24 = vpop.permute.xlu0 %1843  ;;  %2156 = vmatpush.msrb.mxu3 %v2134_v9  ;;  %v2195_v23 = vrot.slane %v2192_v21, 1 }
0x12b8   :  { %2089 = vst.msk [vmem:[#allocation2 + $0x8] sm:$0x1] %vm2087_vm10, %v7930_v13 }
0x12b9   :  { %1849 = vst.msk [vmem:[#allocation2 + $0x8] sm:$0x40] %vm1847_vm9, %v1844_v24  ;;  %2157 = vmatpush.msrb.mxu3 %v2133_v54  ;;  %2240 = vrot.lane.b32.xlu1 %v2195_v23, %s7256_s0 }
0x12bb   :  { %v1606_v44 = vpop.permute.xlu2 %1605  ;;  %2963 = vmatpush.msra.mxu3 %v7870_v34 }
0x12bc   :  { %1611 = vst.msk [vmem:[#allocation2 + $0x8] sm:$0x20] %vm1609_vm15, %v1606_v44 }
0x12bd   :  { %2964 = vmatpush.msra.mxu3 %v7876_v46 }
0x12bf   :  { %2965 = vmatpush.msra.mxu3 %v7884_v17 }
0x12c1   :  { %2966 = vmatpush.msra.mxu3 %v7891_v6 }
0x12ce   :  { %v2292_v63 = vpop.f32.mrf.mxu2 }
0x12cf   :  { %v2293_v58 = vadd.f32 %v2292_v63, %v7961_v28 }
0x12d1   :  { %v2296_v59 = vrot.slane %v2293_v58, 1  ;;  %v2297_v32 = vrot.slane %v2293_v58, 2 }
0x12d3   :  { %2342 = vrot.lane.b32.xlu0 %v2297_v32, %s7256_s0  ;;  %2340 = vrot.lane.b32.xlu2 %v2296_v59, %s7256_s0 }
0x12db   :  { %2238 = vrot.lane.b32.xlu2 %v2192_v21, %s7256_s0 }
0x12fe   :  { %v7943_v30 = vpop.permute.xlu1 %2078 }
0x12ff   :  { %2085 = vst.msk [vmem:[#allocation2] sm:$0x80] %vm2084_vm13, %v7943_v30 }
0x1306   :  { %v2081_v57 = vpop.permute.xlu1 %2080  ;;  %v2092_v25 = vld [vmem:[#allocation2] sm:$0xff] }
0x1307   :  { %2086 = vst.msk [vmem:[#allocation2 + $0x8] sm:$0x80] %vm2084_vm13, %v2081_v57  ;;  %6489 = vmatmul.msk.f32.vlgmr.msrb.gmra.mxu1 %vm2103_vm14, %v2092_v25  ;;  %6491 = vmatmul.msk.f32.vlgmr.msrb.gmra.mxu3 %vm2103_vm14, %v2092_v25 }
0x1308   :  { %3419 = vmatpush.msrb.mxu3 %v7870_v34  ;;  %3305 = vmatpush.msrb.mxu1 %v7868_v11 }
0x130a   :  { %3420 = vmatpush.msrb.mxu3 %v7876_v46  ;;  %3306 = vmatpush.msrb.mxu1 %v7872_v19 }
0x130c   :  { %3421 = vmatpush.msrb.mxu3 %v7884_v17  ;;  %3307 = vmatpush.msrb.mxu1 %v7882_v2 }
0x130e   :  { %v2093_v53 = vld [vmem:[#allocation2 + $0x8] sm:$0xff]  ;;  %3422 = vmatpush.msrb.mxu3 %v7891_v6  ;;  %3308 = vmatpush.msrb.mxu1 %v7889_v39 }
0x130f   :  { %6490 = vmatmul.msk.f32.gmra.mxu1 %vm2103_vm14, %v2093_v53  ;;  %6492 = vmatmul.msk.f32.gmra.mxu3 %vm2103_vm14, %v2093_v53 }
0x132d   :  { %v2341_v53 = vpop.permute.xlu2 %2340 }
0x1384   :  { %v2127_v45 = vpop.f32.mrf.mxu1 }
0x1385   :  { %v7968_v33 = vadd.f32 %v2127_v45, %v2102_v12 }
0x1387   :  { %v2198_v40 = vadd.f32 %v2192_v21, %v7968_v33 }
0x1389   :  { %v6493_v37 = vmul.f32 -1.442695, %v2198_v40 }
0x138a   :  { %v2159_v27 = vpop.f32.mrf.mxu3 }
0x138b   :  { %v7971_v38 = vadd.f32 %v2159_v27, %v2141_v35  ;;  %6848 = vpow2.f32 %v6493_v37 }
0x138c   :  { %v2130_v43 = vpop.f32.mrf.mxu1 }
0x138d   :  { %v7973_v47 = vadd.f32 %v2130_v43, %v2102_v12  ;;  %v2300_v15 = vadd.f32 %v2296_v59, %v7971_v38  ;;  %v2241_v43 = vpop.permute.xlu1 %2240 }
0x138f   :  { %v6495_v50 = vmul.f32 -1.442695, %v2300_v15  ;;  %v2199_v1 = vadd.f32 %v2195_v23, %v7973_v47 }
0x1391   :  { %v6849_v3 = vpop.eup %6848  ;;  %6850 = vpow2.f32 %v6495_v50  ;;  %v6494_v41 = vmul.f32 -1.442695, %v2199_v1 }
0x1392   :  { %v2162_v0 = vpop.f32.mrf.mxu3  ;;  %v7977_v36 = vadd.f32 1.0, %v6849_v3 }
0x1393   :  { %v7979_v4 = vadd.f32 %v2162_v0, %v2141_v35  ;;  %6852 = vpow2.f32 %v6494_v41 }
0x1394   :  { %6854 = vrcp.f32 %v7977_v36  ;;  %vm2213_vm3 = vweird.f32 %v7977_v36  ;;  %v2219_v35 = vand.u32 2147483648, %v7977_v36  ;;  %v2217_v27 = vand.u32 2147483647, %v7977_v36 }
0x1395   :  { %v2301_v60 = vadd.f32 %v2297_v32, %v7979_v4 }
0x1397   :  { %v6851_v5 = vpop.eup %6850  ;;  %v6496_v31 = vmul.f32 -1.442695, %v2301_v60 }
0x1398   :  { %v2308_v52 = vadd.f32 1.0, %v6851_v5 }
0x1399   :  { %v6853_v18 = vpop.eup %6852  ;;  %6856 = vpow2.f32 %v6496_v31 }
0x139a   :  { %v7983_v62 = vpop.eup %6854  ;;  %6858 = vrcp.f32 %v2308_v52  ;;  %v2207_v55 = vadd.f32 1.0, %v6853_v18  ;;  %v2321_v9 = vand.u32 2147483648, %v2308_v52  ;;  %v2319_v57 = vand.u32 2147483647, %v2308_v52 }
0x139b   :  { %v2209_v51 = vmul.f32 %v7983_v62, %v7977_v36  ;;  %vm2315_vm5 = vweird.f32 %v2308_v52  ;;  %vm2214_vm6 = vweird.f32 %v7983_v62 }
0x139c   :  { %6860 = vrcp.f32 %v2207_v55  ;;  %v2234_v42 = vand.u32 2147483648, %v2207_v55  ;;  %v2322_v23 = vor.u32 1.1754944e-38, %v2321_v9  ;;  %v2232_v58 = vand.u32 2147483647, %v2207_v55 }
0x139d   :  { %v2210_v61 = vsub.f32 1.0, %v2209_v51  ;;  %vm2320_vm9 = vcmp.eq.f32.partialorder %v2319_v57, 8.507059e+37  ;;  %vm2228_vm10 = vweird.f32 %v2207_v55 }
0x139e   :  { %v2235_v15 = vor.u32 1.1754944e-38, %v2234_v42 }
0x139f   :  { %v6857_v24 = vpop.eup %6856  ;;  %v2211_v25 = vmul.f32 %v7983_v62, %v2210_v61 }
0x13a0   :  { %v6859_v44 = vpop.eup %6858  ;;  %v2309_v49 = vadd.f32 1.0, %v6857_v24  ;;  %v2343_v24 = vpop.permute.xlu0 %2342 }
0x13a1   :  { %v2311_v14 = vmul.f32 %v6859_v44, %v2308_v52  ;;  %vm2316_vm15 = vweird.f32 %v6859_v44  ;;  %v2212_v32 = vadd.f32 %v7983_v62, %v2211_v25  ;;  %v2220_v52 = vor.u32 1.1754944e-38, %v2219_v35 }
0x13a2   :  { %6862 = vrcp.f32 %v2309_v49  ;;  %v6861_v20 = vpop.eup %6860  ;;  %vm2317_vm8 = vmor %vm2315_vm5, %vm2316_vm15  ;;  %vm2233_vm5 = vcmp.eq.f32.partialorder %v2232_v58, 8.507059e+37  ;;  %v2334_v41 = vand.u32 2147483647, %v2309_v49  ;;  %v2336_v0 = vand.u32 2147483648, %v2309_v49 }
0x13a3   :  { %v2312_v7 = vsub.f32 1.0, %v2311_v14  ;;  %v2224_v16 = vmul.f32 %v6861_v20, %v2207_v55  ;;  %vm2229_vm4 = vweird.f32 %v6861_v20  ;;  %vm8000_vm15 = vmor %vm2213_vm3, %vm2214_vm6  ;;  %vm2330_vm3 = vweird.f32 %v2309_v49  ;;  %v2239_v55 = vpop.permute.xlu2 %2238 }
0x13a4   :  { %vm2230_vm13 = vmor %vm2228_vm10, %vm2229_vm4  ;;  %v2216_v60 = vsel %vm8000_vm15, %v7983_v62, %v2212_v32  ;;  %vm2218_vm4 = vcmp.eq.f32.partialorder %v2217_v27, 8.507059e+37 }
0x13a5   :  { %v2313_v54 = vmul.f32 %v6859_v44, %v2312_v7  ;;  %v2225_v48 = vsub.f32 1.0, %v2224_v16  ;;  %v2221_v51 = vsel %vm2218_vm4, %v2220_v52, %v2216_v60 }
0x13a6   :  { %v2244_v61 = vmul.f32 %v2239_v55, %v2221_v51  ;;  %v2258_v60 = vsub.f32 1.0, %v2221_v51 }
0x13a7   :  { %v2314_v56 = vadd.f32 %v6859_v44, %v2313_v54  ;;  %v2226_v63 = vmul.f32 %v6861_v20, %v2225_v48 }
0x13a8   :  { %v6863_v21 = vpop.eup %6862 }
0x13a9   :  { %v2318_v59 = vsel %vm2317_vm8, %v6859_v44, %v2314_v56  ;;  %v2326_v12 = vmul.f32 %v6863_v21, %v2309_v49  ;;  %v2227_v40 = vadd.f32 %v6861_v20, %v2226_v63  ;;  %vm2331_vm8 = vweird.f32 %v6863_v21 }
0x13aa   :  { %v7991_v45 = vsel %vm2320_vm9, %v2322_v23, %v2318_v59  ;;  %vm2332_vm6 = vmor %vm2330_vm3, %vm2331_vm8  ;;  %v2337_v44 = vor.u32 1.1754944e-38, %v2336_v0  ;;  %vm2335_vm9 = vcmp.eq.f32.partialorder %v2334_v41, 8.507059e+37 }
0x13ab   :  { %v2346_v37 = vmul.f32 %v2341_v53, %v7991_v45  ;;  %v2327_v50 = vsub.f32 1.0, %v2326_v12  ;;  %v2231_v3 = vsel %vm2230_vm13, %v6861_v20, %v2227_v40  ;;  %v2360_v32 = vsub.f32 1.0, %v7991_v45 }
0x13ac   :  { %v2236_v5 = vsel %vm2233_vm5, %v2235_v15, %v2231_v3  ;;  %v2372_v27 = vmul.f32 0.0, %v7991_v45 }
0x13ad   :  { %2350 = vrot.lane.b32.xlu0 %v2346_v37, %s7256_s0  ;;  %v2328_v31 = vmul.f32 %v6863_v21, %v2327_v50  ;;  %v2245_v18 = vmul.f32 %v2241_v43, %v2236_v5  ;;  %v2259_v40 = vsub.f32 1.0, %v2236_v5  ;;  %v2271_v1 = vmul.f32 0.0, %v2236_v5 }
0x13af   :  { %v2329_v36 = vadd.f32 %v6863_v21, %v2328_v31  ;;  %2250 = vrot.lane.b32.xlu2 %v2245_v18, %s7256_s0  ;;  %v2270_v18 = vmul.f32 0.0, %v2221_v51 }
0x13b1   :  { %v2333_v14 = vsel %vm2332_vm6, %v6863_v21, %v2329_v36 }
0x13b2   :  { %v2338_v62 = vsel %vm2335_vm9, %v2337_v44, %v2333_v14 }
0x13b3   :  { %v2347_v20 = vmul.f32 %v2343_v24, %v2338_v62  ;;  %v2361_v63 = vsub.f32 1.0, %v2338_v62  ;;  %v2373_v59 = vmul.f32 0.0, %v2338_v62 }
0x13b5   :  { %2248 = vrot.lane.b32.xlu0 %v2244_v61, %s7256_s0  ;;  %2352 = vrot.lane.b32.xlu1 %v2347_v20, %s7256_s0 }
0x1409   :  { %v2251_v7 = vpop.permute.xlu2 %2250 }
0x140a   :  { %v2255_v9 = vadd.f32 %v2251_v7, %v7973_v47 }
0x140c   :  { %6864 = vtanh.f32 %v2255_v9 }
0x1412   :  { %v6865_v49 = vpop.eup %6864 }
0x1413   :  { %2264 = vrot.lane.b32.xlu0 %v6865_v49, %s7257_s25 }
0x141f   :  { %v2351_v16 = vpop.permute.xlu0 %2350 }
0x1420   :  { %v2356_v54 = vadd.f32 %v2351_v16, %v7971_v38 }
0x1422   :  { %6866 = vtanh.f32 %v2356_v54 }
0x1427   :  { %v2249_v57 = vpop.permute.xlu0 %2248  ;;  %v2353_v25 = vpop.permute.xlu1 %2352 }
0x1428   :  { %v6867_v53 = vpop.eup %6866  ;;  %v2254_v48 = vadd.f32 %v2249_v57, %v7968_v33  ;;  %v2357_v56 = vadd.f32 %v2353_v25, %v7979_v4 }
0x1429   :  { %2364 = vrot.lane.b32.xlu1 %v6867_v53, %s7257_s25 }
0x142a   :  { %6868 = vtanh.f32 %v2254_v48 }
0x142b   :  { %6870 = vtanh.f32 %v2357_v56 }
0x1430   :  { %v6869_v42 = vpop.eup %6868 }
0x1431   :  { %v6871_v21 = vpop.eup %6870  ;;  %2262 = vrot.lane.b32.xlu1 %v6869_v42, %s7257_s25 }
0x1432   :  { %2366 = vrot.lane.b32.xlu2 %v6871_v21, %s7257_s25 }
0x1485   :  { %v2265_v12 = vpop.permute.xlu0 %2264 }
0x1486   :  { %v2269_v15 = vmul.f32 %v2265_v12, %v2259_v40 }
0x1488   :  { %v8027_v0 = vadd.f32 %v2271_v1, %v2269_v15 }
0x148a   :  { %v2378_v45 = vrot.slane %v8027_v0, 7 }
0x148c   :  { %v2367_v23 = vpop.permute.xlu2 %2366 }
0x148d   :  { %v2371_v58 = vmul.f32 %v2367_v23, %v2361_v63 }
0x148f   :  { %v8020_v37 = vadd.f32 %v2373_v59, %v2371_v58 }
0x1491   :  { %v2490_v3 = vrot.slane %v8020_v37, 6  ;;  %v2594_v58 = vrot.slane %v8020_v37, 1 }
0x149b   :  { %v2365_v35 = vpop.permute.xlu1 %2364 }
0x149c   :  { %v2370_v43 = vmul.f32 %v2365_v35, %v2360_v32 }
0x149e   :  { %v8023_v50 = vadd.f32 %v2372_v27, %v2370_v43 }
0x14a0   :  { %v2489_v41 = vrot.slane %v8023_v50, 7 }
0x14a2   :  { %v2491_v31 = vsel %vm419_vm11, %v2490_v3, %v2489_v41 }
0x14a3   :  { %v2263_v52 = vpop.permute.xlu1 %2262  ;;  %2492 = vrot.lane.b32.xlu2 %v2491_v31, %s7257_s25 }
0x14a4   :  { %v2268_v36 = vmul.f32 %v2263_v52, %v2258_v60 }
0x14a6   :  { %v8032_v55 = vadd.f32 %v2270_v18, %v2268_v36 }
0x14a8   :  { %v2379_v5 = vsel %vm419_vm11, %v2378_v45, %v8032_v55 }
0x14a9   :  { %2380 = vrot.lane.b32.xlu0 %v2379_v5, %s7257_s25 }
0x14fd   :  { %v2493_v24 = vpop.permute.xlu2 %2492 }
0x14fe   :  { %6500 = vmatmul.msk.f32.vlgmr.msra.gmra.mxu2 %vm198_vm12, %v2493_v24 }
0x14ff   :  { %3191 = vmatpush.msra.mxu2 %v7870_v34 }
0x1501   :  { %3192 = vmatpush.msra.mxu2 %v7876_v46 }
0x1503   :  { %3193 = vmatpush.msra.mxu2 %v7884_v17 }
0x1505   :  { %3194 = vmatpush.msra.mxu2 %v7891_v6 }
0x151b   :  { %v2381_v51 = vpop.permute.xlu0 %2380 }
0x151c   :  { %6497 = vmatmul.msk.f32.vlgmr.msra.gmra.mxu0 %vm198_vm12, %v2381_v51 }
0x151d   :  { %3077 = vmatpush.msra.mxu0 %v7868_v11 }
0x151f   :  { %3078 = vmatpush.msra.mxu0 %v7872_v19 }
0x1521   :  { %3079 = vmatpush.msra.mxu0 %v7882_v2 }
0x1523   :  { %3080 = vmatpush.msra.mxu0 %v7889_v39 }
0x1581   :  { %v2513_v44 = vpop.f32.mrf.mxu2 }
0x1582   :  { %v2514_v14 = vadd.f32 %v2513_v44, %v7961_v28 }
0x1584   :  { %v2517_v62 = vrot.slane %v2514_v14, 2  ;;  %v2518_v61 = vrot.slane %v2514_v14, 3 }
0x1586   :  { %v2522_v20 = vadd.f32 %v2518_v61, %v7979_v4  ;;  %2563 = vrot.lane.b32.xlu2 %v2518_v61, %s7256_s0  ;;  %2561 = vrot.lane.b32.xlu1 %v2517_v62, %s7256_s0  ;;  %v2521_v35 = vadd.f32 %v2517_v62, %v7971_v38 }
0x1588   :  { %v6502_v7 = vmul.f32 -1.442695, %v2522_v20  ;;  %v6501_v40 = vmul.f32 -1.442695, %v2521_v35 }
0x158a   :  { %6872 = vpow2.f32 %v6502_v7 }
0x1590   :  { %v6873_v9 = vpop.eup %6872 }
0x1591   :  { %v2530_v49 = vadd.f32 1.0, %v6873_v9 }
0x1593   :  { %6874 = vrcp.f32 %v2530_v49  ;;  %v2557_v56 = vand.u32 2147483648, %v2530_v49  ;;  %v2555_v21 = vand.u32 2147483647, %v2530_v49  ;;  %vm2551_vm13 = vweird.f32 %v2530_v49 }
0x1594   :  { %6876 = vpow2.f32 %v6501_v40 }
0x1595   :  { %v2558_v63 = vor.u32 1.1754944e-38, %v2557_v56  ;;  %vm2556_vm5 = vcmp.eq.f32.partialorder %v2555_v21, 8.507059e+37 }
0x1599   :  { %v2401_v16 = vpop.f32.mrf.mxu0  ;;  %v6875_v54 = vpop.eup %6874 }
0x159a   :  { %v2402_v57 = vadd.f32 %v2401_v16, %v7958_v8  ;;  %v2547_v25 = vmul.f32 %v6875_v54, %v2530_v49  ;;  %vm2552_vm10 = vweird.f32 %v6875_v54  ;;  %v6877_v27 = vpop.eup %6876 }
0x159b   :  { %vm2553_vm15 = vmor %vm2551_vm13, %vm2552_vm10  ;;  %v2529_v43 = vadd.f32 1.0, %v6877_v27 }
0x159c   :  { %2450 = vrot.lane.b32.xlu1 %v2402_v57, %s7256_s0  ;;  %v2405_v53 = vrot.slane %v2402_v57, 7  ;;  %v2548_v48 = vsub.f32 1.0, %v2547_v25  ;;  %v2409_v15 = vadd.f32 %v2402_v57, %v7973_v47 }
0x159d   :  { %6878 = vrcp.f32 %v2529_v43  ;;  %v2542_v62 = vand.u32 2147483648, %v2529_v43  ;;  %vm2536_vm4 = vweird.f32 %v2529_v43  ;;  %v2540_v61 = vand.u32 2147483647, %v2529_v43 }
0x159e   :  { %2448 = vrot.lane.b32.xlu0 %v2405_v53, %s7256_s0  ;;  %v2549_v42 = vmul.f32 %v6875_v54, %v2548_v48  ;;  %v2408_v1 = vadd.f32 %v2405_v53, %v7968_v33  ;;  %v6499_v37 = vmul.f32 -1.442695, %v2409_v15 }
0x159f   :  { %v2543_v7 = vor.u32 1.1754944e-38, %v2542_v62  ;;  %vm2541_vm6 = vcmp.eq.f32.partialorder %v2540_v61, 8.507059e+37 }
0x15a0   :  { %v2550_v23 = vadd.f32 %v6875_v54, %v2549_v42  ;;  %v6498_v31 = vmul.f32 -1.442695, %v2408_v1  ;;  %6880 = vpow2.f32 %v6499_v37 }
0x15a2   :  { %v2554_v59 = vsel %vm2553_vm15, %v6875_v54, %v2550_v23  ;;  %6882 = vpow2.f32 %v6498_v31 }
0x15a3   :  { %v8057_v32 = vsel %vm2556_vm5, %v2558_v63, %v2554_v59  ;;  %v6879_v60 = vpop.eup %6878 }
0x15a4   :  { %v8060_v12 = vmul.f32 %v2594_v58, %v8057_v32  ;;  %v2532_v52 = vmul.f32 %v6879_v60, %v2529_v43  ;;  %vm2537_vm8 = vweird.f32 %v6879_v60 }
0x15a5   :  { %vm2538_vm3 = vmor %vm2536_vm4, %vm2537_vm8 }
0x15a6   :  { %v2533_v18 = vsub.f32 1.0, %v2532_v52  ;;  %v6881_v36 = vpop.eup %6880 }
0x15a7   :  { %v2417_v51 = vadd.f32 1.0, %v6881_v36 }
0x15a8   :  { %v6883_v5 = vpop.eup %6882  ;;  %v2534_v24 = vmul.f32 %v6879_v60, %v2533_v18 }
0x15a9   :  { %v2416_v44 = vadd.f32 1.0, %v6883_v5  ;;  %6884 = vrcp.f32 %v2417_v51  ;;  %v2444_v63 = vand.u32 2147483648, %v2417_v51  ;;  %vm2438_vm10 = vweird.f32 %v2417_v51 }
0x15aa   :  { %v2535_v14 = vadd.f32 %v6879_v60, %v2534_v24  ;;  %v2442_v58 = vand.u32 2147483647, %v2417_v51 }
0x15ab   :  { %6886 = vrcp.f32 %v2416_v44  ;;  %v2429_v35 = vand.u32 2147483648, %v2416_v44  ;;  %vm2423_vm5 = vweird.f32 %v2416_v44  ;;  %v2427_v27 = vand.u32 2147483647, %v2416_v44 }
0x15ac   :  { %v2539_v20 = vsel %vm2538_vm3, %v6879_v60, %v2535_v14  ;;  %v2445_v43 = vor.u32 1.1754944e-38, %v2444_v63  ;;  %vm2443_vm4 = vcmp.eq.f32.partialorder %v2442_v58, 8.507059e+37 }
0x15ad   :  { %v8067_v16 = vsel %vm2541_vm6, %v2543_v7, %v2539_v20  ;;  %v2430_v37 = vor.u32 1.1754944e-38, %v2429_v35  ;;  %vm2428_vm3 = vcmp.eq.f32.partialorder %v2427_v27, 8.507059e+37 }
0x15af   :  { %v6885_v9 = vpop.eup %6884 }
0x15b0   :  { %v2434_v25 = vmul.f32 %v6885_v9, %v2417_v51  ;;  %vm2439_vm9 = vweird.f32 %v6885_v9 }
0x15b1   :  { %v6887_v57 = vpop.eup %6886  ;;  %vm2440_vm15 = vmor %vm2438_vm10, %vm2439_vm9 }
0x15b2   :  { %v2419_v53 = vmul.f32 %v6887_v57, %v2416_v44  ;;  %v2435_v48 = vsub.f32 1.0, %v2434_v25  ;;  %vm2424_vm13 = vweird.f32 %v6887_v57  ;;  %v2581_v25 = vsub.f32 1.0, %v8067_v16 }
0x15b3   :  { %vm2425_vm8 = vmor %vm2423_vm5, %vm2424_vm13 }
0x15b4   :  { %v2420_v56 = vsub.f32 1.0, %v2419_v53  ;;  %v2436_v42 = vmul.f32 %v6885_v9, %v2435_v48 }
0x15b6   :  { %v2421_v21 = vmul.f32 %v6887_v57, %v2420_v56  ;;  %v2437_v23 = vadd.f32 %v6885_v9, %v2436_v42 }
0x15b8   :  { %v2422_v59 = vadd.f32 %v6887_v57, %v2421_v21  ;;  %v2441_v40 = vsel %vm2440_vm15, %v6885_v9, %v2437_v23 }
0x15b9   :  { %v2446_v1 = vsel %vm2443_vm4, %v2445_v43, %v2441_v40 }
0x15ba   :  { %v2426_v15 = vsel %vm2425_vm8, %v6887_v57, %v2422_v59  ;;  %v2480_v59 = vrot.slane %v8032_v55, 7  ;;  %v2469_v35 = vsub.f32 1.0, %v2446_v1 }
0x15bb   :  { %v2431_v31 = vsel %vm2428_vm3, %v2430_v37, %v2426_v15  ;;  %v2484_v15 = vmul.f32 %v2446_v1, %v2378_v45 }
0x15bc   :  { %v2468_v40 = vsub.f32 1.0, %v2431_v31  ;;  %v2483_v43 = vmul.f32 %v2480_v59, %v2431_v31 }
0x15e0   :  { %v2564_v3 = vpop.permute.xlu2 %2563 }
0x15e1   :  { %v2568_v41 = vmul.f32 %v2564_v3, %v8057_v32 }
0x15e3   :  { %2573 = vrot.lane.b32.xlu0 %v2568_v41, %s7256_s0 }
0x15f8   :  { %v2562_v49 = vpop.permute.xlu1 %2561 }
0x15f9   :  { %v2567_v54 = vmul.f32 %v2562_v49, %v8067_v16  ;;  %v2582_v49 = vsub.f32 1.0, %v8057_v32 }
0x15fb   :  { %2571 = vrot.lane.b32.xlu2 %v2567_v54, %s7256_s0  ;;  %v2593_v54 = vrot.slane %v8023_v50, 1 }
0x15fd   :  { %v2597_v56 = vmul.f32 %v2593_v54, %v8067_v16 }
0x160e   :  { %v2451_v3 = vpop.permute.xlu1 %2450 }
0x160f   :  { %v2455_v41 = vmul.f32 %v2451_v3, %v2446_v1 }
0x1610   :  { %v2449_v60 = vpop.permute.xlu0 %2448 }
0x1611   :  { %v2454_v52 = vmul.f32 %v2449_v60, %v2431_v31  ;;  %2460 = vrot.lane.b32.xlu2 %v2455_v41, %s7256_s0 }
0x1613   :  { %2458 = vrot.lane.b32.xlu1 %v2454_v52, %s7256_s0 }
0x1655   :  { %v2574_v18 = vpop.permute.xlu0 %2573  ;;  %v2572_v36 = vpop.permute.xlu2 %2571 }
0x1656   :  { %v2578_v5 = vadd.f32 %v2574_v18, %v7979_v4  ;;  %v2577_v24 = vadd.f32 %v2572_v36, %v7971_v38 }
0x1658   :  { %6888 = vtanh.f32 %v2578_v5 }
0x1659   :  { %6890 = vtanh.f32 %v2577_v24 }
0x165e   :  { %v6889_v51 = vpop.eup %6888 }
0x165f   :  { %v6891_v44 = vpop.eup %6890  ;;  %2587 = vrot.lane.b32.xlu1 %v6889_v51, %s7257_s25 }
0x1660   :  { %2585 = vrot.lane.b32.xlu0 %v6891_v44, %s7257_s25 }
0x166b   :  { %v2461_v14 = vpop.permute.xlu2 %2460 }
0x166c   :  { %v2465_v62 = vadd.f32 %v2461_v14, %v7973_v47 }
0x166e   :  { %6892 = vtanh.f32 %v2465_v62 }
0x1674   :  { %v6893_v61 = vpop.eup %6892 }
0x1675   :  { %2474 = vrot.lane.b32.xlu0 %v6893_v61, %s7257_s25 }
0x1685   :  { %v2459_v20 = vpop.permute.xlu1 %2458 }
0x1686   :  { %v2464_v7 = vadd.f32 %v2459_v20, %v7968_v33 }
0x1688   :  { %6894 = vtanh.f32 %v2464_v7 }
0x168e   :  { %v6895_v9 = vpop.eup %6894 }
0x168f   :  { %2472 = vrot.lane.b32.xlu2 %v6895_v9, %s7257_s25 }
0x16d1   :  { %v2588_v57 = vpop.permute.xlu1 %2587 }
0x16d2   :  { %v2592_v53 = vmul.f32 %v2588_v57, %v2582_v49  ;;  %v2586_v48 = vpop.permute.xlu0 %2585 }
0x16d3   :  { %v2591_v42 = vmul.f32 %v2586_v48, %v2581_v25 }
0x16d4   :  { %v8086_v21 = vadd.f32 %v8060_v12, %v2592_v53 }
0x16d5   :  { %v8088_v23 = vadd.f32 %v2597_v56, %v2591_v42 }
0x16d6   :  { %v2717_v63 = vrot.slane %v8086_v21, 5 }
0x16d7   :  { %v2716_v58 = vrot.slane %v8088_v23, 6 }
0x16d9   :  { %v2718_v32 = vsel %vm419_vm11, %v2717_v63, %v2716_v58 }
0x16da   :  { %2719 = vrot.lane.b32.xlu1 %v2718_v32, %s7257_s25 }
0x16e7   :  { %v2475_v50 = vpop.permute.xlu0 %2474 }
0x16e8   :  { %v2479_v27 = vmul.f32 %v2475_v50, %v2469_v35 }
0x16e9   :  { %v2473_v16 = vpop.permute.xlu2 %2472 }
0x16ea   :  { %v2478_v12 = vmul.f32 %v2473_v16, %v2468_v40  ;;  %v8097_v37 = vadd.f32 %v2484_v15, %v2479_v27 }
0x16ec   :  { %v2485_v3 = vadd.f32 %v2483_v43, %v2478_v12 }
0x16ee   :  { %v2603_v41 = vrot.slane %v2485_v3, 1  ;;  %v2706_v61 = vrot.slane %v2485_v3, 7 }
0x16f0   :  { %v2604_v60 = vsel %vm419_vm11, %v8097_v37, %v2603_v41 }
0x16f1   :  { %2605 = vrot.lane.b32.xlu2 %v2604_v60, %s7257_s25 }
0x174b   :  { %v2606_v52 = vpop.permute.xlu2 %2605 }
0x174c   :  { %v2720_v55 = vpop.permute.xlu1 %2719  ;;  %6503 = vmatmul.msk.f32.vlgmr.msrb.gmra.mxu0 %vm198_vm12, %v2606_v52 }
0x174d   :  { %6506 = vmatmul.msk.f32.vlgmr.msrb.gmra.mxu2 %vm198_vm12, %v2720_v55  ;;  %3533 = vmatpush.msrb.mxu0 %v7868_v11 }
0x174e   :  { %3647 = vmatpush.msrb.mxu2 %v7870_v34 }
0x174f   :  { %3534 = vmatpush.msrb.mxu0 %v7872_v19 }
0x1750   :  { %3648 = vmatpush.msrb.mxu2 %v7876_v46 }
0x1751   :  { %3535 = vmatpush.msrb.mxu0 %v7882_v2 }
0x1752   :  { %3649 = vmatpush.msrb.mxu2 %v7884_v17 }
0x1753   :  { %3536 = vmatpush.msrb.mxu0 %v7889_v39 }
0x1754   :  { %3650 = vmatpush.msrb.mxu2 %v7891_v6 }
0x17c9   :  { %v2626_v0 = vpop.f32.mrf.mxu0 }
0x17ca   :  { %v2627_v45 = vadd.f32 %v2626_v0, %v7958_v8 }
0x17cc   :  { %v2630_v1 = vrot.slane %v2627_v45, 6  ;;  %v2631_v6 = vrot.slane %v2627_v45, 7 }
0x17ce   :  { %v2634_v11 = vadd.f32 %v2630_v1, %v7968_v33  ;;  %2674 = vrot.lane.b32.xlu2 %v2630_v1, %s7256_s0  ;;  %v2635_v53 = vadd.f32 %v2631_v6, %v7973_v47 }
0x17d0   :  { %v6504_v34 = vmul.f32 -1.442695, %v2634_v11  ;;  %v2740_v19 = vpop.f32.mrf.mxu2  ;;  %v6505_v48 = vmul.f32 -1.442695, %v2635_v53 }
0x17d1   :  { %v2741_v46 = vadd.f32 %v2740_v19, %v7961_v28 }
0x17d2   :  { %6896 = vpow2.f32 %v6504_v34 }
0x17d3   :  { %v2744_v2 = vrot.slane %v2741_v46, 3  ;;  %v2745_v31 = vrot.slane %v2741_v46, 4 }
0x17d5   :  { %2790 = vrot.lane.b32.xlu1 %v2745_v31, %s7256_s0  ;;  %2788 = vrot.lane.b32.xlu0 %v2744_v2, %s7256_s0  ;;  %v2748_v49 = vadd.f32 %v2744_v2, %v7971_v38  ;;  %v2749_v54 = vadd.f32 %v2745_v31, %v7979_v4 }
0x17d7   :  { %v6507_v57 = vmul.f32 -1.442695, %v2748_v49  ;;  %v6508_v25 = vmul.f32 -1.442695, %v2749_v54 }
0x17d8   :  { %v6897_v17 = vpop.eup %6896 }
0x17d9   :  { %v2642_v39 = vadd.f32 1.0, %v6897_v17 }
0x17db   :  { %6898 = vrcp.f32 %v2642_v39  ;;  %v2655_v24 = vand.u32 2147483648, %v2642_v39  ;;  %v2653_v44 = vand.u32 2147483647, %v2642_v39  ;;  %vm2649_vm9 = vweird.f32 %v2642_v39 }
0x17dc   :  { %6900 = vpow2.f32 %v6507_v57 }
0x17dd   :  { %2676 = vrot.lane.b32.xlu0 %v2631_v6, %s7256_s0  ;;  %v2656_v62 = vor.u32 1.1754944e-38, %v2655_v24  ;;  %vm2654_vm13 = vcmp.eq.f32.partialorder %v2653_v44, 8.507059e+37  ;;  %6902 = vpow2.f32 %v6508_v25 }
0x17de   :  { %6904 = vpow2.f32 %v6505_v48 }
0x17e1   :  { %v6899_v18 = vpop.eup %6898 }
0x17e2   :  { %v2645_v36 = vmul.f32 %v6899_v18, %v2642_v39  ;;  %vm2650_vm6 = vweird.f32 %v6899_v18  ;;  %v6901_v56 = vpop.eup %6900 }
0x17e3   :  { %vm2651_vm10 = vmor %vm2649_vm9, %vm2650_vm6  ;;  %v6903_v42 = vpop.eup %6902  ;;  %v2756_v63 = vadd.f32 1.0, %v6901_v56 }
0x17e4   :  { %v2646_v5 = vsub.f32 1.0, %v2645_v36  ;;  %v2757_v58 = vadd.f32 1.0, %v6903_v42  ;;  %v6905_v59 = vpop.eup %6904 }
0x17e5   :  { %6906 = vrcp.f32 %v2756_v63  ;;  %v2643_v35 = vadd.f32 1.0, %v6905_v59  ;;  %vm2763_vm8 = vweird.f32 %v2756_v63  ;;  %v2769_v11 = vand.u32 2147483648, %v2756_v63 }
0x17e6   :  { %v2647_v51 = vmul.f32 %v6899_v18, %v2646_v5  ;;  %6908 = vrcp.f32 %v2757_v58  ;;  %v2784_v1 = vand.u32 2147483648, %v2757_v58  ;;  %vm2778_vm4 = vweird.f32 %v2757_v58 }
0x17e7   :  { %6910 = vrcp.f32 %v2643_v35  ;;  %v2782_v34 = vand.u32 2147483647, %v2757_v58  ;;  %v2767_v19 = vand.u32 2147483647, %v2756_v63  ;;  %v2770_v39 = vor.u32 1.1754944e-38, %v2769_v11 }
0x17e8   :  { %v2648_v14 = vadd.f32 %v6899_v18, %v2647_v51  ;;  %v2785_v17 = vor.u32 1.1754944e-38, %v2784_v1 }
0x17e9   :  { %vm2783_vm9 = vcmp.eq.f32.partialorder %v2782_v34, 8.507059e+37 }
0x17ea   :  { %v2652_v20 = vsel %vm2651_vm10, %v6899_v18, %v2648_v14  ;;  %vm2768_vm10 = vcmp.eq.f32.partialorder %v2767_v19, 8.507059e+37  ;;  %v2670_v14 = vand.u32 2147483648, %v2643_v35 }
0x17eb   :  { %v8119_v7 = vsel %vm2654_vm13, %v2656_v62, %v2652_v20  ;;  %v6907_v40 = vpop.eup %6906  ;;  %v2668_v62 = vand.u32 2147483647, %v2643_v35 }
0x17ec   :  { %v8122_v9 = vmul.f32 %v2706_v61, %v8119_v7  ;;  %v6909_v16 = vpop.eup %6908  ;;  %v2759_v43 = vmul.f32 %v6907_v40, %v2756_v63  ;;  %vm2764_vm15 = vweird.f32 %v6907_v40  ;;  %v2671_v20 = vor.u32 1.1754944e-38, %v2670_v14  ;;  %v7177_v14 = vld [vmem:[#allocation4 + $0x148] sm:$0xff] }
0x17ed   :  { %v2774_v27 = vmul.f32 %v6909_v16, %v2757_v58  ;;  %v6911_v3 = vpop.eup %6910  ;;  %vm2779_vm5 = vweird.f32 %v6909_v16  ;;  %vm2765_vm3 = vmor %vm2763_vm8, %vm2764_vm15  ;;  %vm2664_vm15 = vweird.f32 %v2643_v35  ;;  %vm2669_vm8 = vcmp.eq.f32.partialorder %v2668_v62, 8.507059e+37  ;;  %v7178_v62 = vld [vmem:[#allocation4 + $0xf8] sm:$0xff] }
0x17ee   :  { %v2760_v15 = vsub.f32 1.0, %v2759_v43  ;;  %v2660_v52 = vmul.f32 %v6911_v3, %v2643_v35  ;;  %vm2780_vm6 = vmor %vm2778_vm4, %vm2779_vm5  ;;  %vm2665_vm13 = vweird.f32 %v6911_v3 }
0x17ef   :  { %v2775_v12 = vsub.f32 1.0, %v2774_v27  ;;  %vm2666_vm5 = vmor %vm2664_vm15, %vm2665_vm13 }
0x17f0   :  { %v2761_v60 = vmul.f32 %v6907_v40, %v2760_v15  ;;  %v2661_v45 = vsub.f32 1.0, %v2660_v52  ;;  %v2821_v15 = vrot.slane %v8086_v21, 1  ;;  %v2707_v21 = vrot.slane %v8097_v37, 7  ;;  %v7174_v37 = vld [vmem:[#allocation4 + $0x160] sm:$0xff] }
0x17f1   :  { %v2776_v41 = vmul.f32 %v6909_v16, %v2775_v12 }
0x17f2   :  { %v2762_v0 = vadd.f32 %v6907_v40, %v2761_v60  ;;  %v2662_v31 = vmul.f32 %v6911_v3, %v2661_v45 }
0x17f3   :  { %v2777_v55 = vadd.f32 %v6909_v16, %v2776_v41 }
0x17f4   :  { %v2766_v2 = vsel %vm2765_vm3, %v6907_v40, %v2762_v0  ;;  %v2663_v44 = vadd.f32 %v6911_v3, %v2662_v31 }
0x17f5   :  { %v2781_v46 = vsel %vm2780_vm6, %v6909_v16, %v2777_v55  ;;  %v2771_v36 = vsel %vm2768_vm10, %v2770_v39, %v2766_v2  ;;  %v2694_v16 = vsub.f32 1.0, %v8119_v7 }
0x17f6   :  { %v2786_v18 = vsel %vm2783_vm9, %v2785_v17, %v2781_v46  ;;  %v2667_v61 = vsel %vm2666_vm5, %v6911_v3, %v2663_v44  ;;  %v2820_v3 = vrot.slane %v8088_v23, 1  ;;  %v2808_v41 = vsub.f32 1.0, %v2771_v36 }
0x17f7   :  { %v2672_v54 = vsel %vm2669_vm8, %v2671_v20, %v2667_v61  ;;  %v2809_v60 = vsub.f32 1.0, %v2786_v18  ;;  %v2825_v1 = vmul.f32 %v2821_v15, %v2786_v18  ;;  %v7179_v61 = vld [vmem:[#allocation4 + $0xf0] sm:$0xff]  ;;  %v7180_v20 = vld [vmem:[#allocation4 + $0xe8] sm:$0xff] }
0x17f8   :  { %v2824_v0 = vmul.f32 %v2820_v3, %v2771_v36  ;;  %v2695_v46 = vsub.f32 1.0, %v2672_v54  ;;  %v2711_v31 = vmul.f32 %v2707_v21, %v2672_v54 }
0x1828   :  { %v2675_v32 = vpop.permute.xlu2 %2674 }
0x1829   :  { %v2680_v50 = vmul.f32 %v2675_v32, %v8119_v7 }
0x182b   :  { %2684 = vrot.lane.b32.xlu0 %v2680_v50, %s7256_s0 }
0x1847   :  { %v2791_v6 = vpop.permute.xlu1 %2790  ;;  %v2789_v5 = vpop.permute.xlu0 %2788 }
0x1848   :  { %v2795_v24 = vmul.f32 %v2791_v6, %v2786_v18  ;;  %v2794_v51 = vmul.f32 %v2789_v5, %v2771_v36 }
0x184a   :  { %2798 = vrot.lane.b32.xlu1 %v2794_v51, %s7256_s0  ;;  %2800 = vrot.lane.b32.xlu2 %v2795_v24, %s7256_s0  ;;  %v7175_v24 = vld [vmem:[#allocation4 + $0x158] sm:$0xff]  ;;  %v7176_v51 = vld [vmem:[#allocation4 + $0x150] sm:$0xff] }
0x184f   :  { %v2677_v49 = vpop.permute.xlu0 %2676 }
0x1850   :  { %v2681_v57 = vmul.f32 %v2677_v49, %v2672_v54  ;;  %v7181_v49 = vld [vmem:[#allocation4 + $0xe0] sm:$0xff] }
0x1852   :  { %2686 = vrot.lane.b32.xlu1 %v2681_v57, %s7256_s0 }
0x189d   :  { %v2685_v25 = vpop.permute.xlu0 %2684 }
0x189e   :  { %v2690_v53 = vadd.f32 %v2685_v25, %v7968_v33 }
0x18a0   :  { %6912 = vtanh.f32 %v2690_v53 }
0x18a4   :  { %v2801_v48 = vpop.permute.xlu2 %2800 }
0x18a5   :  { %v2805_v56 = vadd.f32 %v2801_v48, %v7979_v4 }
0x18a6   :  { %v6913_v42 = vpop.eup %6912 }
0x18a7   :  { %6914 = vtanh.f32 %v2805_v56  ;;  %2698 = vrot.lane.b32.xlu1 %v6913_v42, %s7257_s25 }
0x18ad   :  { %v6915_v63 = vpop.eup %6914 }
0x18ae   :  { %2814 = vrot.lane.b32.xlu0 %v6915_v63, %s7257_s25 }
0x18bc   :  { %v2799_v58 = vpop.permute.xlu1 %2798 }
0x18bd   :  { %v2804_v32 = vadd.f32 %v2799_v58, %v7971_v38 }
0x18bf   :  { %6916 = vtanh.f32 %v2804_v32 }
0x18c4   :  { %v2687_v50 = vpop.permute.xlu1 %2686 }
0x18c5   :  { %v6917_v59 = vpop.eup %6916  ;;  %v2691_v35 = vadd.f32 %v2687_v50, %v7973_v47 }
0x18c6   :  { %2812 = vrot.lane.b32.xlu2 %v6917_v59, %s7257_s25 }
0x18c7   :  { %6918 = vtanh.f32 %v2691_v35 }
0x18cd   :  { %v6919_v40 = vpop.eup %6918 }
0x18ce   :  { %2700 = vrot.lane.b32.xlu2 %v6919_v40, %s7257_s25 }
0x1919   :  { %v2699_v27 = vpop.permute.xlu1 %2698 }
0x191a   :  { %v2704_v43 = vmul.f32 %v2699_v27, %v2694_v16 }
0x191c   :  { %v8142_v12 = vadd.f32 %v8122_v9, %v2704_v43 }
0x191e   :  { %v2830_v6 = vrot.slane %v8142_v12, 2 }
0x1920   :  { %v2813_v52 = vpop.permute.xlu2 %2812  ;;  %v2815_v55 = vpop.permute.xlu0 %2814 }
0x1921   :  { %v2818_v45 = vmul.f32 %v2813_v52, %v2808_v41  ;;  %v2819_v11 = vmul.f32 %v2815_v55, %v2809_v60 }
0x1923   :  { %v8146_v34 = vadd.f32 %v2824_v0, %v2818_v45  ;;  %v8148_v7 = vadd.f32 %v2825_v1, %v2819_v11 }
0x1925   :  { %v2944_v19 = vrot.slane %v8146_v34, 5  ;;  %v2945_v9 = vrot.slane %v8148_v7, 4  ;;  %v3048_v60 = vrot.slane %v8146_v34, 1 }
0x1927   :  { %v2946_v23 = vsel %vm419_vm11, %v2945_v9, %v2944_v19 }
0x1928   :  { %v2701_v2 = vpop.permute.xlu2 %2700  ;;  %2947 = vrot.lane.b32.xlu0 %v2946_v23, %s7257_s25 }
0x1929   :  { %v2705_v17 = vmul.f32 %v2701_v2, %v2695_v46 }
0x192b   :  { %v8155_v39 = vadd.f32 %v2711_v31, %v2705_v17 }
0x192d   :  { %v2831_v18 = vrot.slane %v8155_v39, 1 }
0x192f   :  { %v2832_v36 = vsel %vm419_vm11, %v2831_v18, %v2830_v6 }
0x1930   :  { %2833 = vrot.lane.b32.xlu1 %v2832_v36, %s7257_s25 }
0x199a   :  { %v2948_v5 = vpop.permute.xlu0 %2947 }
0x199b   :  { %6512 = vmatmul.msk.f32.vlgmr.msra.gmra.mxu3 %vm198_vm12, %v2948_v5 }
0x199c   :  { %3872 = vmatpush.msra.mxu3 %v7174_v37 }
0x199e   :  { %3873 = vmatpush.msra.mxu3 %v7175_v24 }
0x19a0   :  { %3874 = vmatpush.msra.mxu3 %v7176_v51 }
0x19a2   :  { %v2834_v44 = vpop.permute.xlu1 %2833  ;;  %3875 = vmatpush.msra.mxu3 %v7177_v14 }
0x19a3   :  { %6509 = vmatmul.msk.f32.vlgmr.msra.gmra.mxu1 %vm198_vm12, %v2834_v44 }
0x19a4   :  { %3759 = vmatpush.msra.mxu1 %v7178_v62 }
0x19a6   :  { %3760 = vmatpush.msra.mxu1 %v7179_v61 }
0x19a8   :  { %3761 = vmatpush.msra.mxu1 %v7180_v20 }
0x19aa   :  { %3762 = vmatpush.msra.mxu1 %v7181_v49 }
0x1a1e   :  { %v2968_v54 = vpop.f32.mrf.mxu3 }
0x1a1f   :  { %v2969_v57 = vadd.f32 %v2968_v54, %v7961_v28 }
0x1a20   :  { %v2854_v25 = vpop.f32.mrf.mxu1 }
0x1a21   :  { %v2972_v53 = vrot.slane %v2969_v57, 4  ;;  %v2973_v48 = vrot.slane %v2969_v57, 5  ;;  %v2855_v56 = vadd.f32 %v2854_v25, %v7958_v8 }
0x1a23   :  { %v2976_v42 = vadd.f32 %v2972_v53, %v7971_v38  ;;  %v2858_v63 = vrot.slane %v2855_v56, 5  ;;  %3018 = vrot.lane.b32.xlu0 %v2973_v48, %s7256_s0  ;;  %3016 = vrot.lane.b32.xlu2 %v2972_v53, %s7256_s0  ;;  %v2859_v32 = vrot.slane %v2855_v56, 6  ;;  %v2977_v19 = vadd.f32 %v2973_v48, %v7979_v4 }
0x1a25   :  { %v6513_v58 = vmul.f32 -1.442695, %v2976_v42  ;;  %2902 = vrot.lane.b32.xlu1 %v2858_v63, %s7256_s0  ;;  %v2863_v45 = vadd.f32 %v2859_v32, %v7973_v47  ;;  %v2862_v21 = vadd.f32 %v2858_v63, %v7968_v33  ;;  %v6514_v46 = vmul.f32 -1.442695, %v2977_v19 }
0x1a27   :  { %6920 = vpow2.f32 %v6513_v58  ;;  %v6511_v1 = vmul.f32 -1.442695, %v2863_v45  ;;  %v6510_v34 = vmul.f32 -1.442695, %v2862_v21 }
0x1a2b   :  { %2904 = vrot.lane.b32.xlu2 %v2859_v32, %s7256_s0 }
0x1a2d   :  { %v6921_v50 = vpop.eup %6920 }
0x1a2e   :  { %v2984_v59 = vadd.f32 1.0, %v6921_v50 }
0x1a30   :  { %6922 = vrcp.f32 %v2984_v59  ;;  %v2997_v27 = vand.u32 2147483648, %v2984_v59  ;;  %v2995_v15 = vand.u32 2147483647, %v2984_v59  ;;  %vm2991_vm3 = vweird.f32 %v2984_v59 }
0x1a31   :  { %6924 = vpow2.f32 %v6511_v1 }
0x1a32   :  { %v2998_v41 = vor.u32 1.1754944e-38, %v2997_v27  ;;  %vm2996_vm9 = vcmp.eq.f32.partialorder %v2995_v15, 8.507059e+37 }
0x1a36   :  { %v6923_v35 = vpop.eup %6922 }
0x1a37   :  { %v2987_v40 = vmul.f32 %v6923_v35, %v2984_v59  ;;  %vm2992_vm4 = vweird.f32 %v6923_v35  ;;  %v6925_v11 = vpop.eup %6924 }
0x1a38   :  { %vm2993_vm6 = vmor %vm2991_vm3, %vm2992_vm4  ;;  %v2871_v9 = vadd.f32 1.0, %v6925_v11 }
0x1a39   :  { %v2988_v16 = vsub.f32 1.0, %v2987_v40 }
0x1a3a   :  { %6926 = vrcp.f32 %v2871_v9  ;;  %v2898_v14 = vand.u32 2147483648, %v2871_v9  ;;  %vm2892_vm13 = vweird.f32 %v2871_v9  ;;  %v2896_v62 = vand.u32 2147483647, %v2871_v9 }
0x1a3b   :  { %v2989_v43 = vmul.f32 %v6923_v35, %v2988_v16  ;;  %6928 = vpow2.f32 %v6514_v46 }
0x1a3c   :  { %6930 = vpow2.f32 %v6510_v34  ;;  %v2899_v54 = vor.u32 1.1754944e-38, %v2898_v14  ;;  %vm2897_vm5 = vcmp.eq.f32.partialorder %v2896_v62, 8.507059e+37 }
0x1a3d   :  { %v2990_v3 = vadd.f32 %v6923_v35, %v2989_v43 }
0x1a3f   :  { %v2994_v52 = vsel %vm2993_vm6, %v6923_v35, %v2990_v3 }
0x1a40   :  { %v8171_v55 = vsel %vm2996_vm9, %v2998_v41, %v2994_v52  ;;  %v6927_v23 = vpop.eup %6926 }
0x1a41   :  { %v8174_v0 = vmul.f32 %v3048_v60, %v8171_v55  ;;  %v6929_v2 = vpop.eup %6928  ;;  %v2888_v31 = vmul.f32 %v6927_v23, %v2871_v9  ;;  %vm2893_vm10 = vweird.f32 %v6927_v23 }
0x1a42   :  { %v6931_v17 = vpop.eup %6930  ;;  %v2985_v6 = vadd.f32 1.0, %v6929_v2  ;;  %vm2894_vm15 = vmor %vm2892_vm13, %vm2893_vm10 }
0x1a43   :  { %v2889_v18 = vsub.f32 1.0, %v2888_v31  ;;  %v2870_v36 = vadd.f32 1.0, %v6931_v17 }
0x1a44   :  { %6932 = vrcp.f32 %v2985_v6  ;;  %v3012_v50 = vand.u32 2147483648, %v2985_v6  ;;  %vm3006_vm4 = vweird.f32 %v2985_v6  ;;  %v3010_v59 = vand.u32 2147483647, %v2985_v6 }
0x1a45   :  { %v2890_v5 = vmul.f32 %v6927_v23, %v2889_v18  ;;  %6934 = vrcp.f32 %v2870_v36  ;;  %v2883_v40 = vand.u32 2147483648, %v2870_v36  ;;  %vm2877_vm9 = vweird.f32 %v2870_v36 }
0x1a46   :  { %v2881_v27 = vand.u32 2147483647, %v2870_v36  ;;  %v3013_v43 = vor.u32 1.1754944e-38, %v3012_v50  ;;  %vm3011_vm13 = vcmp.eq.f32.partialorder %v3010_v59, 8.507059e+37 }
0x1a47   :  { %v2891_v51 = vadd.f32 %v6927_v23, %v2890_v5  ;;  %v2884_v60 = vor.u32 1.1754944e-38, %v2883_v40  ;;  %v3049_v5 = vrot.slane %v8148_v7, 1 }
0x1a49   :  { %v2895_v20 = vsel %vm2894_vm15, %v6927_v23, %v2891_v51  ;;  %vm2882_vm15 = vcmp.eq.f32.partialorder %v2881_v27, 8.507059e+37 }
0x1a4a   :  { %v6933_v44 = vpop.eup %6932  ;;  %v8181_v25 = vsel %vm2897_vm5, %v2899_v54, %v2895_v20 }
0x1a4b   :  { %v6935_v61 = vpop.eup %6934  ;;  %v3002_v49 = vmul.f32 %v6933_v44, %v2985_v6  ;;  %vm3007_vm8 = vweird.f32 %v6933_v44 }
0x1a4c   :  { %v2873_v57 = vmul.f32 %v6935_v61, %v2870_v36  ;;  %vm2878_vm3 = vweird.f32 %v6935_v61  ;;  %vm3008_vm6 = vmor %vm3006_vm4, %vm3007_vm8 }
0x1a4d   :  { %v3003_v56 = vsub.f32 1.0, %v3002_v49  ;;  %vm2879_vm10 = vmor %vm2877_vm9, %vm2878_vm3 }
0x1a4e   :  { %v2874_v42 = vsub.f32 1.0, %v2873_v57 }
0x1a4f   :  { %v3004_v63 = vmul.f32 %v6933_v44, %v3003_v56 }
0x1a50   :  { %v2875_v58 = vmul.f32 %v6935_v61, %v2874_v42  ;;  %v2935_v42 = vrot.slane %v8155_v39, 7 }
0x1a51   :  { %v3005_v32 = vadd.f32 %v6933_v44, %v3004_v63 }
0x1a52   :  { %v2876_v35 = vadd.f32 %v6935_v61, %v2875_v58  ;;  %v2923_v58 = vsub.f32 1.0, %v8181_v25 }
0x1a53   :  { %v3009_v16 = vsel %vm3008_vm6, %v6933_v44, %v3005_v32 }
0x1a54   :  { %v2880_v15 = vsel %vm2879_vm10, %v6935_v61, %v2876_v35  ;;  %v3014_v41 = vsel %vm3011_vm13, %v3013_v43, %v3009_v16 }
0x1a55   :  { %v2885_v1 = vsel %vm2882_vm15, %v2884_v60, %v2880_v15  ;;  %v3053_v14 = vmul.f32 %v3049_v5, %v3014_v41 }
0x1a56   :  { %v2922_v57 = vsub.f32 1.0, %v2885_v1 }
0x1a7d   :  { %v3017_v37 = vpop.permute.xlu2 %3016 }
0x1a7e   :  { %v3022_v24 = vmul.f32 %v3017_v37, %v8171_v55  ;;  %v3037_v37 = vsub.f32 1.0, %v3014_v41 }
0x1a80   :  { %3026 = vrot.lane.b32.xlu0 %v3022_v24, %s7256_s0  ;;  %v3036_v24 = vsub.f32 1.0, %v8171_v55 }
0x1a85   :  { %v2905_v53 = vpop.permute.xlu2 %2904 }
0x1a86   :  { %v2909_v48 = vmul.f32 %v2905_v53, %v8181_v25  ;;  %v2934_v53 = vrot.slane %v8142_v12, 7 }
0x1a88   :  { %2914 = vrot.lane.b32.xlu0 %v2909_v48, %s7256_s0  ;;  %v2938_v55 = vmul.f32 %v2934_v53, %v2885_v1 }
0x1a95   :  { %v3019_v3 = vpop.permute.xlu0 %3018 }
0x1a96   :  { %v3023_v52 = vmul.f32 %v3019_v3, %v3014_v41 }
0x1a97   :  { %v2903_v45 = vpop.permute.xlu1 %2902 }
0x1a98   :  { %v2908_v11 = vmul.f32 %v2903_v45, %v2885_v1  ;;  %3028 = vrot.lane.b32.xlu1 %v3023_v52, %s7256_s0 }
0x1a9a   :  { %2912 = vrot.lane.b32.xlu2 %v2908_v11, %s7256_s0 }
0x1af2   :  { %v3027_v19 = vpop.permute.xlu0 %3026 }
0x1af3   :  { %v3032_v9 = vadd.f32 %v3027_v19, %v7971_v38 }
0x1af4   :  { %v2913_v21 = vpop.permute.xlu2 %2912 }
0x1af5   :  { %6936 = vtanh.f32 %v3032_v9  ;;  %v2918_v46 = vadd.f32 %v2913_v21, %v7968_v33 }
0x1af7   :  { %6938 = vtanh.f32 %v2918_v46 }
0x1afa   :  { %v2915_v34 = vpop.permute.xlu0 %2914 }
0x1afb   :  { %v6937_v23 = vpop.eup %6936  ;;  %v2919_v2 = vadd.f32 %v2915_v34, %v7973_v47 }
0x1afc   :  { %3040 = vrot.lane.b32.xlu1 %v6937_v23, %s7257_s25 }
0x1afd   :  { %v6939_v31 = vpop.eup %6938  ;;  %6940 = vtanh.f32 %v2919_v2 }
0x1afe   :  { %2926 = vrot.lane.b32.xlu0 %v6939_v31, %s7257_s25 }
0x1b03   :  { %v6941_v17 = vpop.eup %6940 }
0x1b04   :  { %2928 = vrot.lane.b32.xlu1 %v6941_v17, %s7257_s25 }
0x1b0a   :  { %v3029_v6 = vpop.permute.xlu1 %3028 }
0x1b0b   :  { %v3033_v18 = vadd.f32 %v3029_v6, %v7979_v4 }
0x1b0d   :  { %6942 = vtanh.f32 %v3033_v18 }
0x1b13   :  { %v6943_v36 = vpop.eup %6942 }
0x1b14   :  { %3042 = vrot.lane.b32.xlu2 %v6943_v36, %s7257_s25 }
0x1b6e   :  { %v3043_v51 = vpop.permute.xlu2 %3042  ;;  %v3041_v44 = vpop.permute.xlu1 %3040 }
0x1b6f   :  { %v3047_v62 = vmul.f32 %v3043_v51, %v3037_v37  ;;  %v3046_v61 = vmul.f32 %v3041_v44, %v3036_v24 }
0x1b70   :  { %v2927_v20 = vpop.permute.xlu0 %2926 }
0x1b71   :  { %v3055_v49 = vadd.f32 %v3053_v14, %v3047_v62  ;;  %v8198_v54 = vadd.f32 %v8174_v0, %v3046_v61  ;;  %v2932_v7 = vmul.f32 %v2927_v20, %v2922_v57  ;;  %v2939_v0 = vmul.f32 %v2935_v42, %v8181_v25 }
0x1b73   :  { %v3173_v48 = vrot.slane %v3055_v49, 3  ;;  %v3172_v56 = vrot.slane %v8198_v54, 4  ;;  %v8206_v50 = vadd.f32 %v2938_v55, %v2932_v7  ;;  %v3277_v18 = vrot.slane %v3055_v49, 1 }
0x1b75   :  { %v3174_v63 = vsel %vm419_vm11, %v3173_v48, %v3172_v56  ;;  %v3058_v35 = vrot.slane %v8206_v50, 3 }
0x1b76   :  { %3175 = vrot.lane.b32.xlu2 %v3174_v63, %s7257_s25  ;;  %v2929_v32 = vpop.permute.xlu1 %2928 }
0x1b77   :  { %v2933_v59 = vmul.f32 %v2929_v32, %v2923_v58 }
0x1b79   :  { %v8209_v12 = vadd.f32 %v2939_v0, %v2933_v59 }
0x1b7b   :  { %v3059_v40 = vrot.slane %v8209_v12, 2 }
0x1b7d   :  { %v3060_v39 = vsel %vm419_vm11, %v3059_v40, %v3058_v35 }
0x1b7e   :  { %3061 = vrot.lane.b32.xlu0 %v3060_v39, %s7257_s25 }
0x1bd0   :  { %v3176_v16 = vpop.permute.xlu2 %3175 }
0x1bd1   :  { %6518 = vmatmul.msk.f32.vlgmr.msra.gmra.mxu2 %vm198_vm12, %v3176_v16 }
0x1bf0   :  { %v3062_v27 = vpop.permute.xlu0 %3061 }
0x1bf1   :  { %6515 = vmatmul.msk.f32.vlgmr.msra.gmra.mxu0 %vm198_vm12, %v3062_v27 }
0x1c54   :  { %v3196_v43 = vpop.f32.mrf.mxu2 }
0x1c55   :  { %v3197_v25 = vadd.f32 %v3196_v43, %v7961_v28 }
0x1c57   :  { %v3200_v15 = vrot.slane %v3197_v25, 5  ;;  %v3201_v3 = vrot.slane %v3197_v25, 6 }
0x1c59   :  { %v3205_v41 = vadd.f32 %v3201_v3, %v7979_v4  ;;  %3246 = vrot.lane.b32.xlu2 %v3201_v3, %s7256_s0  ;;  %3244 = vrot.lane.b32.xlu1 %v3200_v15, %s7256_s0  ;;  %v3204_v24 = vadd.f32 %v3200_v15, %v7971_v38 }
0x1c5b   :  { %v6520_v60 = vmul.f32 -1.442695, %v3205_v41  ;;  %v6519_v51 = vmul.f32 -1.442695, %v3204_v24 }
0x1c5d   :  { %6944 = vpow2.f32 %v6520_v60 }
0x1c63   :  { %v6945_v52 = vpop.eup %6944 }
0x1c64   :  { %v3213_v45 = vadd.f32 1.0, %v6945_v52 }
0x1c66   :  { %6946 = vrcp.f32 %v3213_v45  ;;  %v3240_v23 = vand.u32 2147483648, %v3213_v45  ;;  %v3238_v31 = vand.u32 2147483647, %v3213_v45  ;;  %vm3234_vm8 = vweird.f32 %v3213_v45 }
0x1c67   :  { %6948 = vpow2.f32 %v6519_v51 }
0x1c68   :  { %v3241_v6 = vor.u32 1.1754944e-38, %v3240_v23  ;;  %vm3239_vm3 = vcmp.eq.f32.partialorder %v3238_v31, 8.507059e+37 }
0x1c6c   :  { %v6947_v1 = vpop.eup %6946 }
0x1c6d   :  { %v3230_v19 = vmul.f32 %v6947_v1, %v3213_v45  ;;  %vm3235_vm5 = vweird.f32 %v6947_v1  ;;  %v6949_v44 = vpop.eup %6948 }
0x1c6e   :  { %v3082_v11 = vpop.f32.mrf.mxu0  ;;  %vm3236_vm4 = vmor %vm3234_vm8, %vm3235_vm5  ;;  %v3212_v14 = vadd.f32 1.0, %v6949_v44 }
0x1c6f   :  { %v3083_v9 = vadd.f32 %v3082_v11, %v7958_v8  ;;  %v3231_v21 = vsub.f32 1.0, %v3230_v19 }
0x1c70   :  { %6950 = vrcp.f32 %v3212_v14  ;;  %v3225_v59 = vand.u32 2147483648, %v3212_v14  ;;  %vm3219_vm9 = vweird.f32 %v3212_v14  ;;  %v3223_v35 = vand.u32 2147483647, %v3212_v14 }
0x1c71   :  { %v3086_v46 = vrot.slane %v3083_v9, 4  ;;  %v3087_v34 = vrot.slane %v3083_v9, 5  ;;  %v3232_v2 = vmul.f32 %v6947_v1, %v3231_v21 }
0x1c72   :  { %v3226_v39 = vor.u32 1.1754944e-38, %v3225_v59  ;;  %vm3224_vm13 = vcmp.eq.f32.partialorder %v3223_v35, 8.507059e+37 }
0x1c73   :  { %3132 = vrot.lane.b32.xlu1 %v3087_v34, %s7256_s0  ;;  %3130 = vrot.lane.b32.xlu0 %v3086_v46, %s7256_s0  ;;  %v3233_v17 = vadd.f32 %v6947_v1, %v3232_v2  ;;  %v3090_v62 = vadd.f32 %v3086_v46, %v7968_v33  ;;  %v3091_v20 = vadd.f32 %v3087_v34, %v7973_v47 }
0x1c75   :  { %v3237_v36 = vsel %vm3236_vm4, %v6947_v1, %v3233_v17  ;;  %v6516_v53 = vmul.f32 -1.442695, %v3090_v62  ;;  %v6517_v48 = vmul.f32 -1.442695, %v3091_v20 }
0x1c76   :  { %v8224_v5 = vsel %vm3239_vm3, %v3241_v6, %v3237_v36  ;;  %v6951_v57 = vpop.eup %6950 }
0x1c77   :  { %v8227_v37 = vmul.f32 %v3277_v18, %v8224_v5  ;;  %v3215_v56 = vmul.f32 %v6951_v57, %v3212_v14  ;;  %6952 = vpow2.f32 %v6516_v53  ;;  %vm3220_vm6 = vweird.f32 %v6951_v57 }
0x1c78   :  { %6954 = vpow2.f32 %v6517_v48  ;;  %vm3221_vm10 = vmor %vm3219_vm9, %vm3220_vm6 }
0x1c79   :  { %v3216_v7 = vsub.f32 1.0, %v3215_v56 }
0x1c7b   :  { %v3217_v42 = vmul.f32 %v6951_v57, %v3216_v7 }
0x1c7d   :  { %v6953_v55 = vpop.eup %6952  ;;  %v3218_v32 = vadd.f32 %v6951_v57, %v3217_v42 }
0x1c7e   :  { %v6955_v63 = vpop.eup %6954  ;;  %v3098_v58 = vadd.f32 1.0, %v6953_v55 }
0x1c7f   :  { %v3099_v0 = vadd.f32 1.0, %v6955_v63  ;;  %v3222_v40 = vsel %vm3221_vm10, %v6951_v57, %v3218_v32  ;;  %v3276_v63 = vrot.slane %v8198_v54, 1 }
0x1c80   :  { %6956 = vrcp.f32 %v3098_v58  ;;  %v8234_v16 = vsel %vm3224_vm13, %v3226_v39, %v3222_v40  ;;  %vm3105_vm8 = vweird.f32 %v3098_v58  ;;  %v3111_v21 = vand.u32 2147483648, %v3098_v58 }
0x1c81   :  { %6958 = vrcp.f32 %v3099_v0  ;;  %v3126_v9 = vand.u32 2147483648, %v3099_v0  ;;  %vm3120_vm4 = vweird.f32 %v3099_v0  ;;  %v3124_v46 = vand.u32 2147483647, %v3099_v0 }
0x1c82   :  { %v3109_v34 = vand.u32 2147483647, %v3098_v58  ;;  %v3112_v17 = vor.u32 1.1754944e-38, %v3111_v21  ;;  %v3280_v59 = vmul.f32 %v3276_v63, %v8234_v16 }
0x1c83   :  { %v3127_v31 = vor.u32 1.1754944e-38, %v3126_v9  ;;  %vm3125_vm9 = vcmp.eq.f32.partialorder %v3124_v46, 8.507059e+37 }
0x1c84   :  { %vm3110_vm10 = vcmp.eq.f32.partialorder %v3109_v34, 8.507059e+37 }
0x1c86   :  { %v6957_v25 = vpop.eup %6956 }
0x1c87   :  { %v6959_v15 = vpop.eup %6958  ;;  %v3101_v41 = vmul.f32 %v6957_v25, %v3098_v58  ;;  %vm3106_vm15 = vweird.f32 %v6957_v25  ;;  %v3264_v58 = vsub.f32 1.0, %v8234_v16 }
0x1c88   :  { %v3116_v3 = vmul.f32 %v6959_v15, %v3099_v0  ;;  %vm3121_vm5 = vweird.f32 %v6959_v15  ;;  %vm3107_vm3 = vmor %vm3105_vm8, %vm3106_vm15  ;;  %v3265_v0 = vsub.f32 1.0, %v8224_v5 }
0x1c89   :  { %v3102_v52 = vsub.f32 1.0, %v3101_v41  ;;  %vm3122_vm6 = vmor %vm3120_vm4, %vm3121_vm5 }
0x1c8a   :  { %v3117_v60 = vsub.f32 1.0, %v3116_v3 }
0x1c8b   :  { %v3103_v1 = vmul.f32 %v6957_v25, %v3102_v52 }
0x1c8c   :  { %v3118_v45 = vmul.f32 %v6959_v15, %v3117_v60 }
0x1c8d   :  { %v3104_v19 = vadd.f32 %v6957_v25, %v3103_v1 }
0x1c8e   :  { %v3119_v11 = vadd.f32 %v6959_v15, %v3118_v45 }
0x1c8f   :  { %v3108_v2 = vsel %vm3107_vm3, %v6957_v25, %v3104_v19 }
0x1c90   :  { %v3123_v23 = vsel %vm3122_vm6, %v6959_v15, %v3119_v11  ;;  %v3113_v24 = vsel %vm3110_vm10, %v3112_v17, %v3108_v2 }
0x1c91   :  { %v3128_v18 = vsel %vm3125_vm9, %v3127_v31, %v3123_v23  ;;  %v3150_v41 = vsub.f32 1.0, %v3113_v24 }
0x1c92   :  { %v3151_v3 = vsub.f32 1.0, %v3128_v18 }
0x1cb3   :  { %v3247_v61 = vpop.permute.xlu2 %3246 }
0x1cb4   :  { %v3251_v49 = vmul.f32 %v3247_v61, %v8224_v5  ;;  %v3162_v5 = vrot.slane %v8206_v50, 7 }
0x1cb6   :  { %3256 = vrot.lane.b32.xlu0 %v3251_v49, %s7256_s0 }
0x1ccb   :  { %v3245_v27 = vpop.permute.xlu1 %3244 }
0x1ccc   :  { %v3250_v43 = vmul.f32 %v3245_v27, %v8234_v16  ;;  %v3163_v16 = vrot.slane %v8209_v12, 7 }
0x1cce   :  { %3254 = vrot.lane.b32.xlu2 %v3250_v43, %s7256_s0  ;;  %v3167_v45 = vmul.f32 %v3163_v16, %v3128_v18 }
0x1ce5   :  { %v3133_v6 = vpop.permute.xlu1 %3132  ;;  %v3131_v36 = vpop.permute.xlu0 %3130 }
0x1ce6   :  { %v3137_v51 = vmul.f32 %v3133_v6, %v3128_v18  ;;  %v3136_v44 = vmul.f32 %v3131_v36, %v3113_v24 }
0x1ce8   :  { %3142 = vrot.lane.b32.xlu2 %v3137_v51, %s7256_s0  ;;  %3140 = vrot.lane.b32.xlu1 %v3136_v44, %s7256_s0 }
0x1d28   :  { %v3255_v14 = vpop.permute.xlu2 %3254  ;;  %v3257_v62 = vpop.permute.xlu0 %3256 }
0x1d29   :  { %v3260_v61 = vadd.f32 %v3255_v14, %v7971_v38  ;;  %v3261_v20 = vadd.f32 %v3257_v62, %v7979_v4 }
0x1d2b   :  { %6960 = vtanh.f32 %v3260_v61 }
0x1d2c   :  { %6962 = vtanh.f32 %v3261_v20 }
0x1d31   :  { %v6961_v49 = vpop.eup %6960 }
0x1d32   :  { %v6963_v57 = vpop.eup %6962  ;;  %3268 = vrot.lane.b32.xlu0 %v6961_v49, %s7257_s25 }
0x1d33   :  { %3270 = vrot.lane.b32.xlu1 %v6963_v57, %s7257_s25 }
0x1d42   :  { %v3143_v53 = vpop.permute.xlu2 %3142 }
0x1d43   :  { %v3147_v48 = vadd.f32 %v3143_v53, %v7973_v47 }
0x1d45   :  { %6964 = vtanh.f32 %v3147_v48 }
0x1d4b   :  { %v6965_v56 = vpop.eup %6964 }
0x1d4c   :  { %3156 = vrot.lane.b32.xlu0 %v6965_v56, %s7257_s25 }
0x1d5a   :  { %v3141_v7 = vpop.permute.xlu1 %3140 }
0x1d5b   :  { %v3146_v42 = vadd.f32 %v3141_v7, %v7968_v33 }
0x1d5d   :  { %6966 = vtanh.f32 %v3146_v42 }
0x1d63   :  { %v6967_v55 = vpop.eup %6966 }
0x1d64   :  { %3154 = vrot.lane.b32.xlu2 %v6967_v55, %s7257_s25 }
0x1da4   :  { %v3269_v32 = vpop.permute.xlu0 %3268 }
0x1da5   :  { %v3274_v35 = vmul.f32 %v3269_v32, %v3264_v58  ;;  %v3271_v40 = vpop.permute.xlu1 %3270 }
0x1da6   :  { %v3275_v39 = vmul.f32 %v3271_v40, %v3265_v0 }
0x1da7   :  { %v8252_v27 = vadd.f32 %v3280_v59, %v3274_v35 }
0x1da8   :  { %v8255_v43 = vadd.f32 %v8227_v37, %v3275_v39  ;;  %v3166_v37 = vmul.f32 %v3162_v5, %v3113_v24 }
0x1da9   :  { %v3400_v25 = vrot.slane %v8252_v27, 3 }
0x1daa   :  { %v3401_v15 = vrot.slane %v8255_v43, 2 }
0x1dac   :  { %v3402_v54 = vsel %vm419_vm11, %v3401_v15, %v3400_v25 }
0x1dad   :  { %3403 = vrot.lane.b32.xlu1 %v3402_v54, %s7257_s25 }
0x1dbe   :  { %v3157_v60 = vpop.permute.xlu0 %3156  ;;  %v3155_v52 = vpop.permute.xlu2 %3154 }
0x1dbf   :  { %v3161_v1 = vmul.f32 %v3157_v60, %v3151_v3  ;;  %v3160_v11 = vmul.f32 %v3155_v52, %v3150_v41 }
0x1dc1   :  { %v8263_v19 = vadd.f32 %v3167_v45, %v3161_v1  ;;  %v3168_v9 = vadd.f32 %v3166_v37, %v3160_v11 }
0x1dc3   :  { %v3287_v21 = vrot.slane %v8263_v19, 3  ;;  %v3286_v46 = vrot.slane %v3168_v9, 4  ;;  %v3390_v42 = vrot.slane %v3168_v9, 7 }
0x1dc5   :  { %v3288_v34 = vsel %vm419_vm11, %v3287_v21, %v3286_v46 }
0x1dc6   :  { %3289 = vrot.lane.b32.xlu2 %v3288_v34, %s7257_s25 }
0x1e1f   :  { %v3404_v50 = vpop.permute.xlu1 %3403 }
0x1e20   :  { %6524 = vmatmul.msk.f32.vlgmr.msrb.gmra.mxu3 %vm198_vm12, %v3404_v50  ;;  %v3290_v12 = vpop.permute.xlu2 %3289 }
0x1e21   :  { %6521 = vmatmul.msk.f32.vlgmr.msrb.gmra.mxu1 %vm198_vm12, %v3290_v12 }
0x1e9e   :  { %v3310_v23 = vpop.f32.mrf.mxu1 }
0x1e9f   :  { %v3311_v2 = vadd.f32 %v3310_v23, %v7958_v8 }
0x1ea1   :  { %v3314_v31 = vrot.slane %v3311_v2, 3  ;;  %v3315_v14 = vrot.slane %v3311_v2, 4 }
0x1ea3   :  { %v3318_v17 = vadd.f32 %v3314_v31, %v7968_v33  ;;  %v3424_v6 = vpop.f32.mrf.mxu3  ;;  %3358 = vrot.lane.b32.xlu2 %v3314_v31, %s7256_s0  ;;  %v3319_v40 = vadd.f32 %v3315_v14, %v7973_v47 }
0x1ea4   :  { %v3425_v18 = vadd.f32 %v3424_v6, %v7961_v28 }
0x1ea5   :  { %v6522_v36 = vmul.f32 -1.442695, %v3318_v17  ;;  %v6523_v39 = vmul.f32 -1.442695, %v3319_v40 }
0x1ea6   :  { %v3428_v24 = vrot.slane %v3425_v18, 6  ;;  %v3429_v51 = vrot.slane %v3425_v18, 7 }
0x1ea7   :  { %6968 = vpow2.f32 %v6522_v36 }
0x1ea8   :  { %3474 = vrot.lane.b32.xlu1 %v3429_v51, %s7256_s0  ;;  %3472 = vrot.lane.b32.xlu0 %v3428_v24, %s7256_s0  ;;  %v3432_v32 = vadd.f32 %v3428_v24, %v7971_v38  ;;  %v3433_v0 = vadd.f32 %v3429_v51, %v7979_v4 }
0x1eaa   :  { %v6525_v59 = vmul.f32 -1.442695, %v3432_v32  ;;  %v6526_v35 = vmul.f32 -1.442695, %v3433_v0 }
0x1ead   :  { %v6969_v44 = vpop.eup %6968 }
0x1eae   :  { %v3326_v62 = vadd.f32 1.0, %v6969_v44 }
0x1eb0   :  { %6970 = vrcp.f32 %v3326_v62  ;;  %3360 = vrot.lane.b32.xlu0 %v3315_v14, %s7256_s0  ;;  %v3339_v57 = vand.u32 2147483648, %v3326_v62  ;;  %v3337_v48 = vand.u32 2147483647, %v3326_v62  ;;  %vm3333_vm15 = vweird.f32 %v3326_v62 }
0x1eb1   :  { %6972 = vpow2.f32 %v6525_v59 }
0x1eb2   :  { %v3340_v7 = vor.u32 1.1754944e-38, %v3339_v57  ;;  %vm3338_vm8 = vcmp.eq.f32.partialorder %v3337_v48, 8.507059e+37  ;;  %6974 = vpow2.f32 %v6526_v35 }
0x1eb3   :  { %6976 = vpow2.f32 %v6523_v39 }
0x1eb6   :  { %v6971_v61 = vpop.eup %6970 }
0x1eb7   :  { %v3329_v20 = vmul.f32 %v6971_v61, %v3326_v62  ;;  %vm3334_vm13 = vweird.f32 %v6971_v61  ;;  %v6973_v25 = vpop.eup %6972 }
0x1eb8   :  { %vm3335_vm5 = vmor %vm3333_vm15, %vm3334_vm13  ;;  %v6975_v15 = vpop.eup %6974  ;;  %v3440_v54 = vadd.f32 1.0, %v6973_v25 }
0x1eb9   :  { %v3330_v49 = vsub.f32 1.0, %v3329_v20  ;;  %v3441_v5 = vadd.f32 1.0, %v6975_v15  ;;  %v6977_v41 = vpop.eup %6976 }
0x1eba   :  { %6978 = vrcp.f32 %v3440_v54  ;;  %v3327_v60 = vadd.f32 1.0, %v6977_v41  ;;  %vm3447_vm6 = vweird.f32 %v3440_v54  ;;  %v3453_v17 = vand.u32 2147483648, %v3440_v54 }
0x1ebb   :  { %v3331_v53 = vmul.f32 %v6971_v61, %v3330_v49  ;;  %6980 = vrcp.f32 %v3441_v5  ;;  %v3468_v31 = vand.u32 2147483648, %v3441_v5  ;;  %vm3462_vm9 = vweird.f32 %v3441_v5 }
0x1ebc   :  { %6982 = vrcp.f32 %v3327_v60  ;;  %v3466_v6 = vand.u32 2147483647, %v3441_v5  ;;  %v3451_v18 = vand.u32 2147483647, %v3440_v54  ;;  %v3454_v14 = vor.u32 1.1754944e-38, %v3453_v17 }
0x1ebd   :  { %v3332_v56 = vadd.f32 %v6971_v61, %v3331_v53  ;;  %v3469_v44 = vor.u32 1.1754944e-38, %v3468_v31 }
0x1ebe   :  { %vm3467_vm15 = vcmp.eq.f32.partialorder %v3466_v6, 8.507059e+37 }
0x1ebf   :  { %v3336_v55 = vsel %vm3335_vm5, %v6971_v61, %v3332_v56  ;;  %vm3452_vm5 = vcmp.eq.f32.partialorder %v3451_v18, 8.507059e+37  ;;  %v3354_v56 = vand.u32 2147483648, %v3327_v60 }
0x1ec0   :  { %v8277_v63 = vsel %vm3338_vm8, %v3340_v7, %v3336_v55  ;;  %v6979_v52 = vpop.eup %6978  ;;  %v3352_v7 = vand.u32 2147483647, %v3327_v60 }
0x1ec1   :  { %v8280_v58 = vmul.f32 %v3390_v42, %v8277_v63  ;;  %v6981_v45 = vpop.eup %6980  ;;  %v3443_v37 = vmul.f32 %v6979_v52, %v3440_v54  ;;  %vm3448_vm4 = vweird.f32 %v6979_v52  ;;  %v3355_v55 = vor.u32 1.1754944e-38, %v3354_v56 }
0x1ec2   :  { %v3458_v1 = vmul.f32 %v6981_v45, %v3441_v5  ;;  %v6983_v21 = vpop.eup %6982  ;;  %vm3463_vm3 = vweird.f32 %v6981_v45  ;;  %vm3449_vm10 = vmor %vm3447_vm6, %vm3448_vm4  ;;  %vm3348_vm4 = vweird.f32 %v3327_v60  ;;  %vm3353_vm6 = vcmp.eq.f32.partialorder %v3352_v7, 8.507059e+37 }
0x1ec3   :  { %v3444_v9 = vsub.f32 1.0, %v3443_v37  ;;  %v3344_v50 = vmul.f32 %v6983_v21, %v3327_v60  ;;  %vm3464_vm13 = vmor %vm3462_vm9, %vm3463_vm3  ;;  %vm3349_vm8 = vweird.f32 %v6983_v21 }
0x1ec4   :  { %v3459_v11 = vsub.f32 1.0, %v3458_v1  ;;  %vm3350_vm3 = vmor %vm3348_vm4, %vm3349_vm8 }
0x1ec5   :  { %v3445_v34 = vmul.f32 %v6979_v52, %v3444_v9  ;;  %v3345_v2 = vsub.f32 1.0, %v3344_v50  ;;  %v3504_v9 = vrot.slane %v8252_v27, 1 }
0x1ec6   :  { %v3460_v46 = vmul.f32 %v6981_v45, %v3459_v11 }
0x1ec7   :  { %v3446_v23 = vadd.f32 %v6979_v52, %v3445_v34  ;;  %v3346_v51 = vmul.f32 %v6983_v21, %v3345_v2 }
0x1ec8   :  { %v3461_v12 = vadd.f32 %v6981_v45, %v3460_v46 }
0x1ec9   :  { %v3450_v24 = vsel %vm3449_vm10, %v6979_v52, %v3446_v23  ;;  %v3347_v48 = vadd.f32 %v6983_v21, %v3346_v51 }
0x1eca   :  { %v3465_v36 = vsel %vm3464_vm13, %v6981_v45, %v3461_v12  ;;  %v3455_v49 = vsel %vm3452_vm5, %v3454_v14, %v3450_v24  ;;  %v3378_v45 = vsub.f32 1.0, %v8277_v63 }
0x1ecb   :  { %v3470_v61 = vsel %vm3467_vm15, %v3469_v44, %v3465_v36  ;;  %v3351_v42 = vsel %vm3350_vm3, %v6983_v21, %v3347_v48  ;;  %v3505_v21 = vrot.slane %v8255_v43, 1  ;;  %v3492_v34 = vsub.f32 1.0, %v3455_v49 }
0x1ecc   :  { %v3356_v32 = vsel %vm3353_vm6, %v3355_v55, %v3351_v42  ;;  %v3493_v46 = vsub.f32 1.0, %v3470_v61  ;;  %v3508_v31 = vmul.f32 %v3504_v9, %v3455_v49 }
0x1ecd   :  { %v3509_v23 = vmul.f32 %v3505_v21, %v3470_v61  ;;  %v3379_v43 = vsub.f32 1.0, %v3356_v32 }
0x1efd   :  { %v3359_v16 = vpop.permute.xlu2 %3358 }
0x1efe   :  { %v3364_v3 = vmul.f32 %v3359_v16, %v8277_v63 }
0x1f00   :  { %3368 = vrot.lane.b32.xlu0 %v3364_v3, %s7256_s0 }
0x1f1a   :  { %v3475_v62 = vpop.permute.xlu1 %3474  ;;  %v3473_v20 = vpop.permute.xlu0 %3472 }
0x1f1b   :  { %v3479_v57 = vmul.f32 %v3475_v62, %v3470_v61  ;;  %v3478_v53 = vmul.f32 %v3473_v20, %v3455_v49 }
0x1f1d   :  { %3484 = vrot.lane.b32.xlu2 %v3479_v57, %s7256_s0  ;;  %3482 = vrot.lane.b32.xlu1 %v3478_v53, %s7256_s0 }
0x1f22   :  { %v3361_v0 = vpop.permute.xlu0 %3360 }
0x1f23   :  { %v3365_v59 = vmul.f32 %v3361_v0, %v3356_v32 }
0x1f25   :  { %3370 = vrot.lane.b32.xlu1 %v3365_v59, %s7256_s0 }
0x1f72   :  { %v3369_v35 = vpop.permute.xlu0 %3368 }
0x1f73   :  { %v3374_v40 = vadd.f32 %v3369_v35, %v7968_v33 }
0x1f75   :  { %6984 = vtanh.f32 %v3374_v40 }
0x1f77   :  { %v3485_v39 = vpop.permute.xlu2 %3484 }
0x1f78   :  { %v3489_v25 = vadd.f32 %v3485_v39, %v7979_v4 }
0x1f7a   :  { %6986 = vtanh.f32 %v3489_v25 }
0x1f7b   :  { %v6985_v15 = vpop.eup %6984 }
0x1f7c   :  { %3382 = vrot.lane.b32.xlu1 %v6985_v15, %s7257_s25 }
0x1f80   :  { %v6987_v54 = vpop.eup %6986 }
0x1f81   :  { %3498 = vrot.lane.b32.xlu0 %v6987_v54, %s7257_s25 }
0x1f8f   :  { %v3483_v5 = vpop.permute.xlu1 %3482 }
0x1f90   :  { %v3488_v16 = vadd.f32 %v3483_v5, %v7971_v38 }
0x1f92   :  { %6988 = vtanh.f32 %v3488_v16 }
0x1f97   :  { %v3371_v3 = vpop.permute.xlu1 %3370 }
0x1f98   :  { %v6989_v41 = vpop.eup %6988  ;;  %v3375_v60 = vadd.f32 %v3371_v3, %v7973_v47 }
0x1f99   :  { %3496 = vrot.lane.b32.xlu2 %v6989_v41, %s7257_s25 }
0x1f9a   :  { %6990 = vtanh.f32 %v3375_v60 }
0x1fa0   :  { %v6991_v52 = vpop.eup %6990 }
0x1fa1   :  { %3384 = vrot.lane.b32.xlu2 %v6991_v52, %s7257_s25 }
0x1fee   :  { %v3383_v1 = vpop.permute.xlu1 %3382 }
0x1fef   :  { %v3388_v37 = vmul.f32 %v3383_v1, %v3378_v45 }
0x1ff1   :  { %v8300_v11 = vadd.f32 %v8280_v58, %v3388_v37  ;;  %v3391_v58 = vrot.slane %v8263_v19, 7 }
0x1ff3   :  { %v3499_v50 = vpop.permute.xlu0 %3498  ;;  %v3497_v12 = vpop.permute.xlu2 %3496  ;;  %v3395_v51 = vmul.f32 %v3391_v58, %v3356_v32  ;;  %v3514_v62 = vrot.slane %v8300_v11, 5 }
0x1ff4   :  { %v3503_v2 = vmul.f32 %v3499_v50, %v3493_v46  ;;  %v3502_v17 = vmul.f32 %v3497_v12, %v3492_v34 }
0x1ff6   :  { %v8304_v6 = vadd.f32 %v3509_v23, %v3503_v2  ;;  %v3510_v63 = vadd.f32 %v3508_v31, %v3502_v17 }
0x1ff8   :  { %v3629_v18 = vrot.slane %v8304_v6, 1  ;;  %v3628_v36 = vrot.slane %v3510_v63, 2  ;;  %v3731_v41 = vrot.slane %v3510_v63, 1 }
0x1ffa   :  { %v3630_v27 = vsel %vm419_vm11, %v3629_v18, %v3628_v36 }
0x1ffb   :  { %3631 = vrot.lane.b32.xlu0 %v3630_v27, %s7257_s25  ;;  %v3385_v24 = vpop.permute.xlu2 %3384 }
0x1ffc   :  { %v3389_v44 = vmul.f32 %v3385_v24, %v3379_v43 }
0x1ffe   :  { %v8312_v14 = vadd.f32 %v3395_v51, %v3389_v44 }
0x2000   :  { %v3515_v61 = vrot.slane %v8312_v14, 4 }
0x2002   :  { %v3516_v20 = vsel %vm419_vm11, %v3515_v61, %v3514_v62 }
0x2003   :  { %3517 = vrot.lane.b32.xlu1 %v3516_v20, %s7257_s25 }
0x206d   :  { %v3632_v19 = vpop.permute.xlu0 %3631 }
0x206e   :  { %6530 = vmatmul.msk.f32.vlgmr.msrb.gmra.mxu2 %vm198_vm12, %v3632_v19 }
0x2075   :  { %v3518_v49 = vpop.permute.xlu1 %3517 }
0x2076   :  { %6527 = vmatmul.msk.f32.vlgmr.msrb.gmra.mxu0 %vm198_vm12, %v3518_v49 }
0x20f1   :  { %v3652_v57 = vpop.f32.mrf.mxu2 }
0x20f2   :  { %v3653_v53 = vadd.f32 %v3652_v57, %v7961_v28 }
0x20f3   :  { %v3538_v48 = vpop.f32.mrf.mxu0 }
0x20f4   :  { %v3656_v56 = vrot.slane %v3653_v53, 7  ;;  %v3539_v7 = vadd.f32 %v3538_v48, %v7958_v8  ;;  %3701 = vrot.lane.b32.xlu0 %v3653_v53, %s7256_s0  ;;  %v3660_v21 = vadd.f32 %v3653_v53, %v7979_v4 }
0x20f6   :  { %v3659_v42 = vadd.f32 %v3656_v56, %v7971_v38  ;;  %v3542_v55 = vrot.slane %v3539_v7, 2  ;;  %3699 = vrot.lane.b32.xlu2 %v3656_v56, %s7256_s0  ;;  %v3543_v0 = vrot.slane %v3539_v7, 3  ;;  %v6532_v34 = vmul.f32 -1.442695, %v3660_v21 }
0x20f8   :  { %v6531_v32 = vmul.f32 -1.442695, %v3659_v42  ;;  %3586 = vrot.lane.b32.xlu1 %v3542_v55, %s7256_s0  ;;  %v3547_v1 = vadd.f32 %v3543_v0, %v7973_v47  ;;  %v3546_v50 = vadd.f32 %v3542_v55, %v7968_v33 }
0x20fa   :  { %6992 = vpow2.f32 %v6531_v32  ;;  %v6529_v37 = vmul.f32 -1.442695, %v3547_v1  ;;  %v6528_v12 = vmul.f32 -1.442695, %v3546_v50 }
0x20fe   :  { %3588 = vrot.lane.b32.xlu2 %v3543_v0, %s7256_s0 }
0x2100   :  { %v6993_v59 = vpop.eup %6992 }
0x2101   :  { %v3667_v35 = vadd.f32 1.0, %v6993_v59 }
0x2103   :  { %6994 = vrcp.f32 %v3667_v35  ;;  %v3680_v15 = vand.u32 2147483648, %v3667_v35  ;;  %v3678_v5 = vand.u32 2147483647, %v3667_v35  ;;  %vm3674_vm10 = vweird.f32 %v3667_v35 }
0x2104   :  { %6996 = vpow2.f32 %v6529_v37 }
0x2105   :  { %v3681_v3 = vor.u32 1.1754944e-38, %v3680_v15  ;;  %vm3679_vm15 = vcmp.eq.f32.partialorder %v3678_v5, 8.507059e+37 }
0x2109   :  { %v6995_v40 = vpop.eup %6994 }
0x210a   :  { %v3670_v39 = vmul.f32 %v6995_v40, %v3667_v35  ;;  %vm3675_vm9 = vweird.f32 %v6995_v40  ;;  %v6997_v9 = vpop.eup %6996 }
0x210b   :  { %vm3676_vm13 = vmor %vm3674_vm10, %vm3675_vm9  ;;  %v3555_v46 = vadd.f32 1.0, %v6997_v9 }
0x210c   :  { %v3671_v25 = vsub.f32 1.0, %v3670_v39 }
0x210d   :  { %6998 = vrcp.f32 %v3555_v46  ;;  %v3582_v62 = vand.u32 2147483648, %v3555_v46  ;;  %vm3576_vm8 = vweird.f32 %v3555_v46  ;;  %v3580_v61 = vand.u32 2147483647, %v3555_v46 }
0x210e   :  { %v3672_v54 = vmul.f32 %v6995_v40, %v3671_v25  ;;  %7000 = vpow2.f32 %v6532_v34 }
0x210f   :  { %7002 = vpow2.f32 %v6528_v12  ;;  %v3583_v57 = vor.u32 1.1754944e-38, %v3582_v62  ;;  %vm3581_vm3 = vcmp.eq.f32.partialorder %v3580_v61, 8.507059e+37 }
0x2110   :  { %v3673_v16 = vadd.f32 %v6995_v40, %v3672_v54 }
0x2112   :  { %v3677_v60 = vsel %vm3676_vm13, %v6995_v40, %v3673_v16 }
0x2113   :  { %v8327_v52 = vsel %vm3679_vm15, %v3681_v3, %v3677_v60  ;;  %v6999_v23 = vpop.eup %6998 }
0x2114   :  { %v8330_v45 = vmul.f32 %v3731_v41, %v8327_v52  ;;  %v7001_v2 = vpop.eup %7000  ;;  %v3572_v31 = vmul.f32 %v6999_v23, %v3555_v46  ;;  %vm3577_vm5 = vweird.f32 %v6999_v23 }
0x2115   :  { %v3668_v17 = vadd.f32 1.0, %v7001_v2  ;;  %v7003_v63 = vpop.eup %7002  ;;  %vm3578_vm4 = vmor %vm3576_vm8, %vm3577_vm5 }
0x2116   :  { %v3573_v36 = vsub.f32 1.0, %v3572_v31  ;;  %v3554_v58 = vadd.f32 1.0, %v7003_v63 }
0x2117   :  { %7004 = vrcp.f32 %v3668_v17  ;;  %v3695_v35 = vand.u32 2147483648, %v3668_v17  ;;  %vm3689_vm9 = vweird.f32 %v3668_v17  ;;  %v3693_v40 = vand.u32 2147483647, %v3668_v17 }
0x2118   :  { %v3574_v27 = vmul.f32 %v6999_v23, %v3573_v36  ;;  %7006 = vrcp.f32 %v3554_v58  ;;  %v3567_v54 = vand.u32 2147483648, %v3554_v58  ;;  %vm3561_vm5 = vweird.f32 %v3554_v58 }
0x2119   :  { %v3696_v15 = vor.u32 1.1754944e-38, %v3695_v35  ;;  %vm3694_vm15 = vcmp.eq.f32.partialorder %v3693_v40, 8.507059e+37  ;;  %v3565_v5 = vand.u32 2147483647, %v3554_v58 }
0x211a   :  { %v3575_v44 = vadd.f32 %v6999_v23, %v3574_v27  ;;  %v3568_v1 = vor.u32 1.1754944e-38, %v3567_v54 }
0x211c   :  { %v3579_v49 = vsel %vm3578_vm4, %v6999_v23, %v3575_v44  ;;  %vm3566_vm4 = vcmp.eq.f32.partialorder %v3565_v5, 8.507059e+37 }
0x211d   :  { %v7005_v43 = vpop.eup %7004  ;;  %v8337_v7 = vsel %vm3581_vm3, %v3583_v57, %v3579_v49 }
0x211e   :  { %v3685_v20 = vmul.f32 %v7005_v43, %v3668_v17  ;;  %v7007_v19 = vpop.eup %7006  ;;  %vm3690_vm6 = vweird.f32 %v7005_v43 }
0x211f   :  { %v3557_v48 = vmul.f32 %v7007_v19, %v3554_v58  ;;  %vm3691_vm10 = vmor %vm3689_vm9, %vm3690_vm6  ;;  %vm3562_vm13 = vweird.f32 %v7007_v19 }
0x2120   :  { %v3686_v53 = vsub.f32 1.0, %v3685_v20  ;;  %vm3563_vm8 = vmor %vm3561_vm5, %vm3562_vm13 }
0x2121   :  { %v3558_v32 = vsub.f32 1.0, %v3557_v48 }
0x2122   :  { %v3687_v55 = vmul.f32 %v7005_v43, %v3686_v53  ;;  %v3618_v53 = vrot.slane %v8300_v11, 7 }
0x2123   :  { %v3559_v59 = vmul.f32 %v7007_v19, %v3558_v32  ;;  %v3607_v32 = vsub.f32 1.0, %v8337_v7 }
0x2124   :  { %v3688_v0 = vadd.f32 %v7005_v43, %v3687_v55 }
0x2125   :  { %v3560_v25 = vadd.f32 %v7007_v19, %v3559_v59 }
0x2126   :  { %v3692_v39 = vsel %vm3691_vm10, %v7005_v43, %v3688_v0 }
0x2127   :  { %v3697_v3 = vsel %vm3694_vm15, %v3696_v15, %v3692_v39  ;;  %v3564_v60 = vsel %vm3563_vm8, %v7007_v19, %v3560_v25 }
0x2128   :  { %v3569_v9 = vsel %vm3566_vm4, %v3568_v1, %v3564_v60  ;;  %v3735_v19 = vmul.f32 %v3697_v3, %v3629_v18 }
0x2129   :  { %v3606_v57 = vsub.f32 1.0, %v3569_v9  ;;  %v3622_v55 = vmul.f32 %v3618_v53, %v3569_v9 }
0x2150   :  { %v3700_v24 = vpop.permute.xlu2 %3699 }
0x2151   :  { %v3705_v51 = vmul.f32 %v3700_v24, %v8327_v52  ;;  %v3720_v24 = vsub.f32 1.0, %v3697_v3 }
0x2153   :  { %3709 = vrot.lane.b32.xlu0 %v3705_v51, %s7256_s0  ;;  %v3719_v51 = vsub.f32 1.0, %v8327_v52  ;;  %v3619_v52 = vrot.slane %v8312_v14, 7 }
0x2155   :  { %v3623_v11 = vmul.f32 %v3619_v52, %v8337_v7 }
0x2158   :  { %v3589_v56 = vpop.permute.xlu2 %3588 }
0x2159   :  { %v3593_v42 = vmul.f32 %v3589_v56, %v8337_v7 }
0x215b   :  { %3598 = vrot.lane.b32.xlu0 %v3593_v42, %s7256_s0 }
0x2166   :  { %v3702_v16 = vpop.permute.xlu0 %3701 }
0x2167   :  { %v3706_v41 = vmul.f32 %v3702_v16, %v3697_v3 }
0x2169   :  { %3711 = vrot.lane.b32.xlu1 %v3706_v41, %s7256_s0 }
0x216a   :  { %v3587_v37 = vpop.permute.xlu1 %3586 }
0x216b   :  { %v3592_v21 = vmul.f32 %v3587_v37, %v3569_v9 }
0x216d   :  { %3596 = vrot.lane.b32.xlu2 %v3592_v21, %s7256_s0 }
0x21c5   :  { %v3710_v46 = vpop.permute.xlu0 %3709 }
0x21c6   :  { %v3715_v34 = vadd.f32 %v3710_v46, %v7971_v38 }
0x21c7   :  { %v3597_v50 = vpop.permute.xlu2 %3596 }
0x21c8   :  { %7008 = vtanh.f32 %v3715_v34  ;;  %v3602_v12 = vadd.f32 %v3597_v50, %v7968_v33 }
0x21ca   :  { %7010 = vtanh.f32 %v3602_v12 }
0x21cd   :  { %v3599_v23 = vpop.permute.xlu0 %3598 }
0x21ce   :  { %v7009_v2 = vpop.eup %7008  ;;  %v3603_v31 = vadd.f32 %v3599_v23, %v7973_v47 }
0x21cf   :  { %3723 = vrot.lane.b32.xlu1 %v7009_v2, %s7257_s25 }
0x21d0   :  { %v7011_v17 = vpop.eup %7010  ;;  %7012 = vtanh.f32 %v3603_v31 }
0x21d1   :  { %3610 = vrot.lane.b32.xlu0 %v7011_v17, %s7257_s25 }
0x21d6   :  { %v7013_v63 = vpop.eup %7012 }
0x21d7   :  { %3612 = vrot.lane.b32.xlu1 %v7013_v63, %s7257_s25 }
0x21db   :  { %v3712_v36 = vpop.permute.xlu1 %3711 }
0x21dc   :  { %v3716_v58 = vadd.f32 %v3712_v36, %v7979_v4 }
0x21de   :  { %7014 = vtanh.f32 %v3716_v58 }
0x21e4   :  { %v7015_v27 = vpop.eup %7014 }
0x21e5   :  { %3725 = vrot.lane.b32.xlu2 %v7015_v27, %s7257_s25 }
0x223f   :  { %v3726_v43 = vpop.permute.xlu2 %3725 }
0x2240   :  { %v3730_v62 = vmul.f32 %v3726_v43, %v3720_v24 }
0x2241   :  { %v3724_v44 = vpop.permute.xlu1 %3723 }
0x2242   :  { %v3729_v61 = vmul.f32 %v3724_v44, %v3719_v51  ;;  %v8358_v48 = vadd.f32 %v3735_v19, %v3730_v62 }
0x2243   :  { %v3611_v20 = vpop.permute.xlu0 %3610 }
0x2244   :  { %v8355_v49 = vadd.f32 %v8330_v45, %v3729_v61  ;;  %v3616_v42 = vmul.f32 %v3611_v20, %v3606_v57 }
0x2246   :  { %v3854_v56 = vrot.slane %v8355_v49, 1  ;;  %v8368_v45 = vadd.f32 %v3622_v55, %v3616_v42  ;;  %v4096_v49 = vld [vmem:[#allocation4 + $0x240] sm:$0x1] }
0x2248   :  { %v3855_v6 = vsel %vm419_vm11, %v8358_v48, %v3854_v56  ;;  %v3740_v14 = vrot.slane %v8368_v45, 6 }
0x2249   :  { %v3613_v18 = vpop.permute.xlu1 %3612  ;;  %3856 = vrot.lane.b32.xlu2 %v3855_v6, %s7257_s25 }
0x224a   :  { %v3617_v0 = vmul.f32 %v3613_v18, %v3607_v32 }
0x224c   :  { %v8371_v59 = vadd.f32 %v3623_v11, %v3617_v0 }
0x224e   :  { %v3741_v35 = vrot.slane %v8371_v59, 5 }
0x2250   :  { %v3742_v40 = vsel %vm419_vm11, %v3741_v35, %v3740_v14 }
0x2251   :  { %3743 = vrot.lane.b32.xlu0 %v3742_v40, %s7257_s25 }
0x22a3   :  { %v3857_v39 = vpop.permute.xlu2 %3856 }
0x22a4   :  { %6536 = vmatmul.msk.f32.vlgmr.msra.gmra.mxu3 %vm198_vm12, %v3857_v39 }
0x22c3   :  { %v3744_v25 = vpop.permute.xlu0 %3743 }
0x22c4   :  { %6533 = vmatmul.msk.f32.vlgmr.msra.gmra.mxu1 %vm198_vm12, %v3744_v25 }
0x2327   :  { %v3877_v15 = vpop.f32.mrf.mxu3 }
0x2328   :  { %v3878_v7 = vadd.f32 %v3877_v15, %v7961_v28 }
0x232a   :  { %3924 = vrot.lane.b32.xlu2 %v3878_v7, %s7256_s0  ;;  %v3881_v41 = vrot.slane %v3878_v7, 1  ;;  %v3884_v60 = vadd.f32 %v3878_v7, %v7971_v38 }
0x232c   :  { %v6537_v1 = vmul.f32 -1.442695, %v3884_v60  ;;  %v3885_v24 = vadd.f32 %v3881_v41, %v7979_v4 }
0x232e   :  { %7016 = vpow2.f32 %v6537_v1  ;;  %v6538_v51 = vmul.f32 -1.442695, %v3885_v24 }
0x2334   :  { %v7017_v37 = vpop.eup %7016 }
0x2335   :  { %v3892_v28 = vadd.f32 1.0, %v7017_v37 }
0x2337   :  { %7018 = vrcp.f32 %v3892_v28  ;;  %v3905_v50 = vand.u32 2147483648, %v3892_v28  ;;  %vm3899_vm6 = vweird.f32 %v3892_v28  ;;  %v3903_v12 = vand.u32 2147483647, %v3892_v28 }
0x2339   :  { %v3906_v2 = vor.u32 1.1754944e-38, %v3905_v50  ;;  %vm3904_vm10 = vcmp.eq.f32.partialorder %v3903_v12, 8.507059e+37 }
0x233d   :  { %v7019_v9 = vpop.eup %7018 }
0x233e   :  { %v3895_v21 = vmul.f32 %v7019_v9, %v3892_v28  ;;  %vm3900_vm3 = vweird.f32 %v7019_v9 }
0x233f   :  { %vm3901_vm9 = vmor %vm3899_vm6, %vm3900_vm3 }
0x2340   :  { %v3896_v46 = vsub.f32 1.0, %v3895_v21 }
0x2341   :  { %v3764_v54 = vpop.f32.mrf.mxu1 }
0x2342   :  { %v3765_v5 = vadd.f32 %v3764_v54, %v7958_v8  ;;  %v3897_v8 = vmul.f32 %v7019_v9, %v3896_v46 }
0x2344   :  { %v3768_v16 = vrot.slane %v3765_v5, 1  ;;  %v3769_v3 = vrot.slane %v3765_v5, 2  ;;  %v3898_v34 = vadd.f32 %v7019_v9, %v3897_v8 }
0x2346   :  { %3814 = vrot.lane.b32.xlu1 %v3769_v3, %s7256_s0  ;;  %3812 = vrot.lane.b32.xlu0 %v3768_v16, %s7256_s0  ;;  %v3902_v23 = vsel %vm3901_vm9, %v7019_v9, %v3898_v34  ;;  %v3772_v36 = vadd.f32 %v3768_v16, %v7968_v33  ;;  %v3773_v58 = vadd.f32 %v3769_v3, %v7973_v47 }
0x2347   :  { %v8386_v17 = vsel %vm3904_vm10, %v3906_v2, %v3902_v23 }
0x2348   :  { %v6534_v27 = vmul.f32 -1.442695, %v3772_v36  ;;  %v6535_v43 = vmul.f32 -1.442695, %v3773_v58 }
0x234a   :  { %7020 = vpow2.f32 %v6534_v27 }
0x234b   :  { %7022 = vpow2.f32 %v6535_v43  ;;  %v3963_v43 = vrot.slane %v7866_v10, 7 }
0x234c   :  { %7024 = vpow2.f32 %v6538_v51 }
0x234e   :  { %3926 = vrot.lane.b32.xlu1 %v3881_v41, %s7256_s0 }
0x2350   :  { %v7021_v44 = vpop.eup %7020 }
0x2351   :  { %v7023_v62 = vpop.eup %7022  ;;  %v3780_v61 = vadd.f32 1.0, %v7021_v44 }
0x2352   :  { %v3781_v20 = vadd.f32 1.0, %v7023_v62  ;;  %v7025_v19 = vpop.eup %7024 }
0x2353   :  { %7026 = vrcp.f32 %v3780_v61  ;;  %v3893_v57 = vadd.f32 1.0, %v7025_v19  ;;  %vm3787_vm5 = vweird.f32 %v3780_v61  ;;  %v3793_v15 = vand.u32 2147483648, %v3780_v61 }
0x2354   :  { %7028 = vrcp.f32 %v3781_v20  ;;  %v3808_v25 = vand.u32 2147483648, %v3781_v20  ;;  %vm3802_vm8 = vweird.f32 %v3781_v20  ;;  %v3806_v7 = vand.u32 2147483647, %v3781_v20 }
0x2355   :  { %7030 = vrcp.f32 %v3893_v57  ;;  %v3791_v54 = vand.u32 2147483647, %v3780_v61  ;;  %v3794_v60 = vor.u32 1.1754944e-38, %v3793_v15  ;;  %v3920_v34 = vand.u32 2147483648, %v3893_v57 }
0x2356   :  { %v3809_v41 = vor.u32 1.1754944e-38, %v3808_v25  ;;  %vm3807_vm6 = vcmp.eq.f32.partialorder %v3806_v7, 8.507059e+37  ;;  %v3918_v50 = vand.u32 2147483647, %v3893_v57 }
0x2357   :  { %vm3792_vm9 = vcmp.eq.f32.partialorder %v3791_v54, 8.507059e+37  ;;  %v3921_v23 = vor.u32 1.1754944e-38, %v3920_v34  ;;  %v4001_v34 = vld [vmem:[#allocation4 + $0x190] sm:$0xff] }
0x2359   :  { %v7027_v53 = vpop.eup %7026 }
0x235a   :  { %v7029_v42 = vpop.eup %7028  ;;  %v3783_v55 = vmul.f32 %v7027_v53, %v3780_v61  ;;  %vm3788_vm13 = vweird.f32 %v7027_v53 }
0x235b   :  { %v3798_v52 = vmul.f32 %v7029_v42, %v3781_v20  ;;  %v7031_v18 = vpop.eup %7030  ;;  %vm3803_vm15 = vweird.f32 %v7029_v42  ;;  %vm3789_vm4 = vmor %vm3787_vm5, %vm3788_vm13  ;;  %vm3914_vm13 = vweird.f32 %v3893_v57  ;;  %vm3919_vm5 = vcmp.eq.f32.partialorder %v3918_v50, 8.507059e+37  ;;  %v4000_v50 = vld [vmem:[#allocation4 + $0x188] sm:$0xff] }
0x235c   :  { %v3784_v6 = vsub.f32 1.0, %v3783_v55  ;;  %v3910_v14 = vmul.f32 %v7031_v18, %v3893_v57  ;;  %vm3804_vm3 = vmor %vm3802_vm8, %vm3803_vm15  ;;  %vm3915_vm10 = vweird.f32 %v7031_v18  ;;  %vm3994_vm8 = vcmask 785408  }
0x235d   :  { %v3799_v32 = vsub.f32 1.0, %v3798_v52  ;;  %vm3916_vm15 = vmor %vm3914_vm13, %vm3915_vm10 }
0x235e   :  { %v3785_v0 = vmul.f32 %v7027_v53, %v3784_v6  ;;  %v3911_v39 = vsub.f32 1.0, %v3910_v14 }
0x235f   :  { %v3800_v11 = vmul.f32 %v7029_v42, %v3799_v32  ;;  %v3944_v32 = vsub.f32 1.0, %v8386_v17 }
0x2360   :  { %v3786_v40 = vadd.f32 %v7027_v53, %v3785_v0  ;;  %v3912_v3 = vmul.f32 %v7031_v18, %v3911_v39  ;;  %v3956_v39 = vrot.slane %v8358_v48, 1  ;;  %v4010_v48 = vld [vmem:[#allocation4 + $0x1d8] sm:$0xff] }
0x2361   :  { %v3801_v35 = vadd.f32 %v7029_v42, %v3800_v11 }
0x2362   :  { %v3790_v16 = vsel %vm3789_vm4, %v7027_v53, %v3786_v40  ;;  %v3913_v8 = vadd.f32 %v7031_v18, %v3912_v3  ;;  %vm4017_vm4 = vcmask 1040384  }
0x2363   :  { %v3805_v5 = vsel %vm3804_vm3, %v7029_v42, %v3801_v35  ;;  %v3795_v9 = vsel %vm3792_vm9, %v3794_v60, %v3790_v16  ;;  %v3959_v35 = vmul.f32 %v8386_v17, %v3854_v56  ;;  %v4012_v56 = vld [vmem:[#allocation4 + $0x1e8] sm:$0xff]  ;;  %v4009_v60 = vld [vmem:[#allocation4 + $0x1d0] sm:$0xff] }
0x2364   :  { %v3810_v37 = vsel %vm3807_vm6, %v3809_v41, %v3805_v5  ;;  %v3917_v12 = vsel %vm3916_vm15, %v7031_v18, %v3913_v8  ;;  %v3832_v42 = vsub.f32 1.0, %v3795_v9  ;;  %4022 = vmatpush.msra.mxu0 %v4012_v56  ;;  %v4002_v8 = vld [vmem:[#allocation4 + $0x198] sm:$0xff]  ;;  %v8447_v56 = vld [vmem:[#allocation4 + $0x270] sm:$0x3] }
0x2365   :  { %v3833_v53 = vsub.f32 1.0, %v3810_v37 }
0x2384   :  { %v3925_v31 = vpop.permute.xlu2 %3924 }
0x2385   :  { %v3930_v63 = vmul.f32 %v3925_v31, %v8386_v17  ;;  %v3922_v31 = vsel %vm3919_vm5, %v3921_v23, %v3917_v12  ;;  %v4011_v17 = vld [vmem:[#allocation4 + $0x1e0] sm:$0xff]  ;;  %v3998_v23 = vld [vmem:[#allocation4 + $0x178] sm:$0xff] }
0x2386   :  { %v3945_v15 = vsub.f32 1.0, %v3922_v31  ;;  %v3960_v54 = vmul.f32 %v3956_v39, %v3922_v31  ;;  %4023 = vmatpush.msra.mxu0 %v4011_v17  ;;  %v3999_v12 = vld [vmem:[#allocation4 + $0x180] sm:$0xff]  ;;  %v8437_v39 = vld [vmem:[#allocation4 + $0x258] sm:$0xff]  ;;  %v4117_v17 = vperm.slane %v8447_v56, 1 }
0x2387   :  { %3934 = vrot.lane.b32.xlu0 %v3930_v63, %s7256_s0 }
0x2388   :  { %4024 = vmatpush.msra.mxu0 %v4010_v48 }
0x238a   :  { %4025 = vmatpush.msra.mxu0 %v4009_v60 }
0x23b8   :  { %v3815_v1 = vpop.permute.xlu1 %3814  ;;  %v3813_v28 = vpop.permute.xlu0 %3812 }
0x23b9   :  { %v3819_v21 = vmul.f32 %v3815_v1, %v3810_v37  ;;  %v3818_v46 = vmul.f32 %v3813_v28, %v3795_v9  ;;  %v4008_v1 = vld [vmem:[#allocation4 + $0x1c8] sm:$0xff]  ;;  %v4006_v28 = vld [vmem:[#allocation4 + $0x1b8] sm:$0xff] }
0x23ba   :  { %4026 = vmatpush.msra.mxu0 %v4008_v1  ;;  %v4097_v1 = vld [vmem:[#allocation4 + $0x248] sm:$0x1] }
0x23bb   :  { %3824 = vrot.lane.b32.xlu2 %v3819_v21, %s7256_s0  ;;  %3822 = vrot.lane.b32.xlu1 %v3818_v46, %s7256_s0  ;;  %v4004_v21 = vld [vmem:[#allocation4 + $0x1a8] sm:$0xff]  ;;  %v4003_v46 = vld [vmem:[#allocation4 + $0x1a0] sm:$0xff] }
0x23c0   :  { %v3927_v2 = vpop.permute.xlu1 %3926 }
0x23c1   :  { %v3931_v63 = vmul.f32 %v3927_v2, %v3922_v31  ;;  %v3997_v2 = vld [vmem:[#allocation4 + $0x170] sm:$0xff]  ;;  %v4043_v31 = vld [vmem:[%s9036_s1] sm:$0x3] }
0x23c3   :  { %3936 = vrot.lane.b32.xlu2 %v3931_v63, %s7256_s0 }
0x23f9   :  { %v3935_v36 = vpop.permute.xlu0 %3934 }
0x23fa   :  { %v3940_v58 = vadd.f32 %v3935_v36, %v7971_v38 }
0x23fc   :  { %7032 = vtanh.f32 %v3940_v58 }
0x2402   :  { %v7033_v27 = vpop.eup %7032 }
0x2403   :  { %3948 = vrot.lane.b32.xlu1 %v7033_v27, %s7257_s25 }
0x240b   :  { %3964 = vrot.lane.b32.xlu1 %v3963_v43, %s7257_s25  ;;  %v3969_v43 = vrot.slane %v7921_v29, 1 }
0x2413   :  { %4045 = vrot.lane.b32.xlu1 %v4043_v31, %s7256_s0 }
0x2415   :  { %v3825_v24 = vpop.permute.xlu2 %3824 }
0x2416   :  { %v3829_v51 = vadd.f32 %v3825_v24, %v7973_v47  ;;  %v3845_v47 = vrot.slane %v8371_v59, 7 }
0x2418   :  { %7034 = vtanh.f32 %v3829_v51  ;;  %v3849_v6 = vmul.f32 %v3845_v47, %v3810_v37  ;;  %v4007_v37 = vld [vmem:[#allocation4 + $0x1c0] sm:$0xff]  ;;  %v3990_v51 = vsel %vm198_vm12, %v7943_v30, %v3969_v43 }
0x2419   :  { %4027 = vmatpush.msra.mxu0 %v4007_v37  ;;  %v4059_v30 = vld [vmem:[#allocation4 + $0x220] sm:$0xff] }
0x241b   :  { %4028 = vmatpush.msra.mxu0 %v4006_v28 }
0x241d   :  { %v3937_v44 = vpop.permute.xlu2 %3936 }
0x241e   :  { %v7035_v62 = vpop.eup %7034  ;;  %v3941_v61 = vadd.f32 %v3937_v44, %v7979_v4  ;;  %v3844_v4 = vrot.slane %v8368_v45, 7 }
0x241f   :  { %3838 = vrot.lane.b32.xlu0 %v7035_v62, %s7257_s25 }
0x2420   :  { %7036 = vtanh.f32 %v3941_v61  ;;  %v3848_v14 = vmul.f32 %v3844_v4, %v3795_v9  ;;  %v4005_v9 = vld [vmem:[#allocation4 + $0x1b0] sm:$0xff]  ;;  %v4058_v4 = vld [vmem:[#allocation4 + $0x218] sm:$0xff] }
0x2421   :  { %4029 = vmatpush.msra.mxu0 %v4005_v9 }
0x2423   :  { %4030 = vmatpush.msra.mxu0 %v4004_v21 }
0x2425   :  { %4031 = vmatpush.msra.mxu0 %v4003_v46 }
0x2426   :  { %v7037_v38 = vpop.eup %7036 }
0x2427   :  { %3950 = vrot.lane.b32.xlu0 %v7037_v38, %s7257_s25  ;;  %4032 = vmatpush.msra.mxu0 %v4002_v8 }
0x2429   :  { %4033 = vmatpush.msra.mxu0 %v4001_v34 }
0x242b   :  { %4034 = vmatpush.msra.mxu0 %v4000_v50 }
0x242d   :  { %v3823_v20 = vpop.permute.xlu1 %3822  ;;  %4035 = vmatpush.msra.mxu0 %v3999_v12 }
0x242e   :  { %v3828_v19 = vadd.f32 %v3823_v20, %v7968_v33 }
0x242f   :  { %4036 = vmatpush.msra.mxu0 %v3998_v23 }
0x2430   :  { %7038 = vtanh.f32 %v3828_v19 }
0x2431   :  { %4037 = vmatpush.msra.mxu0 %v3997_v2 }
0x2436   :  { %v7039_v10 = vpop.eup %7038 }
0x2437   :  { %3836 = vrot.lane.b32.xlu2 %v7039_v10, %s7257_s25 }
0x2475   :  { %v3949_v57 = vpop.permute.xlu1 %3948 }
0x2476   :  { %v3954_v0 = vmul.f32 %v3949_v57, %v3944_v32  ;;  %v6651_v32 = vld [vmem:[#allocation4 + $0x1f0] ss:$0 sm:$0xff] }
0x2478   :  { %v3961_v25 = vadd.f32 %v3959_v35, %v3954_v0 }
0x247a   :  { %v3983_v16 = vrot.slane %v3961_v25, 1  ;;  %v8439_v25 = vld [vmem:[#allocation4 + $0x250] sm:$0xff] }
0x247d   :  { %v3965_v36 = vpop.permute.xlu1 %3964 }
0x247e   :  { %v3991_v44 = vsel %vm198_vm12, %v3965_v36, %v7930_v13  ;;  %v4057_v13 = vld [vmem:[#allocation4 + $0x210] sm:$0xff] }
0x2491   :  { %v3839_v52 = vpop.permute.xlu0 %3838  ;;  %v3837_v55 = vpop.permute.xlu2 %3836 }
0x2492   :  { %v3843_v18 = vmul.f32 %v3839_v52, %v3833_v53  ;;  %v3842_v11 = vmul.f32 %v3837_v55, %v3832_v42  ;;  %v4061_v53 = vld [vmem:[#allocation4 + $0x230] sm:$0xff]  ;;  %v4060_v42 = vld [vmem:[#allocation4 + $0x228] sm:$0xff]  ;;  %v4055_v55 = vld [vmem:[#allocation4 + $0x200] sm:$0xff] }
0x2493   :  { %4075 = vmatpush.msra.mxu2 %v4061_v53  ;;  %v4056_v52 = vld [vmem:[#allocation4 + $0x208] sm:$0xff]  ;;  %v4110_v53 = vld [vmem:[#allocation4 + $0x280] sm:$0xff] }
0x2494   :  { %v3851_v33 = vadd.f32 %v3849_v6, %v3843_v18  ;;  %v3850_v40 = vadd.f32 %v3848_v14, %v3842_v11  ;;  %v4046_v18 = vpop.permute.xlu1 %4045 }
0x2495   :  { %4076 = vmatpush.msra.mxu2 %v4060_v42  ;;  %v4109_v42 = vld [vmem:[#allocation4 + $0x278] sm:$0xff] }
0x2496   :  { %v3974_v59 = vrot.slane %v3851_v33, 7  ;;  %v4054_v33 = vld [vmem:[#allocation4 + $0x1f8] sm:$0xff] }
0x2497   :  { %4077 = vmatpush.msra.mxu2 %v4059_v30 }
0x2498   :  { %v6641_v45 = vpack.i.bf16 %v3974_v59, %v3850_v40  ;;  %v8431_v59 = vld [vmem:[#allocation4 + $0x268] sm:$0xff]  ;;  %v8434_v40 = vld [vmem:[#allocation4 + $0x260] sm:$0xff] }
0x2499   :  { %v3951_v7 = vpop.permute.xlu0 %3950  ;;  %4078 = vmatpush.msra.mxu2 %v4058_v4  ;;  %4133 = vmatpush.msrb.mxu1 %v8431_v59 }
0x249a   :  { %v3955_v5 = vmul.f32 %v3951_v7, %v3945_v15  ;;  %6642 = vrot.lane.b32.xlu2 %v6641_v45, %s7258_s26  ;;  %v6652_v45 = vld [vmem:[#allocation4 + $0x238] ss:$0 sm:$0xff] }
0x249b   :  { %4079 = vmatpush.msra.mxu2 %v4057_v13  ;;  %4134 = vmatpush.msrb.mxu1 %v8434_v40 }
0x249c   :  { %v3962_v3 = vadd.f32 %v3960_v54, %v3955_v5 }
0x249d   :  { %4080 = vmatpush.msra.mxu2 %v4056_v52  ;;  %4135 = vmatpush.msrb.mxu1 %v8437_v39 }
0x249e   :  { %v6646_v41 = vpack.i.bf16 %v3962_v3, %v3983_v16 }
0x249f   :  { %4081 = vmatpush.msra.mxu2 %v4055_v55  ;;  %4136 = vmatpush.msrb.mxu1 %v8439_v25 }
0x24a0   :  { %6647 = vrot.lane.b32.xlu0 %v6646_v41, %s7256_s0 }
0x24a1   :  { %4082 = vmatpush.msra.mxu2 %v4054_v33 }
0x24a8   :  { %4100 = vperm.xlu0 %6640, %v4096_v49  }
0x24f4   :  { %v6643_v63 = vpop.permute.xlu2 %6642 }
0x24f5   :  { %v6645_v58 = vunpack.i.h.bf16 %v6643_v63  ;;  %v6644_v27 = vunpack.i.l.bf16 %v6643_v63 }
0x24f7   :  { %v3993_v38 = vsel %vm2103_vm14, %v3991_v44, %v6645_v58  ;;  %v3992_v20 = vsel %vm2103_vm14, %v3990_v51, %v6644_v27 }
0x2512   :  { %v6648_v24 = vpop.permute.xlu0 %6647 }
0x2513   :  { %v6650_v62 = vunpack.i.h.bf16 %v6648_v24  ;;  %v6649_v61 = vunpack.i.l.bf16 %v6648_v24 }
0x2515   :  { %v3995_v19 = vsel %vm3994_vm8, %v3992_v20, %v6649_v61  ;;  %v3996_v10 = vsel %vm3994_vm8, %v3993_v38, %v6650_v62  ;;  %v4116_v20 = vld [vmem:[#allocation4 + $0x2b0] sm:$0xff] }
0x2516   :  { %v4018_v47 = vrot.slane %v3995_v19, 7  ;;  %v4019_v57 = vrot.slane %v3996_v10, 7  ;;  %v4115_v19 = vld [vmem:[#allocation4 + $0x2a8] sm:$0xff]  ;;  %4227 = vmatpush.msra.mxu1 %v4116_v20  ;;  %v4114_v10 = vld [vmem:[#allocation4 + $0x2a0] sm:$0xff] }
0x2518   :  { %v4020_v29 = vsel %vm4017_vm4, %v4018_v47, %v4019_v57  ;;  %4228 = vmatpush.msra.mxu1 %v4115_v19  ;;  %v4113_v47 = vld [vmem:[#allocation4 + $0x298] sm:$0xff]  ;;  %v4112_v57 = vld [vmem:[#allocation4 + $0x290] sm:$0xff] }
0x2519   :  { %4038 = vmatmul.f32.vlgmr.msra.gmra.mxu0 %v4020_v29  ;;  %v4111_v29 = vld [vmem:[#allocation4 + $0x288] sm:$0xff]  ;;  %4202 = vmatpush.msrb.mxu3 %v4112_v57 }
0x251a   :  { %v4101_v37 = vpop.permute.xlu0 %4100  ;;  %4229 = vmatpush.msra.mxu1 %v4114_v10  ;;  %4362 = vmatpush.msrb.mxu2 %v4112_v57 }
0x251b   :  { %v4103_v28 = vmul.f32 %v4101_v37, %v4097_v1  ;;  %4203 = vmatpush.msrb.mxu3 %v4111_v29 }
0x251c   :  { %4230 = vmatpush.msra.mxu1 %v4113_v47  ;;  %4363 = vmatpush.msrb.mxu2 %v4111_v29 }
0x251d   :  { %v4104_v9 = vadd.f32 %v4103_v28, %v8447_v56  ;;  %4204 = vmatpush.msrb.mxu3 %v4110_v53 }
0x251e   :  { %4364 = vmatpush.msrb.mxu2 %v4110_v53 }
0x251f   :  { %v8456_v21 = vperm.slane %v4104_v9, 0  ;;  %4205 = vmatpush.msrb.mxu3 %v4109_v42 }
0x2520   :  { %4365 = vmatpush.msrb.mxu2 %v4109_v42 }
0x2521   :  { %4298 = vmatpush.msra.mxu3 %v8431_v59 }
0x2523   :  { %4299 = vmatpush.msra.mxu3 %v8434_v40 }
0x2525   :  { %4300 = vmatpush.msra.mxu3 %v8437_v39 }
0x2527   :  { %4301 = vmatpush.msra.mxu3 %v8439_v25 }
0x2596   :  { %v4039_v6 = vpop.f32.mrf.mxu0 }
0x2597   :  { %v4040_v11 = vadd.f32 %v6651_v32, %v4039_v6 }
0x2599   :  { %4042 = vst [vmem:[%s9038_s3] sm:$0x3] %v4040_v11  ;;  %v4048_v0 = vmul.f32 %v4046_v18, %v4040_v11  ;;  %s7259_s3 = smov [#allocation7]  }
0x259a   :  { %s6410_s30 = sshll.u32 %s7259_s3, 4  ;;  %s6411_s30 = int_to_ptr.vmem [resolvable:$true] %s6410_s30 }
0x259b   :  { %4050 = vrot.lane.b32.xlu2 %v4048_v0, %s7256_s0 }
0x25f5   :  { %v4051_v14 = vpop.permute.xlu2 %4050 }
0x25f6   :  { %v4053_v35 = vadd.f32 %v4051_v14, %v4040_v11  ;;  %v8475_v11 = vld [vmem:[#allocation4 + $0x2b8] sm:$0x3] }
0x25f7   :  { %v4210_v0 = vperm.slane %v8475_v11, 1 }
0x25f8   :  { %6539 = vmatmul.msk.f32.vlgmr.msra.gmra.mxu2 %vm2103_vm14, %v4053_v35  ;;  %v4184_v35 = vperm.slane %v8475_v11, 0 }
0x267b   :  { %v4084_v15 = vpop.f32.mrf.mxu2 }
0x267c   :  { %v4085_v7 = vadd.f32 %v6652_v45, %v4084_v15 }
0x267e   :  { %v4088_v54 = vmul.f32 1.442695, %v4085_v7  ;;  %vm4087_vm14 = vcmp.gt.f32.partialorder %v4085_v7, 0.0 }
0x2680   :  { %7040 = vpow2.f32 %v4088_v54 }
0x2686   :  { %v7041_v5 = vpop.eup %7040 }
0x2687   :  { %v6540_v16 = vadd.f32 -1.0, %v7041_v5 }
0x2689   :  { %v4091_v3 = vmul.f32 1.6732632, %v6540_v16 }
0x268b   :  { %v4092_v41 = vsel %vm4087_vm14, %v4085_v7, %v4091_v3 }
0x268c   :  { %v8443_v49 = vmul.f32 1.050701, %v4092_v41 }
0x268e   :  { %6541 = vmatmul.msk.f32.vlgmr.msrb.gmra.mxu1 %vm198_vm12, %v8443_v49 }
0x268f   :  { %4386 = vmatpush.msrb.mxu1 %v4116_v20 }
0x2691   :  { %4387 = vmatpush.msrb.mxu1 %v4115_v19 }
0x2693   :  { %4388 = vmatpush.msrb.mxu1 %v4114_v10 }
0x2695   :  { %4389 = vmatpush.msrb.mxu1 %v4113_v47 }
0x270b   :  { %v4138_v48 = vpop.f32.mrf.mxu1 }
0x270c   :  { %v4139_v60 = vadd.f32 %v4138_v48, %v4117_v17 }
0x270e   :  { %4163 = vrot.lane.b32.xlu1 %v4139_v60, %s7256_s0  ;;  %v4142_v46 = vadd.f32 %v8456_v21, %v4139_v60 }
0x2710   :  { %v6542_v8 = vmul.f32 -1.442695, %v4142_v46 }
0x2712   :  { %7042 = vpow2.f32 %v6542_v8 }
0x2716   :  { %4179 = vrot.lane.b32.xlu1 %v8443_v49, %s7258_s26 }
0x2718   :  { %v7043_v34 = vpop.eup %7042 }
0x2719   :  { %v4146_v50 = vadd.f32 1.0, %v7043_v34 }
0x271b   :  { %7044 = vrcp.f32 %v4146_v50  ;;  %v4158_v36 = vand.u32 2147483648, %v4146_v50  ;;  %vm4152_vm6 = vweird.f32 %v4146_v50  ;;  %v4156_v58 = vand.u32 2147483647, %v4146_v50 }
0x271d   :  { %v4159_v43 = vor.u32 1.1754944e-38, %v4158_v36  ;;  %vm4157_vm10 = vcmp.eq.f32.partialorder %v4156_v58, 8.507059e+37 }
0x2721   :  { %v7045_v12 = vpop.eup %7044 }
0x2722   :  { %v4148_v23 = vmul.f32 %v7045_v12, %v4146_v50  ;;  %vm4153_vm3 = vweird.f32 %v7045_v12 }
0x2723   :  { %vm4154_vm9 = vmor %vm4152_vm6, %vm4153_vm3 }
0x2724   :  { %v4149_v2 = vsub.f32 1.0, %v4148_v23 }
0x2726   :  { %v4150_v31 = vmul.f32 %v7045_v12, %v4149_v2 }
0x2728   :  { %v4151_v63 = vadd.f32 %v7045_v12, %v4150_v31 }
0x272a   :  { %v4155_v27 = vsel %vm4154_vm9, %v7045_v12, %v4151_v63 }
0x272b   :  { %v4160_v51 = vsel %vm4157_vm10, %v4159_v43, %v4155_v27 }
0x272c   :  { %v4173_v4 = vsub.f32 1.0, %v4160_v51 }
0x2780   :  { %v4164_v24 = vpop.permute.xlu1 %4163 }
0x2781   :  { %v4166_v44 = vmul.f32 %v4164_v24, %v4160_v51 }
0x2783   :  { %4168 = vrot.lane.b32.xlu2 %v4166_v44, %s7256_s0 }
0x2788   :  { %v4180_v30 = vpop.permute.xlu1 %4179 }
0x2789   :  { %v4182_v52 = vmul.f32 %v4180_v30, %v4160_v51 }
0x27dd   :  { %v4169_v62 = vpop.permute.xlu2 %4168 }
0x27de   :  { %v4171_v61 = vadd.f32 %v4169_v62, %v8456_v21 }
0x27e0   :  { %7046 = vtanh.f32 %v4171_v61 }
0x27e6   :  { %v7047_v38 = vpop.eup %7046 }
0x27e7   :  { %4175 = vrot.lane.b32.xlu0 %v7047_v38, %s7257_s25 }
0x27ef   :  { %4211 = vrot.lane.b32.xlu0 %v8443_v49, %s7257_s25 }
0x2859   :  { %v4176_v13 = vpop.permute.xlu0 %4175 }
0x285a   :  { %v4178_v55 = vmul.f32 %v4176_v13, %v4173_v4 }
0x285c   :  { %v8468_v32 = vadd.f32 %v4182_v52, %v4178_v55 }
0x285e   :  { %4186 = vrot.lane.b32.xlu2 %v8468_v32, %s7257_s25 }
0x2861   :  { %v4212_v6 = vpop.permute.xlu0 %4211 }
0x2862   :  { %6544 = vmatmul.msk.f32.vlgmr.msra.gmra.mxu1 %vm198_vm12, %v4212_v6 }
0x28b8   :  { %v4187_v18 = vpop.permute.xlu2 %4186 }
0x28b9   :  { %6543 = vmatmul.msk.f32.vlgmr.msrb.gmra.mxu3 %vm198_vm12, %v4187_v18 }
0x28c1   :  { %6546 = vmatmul.msk.f32.vlgmr.msra.gmra.mxu3 %vm198_vm12, %v4187_v18 }
0x28df   :  { %v4232_v33 = vpop.f32.mrf.mxu1 }
0x28e0   :  { %v4233_v14 = vadd.f32 %v4232_v33, %v4210_v0 }
0x28e2   :  { %4256 = vrot.lane.b32.xlu1 %v4233_v14, %s7256_s0 }
0x293c   :  { %v4207_v59 = vpop.f32.mrf.mxu3 }
0x293d   :  { %v4208_v40 = vadd.f32 %v4207_v59, %v4184_v35 }
0x293f   :  { %v4235_v39 = vadd.f32 %v4233_v14, %v4208_v40 }
0x2941   :  { %v6545_v25 = vmul.f32 -1.442695, %v4235_v39 }
0x2943   :  { %7048 = vpow2.f32 %v6545_v25 }
0x2944   :  { %v4303_v45 = vpop.f32.mrf.mxu3 }
0x2945   :  { %v4304_v15 = vadd.f32 %v4303_v45, %v4117_v17 }
0x2947   :  { %4327 = vrot.lane.b32.xlu2 %v4304_v15, %s7256_s0  ;;  %v4306_v46 = vadd.f32 %v4304_v15, %v8456_v21 }
0x2949   :  { %v7049_v7 = vpop.eup %7048  ;;  %v6547_v8 = vmul.f32 -1.442695, %v4306_v46 }
0x294a   :  { %v4239_v54 = vadd.f32 1.0, %v7049_v7 }
0x294c   :  { %7050 = vrcp.f32 %v4239_v54  ;;  %v4251_v41 = vand.u32 2147483648, %v4239_v54  ;;  %v4249_v60 = vand.u32 2147483647, %v4239_v54  ;;  %vm4245_vm15 = vweird.f32 %v4239_v54 }
0x294d   :  { %7052 = vpow2.f32 %v6547_v8 }
0x294e   :  { %v4252_v37 = vor.u32 1.1754944e-38, %v4251_v41  ;;  %vm4250_vm8 = vcmp.eq.f32.partialorder %v4249_v60, 8.507059e+37 }
0x2952   :  { %v7051_v5 = vpop.eup %7050 }
0x2953   :  { %v4241_v16 = vmul.f32 %v7051_v5, %v4239_v54  ;;  %vm4246_vm13 = vweird.f32 %v7051_v5  ;;  %v7053_v34 = vpop.eup %7052 }
0x2954   :  { %vm4247_vm5 = vmor %vm4245_vm15, %vm4246_vm13  ;;  %v4257_v56 = vpop.permute.xlu1 %4256  ;;  %v4310_v50 = vadd.f32 1.0, %v7053_v34 }
0x2955   :  { %v4242_v3 = vsub.f32 1.0, %v4241_v16 }
0x2956   :  { %7054 = vrcp.f32 %v4310_v50  ;;  %v4322_v36 = vand.u32 2147483648, %v4310_v50  ;;  %vm4316_vm14 = vweird.f32 %v4310_v50  ;;  %v4320_v58 = vand.u32 2147483647, %v4310_v50 }
0x2957   :  { %v4243_v48 = vmul.f32 %v7051_v5, %v4242_v3 }
0x2958   :  { %v4323_v43 = vor.u32 1.1754944e-38, %v4322_v36  ;;  %vm4321_vm6 = vcmp.eq.f32.partialorder %v4320_v58, 8.507059e+37  ;;  %v4451_v36 = vld [vmem:[#allocation4 + $0x318] sm:$0xff]  ;;  %v4450_v58 = vld [vmem:[#allocation4 + $0x310] sm:$0xff] }
0x2959   :  { %v4244_v1 = vadd.f32 %v7051_v5, %v4243_v48 }
0x295b   :  { %v4248_v28 = vsel %vm4247_vm5, %v7051_v5, %v4244_v1 }
0x295c   :  { %v4253_v17 = vsel %vm4250_vm8, %v4252_v37, %v4248_v28  ;;  %v7055_v12 = vpop.eup %7054 }
0x295d   :  { %v4259_v9 = vmul.f32 %v4257_v56, %v4253_v17  ;;  %v4312_v23 = vmul.f32 %v7055_v12, %v4310_v50  ;;  %vm4317_vm4 = vweird.f32 %v7055_v12  ;;  %v4266_v47 = vsub.f32 1.0, %v4253_v17 }
0x295e   :  { %vm4318_vm3 = vmor %vm4316_vm14, %vm4317_vm4  ;;  %v4272_v29 = vmul.f32 %v4253_v17, %v8443_v49 }
0x295f   :  { %4261 = vrot.lane.b32.xlu0 %v4259_v9, %s7256_s0  ;;  %v4313_v2 = vsub.f32 1.0, %v4312_v23 }
0x2961   :  { %v4314_v31 = vmul.f32 %v7055_v12, %v4313_v2 }
0x2963   :  { %v4315_v63 = vadd.f32 %v7055_v12, %v4314_v31 }
0x2965   :  { %v4319_v27 = vsel %vm4318_vm3, %v7055_v12, %v4315_v63  ;;  %v4452_v63 = vld [vmem:[#allocation4 + $0x320] sm:$0xff] }
0x2966   :  { %v4324_v51 = vsel %vm4321_vm6, %v4323_v43, %v4319_v27  ;;  %4475 = vmatpush.msrb.mxu3 %v4452_v63  ;;  %v4449_v27 = vld [vmem:[#allocation4 + $0x308] sm:$0xff] }
0x2967   :  { %v4337_v30 = vsub.f32 1.0, %v4324_v51  ;;  %v4343_v13 = vmul.f32 %v4324_v51, %v8468_v32 }
0x2968   :  { %4476 = vmatpush.msrb.mxu3 %v4451_v36 }
0x296a   :  { %4477 = vmatpush.msrb.mxu3 %v4450_v58 }
0x296c   :  { %4478 = vmatpush.msrb.mxu3 %v4449_v27 }
0x29a1   :  { %v4328_v24 = vpop.permute.xlu2 %4327 }
0x29a2   :  { %v4330_v44 = vmul.f32 %v4328_v24, %v4324_v51  ;;  %v4495_v51 = vld [vmem:[#allocation4 + $0x348] sm:$0xff] }
0x29a3   :  { %4516 = vmatpush.msra.mxu2 %v4495_v51 }
0x29a4   :  { %4332 = vrot.lane.b32.xlu1 %v4330_v44, %s7256_s0  ;;  %v4494_v44 = vld [vmem:[#allocation4 + $0x340] sm:$0xff] }
0x29a5   :  { %4517 = vmatpush.msra.mxu2 %v4494_v44 }
0x29d1   :  { %v4262_v62 = vpop.permute.xlu0 %4261 }
0x29d2   :  { %v4264_v61 = vadd.f32 %v4262_v62, %v4208_v40  ;;  %v4493_v62 = vld [vmem:[#allocation4 + $0x338] sm:$0xff] }
0x29d3   :  { %4518 = vmatpush.msra.mxu2 %v4493_v62 }
0x29d4   :  { %7056 = vtanh.f32 %v4264_v61  ;;  %v4492_v61 = vld [vmem:[#allocation4 + $0x330] sm:$0xff] }
0x29d5   :  { %4519 = vmatpush.msra.mxu2 %v4492_v61 }
0x29da   :  { %v7057_v38 = vpop.eup %7056 }
0x29db   :  { %4268 = vrot.lane.b32.xlu2 %v7057_v38, %s7257_s25 }
0x2a16   :  { %v4333_v20 = vpop.permute.xlu1 %4332 }
0x2a17   :  { %v4335_v19 = vadd.f32 %v4333_v20, %v8456_v21 }
0x2a19   :  { %7058 = vtanh.f32 %v4335_v19 }
0x2a1f   :  { %v7059_v10 = vpop.eup %7058 }
0x2a20   :  { %4339 = vrot.lane.b32.xlu0 %v7059_v10, %s7257_s25 }
0x2a35   :  { %v4269_v57 = vpop.permute.xlu2 %4268 }
0x2a36   :  { %v4271_v53 = vmul.f32 %v4269_v57, %v4266_v47  ;;  %v8516_v47 = vld [vmem:[#allocation4 + $0x3a8] sm:$0xff]  ;;  %v8519_v57 = vld [vmem:[#allocation4 + $0x3a0] sm:$0xff] }
0x2a38   :  { %v4273_v42 = vadd.f32 %v4272_v29, %v4271_v53  ;;  %v4534_v29 = vld [vmem:[#allocation4 + $0x388] sm:$0xff]  ;;  %v8522_v53 = vld [vmem:[#allocation4 + $0x398] sm:$0xff] }
0x2a39   :  { %4551 = vmatpush.msra.mxu1 %v4534_v29 }
0x2a3a   :  { %4370 = vrot.lane.b32.xlu1 %v4273_v42, %s7257_s25  ;;  %v4276_v33 = vperm.slane %v4273_v42, 0  ;;  %v4275_v60 = vrot.slane %v4273_v42, 1 }
0x2a3c   :  { %v4277_v37 = vperm.slane %v4275_v60, 0 }
0x2a92   :  { %v4340_v4 = vpop.permute.xlu0 %4339 }
0x2a93   :  { %v4342_v52 = vmul.f32 %v4340_v4, %v4337_v30  ;;  %v8525_v30 = vld [vmem:[#allocation4 + $0x390] sm:$0xff]  ;;  %v4532_v4 = vld [vmem:[#allocation4 + $0x378] sm:$0xff] }
0x2a95   :  { %v4344_v55 = vadd.f32 %v4343_v13, %v4342_v52  ;;  %v4531_v13 = vld [vmem:[#allocation4 + $0x370] sm:$0xff]  ;;  %v4562_v52 = vld [vmem:[#allocation4 + $0x368] sm:$0x3] }
0x2a96   :  { %6560 = vmatpush.msk.msrb.mxu0 %vm66_vm0, %v4562_v52  ;;  %6556 = vmatpush.msk.msra.mxu3 %vm66_vm0, %v4562_v52 }
0x2a97   :  { %4346 = vrot.lane.b32.xlu2 %v4344_v55, %s7257_s25  ;;  %v4561_v55 = vld [vmem:[#allocation4 + $0x360] sm:$0xff] }
0x2a98   :  { %4623 = vmatpush.msrb.mxu0 %v4561_v55  ;;  %4593 = vmatpush.msra.mxu3 %v4561_v55 }
0x2aac   :  { %v4371_v21 = vpop.permute.xlu1 %4370 }
0x2aad   :  { %6549 = vmatmul.msk.f32.vlgmr.msrb.gmra.mxu1 %vm198_vm12, %v4371_v21  ;;  %v6653_v21 = vld [vmem:[#allocation4 + $0x328] ss:$0 sm:$0xff] }
0x2af1   :  { %v4347_v6 = vpop.permute.xlu2 %4346 }
0x2af2   :  { %6548 = vmatmul.msk.f32.vlgmr.msrb.gmra.mxu2 %vm198_vm12, %v4347_v6  ;;  %v4604_v6 = vld [vmem:[#allocation4 + $0x358] sm:$0x1] }
0x2af3   :  { %4669 = vmatpush.msrb.mxu2 %v8516_v47  ;;  %6561 = vmatmul.msk.f32.vlgmr.msrb.gmra.mxu0 %vm56_vm1, %v4604_v6  ;;  %v8556_v6 = vld [vmem:[#allocation4 + $0x2f8] sm:$0xff] }
0x2af4   :  { %4762 = vmatpush.msra.mxu0 %v8556_v6 }
0x2af5   :  { %4670 = vmatpush.msrb.mxu2 %v8519_v57 }
0x2af7   :  { %4671 = vmatpush.msrb.mxu2 %v8522_v53 }
0x2af9   :  { %4672 = vmatpush.msrb.mxu2 %v8525_v30 }
0x2b2a   :  { %v4391_v18 = vpop.f32.mrf.mxu1 }
0x2b2b   :  { %v4392_v49 = vadd.f32 %v4391_v18, %v4210_v0 }
0x2b2d   :  { %4415 = vrot.lane.b32.xlu0 %v4392_v49, %s7256_s0 }
0x2b35   :  { %4278 = vrot.lane.b32.xlu0 %v4276_v33, %s7257_s25 }
0x2b70   :  { %v4625_v63 = vpop.f32.mrf.mxu0 }
0x2b71   :  { %v4645_v58 = vperm.slane %v4625_v63, 0 }
0x2b75   :  { %v4367_v32 = vpop.f32.mrf.mxu2 }
0x2b76   :  { %v4368_v14 = vadd.f32 %v4367_v32, %v4184_v35  ;;  %v6654_v32 = vld [vmem:[#allocation4 + $0x350] ss:$0 sm:$0xff] }
0x2b78   :  { %v4394_v59 = vadd.f32 %v4392_v49, %v4368_v14 }
0x2b7a   :  { %v6550_v40 = vmul.f32 -1.442695, %v4394_v59 }
0x2b7c   :  { %7060 = vpow2.f32 %v6550_v40 }
0x2b82   :  { %v7061_v39 = vpop.eup %7060 }
0x2b83   :  { %v4398_v25 = vadd.f32 1.0, %v7061_v39 }
0x2b85   :  { %7062 = vrcp.f32 %v4398_v25  ;;  %v4410_v5 = vand.u32 2147483648, %v4398_v25  ;;  %vm4404_vm10 = vweird.f32 %v4398_v25  ;;  %v4408_v16 = vand.u32 2147483647, %v4398_v25 }
0x2b87   :  { %v4411_v41 = vor.u32 1.1754944e-38, %v4410_v5  ;;  %vm4409_vm15 = vcmp.eq.f32.partialorder %v4408_v16, 8.507059e+37 }
0x2b8b   :  { %v7063_v45 = vpop.eup %7062 }
0x2b8c   :  { %v4400_v15 = vmul.f32 %v7063_v45, %v4398_v25  ;;  %vm4405_vm9 = vweird.f32 %v7063_v45 }
0x2b8d   :  { %vm4406_vm13 = vmor %vm4404_vm10, %vm4405_vm9  ;;  %vm4840_vm10 = vcmask 155648  }
0x2b8e   :  { %v4401_v7 = vsub.f32 1.0, %v4400_v15 }
0x2b90   :  { %v4402_v54 = vmul.f32 %v7063_v45, %v4401_v7 }
0x2b92   :  { %v4403_v0 = vadd.f32 %v7063_v45, %v4402_v54 }
0x2b94   :  { %v4407_v3 = vsel %vm4406_vm13, %v7063_v45, %v4403_v0  ;;  %vm4843_vm13 = vcmask 156672  }
0x2b95   :  { %v4412_v11 = vsel %vm4409_vm15, %v4411_v41, %v4407_v3 }
0x2b96   :  { %v4425_v46 = vsub.f32 1.0, %v4412_v11  ;;  %v4431_v34 = vmul.f32 %v4412_v11, %v4273_v42  ;;  %v4533_v42 = vld [vmem:[#allocation4 + $0x380] sm:$0xff] }
0x2b97   :  { %4552 = vmatpush.msra.mxu1 %v4533_v42 }
0x2b99   :  { %4553 = vmatpush.msra.mxu1 %v4532_v4 }
0x2b9b   :  { %4554 = vmatpush.msra.mxu1 %v4531_v13 }
0x2b9f   :  { %v4416_v35 = vpop.permute.xlu0 %4415 }
0x2ba0   :  { %v4418_v48 = vmul.f32 %v4416_v35, %v4412_v11 }
0x2ba2   :  { %4420 = vrot.lane.b32.xlu1 %v4418_v48, %s7256_s0 }
0x2ba7   :  { %v4279_v1 = vpop.permute.xlu0 %4278 }
0x2ba8   :  { %4284 = vst.msk [vmem:[#allocation3] sm:$0x1] %vm412_vm7, %v4279_v1 }
0x2baa   :  { %4280 = vrot.lane.b32.xlu1 %v4277_v37, %s7257_s25 }
0x2c14   :  { %v4421_v28 = vpop.permute.xlu1 %4420 }
0x2c15   :  { %v4423_v56 = vadd.f32 %v4421_v28, %v4368_v14  ;;  %v4445_v28 = vld [vmem:[#allocation4 + $0x3b0] sm:$0x3] }
0x2c17   :  { %7064 = vtanh.f32 %v4423_v56  ;;  %v4535_v56 = vperm.slane %v4445_v28, 0 }
0x2c1c   :  { %v4281_v17 = vpop.permute.xlu1 %4280 }
0x2c1d   :  { %v7065_v9 = vpop.eup %7064  ;;  %4285 = vst.msk [vmem:[#allocation3 + $0x2] sm:$0x1] %vm412_vm7, %v4281_v17  ;;  %v8540_v17 = vperm.slane %v4445_v28, 1 }
0x2c1e   :  { %4427 = vrot.lane.b32.xlu2 %v7065_v9, %s7257_s25 }
0x2c78   :  { %v4428_v8 = vpop.permute.xlu2 %4427 }
0x2c79   :  { %v4430_v50 = vmul.f32 %v4428_v8, %v4425_v46 }
0x2c7b   :  { %v4432_v12 = vadd.f32 %v4431_v34, %v4430_v50 }
0x2c7d   :  { %v4434_v23 = vrot.slane %v4432_v12, 1  ;;  %v4435_v2 = vperm.slane %v4432_v12, 0 }
0x2c7f   :  { %v4436_v31 = vperm.slane %v4434_v23, 0  ;;  %4437 = vrot.lane.b32.xlu2 %v4435_v2, %s7257_s25 }
0x2c81   :  { %4439 = vrot.lane.b32.xlu0 %v4436_v31, %s7257_s25 }
0x2cd9   :  { %v4438_v43 = vpop.permute.xlu2 %4437 }
0x2cda   :  { %4443 = vst.msk [vmem:[#allocation3 + $0x1] sm:$0x1] %vm412_vm7, %v4438_v43 }
0x2ce1   :  { %v4447_v24 = vld [vmem:[#allocation3] sm:$0x3] }
0x2ce2   :  { %4457 = vst [vmem:[#allocation1] ss:$4 sm:$0xff] %v4447_v24 }
0x2cf3   :  { %v4440_v38 = vpop.permute.xlu0 %4439 }
0x2cf4   :  { %4444 = vst.msk [vmem:[#allocation3 + $0x3] sm:$0x1] %vm412_vm7, %v4440_v38 }
0x2cfb   :  { %v4448_v20 = vld [vmem:[#allocation3 + $0x2] sm:$0x3] }
0x2cfc   :  { %4459 = vst [vmem:[#allocation1 + $0x1] ss:$4 sm:$0xff] %v4448_v20 }
0x2d03   :  { %v4460_v19 = vld.sshfl [vmem:[#allocation1] sm:$0xff pattern:$0x73625140] }
0x2d04   :  { %6551 = vmatmul.msk.f32.vlgmr.msrb.gmra.mxu3 %vm198_vm12, %v4460_v19  ;;  %4498 = vst [vmem:[#allocation1] ss:$4 sm:$0xff] %v4447_v24 }
0x2d05   :  { %4500 = vst [vmem:[#allocation1 + $0x1] ss:$4 sm:$0xff] %v4448_v20 }
0x2d0c   :  { %v4501_v10 = vld.sshfl [vmem:[#allocation1] sm:$0xff pattern:$0x73625140] }
0x2d0d   :  { %6553 = vmatmul.msk.f32.vlgmr.msra.gmra.mxu2 %vm198_vm12, %v4501_v10 }
0x2d87   :  { %v4480_v18 = vpop.f32.mrf.mxu3 }
0x2d88   :  { %v4481_v49 = vadd.f32 %v6653_v21, %v4480_v18  ;;  %v8558_v18 = vld [vmem:[#allocation4 + $0x2f0] sm:$0xff] }
0x2d89   :  { %4763 = vmatpush.msra.mxu0 %v8558_v18 }
0x2d8a   :  { %v4484_v33 = vmul.f32 1.442695, %v4481_v49  ;;  %vm4483_vm7 = vcmp.gt.f32.partialorder %v4481_v49, 0.0 }
0x2d8c   :  { %7066 = vpow2.f32 %v4484_v33  ;;  %v8564_v33 = vld [vmem:[#allocation4 + $0x2e0] sm:$0xff] }
0x2d90   :  { %v4521_v14 = vpop.f32.mrf.mxu2 }
0x2d91   :  { %v4522_v59 = vadd.f32 %v6654_v32, %v4521_v14 }
0x2d92   :  { %v7067_v40 = vpop.eup %7066 }
0x2d93   :  { %v6552_v39 = vadd.f32 -1.0, %v7067_v40  ;;  %v4525_v25 = vmul.f32 1.442695, %v4522_v59  ;;  %vm4524_vm0 = vcmp.gt.f32.partialorder %v4522_v59, 0.0 }
0x2d95   :  { %v4487_v45 = vmul.f32 1.6732632, %v6552_v39  ;;  %7068 = vpow2.f32 %v4525_v25  ;;  %v8574_v39 = vld [vmem:[#allocation4 + $0x2d8] sm:$0xff]  ;;  %v8576_v25 = vld [vmem:[#allocation4 + $0x2d0] sm:$0xff] }
0x2d96   :  { %4737 = vmatpush.msrb.mxu1 %v8574_v39 }
0x2d97   :  { %v4488_v15 = vsel %vm4483_vm7, %v4481_v49, %v4487_v45  ;;  %v8561_v49 = vld [vmem:[#allocation4 + $0x2e8] sm:$0xff] }
0x2d98   :  { %v4489_v7 = vmul.f32 1.050701, %v4488_v15  ;;  %4764 = vmatpush.msra.mxu0 %v8561_v49  ;;  %v8579_v45 = vld [vmem:[#allocation4 + $0x2c8] sm:$0xff]  ;;  %4738 = vmatpush.msrb.mxu1 %v8576_v25  ;;  %v8582_v15 = vld [vmem:[#allocation4 + $0x2c0] sm:$0xff] }
0x2d9a   :  { %v4491_v54 = vrot.slane %v4489_v7, 2  ;;  %v4652_v5 = vperm.slane %v4489_v7, 0  ;;  %v5557_v16 = vperm.slane %v4489_v7, 1  ;;  %4765 = vmatpush.msra.mxu0 %v8564_v33  ;;  %4739 = vmatpush.msrb.mxu1 %v8579_v45 }
0x2d9b   :  { %v7069_v0 = vpop.eup %7068 }
0x2d9c   :  { %v6554_v3 = vadd.f32 -1.0, %v7069_v0  ;;  %v4653_v41 = vperm.slane %v4491_v54, 0  ;;  %v5558_v11 = vperm.slane %v4491_v54, 1  ;;  %4905 = vmatpush.msrb.mxu0 %v8516_v47  ;;  %4740 = vmatpush.msrb.mxu1 %v8582_v15 }
0x2d9e   :  { %v4528_v35 = vmul.f32 1.6732632, %v6554_v3  ;;  %v8532_v48 = vsel %vm419_vm11, %v4653_v41, %v4652_v5  ;;  %v8535_v60 = vsel %vm419_vm11, %v5558_v11, %v5557_v16  ;;  %4906 = vmatpush.msrb.mxu0 %v8519_v57  ;;  %v4446_v41 = vld [vmem:[#allocation4 + $0x300] sm:$0x3] }
0x2d9f   :  { %6562 = vmatmul.msk.f32.vlgmr.msrb.gmra.mxu2 %vm198_vm12, %v8532_v48  ;;  %v8590_v11 = vperm.slane %v4446_v41, 1  ;;  %v8596_v28 = vperm.slane %v4446_v41, 0  ;;  %v4563_v41 = vld [vmem:[#allocation4 + $0x18] sm:$0xff] }
0x2da0   :  { %v4529_v1 = vsel %vm4524_vm0, %v4522_v59, %v4528_v35  ;;  %4907 = vmatpush.msrb.mxu0 %v8522_v53  ;;  %6557 = vmatmul.msk.f32.vlgmr.msra.gmra.mxu3 %vm56_vm1, %v4563_v41  ;;  %vm9045_vm0 = vcmask 162816  }
0x2da1   :  { %v4530_v37 = vmul.f32 1.050701, %v4529_v1 }
0x2da2   :  { %4908 = vmatpush.msrb.mxu0 %v8525_v30 }
0x2da3   :  { %6555 = vmatmul.msk.f32.vlgmr.msra.gmra.mxu1 %vm198_vm12, %v4530_v37 }
0x2e20   :  { %v4556_v9 = vpop.f32.mrf.mxu1 }
0x2e21   :  { %v4557_v46 = vadd.f32 %v4556_v9, %v4535_v56 }
0x2e22   :  { %v4674_v8 = vpop.f32.mrf.mxu2 }
0x2e23   :  { %v4560_v34 = vrot.slane %v4557_v46, 2  ;;  %v4675_v50 = vadd.f32 %v4674_v8, %v8540_v17  ;;  %v5530_v12 = vperm.slane %v4557_v46, 1  ;;  %v4646_v36 = vperm.slane %v4557_v46, 0 }
0x2e25   :  { %v5531_v23 = vperm.slane %v4560_v34, 1  ;;  %4698 = vrot.lane.b32.xlu1 %v4675_v50, %s7256_s0  ;;  %v4647_v31 = vperm.slane %v4560_v34, 0 }
0x2e27   :  { %v8545_v2 = vsel %vm419_vm11, %v5531_v23, %v5530_v12  ;;  %v8550_v27 = vsel %vm419_vm11, %v4647_v31, %v4646_v36 }
0x2e28   :  { %v4650_v43 = vadd.f32 %v8550_v27, %v4645_v58 }
0x2e2a   :  { %v4677_v24 = vadd.f32 %v4675_v50, %v4650_v43 }
0x2e2c   :  { %v6563_v51 = vmul.f32 -1.442695, %v4677_v24 }
0x2e2d   :  { %4714 = vrot.lane.b32.xlu1 %v8532_v48, %s7258_s26 }
0x2e2e   :  { %7070 = vpow2.f32 %v6563_v51 }
0x2e34   :  { %v7071_v44 = vpop.eup %7070 }
0x2e35   :  { %v4681_v62 = vadd.f32 1.0, %v7071_v44 }
0x2e37   :  { %7072 = vrcp.f32 %v4681_v62  ;;  %v4693_v29 = vand.u32 2147483648, %v4681_v62  ;;  %vm4687_vm8 = vweird.f32 %v4681_v62  ;;  %v4691_v42 = vand.u32 2147483647, %v4681_v62 }
0x2e39   :  { %v4694_v13 = vor.u32 1.1754944e-38, %v4693_v29  ;;  %vm4692_vm11 = vcmp.eq.f32.partialorder %v4691_v42, 8.507059e+37  ;;  %v8603_v29 = vld [vmem:[#allocation4 + $0x3c8] sm:$0xff]  ;;  %v8607_v42 = vld [vmem:[#allocation4 + $0x3c0] sm:$0xff] }
0x2e3d   :  { %v7073_v61 = vpop.eup %7072 }
0x2e3e   :  { %v4683_v38 = vmul.f32 %v7073_v61, %v4681_v62  ;;  %vm4688_vm5 = vweird.f32 %v7073_v61 }
0x2e3f   :  { %vm4689_vm4 = vmor %vm4687_vm8, %vm4688_vm5 }
0x2e40   :  { %v4684_v20 = vsub.f32 1.0, %v4683_v38 }
0x2e42   :  { %v4685_v19 = vmul.f32 %v7073_v61, %v4684_v20 }
0x2e44   :  { %v4686_v10 = vadd.f32 %v7073_v61, %v4685_v19 }
0x2e46   :  { %v4690_v4 = vsel %vm4689_vm4, %v7073_v61, %v4686_v10  ;;  %v8601_v10 = vld [vmem:[#allocation4 + $0x3d0] sm:$0xff] }
0x2e47   :  { %v4695_v55 = vsel %vm4692_vm11, %v4694_v13, %v4690_v4  ;;  %4828 = vmatpush.msra.mxu2 %v8601_v10  ;;  %5053 = vmatpush.msrb.mxu3 %v8601_v10  ;;  %v8611_v4 = vld [vmem:[#allocation4 + $0x3b8] sm:$0xff] }
0x2e48   :  { %v4708_v54 = vsub.f32 1.0, %v4695_v55 }
0x2e49   :  { %4829 = vmatpush.msra.mxu2 %v8603_v29  ;;  %5054 = vmatpush.msrb.mxu3 %v8603_v29 }
0x2e4b   :  { %4830 = vmatpush.msra.mxu2 %v8607_v42  ;;  %5055 = vmatpush.msrb.mxu3 %v8607_v42 }
0x2e4d   :  { %4831 = vmatpush.msra.mxu2 %v8611_v4  ;;  %5056 = vmatpush.msrb.mxu3 %v8611_v4 }
0x2e4f   :  { %4969 = vmatpush.msrb.mxu2 %v8574_v39  ;;  %5209 = vmatpush.msra.mxu3 %v8556_v6 }
0x2e51   :  { %4970 = vmatpush.msrb.mxu2 %v8576_v25  ;;  %5210 = vmatpush.msra.mxu3 %v8558_v18 }
0x2e53   :  { %4971 = vmatpush.msrb.mxu2 %v8579_v45  ;;  %5211 = vmatpush.msra.mxu3 %v8561_v49 }
0x2e55   :  { %4972 = vmatpush.msrb.mxu2 %v8582_v15  ;;  %5212 = vmatpush.msra.mxu3 %v8564_v33 }
0x2e97   :  { %v4699_v52 = vpop.permute.xlu1 %4698 }
0x2e98   :  { %v4701_v21 = vmul.f32 %v4699_v52, %v4695_v55 }
0x2e9a   :  { %4703 = vrot.lane.b32.xlu2 %v4701_v21, %s7256_s0 }
0x2e9f   :  { %v4715_v7 = vpop.permute.xlu1 %4714 }
0x2ea0   :  { %v4717_v5 = vmul.f32 %v4715_v7, %v4695_v55 }
0x2ea2   :  { %4746 = vrot.lane.b32.xlu2 %v8532_v48, %s7257_s25 }
0x2ef4   :  { %v4704_v32 = vpop.permute.xlu2 %4703 }
0x2ef5   :  { %v4706_v14 = vadd.f32 %v4704_v32, %v4650_v43 }
0x2ef7   :  { %7074 = vtanh.f32 %v4706_v14 }
0x2efc   :  { %v4747_v59 = vpop.permute.xlu2 %4746 }
0x2efd   :  { %v7075_v40 = vpop.eup %7074  ;;  %6565 = vmatmul.msk.f32.vlgmr.msra.gmra.mxu0 %vm198_vm12, %v4747_v59 }
0x2efe   :  { %4710 = vrot.lane.b32.xlu0 %v7075_v40, %s7257_s25 }
0x2f70   :  { %v4711_v0 = vpop.permute.xlu0 %4710 }
0x2f71   :  { %v4713_v16 = vmul.f32 %v4711_v0, %v4708_v54 }
0x2f73   :  { %v8586_v3 = vadd.f32 %v4717_v5, %v4713_v16 }
0x2f75   :  { %4721 = vrot.lane.b32.xlu0 %v8586_v3, %s7257_s25 }
0x2f7a   :  { %v4767_v35 = vpop.f32.mrf.mxu0 }
0x2f7b   :  { %v4768_v1 = vadd.f32 %v4767_v35, %v8590_v11  ;;  %v4564_v35 = vld [vmem:[#allocation4 + $0x20] sm:$0xff] }
0x2f7c   :  { %6558 = vmatmul.msk.f32.gmra.mxu3 %vm56_vm1, %v4564_v35 }
0x2f7d   :  { %4791 = vrot.lane.b32.xlu1 %v4768_v1, %s7256_s0 }
0x2fe7   :  { %v4722_v37 = vpop.permute.xlu0 %4721 }
0x2fe8   :  { %6564 = vmatmul.msk.f32.vlgmr.msrb.gmra.mxu1 %vm198_vm12, %v4722_v37  ;;  %6571 = vmatmul.msk.f32.vlgmr.msrb.gmra.mxu0 %vm198_vm12, %v4722_v37 }
0x2fef   :  { %v4792_v44 = vpop.permute.xlu1 %4791 }
0x3065   :  { %v4742_v56 = vpop.f32.mrf.mxu1  ;;  %v4910_v5 = vpop.f32.mrf.mxu0 }
0x3066   :  { %v4743_v9 = vadd.f32 %v4742_v56, %v8596_v28  ;;  %v4911_v16 = vadd.f32 %v4910_v5, %v8540_v17 }
0x3068   :  { %v4770_v46 = vadd.f32 %v4768_v1, %v4743_v9  ;;  %v4565_v1 = vld [vmem:[#allocation4 + $0x28] sm:$0xf] }
0x3069   :  { %6559 = vmatmul.msk.f32.gmra.mxu3 %vm56_vm1, %v4565_v1 }
0x306a   :  { %v6566_v8 = vmul.f32 -1.442695, %v4770_v46 }
0x306c   :  { %7076 = vpow2.f32 %v6566_v8 }
0x3072   :  { %v7077_v34 = vpop.eup %7076 }
0x3073   :  { %v4774_v50 = vadd.f32 1.0, %v7077_v34  ;;  %v8651_v34 = vpop.f32.mrf.mxu3 }
0x3075   :  { %7078 = vrcp.f32 %v4774_v50  ;;  %v4786_v63 = vand.u32 2147483648, %v4774_v50  ;;  %v4784_v58 = vand.u32 2147483647, %v4774_v50  ;;  %vm4780_vm3 = vweird.f32 %v4774_v50 }
0x3077   :  { %v4787_v24 = vor.u32 1.1754944e-38, %v4786_v63  ;;  %vm4785_vm9 = vcmp.eq.f32.partialorder %v4784_v58, 8.507059e+37 }
0x307b   :  { %v7079_v12 = vpop.eup %7078 }
0x307c   :  { %v4776_v23 = vmul.f32 %v7079_v12, %v4774_v50  ;;  %vm4781_vm14 = vweird.f32 %v7079_v12  ;;  %v8653_v50 = vpop.f32.mrf.mxu3 }
0x307d   :  { %vm4782_vm6 = vmor %vm4780_vm3, %vm4781_vm14 }
0x307e   :  { %v4777_v31 = vsub.f32 1.0, %v4776_v23 }
0x3080   :  { %v4778_v36 = vmul.f32 %v7079_v12, %v4777_v31 }
0x3082   :  { %v4779_v43 = vadd.f32 %v7079_v12, %v4778_v36 }
0x3084   :  { %v4783_v51 = vsel %vm4782_vm6, %v7079_v12, %v4779_v43 }
0x3085   :  { %v4788_v62 = vsel %vm4785_vm9, %v4787_v24, %v4783_v51 }
0x3086   :  { %v4794_v61 = vmul.f32 %v4792_v44, %v4788_v62  ;;  %v4801_v13 = vsub.f32 1.0, %v4788_v62  ;;  %v4808_v55 = vmul.f32 %v4788_v62, %v8532_v48  ;;  %v8634_v48 = vld [vmem:[#allocation4 + $0x3d8] ss:$0 sm:$0xff] }
0x3088   :  { %4796 = vrot.lane.b32.xlu2 %v4794_v61, %s7256_s0 }
0x30e2   :  { %v4797_v38 = vpop.permute.xlu2 %4796 }
0x30e3   :  { %v4799_v20 = vadd.f32 %v4797_v38, %v4743_v9 }
0x30e5   :  { %7080 = vtanh.f32 %v4799_v20 }
0x30eb   :  { %v7081_v19 = vpop.eup %7080 }
0x30ec   :  { %4803 = vrot.lane.b32.xlu0 %v7081_v19, %s7257_s25  ;;  %v8655_v63 = vpop.f32.mrf.mxu3 }
0x30ed   :  { %6569 = vmatpush.msk.msra.mxu1 %vm104_vm2, %v8655_v63  ;;  %6578 = vmatpush.msk.msra.mxu0 %vm104_vm2, %v8655_v63 }
0x30ef   :  { %4887 = vmatpush.msra.mxu1 %v8653_v50  ;;  %5107 = vmatpush.msra.mxu0 %v8653_v50 }
0x30f1   :  { %4888 = vmatpush.msra.mxu1 %v8651_v34  ;;  %5108 = vmatpush.msra.mxu0 %v8651_v34 }
0x30f3   :  { %4989 = vmatpush.msrb.mxu1 %v8556_v6  ;;  %5273 = vmatpush.msrb.mxu0 %v8601_v10 }
0x30f5   :  { %4990 = vmatpush.msrb.mxu1 %v8558_v18  ;;  %5274 = vmatpush.msrb.mxu0 %v8603_v29 }
0x30f7   :  { %4991 = vmatpush.msrb.mxu1 %v8561_v49  ;;  %5275 = vmatpush.msrb.mxu0 %v8607_v42 }
0x30f9   :  { %4992 = vmatpush.msrb.mxu1 %v8564_v33  ;;  %5276 = vmatpush.msrb.mxu0 %v8611_v4 }
0x315e   :  { %v4804_v52 = vpop.permute.xlu0 %4803 }
0x315f   :  { %v4806_v21 = vmul.f32 %v4804_v52, %v4801_v13 }
0x3161   :  { %v8622_v32 = vadd.f32 %v4808_v55, %v4806_v21 }
0x3163   :  { %4812 = vrot.lane.b32.xlu1 %v8622_v32, %s7257_s25 }
0x31d5   :  { %v8626_v14 = vpop.permute.xlu1 %4812 }
0x31d6   :  { %6567 = vmatmul.msk.f32.vlgmr.msra.gmra.mxu2 %vm198_vm12, %v8626_v14 }
0x31d7   :  { %5125 = vmatpush.msra.mxu2 %v8516_v47 }
0x31d9   :  { %5126 = vmatpush.msra.mxu2 %v8519_v57 }
0x31db   :  { %5127 = vmatpush.msra.mxu2 %v8522_v53 }
0x31dd   :  { %5128 = vmatpush.msra.mxu2 %v8525_v30 }
0x3259   :  { %v4833_v59 = vpop.f32.mrf.mxu2 }
0x325a   :  { %v4834_v40 = vadd.f32 %v8634_v48, %v4833_v59 }
0x325c   :  { %v4836_v7 = vmax.f32 %v4834_v40, 0.0 }
0x325e   :  { %v4838_v54 = vrot.slane %v4836_v7, 1  ;;  %4841 = vst.msk [vmem:[#allocation7] sm:$0x1] %vm4840_vm10, %v4836_v7  ;;  %v4844_v0 = vsel %vm4843_vm13, %v4836_v7, -inf }
0x325f   :  { %4845 = vmax.xlane.f32.xlu2 %v4844_v0 }
0x3260   :  { %4842 = vst.msk [vmem:[#allocation7 + $0x8] sm:$0x1] %vm4840_vm10, %v4838_v54 }
0x3277   :  { %4934 = vrot.lane.b32.xlu2 %v4911_v16, %s7256_s0 }
0x32d2   :  { %v4846_v37 = vpop.xlane.xlu2 %4845 }
0x32d3   :  { %vm4847_vm15 = vcmp.eq.f32.partialorder %v4836_v7, %v4846_v37 }
0x32d4   :  { %v4848_v56 = vsel %vm4847_vm15, %v7334_v22, 20 }
0x32d5   :  { %v4849_v9 = vsel %vm4843_vm13, %v4848_v56, 2147483647 }
0x32d6   :  { %v4851_v46 = vshra.s32 %v4849_v9, 16  ;;  %v4850_v12 = vand.u32 65535, %v4849_v9 }
0x32d8   :  { %v4853_v8 = vcvt.s32.f32 %v4851_v46  ;;  %v4852_v31 = vcvt.s32.f32 %v4850_v12 }
0x32da   :  { %4854 = vmin.xlane.f32.xlu0 %v4853_v8  ;;  %v4935_v41 = vpop.permute.xlu2 %4934 }
0x334d   :  { %v4855_v23 = vpop.xlane.xlu0 %4854 }
0x334e   :  { %vm4856_vm7 = vcmp.eq.f32.partialorder %v4853_v8, %v4855_v23  ;;  %v4861_v58 = vcvt.f32.s32 %v4855_v23 }
0x334f   :  { %v4857_v36 = vsel %vm4856_vm7, %v4852_v31, inf }
0x3350   :  { %4858 = vmin.xlane.f32.xlu1 %v4857_v36  ;;  %v4862_v24 = vshll.u32 %v4861_v58, 16 }
0x33c3   :  { %v4859_v43 = vpop.xlane.xlu1 %4858 }
0x33c4   :  { %v4860_v51 = vcvt.f32.s32 %v4859_v43 }
0x33c6   :  { %v4863_v44 = vadd.s32 %v4862_v24, %v4860_v51 }
0x33c8   :  { %vm4864_vm1 = vcmp.eq.s32.totalorder %v7334_v22, %v4863_v44 }
0x33c9   :  { %v6568_v62 = vsel %vm4864_vm1, 1.0, %v7255_v26 }
0x33ca   :  { %6570 = vmatmul.msk.f32.vlgmr.msra.gmra.mxu1 %vm9045_vm0, %v6568_v62 }
0x33cb   :  { %5189 = vmatpush.msra.mxu1 %v8574_v39 }
0x33cd   :  { %5190 = vmatpush.msra.mxu1 %v8576_v25 }
0x33cf   :  { %5191 = vmatpush.msra.mxu1 %v8579_v45 }
0x33d1   :  { %5192 = vmatpush.msra.mxu1 %v8582_v15 }
0x33d2   :  { %6574 = vmatmul.msk.f32.vlgmr.msrb.gmra.mxu1 %vm198_vm12, %v8626_v14 }
0x33d3   :  { %5345 = vmatpush.msrb.mxu1 %v8516_v47 }
0x33d5   :  { %5346 = vmatpush.msrb.mxu1 %v8519_v57 }
0x33d7   :  { %5347 = vmatpush.msrb.mxu1 %v8522_v53 }
0x33d9   :  { %5348 = vmatpush.msrb.mxu1 %v8525_v30 }
0x3447   :  { %v4890_v61 = vpop.f32.mrf.mxu1 }
0x3448   :  { %v4891_v38 = vadd.f32 %v4890_v61, %v8550_v27 }
0x344a   :  { %v4913_v20 = vadd.f32 %v4911_v16, %v4891_v38 }
0x344c   :  { %v6572_v19 = vmul.f32 -1.442695, %v4913_v20 }
0x344e   :  { %7082 = vpow2.f32 %v6572_v19 }
0x344f   :  { %v4994_v1 = vpop.f32.mrf.mxu1 }
0x3450   :  { %v4995_v37 = vadd.f32 %v4994_v1, %v8590_v11 }
0x3454   :  { %v7083_v13 = vpop.eup %7082 }
0x3455   :  { %v4917_v52 = vadd.f32 1.0, %v7083_v13 }
0x3457   :  { %7084 = vrcp.f32 %v4917_v52  ;;  %v4929_v59 = vand.u32 2147483648, %v4917_v52  ;;  %v4927_v7 = vand.u32 2147483647, %v4917_v52  ;;  %vm4923_vm8 = vweird.f32 %v4917_v52 }
0x3459   :  { %v4930_v0 = vor.u32 1.1754944e-38, %v4929_v59  ;;  %vm4928_vm11 = vcmp.eq.f32.partialorder %v4927_v7, 8.507059e+37 }
0x345d   :  { %v7085_v55 = vpop.eup %7084 }
0x345e   :  { %v4919_v21 = vmul.f32 %v7085_v55, %v4917_v52  ;;  %vm4924_vm5 = vweird.f32 %v7085_v55 }
0x345f   :  { %vm4925_vm4 = vmor %vm4923_vm8, %vm4924_vm5 }
0x3460   :  { %v4920_v14 = vsub.f32 1.0, %v4919_v21 }
0x3462   :  { %v4921_v40 = vmul.f32 %v7085_v55, %v4920_v14 }
0x3464   :  { %v4922_v54 = vadd.f32 %v7085_v55, %v4921_v40 }
0x3466   :  { %v4926_v5 = vsel %vm4925_vm4, %v7085_v55, %v4922_v54 }
0x3467   :  { %v4931_v16 = vsel %vm4928_vm11, %v4930_v0, %v4926_v5 }
0x3468   :  { %v4937_v35 = vmul.f32 %v4935_v41, %v4931_v16  ;;  %v4944_v8 = vsub.f32 1.0, %v4931_v16  ;;  %v4950_v23 = vmul.f32 %v4931_v16, %v8586_v3 }
0x346a   :  { %4939 = vrot.lane.b32.xlu0 %v4937_v35, %s7256_s0 }
0x3472   :  { %5018 = vrot.lane.b32.xlu0 %v4995_v37, %s7256_s0 }
0x34dc   :  { %v4940_v56 = vpop.permute.xlu0 %4939 }
0x34dd   :  { %v4942_v9 = vadd.f32 %v4940_v56, %v4891_v38 }
0x34df   :  { %7086 = vtanh.f32 %v4942_v9 }
0x34e4   :  { %v5019_v59 = vpop.permute.xlu0 %5018 }
0x34e5   :  { %v7087_v46 = vpop.eup %7086 }
0x34e6   :  { %4946 = vrot.lane.b32.xlu1 %v7087_v46, %s7257_s25 }
0x3558   :  { %v4947_v12 = vpop.permute.xlu1 %4946 }
0x3559   :  { %v4949_v31 = vmul.f32 %v4947_v12, %v4944_v8 }
0x355b   :  { %v8692_v36 = vadd.f32 %v4950_v23, %v4949_v31 }
0x355d   :  { %4953 = vrot.lane.b32.xlu2 %v8692_v36, %s7257_s25 }
0x35b7   :  { %v4954_v58 = vpop.permute.xlu2 %4953 }
0x35b8   :  { %6573 = vmatmul.msk.f32.vlgmr.msrb.gmra.mxu2 %vm198_vm12, %v4954_v58 }
0x35b9   :  { %6587 = vmatpush.msk.msrb.mxu2 %vm104_vm2, %v8655_v63 }
0x35bb   :  { %5327 = vmatpush.msrb.mxu2 %v8653_v50 }
0x35bd   :  { %5328 = vmatpush.msrb.mxu2 %v8651_v34 }
0x35c0   :  { %6580 = vmatmul.msk.f32.vlgmr.msra.gmra.mxu2 %vm198_vm12, %v4954_v58 }
0x35c1   :  { %5493 = vmatpush.msra.mxu2 %v8601_v10 }
0x35c3   :  { %5494 = vmatpush.msra.mxu2 %v8603_v29 }
0x35c5   :  { %5495 = vmatpush.msra.mxu2 %v8607_v42 }
0x35c7   :  { %5496 = vmatpush.msra.mxu2 %v8611_v4 }
0x363b   :  { %v4974_v3 = vpop.f32.mrf.mxu2 }
0x363c   :  { %v4975_v43 = vadd.f32 %v4974_v3, %v8596_v28 }
0x363e   :  { %v4997_v24 = vadd.f32 %v4995_v37, %v4975_v43 }
0x3640   :  { %v6575_v51 = vmul.f32 -1.442695, %v4997_v24 }
0x3642   :  { %7088 = vpow2.f32 %v6575_v51 }
0x3643   :  { %v5130_v23 = vpop.f32.mrf.mxu2 }
0x3644   :  { %v5131_v31 = vadd.f32 %v5130_v23, %v8540_v17 }
0x3648   :  { %v7089_v44 = vpop.eup %7088 }
0x3649   :  { %v5001_v62 = vadd.f32 1.0, %v7089_v44 }
0x364b   :  { %7090 = vrcp.f32 %v5001_v62  ;;  %v5013_v19 = vand.u32 2147483648, %v5001_v62  ;;  %v5011_v52 = vand.u32 2147483647, %v5001_v62  ;;  %vm5007_vm3 = vweird.f32 %v5001_v62 }
0x364d   :  { %v5014_v21 = vor.u32 1.1754944e-38, %v5013_v19  ;;  %vm5012_vm9 = vcmp.eq.f32.partialorder %v5011_v52, 8.507059e+37 }
0x3651   :  { %v7091_v61 = vpop.eup %7090 }
0x3652   :  { %v5003_v38 = vmul.f32 %v7091_v61, %v5001_v62  ;;  %vm5008_vm14 = vweird.f32 %v7091_v61 }
0x3653   :  { %vm5009_vm6 = vmor %vm5007_vm3, %vm5008_vm14 }
0x3654   :  { %v5004_v20 = vsub.f32 1.0, %v5003_v38 }
0x3656   :  { %v5005_v13 = vmul.f32 %v7091_v61, %v5004_v20 }
0x3658   :  { %v5006_v55 = vadd.f32 %v7091_v61, %v5005_v13 }
0x365a   :  { %v5010_v14 = vsel %vm5009_vm6, %v7091_v61, %v5006_v55 }
0x365b   :  { %v5015_v40 = vsel %vm5012_vm9, %v5014_v21, %v5010_v14 }
0x365c   :  { %v5021_v7 = vmul.f32 %v5019_v59, %v5015_v40  ;;  %v5028_v41 = vsub.f32 1.0, %v5015_v40  ;;  %v5034_v35 = vmul.f32 %v5015_v40, %v8622_v32 }
0x365e   :  { %5023 = vrot.lane.b32.xlu2 %v5021_v7, %s7256_s0 }
0x36b8   :  { %v5024_v54 = vpop.permute.xlu2 %5023 }
0x36b9   :  { %v5026_v0 = vadd.f32 %v5024_v54, %v4975_v43 }
0x36bb   :  { %7092 = vtanh.f32 %v5026_v0 }
0x36c1   :  { %v7093_v5 = vpop.eup %7092 }
0x36c2   :  { %5030 = vrot.lane.b32.xlu1 %v7093_v5, %s7257_s25 }
0x3734   :  { %v5031_v16 = vpop.permute.xlu1 %5030 }
0x3735   :  { %v5033_v1 = vmul.f32 %v5031_v16, %v5028_v41 }
0x3737   :  { %v8710_v37 = vadd.f32 %v5034_v35, %v5033_v1 }
0x3739   :  { %5037 = vrot.lane.b32.xlu0 %v8710_v37, %s7257_s25 }
0x37ab   :  { %v5038_v56 = vpop.permute.xlu0 %5037 }
0x37ac   :  { %6576 = vmatmul.msk.f32.vlgmr.msrb.gmra.mxu3 %vm198_vm12, %v5038_v56 }
0x37ad   :  { %5409 = vmatpush.msrb.mxu3 %v8574_v39 }
0x37af   :  { %5410 = vmatpush.msrb.mxu3 %v8576_v25 }
0x37b1   :  { %5411 = vmatpush.msrb.mxu3 %v8579_v45 }
0x37b3   :  { %5412 = vmatpush.msrb.mxu3 %v8582_v15 }
0x37b4   :  { %6583 = vmatmul.msk.f32.vlgmr.msra.gmra.mxu3 %vm198_vm12, %v5038_v56 }
0x37b5   :  { %5574 = vmatpush.msra.mxu3 %v8516_v47 }
0x37b7   :  { %5575 = vmatpush.msra.mxu3 %v8519_v57 }
0x37b9   :  { %5576 = vmatpush.msra.mxu3 %v8522_v53 }
0x37bb   :  { %5577 = vmatpush.msra.mxu3 %v8525_v30 }
0x382f   :  { %v5058_v32 = vpop.f32.mrf.mxu3 }
0x3830   :  { %v5059_v9 = vadd.f32 %v8634_v48, %v5058_v32 }
0x3832   :  { %v5061_v46 = vmax.f32 %v5059_v9, 0.0 }
0x3834   :  { %v5063_v8 = vrot.slane %v5061_v46, 1  ;;  %5065 = vst.msk [vmem:[#allocation7 + $0x1] sm:$0x1] %vm4840_vm10, %v5061_v46  ;;  %v5067_v12 = vsel %vm4843_vm13, %v5061_v46, -inf }
0x3835   :  { %5068 = vmax.xlane.f32.xlu2 %v5067_v12 }
0x3836   :  { %5066 = vst.msk [vmem:[#allocation7 + $0x9] sm:$0x1] %vm4840_vm10, %v5063_v8 }
0x384d   :  { %5154 = vrot.lane.b32.xlu2 %v5131_v31, %s7256_s0 }
0x38a8   :  { %v5069_v58 = vpop.xlane.xlu2 %5068 }
0x38a9   :  { %vm5070_vm15 = vcmp.eq.f32.partialorder %v5061_v46, %v5069_v58 }
0x38aa   :  { %v5071_v3 = vsel %vm5070_vm15, %v7334_v22, 20 }
0x38ab   :  { %v5072_v43 = vsel %vm4843_vm13, %v5071_v3, 2147483647 }
0x38ac   :  { %v5074_v24 = vshra.s32 %v5072_v43, 16  ;;  %v5073_v44 = vand.u32 65535, %v5072_v43  ;;  %v5214_v43 = vpop.f32.mrf.mxu3 }
0x38ae   :  { %v5076_v51 = vcvt.s32.f32 %v5074_v24  ;;  %v5075_v61 = vcvt.s32.f32 %v5073_v44  ;;  %v5215_v24 = vadd.f32 %v5214_v43, %v8590_v11 }
0x38b0   :  { %5077 = vmin.xlane.f32.xlu1 %v5076_v51  ;;  %v5155_v8 = vpop.permute.xlu2 %5154 }
0x3923   :  { %v5078_v62 = vpop.xlane.xlu1 %5077 }
0x3924   :  { %vm5079_vm7 = vcmp.eq.f32.partialorder %v5076_v51, %v5078_v62  ;;  %v5084_v20 = vcvt.f32.s32 %v5078_v62 }
0x3925   :  { %v5080_v38 = vsel %vm5079_vm7, %v5075_v61, inf }
0x3926   :  { %5081 = vmin.xlane.f32.xlu0 %v5080_v38  ;;  %v5085_v13 = vshll.u32 %v5084_v20, 16 }
0x3999   :  { %v5082_v19 = vpop.xlane.xlu0 %5081 }
0x399a   :  { %v5083_v52 = vcvt.f32.s32 %v5082_v19 }
0x399c   :  { %v5086_v55 = vadd.s32 %v5085_v13, %v5083_v52 }
0x399e   :  { %vm5087_vm1 = vcmp.eq.s32.totalorder %v7334_v22, %v5086_v55 }
0x399f   :  { %v6577_v21 = vsel %vm5087_vm1, 1.0, %v7255_v26 }
0x39a0   :  { %6579 = vmatmul.msk.f32.vlgmr.msra.gmra.mxu0 %vm9045_vm0, %v6577_v21 }
0x39a1   :  { %5429 = vmatpush.msra.mxu0 %v8556_v6 }
0x39a3   :  { %5430 = vmatpush.msra.mxu0 %v8558_v18 }
0x39a5   :  { %5431 = vmatpush.msra.mxu0 %v8561_v49 }
0x39a7   :  { %5432 = vmatpush.msra.mxu0 %v8564_v33 }
0x3a1d   :  { %v5110_v14 = vpop.f32.mrf.mxu0 }
0x3a1e   :  { %v5111_v59 = vadd.f32 %v5110_v14, %v8550_v27 }
0x3a20   :  { %v5133_v40 = vadd.f32 %v5131_v31, %v5111_v59 }
0x3a22   :  { %v6581_v7 = vmul.f32 -1.442695, %v5133_v40 }
0x3a24   :  { %7094 = vpow2.f32 %v6581_v7 }
0x3a2a   :  { %v7095_v54 = vpop.eup %7094 }
0x3a2b   :  { %v5137_v0 = vadd.f32 1.0, %v7095_v54 }
0x3a2d   :  { %7096 = vrcp.f32 %v5137_v0  ;;  %v5149_v35 = vand.u32 2147483648, %v5137_v0  ;;  %v5147_v56 = vand.u32 2147483647, %v5137_v0  ;;  %vm5143_vm8 = vweird.f32 %v5137_v0 }
0x3a2f   :  { %v5150_v9 = vor.u32 1.1754944e-38, %v5149_v35  ;;  %vm5148_vm11 = vcmp.eq.f32.partialorder %v5147_v56, 8.507059e+37 }
0x3a33   :  { %v7097_v5 = vpop.eup %7096 }
0x3a34   :  { %v5139_v41 = vmul.f32 %v7097_v5, %v5137_v0  ;;  %vm5144_vm5 = vweird.f32 %v7097_v5 }
0x3a35   :  { %vm5145_vm4 = vmor %vm5143_vm8, %vm5144_vm5 }
0x3a36   :  { %v5140_v16 = vsub.f32 1.0, %v5139_v41 }
0x3a38   :  { %v5141_v1 = vmul.f32 %v7097_v5, %v5140_v16 }
0x3a3a   :  { %v5142_v32 = vadd.f32 %v7097_v5, %v5141_v1 }
0x3a3c   :  { %v5146_v46 = vsel %vm5145_vm4, %v7097_v5, %v5142_v32 }
0x3a3d   :  { %v5151_v12 = vsel %vm5148_vm11, %v5150_v9, %v5146_v46 }
0x3a3e   :  { %v5157_v23 = vmul.f32 %v5155_v8, %v5151_v12  ;;  %v5164_v51 = vsub.f32 1.0, %v5151_v12  ;;  %v5170_v62 = vmul.f32 %v5151_v12, %v8692_v36 }
0x3a40   :  { %5159 = vrot.lane.b32.xlu1 %v5157_v23, %s7256_s0 }
0x3ab2   :  { %v5160_v31 = vpop.permute.xlu1 %5159 }
0x3ab3   :  { %v5162_v58 = vadd.f32 %v5160_v31, %v5111_v59 }
0x3ab5   :  { %7098 = vtanh.f32 %v5162_v58 }
0x3abb   :  { %v7099_v3 = vpop.eup %7098 }
0x3abc   :  { %5166 = vrot.lane.b32.xlu0 %v7099_v3, %s7257_s25 }
0x3ac4   :  { %5238 = vrot.lane.b32.xlu0 %v5215_v24, %s7256_s0 }
0x3b2e   :  { %v5167_v44 = vpop.permute.xlu0 %5166 }
0x3b2f   :  { %v5169_v61 = vmul.f32 %v5167_v44, %v5164_v51 }
0x3b31   :  { %v8745_v38 = vadd.f32 %v5170_v62, %v5169_v61 }
0x3b33   :  { %5173 = vrot.lane.b32.xlu2 %v8745_v38, %s7257_s25 }
0x3b36   :  { %v5239_v35 = vpop.permute.xlu0 %5238 }
0x3b8d   :  { %v5174_v20 = vpop.permute.xlu2 %5173 }
0x3b8e   :  { %6582 = vmatmul.msk.f32.vlgmr.msra.gmra.mxu1 %vm198_vm12, %v5174_v20 }
0x3b8f   :  { %6596 = vmatpush.msk.msra.mxu1 %vm104_vm2, %v8655_v63 }
0x3b91   :  { %5551 = vmatpush.msra.mxu1 %v8653_v50 }
0x3b93   :  { %5552 = vmatpush.msra.mxu1 %v8651_v34 }
0x3b96   :  { %6589 = vmatmul.msk.f32.vlgmr.msrb.gmra.mxu1 %vm198_vm12, %v5174_v20 }
0x3b97   :  { %5730 = vmatpush.msrb.mxu1 %v8601_v10 }
0x3b99   :  { %5731 = vmatpush.msrb.mxu1 %v8603_v29 }
0x3b9b   :  { %5732 = vmatpush.msrb.mxu1 %v8607_v42 }
0x3b9d   :  { %5733 = vmatpush.msrb.mxu1 %v8611_v4 }
0x3c0b   :  { %v5194_v36 = vpop.f32.mrf.mxu1 }
0x3c0c   :  { %v5195_v19 = vadd.f32 %v5194_v36, %v8596_v28 }
0x3c0e   :  { %v5217_v13 = vadd.f32 %v5215_v24, %v5195_v19 }
0x3c10   :  { %v6584_v52 = vmul.f32 -1.442695, %v5217_v13 }
0x3c12   :  { %7100 = vpow2.f32 %v6584_v52 }
0x3c13   :  { %v5350_v62 = vpop.f32.mrf.mxu1 }
0x3c18   :  { %v7101_v55 = vpop.eup %7100 }
0x3c19   :  { %v5221_v21 = vadd.f32 1.0, %v7101_v55 }
0x3c1b   :  { %7102 = vrcp.f32 %v5221_v21  ;;  %v5233_v7 = vand.u32 2147483648, %v5221_v21  ;;  %v5231_v0 = vand.u32 2147483647, %v5221_v21  ;;  %vm5227_vm3 = vweird.f32 %v5221_v21 }
0x3c1d   :  { %v5234_v41 = vor.u32 1.1754944e-38, %v5233_v7  ;;  %vm5232_vm9 = vcmp.eq.f32.partialorder %v5231_v0, 8.507059e+37 }
0x3c21   :  { %v7103_v14 = vpop.eup %7102 }
0x3c22   :  { %v5223_v59 = vmul.f32 %v7103_v14, %v5221_v21  ;;  %vm5228_vm14 = vweird.f32 %v7103_v14 }
0x3c23   :  { %vm5229_vm6 = vmor %vm5227_vm3, %vm5228_vm14 }
0x3c24   :  { %v5224_v40 = vsub.f32 1.0, %v5223_v59 }
0x3c26   :  { %v5225_v54 = vmul.f32 %v7103_v14, %v5224_v40 }
0x3c28   :  { %v5226_v5 = vadd.f32 %v7103_v14, %v5225_v54 }
0x3c2a   :  { %v5230_v16 = vsel %vm5229_vm6, %v7103_v14, %v5226_v5 }
0x3c2b   :  { %v5235_v1 = vsel %vm5232_vm9, %v5234_v41, %v5230_v16 }
0x3c2c   :  { %v5241_v56 = vmul.f32 %v5239_v35, %v5235_v1  ;;  %v5248_v8 = vsub.f32 1.0, %v5235_v1  ;;  %v5254_v23 = vmul.f32 %v5235_v1, %v8710_v37 }
0x3c2e   :  { %5243 = vrot.lane.b32.xlu1 %v5241_v56, %s7256_s0 }
0x3ca0   :  { %v5244_v32 = vpop.permute.xlu1 %5243 }
0x3ca1   :  { %v5246_v9 = vadd.f32 %v5244_v32, %v5195_v19 }
0x3ca3   :  { %7104 = vtanh.f32 %v5246_v9 }
0x3ca9   :  { %v7105_v46 = vpop.eup %7104 }
0x3caa   :  { %5250 = vrot.lane.b32.xlu2 %v7105_v46, %s7257_s25 }
0x3d04   :  { %v5251_v12 = vpop.permute.xlu2 %5250 }
0x3d05   :  { %v5253_v31 = vmul.f32 %v5251_v12, %v5248_v8 }
0x3d07   :  { %v8763_v58 = vadd.f32 %v5254_v23, %v5253_v31 }
0x3d09   :  { %5257 = vrot.lane.b32.xlu0 %v8763_v58, %s7257_s25 }
0x3d7b   :  { %v5258_v3 = vpop.permute.xlu0 %5257 }
0x3d7c   :  { %6585 = vmatmul.msk.f32.vlgmr.msrb.gmra.mxu0 %vm198_vm12, %v5258_v3 }
0x3d7d   :  { %5641 = vmatpush.msrb.mxu0 %v8574_v39 }
0x3d7f   :  { %5642 = vmatpush.msrb.mxu0 %v8576_v25 }
0x3d81   :  { %5643 = vmatpush.msrb.mxu0 %v8579_v45 }
0x3d83   :  { %5644 = vmatpush.msrb.mxu0 %v8582_v15 }
0x3d84   :  { %6592 = vmatmul.msk.f32.vlgmr.msra.gmra.mxu0 %vm198_vm12, %v5258_v3 }
0x3d85   :  { %5802 = vmatpush.msra.mxu0 %v8516_v47  ;;  %v5351_v47 = vadd.f32 %v5350_v62, %v8540_v17 }
0x3d87   :  { %5803 = vmatpush.msra.mxu0 %v8519_v57 }
0x3d89   :  { %5804 = vmatpush.msra.mxu0 %v8522_v53 }
0x3d8b   :  { %5805 = vmatpush.msra.mxu0 %v8525_v30 }
0x3df9   :  { %v5278_v37 = vpop.f32.mrf.mxu0 }
0x3dfa   :  { %v5279_v43 = vadd.f32 %v8634_v48, %v5278_v37 }
0x3dfc   :  { %v5281_v24 = vmax.f32 %v5279_v43, 0.0 }
0x3dfe   :  { %v5283_v51 = vrot.slane %v5281_v24, 1  ;;  %5285 = vst.msk [vmem:[#allocation7 + $0x2] sm:$0x1] %vm4840_vm10, %v5281_v24  ;;  %v5287_v44 = vsel %vm4843_vm13, %v5281_v24, -inf }
0x3dff   :  { %5288 = vmax.xlane.f32.xlu1 %v5287_v44 }
0x3e00   :  { %5286 = vst.msk [vmem:[#allocation7 + $0xa] sm:$0x1] %vm4840_vm10, %v5283_v51 }
0x3e01   :  { %v5434_v37 = vpop.f32.mrf.mxu0 }
0x3e02   :  { %v5435_v43 = vadd.f32 %v5434_v37, %v8590_v11 }
0x3e18   :  { %5374 = vrot.lane.b32.xlu1 %v5351_v47, %s7256_s0 }
0x3e72   :  { %v5289_v57 = vpop.xlane.xlu1 %5288 }
0x3e73   :  { %vm5290_vm15 = vcmp.eq.f32.partialorder %v5281_v24, %v5289_v57 }
0x3e74   :  { %v5291_v53 = vsel %vm5290_vm15, %v7334_v22, 20 }
0x3e75   :  { %v5292_v30 = vsel %vm4843_vm13, %v5291_v53, 2147483647 }
0x3e76   :  { %v5294_v61 = vshra.s32 %v5292_v30, 16  ;;  %v5293_v36 = vand.u32 65535, %v5292_v30 }
0x3e78   :  { %v5296_v20 = vcvt.s32.f32 %v5294_v61  ;;  %v5295_v13 = vcvt.s32.f32 %v5293_v36 }
0x3e7a   :  { %5297 = vmin.xlane.f32.xlu2 %v5296_v20 }
0x3eed   :  { %v5298_v19 = vpop.xlane.xlu2 %5297 }
0x3eee   :  { %vm5299_vm7 = vcmp.eq.f32.partialorder %v5296_v20, %v5298_v19  ;;  %v5304_v55 = vcvt.f32.s32 %v5298_v19 }
0x3eef   :  { %v5300_v52 = vsel %vm5299_vm7, %v5295_v13, inf }
0x3ef0   :  { %5301 = vmin.xlane.f32.xlu0 %v5300_v52  ;;  %v5305_v14 = vshll.u32 %v5304_v55, 16 }
0x3f63   :  { %v5302_v21 = vpop.xlane.xlu0 %5301 }
0x3f64   :  { %v5303_v59 = vcvt.f32.s32 %v5302_v21 }
0x3f66   :  { %v5306_v40 = vadd.s32 %v5305_v14, %v5303_v59 }
0x3f68   :  { %vm5307_vm1 = vcmp.eq.s32.totalorder %v7334_v22, %v5306_v40 }
0x3f69   :  { %v6586_v7 = vsel %vm5307_vm1, 1.0, %v7255_v26 }
0x3f6a   :  { %6588 = vmatmul.msk.f32.vlgmr.msrb.gmra.mxu2 %vm9045_vm0, %v6586_v7 }
0x3f6b   :  { %5665 = vmatpush.msrb.mxu2 %v8556_v6 }
0x3f6d   :  { %5666 = vmatpush.msrb.mxu2 %v8558_v18 }
0x3f6f   :  { %5667 = vmatpush.msrb.mxu2 %v8561_v49 }
0x3f71   :  { %5668 = vmatpush.msrb.mxu2 %v8564_v33 }
0x3fed   :  { %v5330_v54 = vpop.f32.mrf.mxu2 }
0x3fee   :  { %v5331_v0 = vadd.f32 %v5330_v54, %v8550_v27  ;;  %v5375_v27 = vpop.permute.xlu1 %5374 }
0x3ff0   :  { %v5353_v5 = vadd.f32 %v5351_v47, %v5331_v0 }
0x3ff2   :  { %v6590_v41 = vmul.f32 -1.442695, %v5353_v5 }
0x3ff4   :  { %7106 = vpow2.f32 %v6590_v41 }
0x3ffa   :  { %v7107_v16 = vpop.eup %7106 }
0x3ffb   :  { %v5357_v35 = vadd.f32 1.0, %v7107_v16 }
0x3ffd   :  { %7108 = vrcp.f32 %v5357_v35  ;;  %v5369_v9 = vand.u32 2147483648, %v5357_v35  ;;  %v5367_v18 = vand.u32 2147483647, %v5357_v35  ;;  %vm5363_vm8 = vweird.f32 %v5357_v35 }
0x3fff   :  { %v5370_v49 = vor.u32 1.1754944e-38, %v5369_v9  ;;  %vm5368_vm11 = vcmp.eq.f32.partialorder %v5367_v18, 8.507059e+37 }
0x4003   :  { %v7109_v1 = vpop.eup %7108 }
0x4004   :  { %v5359_v56 = vmul.f32 %v7109_v1, %v5357_v35  ;;  %vm5364_vm5 = vweird.f32 %v7109_v1 }
0x4005   :  { %vm5365_vm4 = vmor %vm5363_vm8, %vm5364_vm5 }
0x4006   :  { %v5360_v32 = vsub.f32 1.0, %v5359_v56 }
0x4008   :  { %v5361_v6 = vmul.f32 %v7109_v1, %v5360_v32 }
0x400a   :  { %v5362_v46 = vadd.f32 %v7109_v1, %v5361_v6 }
0x400c   :  { %v5366_v33 = vsel %vm5365_vm4, %v7109_v1, %v5362_v46 }
0x400d   :  { %v5371_v8 = vsel %vm5368_vm11, %v5370_v49, %v5366_v33 }
0x400e   :  { %v5377_v12 = vmul.f32 %v5375_v27, %v5371_v8  ;;  %v5384_v24 = vsub.f32 1.0, %v5371_v8  ;;  %v5390_v44 = vmul.f32 %v5371_v8, %v8745_v38 }
0x4010   :  { %5379 = vrot.lane.b32.xlu2 %v5377_v12, %s7256_s0 }
0x406a   :  { %v5380_v23 = vpop.permute.xlu2 %5379 }
0x406b   :  { %v5382_v31 = vadd.f32 %v5380_v23, %v5331_v0 }
0x406d   :  { %7110 = vtanh.f32 %v5382_v31 }
0x4073   :  { %v7111_v3 = vpop.eup %7110 }
0x4074   :  { %5386 = vrot.lane.b32.xlu0 %v7111_v3, %s7257_s25 }
0x407c   :  { %5458 = vrot.lane.b32.xlu0 %v5435_v43, %s7256_s0 }
0x40e6   :  { %v5387_v51 = vpop.permute.xlu0 %5386 }
0x40e7   :  { %v5389_v62 = vmul.f32 %v5387_v51, %v5384_v24  ;;  %v8833_v51 = vld [vmem:[#allocation4 + $0x2f8] sm:$0xff] }
0x40e9   :  { %v5391_v47 = vadd.f32 %v5390_v44, %v5389_v62  ;;  %v8836_v44 = vld [vmem:[#allocation4 + $0x2f0] sm:$0xff]  ;;  %v8839_v62 = vld [vmem:[#allocation4 + $0x2e8] sm:$0xff] }
0x40eb   :  { %5393 = vrot.lane.b32.xlu1 %v5391_v47, %s7257_s25  ;;  %v8842_v47 = vld [vmem:[#allocation4 + $0x2e0] sm:$0xff] }
0x40ee   :  { %v5459_v14 = vpop.permute.xlu0 %5458 }
0x415d   :  { %v5394_v57 = vpop.permute.xlu1 %5393 }
0x415e   :  { %6591 = vmatmul.msk.f32.vlgmr.msrb.gmra.mxu3 %vm198_vm12, %v5394_v57 }
0x415f   :  { %6605 = vmatpush.msk.msrb.mxu3 %vm104_vm2, %v8655_v63 }
0x4161   :  { %5784 = vmatpush.msrb.mxu3 %v8653_v50 }
0x4163   :  { %5785 = vmatpush.msrb.mxu3 %v8651_v34 }
0x4166   :  { %6598 = vmatmul.msk.f32.vlgmr.msra.gmra.mxu3 %vm198_vm12, %v8535_v60 }
0x4167   :  { %5950 = vmatpush.msra.mxu3 %v8601_v10 }
0x4169   :  { %5951 = vmatpush.msra.mxu3 %v8603_v29 }
0x416b   :  { %5952 = vmatpush.msra.mxu3 %v8607_v42 }
0x416d   :  { %5953 = vmatpush.msra.mxu3 %v8611_v4 }
0x41e1   :  { %v5414_v38 = vpop.f32.mrf.mxu3 }
0x41e2   :  { %v5415_v53 = vadd.f32 %v5414_v38, %v8596_v28 }
0x41e4   :  { %v5437_v30 = vadd.f32 %v5435_v43, %v5415_v53 }
0x41e6   :  { %v6593_v61 = vmul.f32 -1.442695, %v5437_v30 }
0x41e8   :  { %7112 = vpow2.f32 %v6593_v61 }
0x41e9   :  { %v5579_v46 = vpop.f32.mrf.mxu3 }
0x41ee   :  { %v7113_v20 = vpop.eup %7112 }
0x41ef   :  { %v5441_v36 = vadd.f32 1.0, %v7113_v20 }
0x41f1   :  { %7114 = vrcp.f32 %v5441_v36  ;;  %v5453_v55 = vand.u32 2147483648, %v5441_v36  ;;  %v5451_v29 = vand.u32 2147483647, %v5441_v36  ;;  %vm5447_vm3 = vweird.f32 %v5441_v36 }
0x41f3   :  { %v5454_v42 = vor.u32 1.1754944e-38, %v5453_v55  ;;  %vm5452_vm9 = vcmp.eq.f32.partialorder %v5451_v29, 8.507059e+37 }
0x41f7   :  { %v7115_v19 = vpop.eup %7114 }
0x41f8   :  { %v5443_v13 = vmul.f32 %v7115_v19, %v5441_v36  ;;  %vm5448_vm14 = vweird.f32 %v7115_v19 }
0x41f9   :  { %vm5449_vm6 = vmor %vm5447_vm3, %vm5448_vm14 }
0x41fa   :  { %v5444_v52 = vsub.f32 1.0, %v5443_v13 }
0x41fc   :  { %v5445_v10 = vmul.f32 %v7115_v19, %v5444_v52 }
0x41fe   :  { %v5446_v21 = vadd.f32 %v7115_v19, %v5445_v10 }
0x4200   :  { %v5450_v4 = vsel %vm5449_vm6, %v7115_v19, %v5446_v21 }
0x4201   :  { %v5455_v59 = vsel %vm5452_vm9, %v5454_v42, %v5450_v4 }
0x4202   :  { %v5461_v40 = vmul.f32 %v5459_v14, %v5455_v59  ;;  %v5468_v5 = vsub.f32 1.0, %v5455_v59  ;;  %v5474_v16 = vmul.f32 %v5455_v59, %v8763_v58 }
0x4204   :  { %5463 = vrot.lane.b32.xlu2 %v5461_v40, %s7256_s0 }
0x425e   :  { %v5464_v7 = vpop.permute.xlu2 %5463 }
0x425f   :  { %v5466_v54 = vadd.f32 %v5464_v7, %v5415_v53 }
0x4261   :  { %7116 = vtanh.f32 %v5466_v54 }
0x4267   :  { %v7117_v0 = vpop.eup %7116 }
0x4268   :  { %5470 = vrot.lane.b32.xlu1 %v7117_v0, %s7257_s25 }
0x42da   :  { %v5471_v41 = vpop.permute.xlu1 %5470 }
0x42db   :  { %v5473_v35 = vmul.f32 %v5471_v41, %v5468_v5 }
0x42dd   :  { %v5475_v1 = vadd.f32 %v5474_v16, %v5473_v35 }
0x42df   :  { %5477 = vrot.lane.b32.xlu0 %v5475_v1, %s7257_s25 }
0x4351   :  { %v5478_v56 = vpop.permute.xlu0 %5477 }
0x4352   :  { %6594 = vmatmul.msk.f32.vlgmr.msra.gmra.mxu2 %vm198_vm12, %v5478_v56 }
0x4353   :  { %5866 = vmatpush.msra.mxu2 %v8574_v39  ;;  %v5580_v39 = vadd.f32 %v5579_v46, %v8540_v17  ;;  %v8873_v46 = vld [vmem:[#allocation4 + $0x3d0] sm:$0xff] }
0x4355   :  { %5867 = vmatpush.msra.mxu2 %v8576_v25 }
0x4357   :  { %5868 = vmatpush.msra.mxu2 %v8579_v45 }
0x4359   :  { %5869 = vmatpush.msra.mxu2 %v8582_v15 }
0x43d5   :  { %v5498_v32 = vpop.f32.mrf.mxu2 }
0x43d6   :  { %v5499_v9 = vadd.f32 %v8634_v48, %v5498_v32  ;;  %v8855_v32 = vld [vmem:[#allocation4 + $0x3a8] sm:$0xff] }
0x43d8   :  { %v5501_v6 = vmax.f32 %v5499_v9, 0.0  ;;  %v8858_v9 = vld [vmem:[#allocation4 + $0x3a0] sm:$0xff] }
0x43da   :  { %v5503_v58 = vrot.slane %v5501_v6, 1  ;;  %5505 = vst.msk [vmem:[#allocation7 + $0x3] sm:$0x1] %vm4840_vm10, %v5501_v6  ;;  %v5507_v18 = vsel %vm4843_vm13, %v5501_v6, -inf }
0x43db   :  { %5508 = vmax.xlane.f32.xlu2 %v5507_v18 }
0x43dc   :  { %5506 = vst.msk [vmem:[#allocation7 + $0xb] sm:$0x1] %vm4840_vm10, %v5503_v58  ;;  %v8864_v58 = vld [vmem:[#allocation4 + $0x390] sm:$0xff] }
0x43f3   :  { %5603 = vrot.lane.b32.xlu2 %v5580_v39, %s7256_s0 }
0x43fb   :  { %5619 = vrot.lane.b32.xlu2 %v8535_v60, %s7258_s26 }
0x444e   :  { %v5509_v25 = vpop.xlane.xlu2 %5508 }
0x444f   :  { %vm5510_vm15 = vcmp.eq.f32.partialorder %v5501_v6, %v5509_v25  ;;  %v8861_v6 = vld [vmem:[#allocation4 + $0x398] sm:$0xff]  ;;  %v8879_v25 = vld [vmem:[#allocation4 + $0x3c0] sm:$0xff] }
0x4450   :  { %v5511_v45 = vsel %vm5510_vm15, %v7334_v22, 20 }
0x4451   :  { %v5512_v15 = vsel %vm4843_vm13, %v5511_v45, 2147483647  ;;  %v8882_v45 = vld [vmem:[#allocation4 + $0x3b8] sm:$0xff] }
0x4452   :  { %v5514_v48 = vshra.s32 %v5512_v15, 16  ;;  %v5513_v33 = vand.u32 65535, %v5512_v15 }
0x4454   :  { %v5516_v49 = vcvt.s32.f32 %v5514_v48  ;;  %v5515_v8 = vcvt.s32.f32 %v5513_v33 }
0x4456   :  { %5517 = vmin.xlane.f32.xlu1 %v5516_v49  ;;  %v5604_v4 = vpop.permute.xlu2 %5603 }
0x445e   :  { %v5620_v5 = vpop.permute.xlu2 %5619 }
0x44c9   :  { %v5518_v27 = vpop.xlane.xlu1 %5517 }
0x44ca   :  { %vm5519_vm7 = vcmp.eq.f32.partialorder %v5516_v49, %v5518_v27  ;;  %v5524_v23 = vcvt.f32.s32 %v5518_v27 }
0x44cb   :  { %v5520_v12 = vsel %vm5519_vm7, %v5515_v8, inf }
0x44cc   :  { %5521 = vmin.xlane.f32.xlu0 %v5520_v12  ;;  %v5525_v3 = vshll.u32 %v5524_v23, 16 }
0x453f   :  { %v5522_v31 = vpop.xlane.xlu0 %5521 }
0x4540   :  { %v5523_v37 = vcvt.f32.s32 %v5522_v31 }
0x4542   :  { %v5526_v43 = vadd.s32 %v5525_v3, %v5523_v37 }
0x4544   :  { %vm5527_vm1 = vcmp.eq.s32.totalorder %v7334_v22, %v5526_v43 }
0x4545   :  { %v6595_v24 = vsel %vm5527_vm1, 1.0, %v7255_v26 }
0x4546   :  { %6597 = vmatmul.msk.f32.vlgmr.msra.gmra.mxu1 %vm9045_vm0, %v6595_v24 }
0x4547   :  { %5886 = vmatpush.msra.mxu1 %v8833_v51 }
0x4549   :  { %5887 = vmatpush.msra.mxu1 %v8836_v44 }
0x454b   :  { %5888 = vmatpush.msra.mxu1 %v8839_v62 }
0x454d   :  { %5889 = vmatpush.msra.mxu1 %v8842_v47 }
0x45c3   :  { %v5554_v57 = vpop.f32.mrf.mxu1 }
0x45c4   :  { %v5555_v38 = vadd.f32 %v5554_v57, %v8545_v2 }
0x45c6   :  { %v5582_v53 = vadd.f32 %v5580_v39, %v5555_v38  ;;  %v8876_v39 = vld [vmem:[#allocation4 + $0x3c8] sm:$0xff] }
0x45c8   :  { %v6599_v30 = vmul.f32 -1.442695, %v5582_v53 }
0x45ca   :  { %7118 = vpow2.f32 %v6599_v30 }
0x45d0   :  { %v7119_v61 = vpop.eup %7118 }
0x45d1   :  { %v5586_v20 = vadd.f32 1.0, %v7119_v61 }
0x45d3   :  { %7120 = vrcp.f32 %v5586_v20  ;;  %v5598_v52 = vand.u32 2147483648, %v5586_v20  ;;  %v5596_v10 = vand.u32 2147483647, %v5586_v20  ;;  %vm5592_vm8 = vweird.f32 %v5586_v20 }
0x45d5   :  { %v5599_v21 = vor.u32 1.1754944e-38, %v5598_v52  ;;  %vm5597_vm11 = vcmp.eq.f32.partialorder %v5596_v10, 8.507059e+37 }
0x45d9   :  { %v7121_v36 = vpop.eup %7120 }
0x45da   :  { %v5588_v19 = vmul.f32 %v7121_v36, %v5586_v20  ;;  %vm5593_vm5 = vweird.f32 %v7121_v36 }
0x45db   :  { %vm5594_vm4 = vmor %vm5592_vm8, %vm5593_vm5 }
0x45dc   :  { %v5589_v13 = vsub.f32 1.0, %v5588_v19 }
0x45de   :  { %v5590_v55 = vmul.f32 %v7121_v36, %v5589_v13 }
0x45e0   :  { %v5591_v29 = vadd.f32 %v7121_v36, %v5590_v55 }
0x45e2   :  { %v5595_v42 = vsel %vm5594_vm4, %v7121_v36, %v5591_v29 }
0x45e3   :  { %v5600_v14 = vsel %vm5597_vm11, %v5599_v21, %v5595_v42 }
0x45e4   :  { %v5606_v59 = vmul.f32 %v5604_v4, %v5600_v14  ;;  %v5613_v0 = vsub.f32 1.0, %v5600_v14  ;;  %v5622_v35 = vmul.f32 %v5620_v5, %v5600_v14  ;;  %v8896_v14 = vld [vmem:[#allocation4 + $0x2d8] sm:$0xff] }
0x45e6   :  { %5608 = vrot.lane.b32.xlu1 %v5606_v59, %s7256_s0  ;;  %v8899_v59 = vld [vmem:[#allocation4 + $0x2d0] sm:$0xff] }
0x4658   :  { %v5609_v40 = vpop.permute.xlu1 %5608 }
0x4659   :  { %v5611_v7 = vadd.f32 %v5609_v40, %v5555_v38  ;;  %v8902_v40 = vld [vmem:[#allocation4 + $0x2c8] sm:$0xff] }
0x465b   :  { %7122 = vtanh.f32 %v5611_v7 }
0x4661   :  { %v7123_v54 = vpop.eup %7122 }
0x4662   :  { %5615 = vrot.lane.b32.xlu0 %v7123_v54, %s7257_s25  ;;  %v8913_v54 = vld [vmem:[#allocation4 + $0x3d8] ss:$0 sm:$0xff] }
0x466a   :  { %5649 = vrot.lane.b32.xlu0 %v8535_v60, %s7257_s25 }
0x46d4   :  { %v5616_v41 = vpop.permute.xlu0 %5615 }
0x46d5   :  { %v5618_v16 = vmul.f32 %v5616_v41, %v5613_v0 }
0x46d7   :  { %v8850_v1 = vadd.f32 %v5622_v35, %v5618_v16 }
0x46d9   :  { %5625 = vrot.lane.b32.xlu1 %v8850_v1, %s7257_s25 }
0x46dc   :  { %v5650_v56 = vpop.permute.xlu0 %5649 }
0x46dd   :  { %6601 = vmatmul.msk.f32.vlgmr.msrb.gmra.mxu2 %vm198_vm12, %v5650_v56 }
0x46de   :  { %6022 = vmatpush.msrb.mxu2 %v8855_v32 }
0x46e0   :  { %6023 = vmatpush.msrb.mxu2 %v8858_v9 }
0x46e2   :  { %6024 = vmatpush.msrb.mxu2 %v8861_v6 }
0x46e4   :  { %6025 = vmatpush.msrb.mxu2 %v8864_v58 }
0x474b   :  { %v5626_v18 = vpop.permute.xlu1 %5625 }
0x474c   :  { %6600 = vmatmul.msk.f32.vlgmr.msrb.gmra.mxu0 %vm198_vm12, %v5626_v18 }
0x474d   :  { %6614 = vmatpush.msk.msrb.mxu0 %vm104_vm2, %v8655_v63 }
0x474f   :  { %6004 = vmatpush.msrb.mxu0 %v8653_v50 }
0x4751   :  { %6005 = vmatpush.msrb.mxu0 %v8651_v34 }
0x4754   :  { %6607 = vmatmul.msk.f32.vlgmr.msra.gmra.mxu0 %vm198_vm12, %v5626_v18 }
0x4755   :  { %6170 = vmatpush.msra.mxu0 %v8873_v46 }
0x4757   :  { %6171 = vmatpush.msra.mxu0 %v8876_v39 }
0x4759   :  { %6172 = vmatpush.msra.mxu0 %v8879_v25 }
0x475b   :  { %6173 = vmatpush.msra.mxu0 %v8882_v45 }
0x4760   :  { %v5670_v15 = vpop.f32.mrf.mxu2 }
0x4761   :  { %v5671_v48 = vadd.f32 %v5670_v15, %v8590_v11 }
0x4763   :  { %5694 = vrot.lane.b32.xlu2 %v5671_v48, %s7256_s0 }
0x47bd   :  { %v5695_v61 = vpop.permute.xlu2 %5694 }
0x47c9   :  { %v5646_v49 = vpop.f32.mrf.mxu0 }
0x47ca   :  { %v5647_v33 = vadd.f32 %v5646_v49, %v8596_v28 }
0x47cc   :  { %v5673_v27 = vadd.f32 %v5671_v48, %v5647_v33 }
0x47ce   :  { %v6602_v8 = vmul.f32 -1.442695, %v5673_v27 }
0x47d0   :  { %7124 = vpow2.f32 %v6602_v8 }
0x47d1   :  { %v5807_v35 = vpop.f32.mrf.mxu0 }
0x47d2   :  { %v5808_v56 = vadd.f32 %v5807_v35, %v8540_v17 }
0x47d6   :  { %v7125_v12 = vpop.eup %7124 }
0x47d7   :  { %v5677_v23 = vadd.f32 1.0, %v7125_v12 }
0x47d9   :  { %7126 = vrcp.f32 %v5677_v23  ;;  %v5689_v43 = vand.u32 2147483648, %v5677_v23  ;;  %v5687_v57 = vand.u32 2147483647, %v5677_v23  ;;  %vm5683_vm3 = vweird.f32 %v5677_v23 }
0x47db   :  { %v5690_v53 = vor.u32 1.1754944e-38, %v5689_v43  ;;  %vm5688_vm9 = vcmp.eq.f32.partialorder %v5687_v57, 8.507059e+37 }
0x47df   :  { %v7127_v31 = vpop.eup %7126 }
0x47e0   :  { %v5679_v3 = vmul.f32 %v7127_v31, %v5677_v23  ;;  %vm5684_vm14 = vweird.f32 %v7127_v31 }
0x47e1   :  { %vm5685_vm6 = vmor %vm5683_vm3, %vm5684_vm14 }
0x47e2   :  { %v5680_v37 = vsub.f32 1.0, %v5679_v3 }
0x47e4   :  { %v5681_v24 = vmul.f32 %v7127_v31, %v5680_v37 }
0x47e6   :  { %v5682_v38 = vadd.f32 %v7127_v31, %v5681_v24 }
0x47e8   :  { %v5686_v30 = vsel %vm5685_vm6, %v7127_v31, %v5682_v38 }
0x47e9   :  { %v5691_v20 = vsel %vm5688_vm9, %v5690_v53, %v5686_v30 }
0x47ea   :  { %v5697_v36 = vmul.f32 %v5695_v61, %v5691_v20  ;;  %v5704_v55 = vsub.f32 1.0, %v5691_v20  ;;  %v5711_v29 = vmul.f32 %v5691_v20, %v8535_v60  ;;  %v8905_v60 = vld [vmem:[#allocation4 + $0x2c0] sm:$0xff] }
0x47ec   :  { %5699 = vrot.lane.b32.xlu0 %v5697_v36, %s7256_s0 }
0x485e   :  { %v5700_v19 = vpop.permute.xlu0 %5699 }
0x485f   :  { %v5702_v13 = vadd.f32 %v5700_v19, %v5647_v33 }
0x4861   :  { %7128 = vtanh.f32 %v5702_v13 }
0x4867   :  { %v7129_v52 = vpop.eup %7128 }
0x4868   :  { %5706 = vrot.lane.b32.xlu1 %v7129_v52, %s7257_s25 }
0x48da   :  { %v5707_v10 = vpop.permute.xlu1 %5706 }
0x48db   :  { %v5709_v21 = vmul.f32 %v5707_v10, %v5704_v55 }
0x48dd   :  { %v8891_v42 = vadd.f32 %v5711_v29, %v5709_v21 }
0x48df   :  { %5714 = vrot.lane.b32.xlu2 %v8891_v42, %s7257_s25 }
0x4939   :  { %v5715_v4 = vpop.permute.xlu2 %5714 }
0x493a   :  { %6603 = vmatmul.msk.f32.vlgmr.msrb.gmra.mxu1 %vm198_vm12, %v5715_v4 }
0x493b   :  { %6086 = vmatpush.msrb.mxu1 %v8896_v14 }
0x493d   :  { %6087 = vmatpush.msrb.mxu1 %v8899_v59 }
0x493f   :  { %6088 = vmatpush.msrb.mxu1 %v8902_v40 }
0x4941   :  { %6089 = vmatpush.msrb.mxu1 %v8905_v60 }
0x4942   :  { %6610 = vmatmul.msk.f32.vlgmr.msra.gmra.mxu1 %vm198_vm12, %v5715_v4 }
0x4943   :  { %6242 = vmatpush.msra.mxu1 %v8855_v32 }
0x4945   :  { %6243 = vmatpush.msra.mxu1 %v8858_v9 }
0x4947   :  { %6244 = vmatpush.msra.mxu1 %v8861_v6 }
0x4949   :  { %6245 = vmatpush.msra.mxu1 %v8864_v58 }
0x49b7   :  { %v5735_v7 = vpop.f32.mrf.mxu1 }
0x49b8   :  { %v5736_v0 = vadd.f32 %v8913_v54, %v5735_v7 }
0x49ba   :  { %v5738_v5 = vmax.f32 %v5736_v0, 0.0 }
0x49bc   :  { %v5740_v41 = vrot.slane %v5738_v5, 1  ;;  %5742 = vst.msk [vmem:[#allocation7 + $0x4] sm:$0x1] %vm4840_vm10, %v5738_v5  ;;  %v5744_v16 = vsel %vm4843_vm13, %v5738_v5, -inf }
0x49bd   :  { %5745 = vmax.xlane.f32.xlu0 %v5744_v16 }
0x49be   :  { %5743 = vst.msk [vmem:[#allocation7 + $0xc] sm:$0x1] %vm4840_vm10, %v5740_v41 }
0x49bf   :  { %v5891_v7 = vpop.f32.mrf.mxu1 }
0x49c0   :  { %v5892_v0 = vadd.f32 %v5891_v7, %v8590_v11 }
0x49d1   :  { %5831 = vrot.lane.b32.xlu0 %v5808_v56, %s7256_s0 }
0x4a30   :  { %v5746_v32 = vpop.xlane.xlu0 %5745 }
0x4a31   :  { %vm5747_vm15 = vcmp.eq.f32.partialorder %v5738_v5, %v5746_v32 }
0x4a32   :  { %v5748_v9 = vsel %vm5747_vm15, %v7334_v22, 20 }
0x4a33   :  { %v5749_v6 = vsel %vm4843_vm13, %v5748_v9, 2147483647 }
0x4a34   :  { %v5751_v58 = vshra.s32 %v5749_v6, 16  ;;  %v5750_v15 = vand.u32 65535, %v5749_v6 }
0x4a36   :  { %v5753_v18 = vcvt.s32.f32 %v5751_v58  ;;  %v5752_v49 = vcvt.s32.f32 %v5750_v15 }
0x4a38   :  { %5754 = vmin.xlane.f32.xlu1 %v5753_v18 }
0x4a43   :  { %v5832_v29 = vpop.permute.xlu0 %5831 }
0x4aab   :  { %v5755_v48 = vpop.xlane.xlu1 %5754 }
0x4aac   :  { %vm5756_vm7 = vcmp.eq.f32.partialorder %v5753_v18, %v5755_v48  ;;  %v5761_v27 = vcvt.f32.s32 %v5755_v48 }
0x4aad   :  { %v5757_v33 = vsel %vm5756_vm7, %v5752_v49, inf }
0x4aae   :  { %5758 = vmin.xlane.f32.xlu2 %v5757_v33  ;;  %v5762_v12 = vshll.u32 %v5761_v27, 16 }
0x4b21   :  { %v5759_v8 = vpop.xlane.xlu2 %5758 }
0x4b22   :  { %v5760_v23 = vcvt.f32.s32 %v5759_v8 }
0x4b24   :  { %v5763_v31 = vadd.s32 %v5762_v12, %v5760_v23 }
0x4b26   :  { %vm5764_vm1 = vcmp.eq.s32.totalorder %v7334_v22, %v5763_v31 }
0x4b27   :  { %v6604_v3 = vsel %vm5764_vm1, 1.0, %v7255_v26  ;;  %vm9046_vm1 = vmmov %vm9045_vm0 }
0x4b28   :  { %6606 = vmatmul.msk.f32.vlgmr.msrb.gmra.mxu3 %vm9045_vm0, %v6604_v3 }
0x4b29   :  { %6106 = vmatpush.msrb.mxu3 %v8833_v51 }
0x4b2b   :  { %6107 = vmatpush.msrb.mxu3 %v8836_v44 }
0x4b2d   :  { %6108 = vmatpush.msrb.mxu3 %v8839_v62 }
0x4b2f   :  { %6109 = vmatpush.msrb.mxu3 %v8842_v47 }
0x4bab   :  { %v5787_v37 = vpop.f32.mrf.mxu3 }
0x4bac   :  { %v5788_v43 = vadd.f32 %v5787_v37, %v8545_v2 }
0x4bae   :  { %v5810_v24 = vadd.f32 %v5808_v56, %v5788_v43 }
0x4bb0   :  { %v6608_v57 = vmul.f32 -1.442695, %v5810_v24 }
0x4bb2   :  { %7130 = vpow2.f32 %v6608_v57 }
0x4bb8   :  { %v7131_v38 = vpop.eup %7130 }
0x4bb9   :  { %v5814_v53 = vadd.f32 1.0, %v7131_v38 }
0x4bbb   :  { %7132 = vrcp.f32 %v5814_v53  ;;  %v5826_v36 = vand.u32 2147483648, %v5814_v53  ;;  %v5824_v13 = vand.u32 2147483647, %v5814_v53  ;;  %vm5820_vm8 = vweird.f32 %v5814_v53 }
0x4bbd   :  { %v5827_v55 = vor.u32 1.1754944e-38, %v5826_v36  ;;  %vm5825_vm11 = vcmp.eq.f32.partialorder %v5824_v13, 8.507059e+37 }
0x4bc1   :  { %v7133_v30 = vpop.eup %7132 }
0x4bc2   :  { %v5816_v61 = vmul.f32 %v7133_v30, %v5814_v53  ;;  %vm5821_vm5 = vweird.f32 %v7133_v30 }
0x4bc3   :  { %vm5822_vm4 = vmor %vm5820_vm8, %vm5821_vm5 }
0x4bc4   :  { %v5817_v20 = vsub.f32 1.0, %v5816_v61 }
0x4bc6   :  { %v5818_v19 = vmul.f32 %v7133_v30, %v5817_v20 }
0x4bc8   :  { %v5819_v52 = vadd.f32 %v7133_v30, %v5818_v19 }
0x4bca   :  { %v5823_v10 = vsel %vm5822_vm4, %v7133_v30, %v5819_v52 }
0x4bcb   :  { %v5828_v21 = vsel %vm5825_vm11, %v5827_v55, %v5823_v10 }
0x4bcc   :  { %v5834_v4 = vmul.f32 %v5832_v29, %v5828_v21  ;;  %v5841_v35 = vsub.f32 1.0, %v5828_v21  ;;  %v5847_v32 = vmul.f32 %v5828_v21, %v8850_v1 }
0x4bce   :  { %5836 = vrot.lane.b32.xlu2 %v5834_v4, %s7256_s0 }
0x4bd6   :  { %5915 = vrot.lane.b32.xlu2 %v5892_v0, %s7256_s0 }
0x4c28   :  { %v5837_v5 = vpop.permute.xlu2 %5836 }
0x4c29   :  { %v5839_v41 = vadd.f32 %v5837_v5, %v5788_v43 }
0x4c2b   :  { %7134 = vtanh.f32 %v5839_v41 }
0x4c30   :  { %v5916_v12 = vpop.permute.xlu2 %5915 }
0x4c31   :  { %v7135_v16 = vpop.eup %7134 }
0x4c32   :  { %5843 = vrot.lane.b32.xlu1 %v7135_v16, %s7257_s25 }
0x4ca4   :  { %v5844_v56 = vpop.permute.xlu1 %5843 }
0x4ca5   :  { %v5846_v9 = vmul.f32 %v5844_v56, %v5841_v35 }
0x4ca7   :  { %v8936_v6 = vadd.f32 %v5847_v32, %v5846_v9 }
0x4ca9   :  { %5850 = vrot.lane.b32.xlu0 %v8936_v6, %s7257_s25 }
0x4d1b   :  { %v5851_v58 = vpop.permute.xlu0 %5850 }
0x4d1c   :  { %6609 = vmatmul.msk.f32.vlgmr.msra.gmra.mxu2 %vm198_vm12, %v5851_v58 }
0x4d1d   :  { %6623 = vmatpush.msk.msra.mxu2 %vm104_vm2, %v8655_v63 }
0x4d1f   :  { %6224 = vmatpush.msra.mxu2 %v8653_v50 }
0x4d21   :  { %6225 = vmatpush.msra.mxu2 %v8651_v34 }
0x4d24   :  { %6616 = vmatmul.msk.f32.vlgmr.msrb.gmra.mxu2 %vm198_vm12, %v5851_v58 }
0x4d25   :  { %6390 = vmatpush.msrb.mxu2 %v8873_v46 }
0x4d27   :  { %6391 = vmatpush.msrb.mxu2 %v8876_v39 }
0x4d29   :  { %6392 = vmatpush.msrb.mxu2 %v8879_v25 }
0x4d2b   :  { %6393 = vmatpush.msrb.mxu2 %v8882_v45 }
0x4d9f   :  { %v5871_v1 = vpop.f32.mrf.mxu2 }
0x4da0   :  { %v5872_v18 = vadd.f32 %v5871_v1, %v8596_v28 }
0x4da2   :  { %v5894_v15 = vadd.f32 %v5892_v0, %v5872_v18 }
0x4da4   :  { %v6611_v48 = vmul.f32 -1.442695, %v5894_v15 }
0x4da6   :  { %7136 = vpow2.f32 %v6611_v48 }
0x4dac   :  { %v7137_v63 = vpop.eup %7136 }
0x4dad   :  { %v5898_v50 = vadd.f32 1.0, %v7137_v63 }
0x4daf   :  { %7138 = vrcp.f32 %v5898_v50  ;;  %v5910_v27 = vand.u32 2147483648, %v5898_v50  ;;  %v5908_v39 = vand.u32 2147483647, %v5898_v50  ;;  %vm5904_vm14 = vweird.f32 %v5898_v50 }
0x4db1   :  { %v5911_v25 = vor.u32 1.1754944e-38, %v5910_v27  ;;  %vm5909_vm6 = vcmp.eq.f32.partialorder %v5908_v39, 8.507059e+37 }
0x4db5   :  { %v7139_v34 = vpop.eup %7138 }
0x4db6   :  { %v5900_v49 = vmul.f32 %v7139_v34, %v5898_v50  ;;  %vm5905_vm2 = vweird.f32 %v7139_v34 }
0x4db7   :  { %vm5906_vm3 = vmor %vm5904_vm14, %vm5905_vm2 }
0x4db8   :  { %v5901_v33 = vsub.f32 1.0, %v5900_v49 }
0x4dba   :  { %v5902_v46 = vmul.f32 %v7139_v34, %v5901_v33 }
0x4dbc   :  { %v5903_v8 = vadd.f32 %v7139_v34, %v5902_v46 }
0x4dbe   :  { %v5907_v45 = vsel %vm5906_vm3, %v7139_v34, %v5903_v8 }
0x4dbf   :  { %v5912_v23 = vsel %vm5909_vm6, %v5911_v25, %v5907_v45 }
0x4dc0   :  { %v5918_v31 = vmul.f32 %v5916_v12, %v5912_v23  ;;  %v5925_v24 = vsub.f32 1.0, %v5912_v23  ;;  %v5931_v38 = vmul.f32 %v5912_v23, %v8891_v42 }
0x4dc2   :  { %5920 = vrot.lane.b32.xlu0 %v5918_v31, %s7256_s0 }
0x4e34   :  { %v5921_v3 = vpop.permute.xlu0 %5920 }
0x4e35   :  { %v5923_v37 = vadd.f32 %v5921_v3, %v5872_v18 }
0x4e37   :  { %7140 = vtanh.f32 %v5923_v37 }
0x4e3d   :  { %v7141_v43 = vpop.eup %7140 }
0x4e3e   :  { %5927 = vrot.lane.b32.xlu1 %v7141_v43, %s7257_s25 }
0x4eb0   :  { %v5928_v57 = vpop.permute.xlu1 %5927 }
0x4eb1   :  { %v5930_v53 = vmul.f32 %v5928_v57, %v5925_v24 }
0x4eb3   :  { %v8954_v30 = vadd.f32 %v5931_v38, %v5930_v53 }
0x4eb5   :  { %5934 = vrot.lane.b32.xlu2 %v8954_v30, %s7257_s25 }
0x4f0f   :  { %v5935_v61 = vpop.permute.xlu2 %5934 }
0x4f10   :  { %6612 = vmatmul.msk.f32.vlgmr.msra.gmra.mxu3 %vm198_vm12, %v5935_v61 }
0x4f11   :  { %6306 = vmatpush.msra.mxu3 %v8896_v14  ;;  %v6027_v14 = vpop.f32.mrf.mxu2 }
0x4f13   :  { %6307 = vmatpush.msra.mxu3 %v8899_v59  ;;  %v6028_v59 = vadd.f32 %v6027_v14, %v8540_v17 }
0x4f15   :  { %6308 = vmatpush.msra.mxu3 %v8902_v40 }
0x4f17   :  { %6309 = vmatpush.msra.mxu3 %v8905_v60 }
0x4f18   :  { %6619 = vmatmul.msk.f32.vlgmr.msrb.gmra.mxu3 %vm198_vm12, %v5935_v61 }
0x4f93   :  { %v5955_v42 = vpop.f32.mrf.mxu3 }
0x4f94   :  { %v5956_v20 = vadd.f32 %v8913_v54, %v5955_v42 }
0x4f96   :  { %v5958_v36 = vmax.f32 %v5956_v20, 0.0 }
0x4f98   :  { %v5960_v19 = vrot.slane %v5958_v36, 1  ;;  %5962 = vst.msk [vmem:[#allocation7 + $0x5] sm:$0x1] %vm4840_vm10, %v5958_v36  ;;  %v5964_v13 = vsel %vm4843_vm13, %v5958_v36, -inf }
0x4f99   :  { %5965 = vmax.xlane.f32.xlu0 %v5964_v13 }
0x4f9a   :  { %5963 = vst.msk [vmem:[#allocation7 + $0xd] sm:$0x1] %vm4840_vm10, %v5960_v19 }
0x4f9b   :  { %v6111_v39 = vpop.f32.mrf.mxu3 }
0x4f9c   :  { %v6112_v8 = vadd.f32 %v6111_v39, %v8590_v11 }
0x4fad   :  { %6051 = vrot.lane.b32.xlu0 %v6028_v59, %s7256_s0 }
0x500c   :  { %v5966_v40 = vpop.xlane.xlu0 %5965 }
0x500d   :  { %vm5967_vm9 = vcmp.eq.f32.partialorder %v5958_v36, %v5966_v40 }
0x500e   :  { %v5968_v60 = vsel %vm5967_vm9, %v7334_v22, 20 }
0x500f   :  { %v5969_v52 = vsel %vm4843_vm13, %v5968_v60, 2147483647 }
0x5010   :  { %v5971_v55 = vshra.s32 %v5969_v52, 16  ;;  %v5970_v29 = vand.u32 65535, %v5969_v52 }
0x5012   :  { %v5973_v10 = vcvt.s32.f32 %v5971_v55  ;;  %v5972_v4 = vcvt.s32.f32 %v5970_v29 }
0x5014   :  { %5974 = vmin.xlane.f32.xlu1 %v5973_v10 }
0x501f   :  { %v6052_v33 = vpop.permute.xlu0 %6051 }
0x5087   :  { %v5975_v21 = vpop.xlane.xlu1 %5974 }
0x5088   :  { %vm5976_vm15 = vcmp.eq.f32.partialorder %v5973_v10, %v5975_v21  ;;  %v5981_v0 = vcvt.f32.s32 %v5975_v21 }
0x5089   :  { %v5977_v7 = vsel %vm5976_vm15, %v5972_v4, inf }
0x508a   :  { %5978 = vmin.xlane.f32.xlu2 %v5977_v7  ;;  %v5982_v41 = vshll.u32 %v5981_v0, 16 }
0x50fd   :  { %v5979_v5 = vpop.xlane.xlu2 %5978 }
0x50fe   :  { %v5980_v16 = vcvt.f32.s32 %v5979_v5 }
0x5100   :  { %v5983_v35 = vadd.s32 %v5982_v41, %v5980_v16 }
0x5102   :  { %vm5984_vm7 = vcmp.eq.s32.totalorder %v7334_v22, %v5983_v35 }
0x5103   :  { %v6613_v56 = vsel %vm5984_vm7, 1.0, %v7255_v26  ;;  %vm9047_vm7 = vmmov %vm9046_vm1 }
0x5104   :  { %6615 = vmatmul.msk.f32.vlgmr.msrb.gmra.mxu0 %vm9046_vm1, %v6613_v56 }
0x5105   :  { %6326 = vmatpush.msrb.mxu0 %v8833_v51 }
0x5107   :  { %6327 = vmatpush.msrb.mxu0 %v8836_v44 }
0x5109   :  { %6328 = vmatpush.msrb.mxu0 %v8839_v62 }
0x510b   :  { %6329 = vmatpush.msrb.mxu0 %v8842_v47 }
0x5181   :  { %v6007_v32 = vpop.f32.mrf.mxu0 }
0x5182   :  { %v6008_v9 = vadd.f32 %v6007_v32, %v8545_v2 }
0x5184   :  { %v6030_v58 = vadd.f32 %v6028_v59, %v6008_v9 }
0x5186   :  { %v6617_v1 = vmul.f32 -1.442695, %v6030_v58 }
0x5188   :  { %7142 = vpow2.f32 %v6617_v1 }
0x518e   :  { %v7143_v18 = vpop.eup %7142 }
0x518f   :  { %v6034_v15 = vadd.f32 1.0, %v7143_v18 }
0x5191   :  { %7144 = vrcp.f32 %v6034_v15  ;;  %v6046_v34 = vand.u32 2147483648, %v6034_v15  ;;  %v6044_v44 = vand.u32 2147483647, %v6034_v15  ;;  %vm6040_vm5 = vweird.f32 %v6034_v15 }
0x5193   :  { %v6047_v62 = vor.u32 1.1754944e-38, %v6046_v34  ;;  %vm6045_vm4 = vcmp.eq.f32.partialorder %v6044_v44, 8.507059e+37 }
0x5197   :  { %v7145_v48 = vpop.eup %7144 }
0x5198   :  { %v6036_v63 = vmul.f32 %v7145_v48, %v6034_v15  ;;  %vm6041_vm0 = vweird.f32 %v7145_v48 }
0x5199   :  { %vm6042_vm8 = vmor %vm6040_vm5, %vm6041_vm0 }
0x519a   :  { %v6037_v50 = vsub.f32 1.0, %v6036_v63 }
0x519c   :  { %v6038_v51 = vmul.f32 %v7145_v48, %v6037_v50 }
0x519e   :  { %v6039_v49 = vadd.f32 %v7145_v48, %v6038_v51 }
0x51a0   :  { %v6043_v47 = vsel %vm6042_vm8, %v7145_v48, %v6039_v49 }
0x51a1   :  { %v6048_v27 = vsel %vm6045_vm4, %v6047_v62, %v6043_v47 }
0x51a2   :  { %v6054_v46 = vmul.f32 %v6052_v33, %v6048_v27  ;;  %v6061_v23 = vsub.f32 1.0, %v6048_v27  ;;  %v6067_v3 = vmul.f32 %v6048_v27, %v8936_v6 }
0x51a4   :  { %6056 = vrot.lane.b32.xlu1 %v6054_v46, %s7256_s0 }
0x51ac   :  { %6135 = vrot.lane.b32.xlu1 %v6112_v8, %s7256_s0 }
0x5216   :  { %v6057_v25 = vpop.permute.xlu1 %6056 }
0x5217   :  { %v6059_v45 = vadd.f32 %v6057_v25, %v6008_v9 }
0x5219   :  { %7146 = vtanh.f32 %v6059_v45 }
0x521e   :  { %v6136_v55 = vpop.permute.xlu1 %6135 }
0x521f   :  { %v7147_v12 = vpop.eup %7146 }
0x5220   :  { %6063 = vrot.lane.b32.xlu2 %v7147_v12, %s7257_s25 }
0x527a   :  { %v6064_v31 = vpop.permute.xlu2 %6063 }
0x527b   :  { %v6066_v37 = vmul.f32 %v6064_v31, %v6061_v23 }
0x527d   :  { %v8985_v43 = vadd.f32 %v6067_v3, %v6066_v37 }
0x527f   :  { %6070 = vrot.lane.b32.xlu0 %v8985_v43, %s7257_s25 }
0x52f1   :  { %v6071_v24 = vpop.permute.xlu0 %6070 }
0x52f2   :  { %6618 = vmatmul.msk.f32.vlgmr.msrb.gmra.mxu1 %vm198_vm12, %v6071_v24 }
0x52fa   :  { %6625 = vmatmul.msk.f32.vlgmr.msra.gmra.mxu1 %vm198_vm12, %v6071_v24 }
0x536f   :  { %v6091_v57 = vpop.f32.mrf.mxu1 }
0x5370   :  { %v6092_v38 = vadd.f32 %v6091_v57, %v8596_v28 }
0x5372   :  { %v6114_v53 = vadd.f32 %v6112_v8, %v6092_v38 }
0x5374   :  { %v6620_v61 = vmul.f32 -1.442695, %v6114_v53 }
0x5376   :  { %7148 = vpow2.f32 %v6620_v61 }
0x5377   :  { %v6247_v18 = vpop.f32.mrf.mxu1 }
0x5378   :  { %v6248_v15 = vadd.f32 %v6247_v18, %v8540_v17 }
0x537c   :  { %v7149_v42 = vpop.eup %7148 }
0x537d   :  { %v6118_v20 = vadd.f32 1.0, %v7149_v42 }
0x537f   :  { %7150 = vrcp.f32 %v6118_v20  ;;  %v6130_v13 = vand.u32 2147483648, %v6118_v20  ;;  %v6128_v59 = vand.u32 2147483647, %v6118_v20  ;;  %vm6124_vm2 = vweird.f32 %v6118_v20 }
0x5381   :  { %v6131_v60 = vor.u32 1.1754944e-38, %v6130_v13  ;;  %vm6129_vm3 = vcmp.eq.f32.partialorder %v6128_v59, 8.507059e+37 }
0x5385   :  { %v7151_v6 = vpop.eup %7150 }
0x5386   :  { %v6120_v36 = vmul.f32 %v7151_v6, %v6118_v20  ;;  %vm6125_vm11 = vweird.f32 %v7151_v6 }
0x5387   :  { %vm6126_vm14 = vmor %vm6124_vm2, %vm6125_vm11 }
0x5388   :  { %v6121_v19 = vsub.f32 1.0, %v6120_v36 }
0x538a   :  { %v6122_v14 = vmul.f32 %v7151_v6, %v6121_v19 }
0x538c   :  { %v6123_v40 = vadd.f32 %v7151_v6, %v6122_v14 }
0x538e   :  { %v6127_v52 = vsel %vm6126_vm14, %v7151_v6, %v6123_v40 }
0x538f   :  { %v6132_v10 = vsel %vm6129_vm3, %v6131_v60, %v6127_v52 }
0x5390   :  { %v6138_v29 = vmul.f32 %v6136_v55, %v6132_v10  ;;  %v6145_v0 = vsub.f32 1.0, %v6132_v10  ;;  %v6151_v41 = vmul.f32 %v6132_v10, %v8954_v30 }
0x5392   :  { %6140 = vrot.lane.b32.xlu0 %v6138_v29, %s7256_s0 }
0x5404   :  { %v6141_v21 = vpop.permute.xlu0 %6140 }
0x5405   :  { %v6143_v4 = vadd.f32 %v6141_v21, %v6092_v38 }
0x5407   :  { %7152 = vtanh.f32 %v6143_v4 }
0x540d   :  { %v7153_v7 = vpop.eup %7152 }
0x540e   :  { %6147 = vrot.lane.b32.xlu2 %v7153_v7, %s7257_s25 }
0x5468   :  { %v6148_v5 = vpop.permute.xlu2 %6147 }
0x5469   :  { %v6150_v16 = vmul.f32 %v6148_v5, %v6145_v0 }
0x546b   :  { %v8995_v35 = vadd.f32 %v6151_v41, %v6150_v16 }
0x546d   :  { %6154 = vrot.lane.b32.xlu1 %v8995_v35, %s7257_s25 }
0x54df   :  { %v6155_v56 = vpop.permute.xlu1 %6154 }
0x54e0   :  { %6621 = vmatmul.msk.f32.vlgmr.msra.gmra.mxu0 %vm198_vm12, %v6155_v56 }
0x54e8   :  { %6628 = vmatmul.msk.f32.vlgmr.msrb.gmra.mxu0 %vm198_vm12, %v6155_v56 }
0x555d   :  { %v6175_v32 = vpop.f32.mrf.mxu0 }
0x555e   :  { %v6176_v9 = vadd.f32 %v8913_v54, %v6175_v32 }
0x5560   :  { %v6178_v58 = vmax.f32 %v6176_v9, 0.0 }
0x5562   :  { %v6180_v1 = vrot.slane %v6178_v58, 1  ;;  %6182 = vst.msk [vmem:[#allocation7 + $0x6] sm:$0x1] %vm4840_vm10, %v6178_v58  ;;  %v6184_v30 = vsel %vm4843_vm13, %v6178_v58, -inf }
0x5563   :  { %6185 = vmax.xlane.f32.xlu0 %v6184_v30 }
0x5564   :  { %6183 = vst.msk [vmem:[#allocation7 + $0xe] sm:$0x1] %vm4840_vm10, %v6180_v1 }
0x5565   :  { %v6331_v36 = vpop.f32.mrf.mxu0 }
0x5566   :  { %v6332_v19 = vadd.f32 %v6331_v36, %v8590_v11 }
0x5577   :  { %6271 = vrot.lane.b32.xlu0 %v6248_v15, %s7256_s0 }
0x55d6   :  { %v6186_v48 = vpop.xlane.xlu0 %6185 }
0x55d7   :  { %vm6187_vm6 = vcmp.eq.f32.partialorder %v6178_v58, %v6186_v48 }
0x55d8   :  { %v6188_v63 = vsel %vm6187_vm6, %v7334_v22, 20 }
0x55d9   :  { %v6189_v50 = vsel %vm4843_vm13, %v6188_v63, 2147483647 }
0x55da   :  { %v6191_v34 = vshra.s32 %v6189_v50, 16  ;;  %v6190_v44 = vand.u32 65535, %v6189_v50 }
0x55dc   :  { %v6193_v51 = vcvt.s32.f32 %v6191_v34  ;;  %v6192_v62 = vcvt.s32.f32 %v6190_v44 }
0x55de   :  { %6194 = vmin.xlane.f32.xlu2 %v6193_v51 }
0x5651   :  { %v6195_v49 = vpop.xlane.xlu2 %6194 }
0x5652   :  { %vm6196_vm9 = vcmp.eq.f32.partialorder %v6193_v51, %v6195_v49  ;;  %v6201_v33 = vcvt.f32.s32 %v6195_v49 }
0x5653   :  { %v6197_v47 = vsel %vm6196_vm9, %v6192_v62, inf }
0x5654   :  { %6198 = vmin.xlane.f32.xlu1 %v6197_v47  ;;  %v6202_v17 = vshll.u32 %v6201_v33, 16 }
0x56c7   :  { %v6199_v27 = vpop.xlane.xlu1 %6198 }
0x56c8   :  { %v6200_v46 = vcvt.f32.s32 %v6199_v27 }
0x56ca   :  { %v6203_v39 = vadd.s32 %v6202_v17, %v6200_v46 }
0x56cc   :  { %vm6204_vm15 = vcmp.eq.s32.totalorder %v7334_v22, %v6203_v39 }
0x56cd   :  { %v6622_v8 = vsel %vm6204_vm15, 1.0, %v7255_v26 }
0x56ce   :  { %6624 = vmatmul.msk.f32.vlgmr.msra.gmra.mxu2 %vm9047_vm7, %v6622_v8 }
0x5751   :  { %v6227_v25 = vpop.f32.mrf.mxu2 }
0x5752   :  { %v6228_v45 = vadd.f32 %v6227_v25, %v8545_v2  ;;  %v6272_v2 = vpop.permute.xlu0 %6271 }
0x5754   :  { %v6250_v12 = vadd.f32 %v6248_v15, %v6228_v45 }
0x5756   :  { %v6626_v23 = vmul.f32 -1.442695, %v6250_v12 }
0x5758   :  { %7154 = vpow2.f32 %v6626_v23 }
0x575e   :  { %v7155_v31 = vpop.eup %7154 }
0x575f   :  { %v6254_v3 = vadd.f32 1.0, %v7155_v31 }
0x5761   :  { %7156 = vrcp.f32 %v6254_v3  ;;  %v6266_v38 = vand.u32 2147483648, %v6254_v3  ;;  %v6264_v22 = vand.u32 2147483647, %v6254_v3  ;;  %vm6260_vm1 = vweird.f32 %v6254_v3 }
0x5763   :  { %v6267_v26 = vor.u32 1.1754944e-38, %v6266_v38  ;;  %vm6265_vm5 = vcmp.eq.f32.partialorder %v6264_v22, 8.507059e+37 }
0x5767   :  { %v7157_v37 = vpop.eup %7156 }
0x5768   :  { %v6256_v24 = vmul.f32 %v7157_v37, %v6254_v3  ;;  %vm6261_vm13 = vweird.f32 %v7157_v37 }
0x5769   :  { %vm6262_vm0 = vmor %vm6260_vm1, %vm6261_vm13 }
0x576a   :  { %v6257_v57 = vsub.f32 1.0, %v6256_v24 }
0x576c   :  { %v6258_v53 = vmul.f32 %v7157_v37, %v6257_v57 }
0x576e   :  { %v6259_v61 = vadd.f32 %v7157_v37, %v6258_v53 }
0x5770   :  { %v6263_v42 = vsel %vm6262_vm0, %v7157_v37, %v6259_v61 }
0x5771   :  { %v6268_v20 = vsel %vm6265_vm5, %v6267_v26, %v6263_v42 }
0x5772   :  { %v6274_v6 = vmul.f32 %v6272_v2, %v6268_v20  ;;  %v6281_v40 = vsub.f32 1.0, %v6268_v20  ;;  %v6287_v52 = vmul.f32 %v6268_v20, %v8985_v43 }
0x5774   :  { %6276 = vrot.lane.b32.xlu2 %v6274_v6, %s7256_s0 }
0x577c   :  { %6355 = vrot.lane.b32.xlu2 %v6332_v19, %s7256_s0 }
0x57ce   :  { %v6277_v13 = vpop.permute.xlu2 %6276 }
0x57cf   :  { %v6279_v14 = vadd.f32 %v6277_v13, %v6228_v45 }
0x57d1   :  { %7158 = vtanh.f32 %v6279_v14 }
0x57d7   :  { %v7159_v59 = vpop.eup %7158 }
0x57d8   :  { %6283 = vrot.lane.b32.xlu1 %v7159_v59, %s7257_s25 }
0x584a   :  { %v6284_v60 = vpop.permute.xlu1 %6283 }
0x584b   :  { %v6286_v55 = vmul.f32 %v6284_v60, %v6281_v40 }
0x584d   :  { %v6288_v10 = vadd.f32 %v6287_v52, %v6286_v55 }
0x584f   :  { %6290 = vrot.lane.b32.xlu0 %v6288_v10, %s7257_s25 }
0x58c1   :  { %v6291_v29 = vpop.permute.xlu0 %6290 }
0x58c2   :  { %6627 = vmatmul.msk.f32.vlgmr.msra.gmra.mxu3 %vm198_vm12, %v6291_v29 }
0x5945   :  { %v6311_v11 = vpop.f32.mrf.mxu3 }
0x5946   :  { %v6312_v21 = vadd.f32 %v6311_v11, %v8596_v28  ;;  %v6356_v28 = vpop.permute.xlu2 %6355 }
0x5948   :  { %v6334_v4 = vadd.f32 %v6332_v19, %v6312_v21 }
0x594a   :  { %v6629_v7 = vmul.f32 -1.442695, %v6334_v4 }
0x594c   :  { %7160 = vpow2.f32 %v6629_v7 }
0x5952   :  { %v7161_v0 = vpop.eup %7160 }
0x5953   :  { %v6338_v5 = vadd.f32 1.0, %v7161_v0 }
0x5955   :  { %7162 = vrcp.f32 %v6338_v5  ;;  %v6350_v43 = vand.u32 2147483648, %v6338_v5  ;;  %v6348_v9 = vand.u32 2147483647, %v6338_v5  ;;  %vm6344_vm4 = vweird.f32 %v6338_v5 }
0x5957   :  { %v6351_v1 = vor.u32 1.1754944e-38, %v6350_v43  ;;  %vm6349_vm2 = vcmp.eq.f32.partialorder %v6348_v9, 8.507059e+37 }
0x595b   :  { %v7163_v41 = vpop.eup %7162 }
0x595c   :  { %v6340_v16 = vmul.f32 %v7163_v41, %v6338_v5  ;;  %vm6345_vm8 = vweird.f32 %v7163_v41 }
0x595d   :  { %vm6346_vm11 = vmor %vm6344_vm4, %vm6345_vm8 }
0x595e   :  { %v6341_v56 = vsub.f32 1.0, %v6340_v16 }
0x5960   :  { %v6342_v32 = vmul.f32 %v7163_v41, %v6341_v56 }
0x5962   :  { %v6343_v58 = vadd.f32 %v7163_v41, %v6342_v32 }
0x5964   :  { %v6347_v30 = vsel %vm6346_vm11, %v7163_v41, %v6343_v58 }
0x5965   :  { %v6352_v18 = vsel %vm6349_vm2, %v6351_v1, %v6347_v30 }
0x5966   :  { %v6358_v15 = vmul.f32 %v6356_v28, %v6352_v18  ;;  %v6365_v34 = vsub.f32 1.0, %v6352_v18  ;;  %v6371_v44 = vmul.f32 %v6352_v18, %v8995_v35 }
0x5968   :  { %6360 = vrot.lane.b32.xlu0 %v6358_v15, %s7256_s0 }
0x59da   :  { %v6361_v48 = vpop.permute.xlu0 %6360 }
0x59db   :  { %v6363_v63 = vadd.f32 %v6361_v48, %v6312_v21 }
0x59dd   :  { %7164 = vtanh.f32 %v6363_v63 }
0x59e3   :  { %v7165_v50 = vpop.eup %7164 }
0x59e4   :  { %6367 = vrot.lane.b32.xlu1 %v7165_v50, %s7257_s25 }
0x5a56   :  { %v6368_v51 = vpop.permute.xlu1 %6367 }
0x5a57   :  { %v6370_v49 = vmul.f32 %v6368_v51, %v6365_v34 }
0x5a59   :  { %v6372_v62 = vadd.f32 %v6371_v44, %v6370_v49 }
0x5a5b   :  { %6374 = vrot.lane.b32.xlu2 %v6372_v62, %s7257_s25 }
0x5ab5   :  { %v6375_v47 = vpop.permute.xlu2 %6374 }
0x5ab6   :  { %6630 = vmatmul.msk.f32.vlgmr.msrb.gmra.mxu2 %vm198_vm12, %v6375_v47 }
0x5b39   :  { %v6395_v33 = vpop.f32.mrf.mxu2 }
0x5b3a   :  { %v6396_v27 = vadd.f32 %v8913_v54, %v6395_v33 }
0x5b3c   :  { %v6398_v17 = vmax.f32 %v6396_v27, 0.0 }
0x5b3e   :  { %v6400_v46 = vrot.slane %v6398_v17, 1  ;;  %6402 = vst.msk [vmem:[#allocation7 + $0x7] sm:$0x1] %vm4840_vm10, %v6398_v17 }
0x5b40   :  { %6403 = vst.msk [vmem:[#allocation7 + $0xf] sm:$0x1] %vm4840_vm10, %v6400_v46 }
0x5b41   :  { %6418 = dma.vmem_to_hbm [thread:$0]  %s6411_s30, 256, %s6413_s7, [#allocation6], %s7252_s20, %s7252_s20, %s7253_s21  }
0x5b42   :  { %7249 = dma.done.wait [#allocation6], 256  }
0x5b43   :  { %7250 = vsyncadd [#allocation6], 4294967040 }
0x5b44   :  { %6425 = vsyncpa [#allocation5], 1 }
0x5b45   :  { %6426 = vsyncpa [#allocation6], 1 }

</bundles_post_ra>
